<compile_context>
chip_gen: v5e
topology: v5e:2x2
jax: 0.10.0
libtpu: 0.0.40
codegen_flags: <defaults>
</compile_context>

<pallas_src>
import functools
import math

import jax
import jax.numpy as jnp
import numpy as np
from jax.experimental import pallas as pl
from jax.experimental.pallas import tpu as pltpu

EMBEDDING_DIM = 128
HEAD_NUM = 4
QKV_DIM = 32            # head_num * qkv_dim == embedding_dim (as in POMO)
FF_HIDDEN_DIM = 256
ENCODER_LAYER_NUM = 2
EPS = 1e-5              # InstanceNorm1d default eps
_HI = jax.lax.Precision.HIGHEST


# ----------------------------------------------------------------------------
# Fused kernel: embedding + all encoder layers for a block of TB batches.
# The activation lives as a flattened lane-dense (TB*n_pad, E) slab.
# ----------------------------------------------------------------------------
def _fused_encoder_kernel(feat_ref, wemb_ref,
                          wqkv_ref, wo_ref, bo_ref,
                          n1w_ref, n1b_ref, w1_ref, b1_ref,
                          w2_ref, b2_ref, n2w_ref, n2b_ref,
                          o_ref, *,
                          tb, n_pad, n_valid, head_num, qkv_dim, layer_num):
    f32 = jnp.float32
    hd = head_num * qkv_dim
    rows = tb * n_pad
    inv_n = 1.0 / float(n_valid)

    # Embedding: one (rows, 8) @ (8, E) matmul. Depot/node linears + biases are
    # folded into the packed feature columns; pad rows are all-zero -> emb 0.
    x2 = jnp.dot(feat_ref[...], wemb_ref[...],
                 preferred_element_type=f32, precision=_HI)        # (rows, E)
    emb_dim = x2.shape[-1]

    # Static masks for padded sequence positions (hoisted out of the layer loop).
    key_mask = (jax.lax.broadcasted_iota(jnp.int32, (1, n_pad, n_pad), 2)
                < n_valid)                                          # pad key cols
    row_maskf = (jax.lax.broadcasted_iota(jnp.int32, (1, n_pad, 1), 1)
                 < n_valid).astype(f32)                             # pad rows

    def inorm(a_flat, wl, bl):
        # InstanceNorm1d over the valid problem positions, per channel, per batch.
        a = a_flat.reshape(tb, n_pad, emb_dim)
        mean = jnp.sum(a * row_maskf, axis=1, keepdims=True) * inv_n
        cen = a - mean
        var = jnp.sum((cen * cen) * row_maskf, axis=1, keepdims=True) * inv_n
        y = cen * jax.lax.rsqrt(var + EPS) * wl + bl
        return y.reshape(rows, emb_dim)

    for l in range(layer_num):
        wqkv = wqkv_ref[l]        # (E, 3*H*D); Q columns pre-scaled by 1/sqrt(D)
        wo = wo_ref[l]            # (H*D, E)

        # One fused QKV matmul over the whole flattened batch block.
        qkv = jnp.dot(x2, wqkv, preferred_element_type=f32, precision=_HI)
        qkv3 = qkv.reshape(tb, n_pad, 3 * hd)

        acc = None
        for h in range(head_num):
            c0 = h * qkv_dim
            q_h = qkv3[:, :, c0:c0 + qkv_dim]                  # (tb, n_pad, D)
            k_h = qkv3[:, :, hd + c0:hd + c0 + qkv_dim]
            v_h = qkv3[:, :, 2 * hd + c0:2 * hd + c0 + qkv_dim]

            # Scores for all TB batches of this head at once (batched matmul).
            s = jnp.einsum('bnd,bmd->bnm', q_h, k_h,
                           preferred_element_type=f32, precision=_HI)
            s = jnp.where(key_mask, s, -1e30)
            s = s - jnp.max(s, axis=-1, keepdims=True)
            e = jnp.exp(s)
            p = e / jnp.sum(e, axis=-1, keepdims=True)          # exact divide
            head_out = jnp.einsum('bnm,bmd->bnd', p, v_h,
                                  preferred_element_type=f32, precision=_HI)

            # Wo projection hoisted to one (rows, D) x (D, E) matmul per head,
            # accumulated across heads (== concat-then-Wo, no relayout).
            contrib = jnp.dot(head_out.reshape(rows, qkv_dim),
                              wo[c0:c0 + qkv_dim, :],
                              preferred_element_type=f32, precision=_HI)
            acc = contrib if acc is None else acc + contrib

        mh = acc + bo_ref[l]
        out1 = inorm(x2 + mh, n1w_ref[l], n1b_ref[l])

        # FFN on the flattened slab (two lane-dense MXU matmuls).
        h1 = jnp.maximum(
            jnp.dot(out1, w1_ref[l], preferred_element_type=f32, precision=_HI)
            + b1_ref[l], 0.0)
        ff = jnp.dot(h1, w2_ref[l], preferred_element_type=f32, precision=_HI) \
            + b2_ref[l]
        x2 = inorm(out1 + ff, n2w_ref[l], n2b_ref[l])

    o_ref[...] = x2


def _const_spec(arr):
    nd = arr.ndim
    return pl.BlockSpec(arr.shape, lambda b, _nd=nd: (0,) * _nd)


def _choose_tb(batch, n_pad, target_rows=512):
    # ~512 flattened rows per program (fills the MXU on v5e/v6e/v7x), but keep
    # >=2 grid programs when the batch allows (megacore / v7x 2 TensorCores).
    tb = max(1, min(batch, max(1, target_rows // n_pad)))
    while tb > 1 and batch % tb != 0:
        tb -= 1
    while tb > 1 and batch // tb < 2:
        tb -= 1
        while tb > 1 and batch % tb != 0:
            tb -= 1
    return max(tb, 1)


def _pack_embed(embed_p):
    # Rows: [Wd (2), Wn (3), bd (1), bn (1), zero pad (1)] -> (8, E)
    return jnp.concatenate(
        [embed_p["Wd"], embed_p["Wn"], embed_p["bd"], embed_p["bn"],
         jnp.zeros((1, EMBEDDING_DIM), jnp.float32)], axis=0)


def _pack_layer_params(layer_ps, qkv_dim):
    scale = 1.0 / math.sqrt(float(qkv_dim))
    stack = lambda key: jnp.stack([p[key] for p in layer_ps], axis=0)
    # Fold the attention scale into the Q columns of the fused QKV weight.
    wqkv = jnp.stack(
        [jnp.concatenate([p["Wq"] * scale, p["Wk"], p["Wv"]], axis=1)
         for p in layer_ps], axis=0)
    return dict(Wqkv=wqkv, Wo=stack("Wo"), bo=stack("bo"),
                n1w=stack("n1w"), n1b=stack("n1b"),
                W1=stack("W1"), b1=stack("b1"),
                W2=stack("W2"), b2=stack("b2"),
                n2w=stack("n2w"), n2b=stack("n2b"))


def _build_features(depot_xy, node_feat, n_pad):
    # Host-side layout plumbing: pack depot coords, node features and two bias
    # indicator columns into a single lane-padded feature slab (8 columns).
    B, n_depot, dd = depot_xy.shape
    _, n_nodes, dn = node_feat.shape
    n = n_depot + n_nodes
    nf = 8
    feat = jnp.zeros((B, n_pad, nf), jnp.float32)
    feat = feat.at[:, :n_depot, :dd].set(depot_xy.astype(jnp.float32))
    feat = feat.at[:, n_depot:n, dd:dd + dn].set(node_feat.astype(jnp.float32))
    feat = feat.at[:, :n_depot, dd + dn].set(1.0)        # depot bias indicator
    feat = feat.at[:, n_depot:n, dd + dn + 1].set(1.0)   # node bias indicator
    return feat.reshape(B * n_pad, nf)


def single_encoder_forward(depot_xy, node_feat, embed_p, layer_ps):
    B = depot_xy.shape[0]
    n_depot = depot_xy.shape[1]
    n_nodes = node_feat.shape[1]
    n = n_depot + n_nodes
    n_pad = ((n + 7) // 8) * 8          # tile-clean flattened slab
    tb = _choose_tb(B, n_pad)
    assert B % tb == 0
    E, H, D, FF = EMBEDDING_DIM, HEAD_NUM, QKV_DIM, FF_HIDDEN_DIM
    L = len(layer_ps)
    hd = H * D

    feat = _build_features(depot_xy, node_feat, n_pad)    # (B*n_pad, 8)
    wemb = _pack_embed(embed_p)                           # (8, E)
    lp = _pack_layer_params(layer_ps, D)

    weights = [wemb, lp["Wqkv"], lp["Wo"], lp["bo"], lp["n1w"], lp["n1b"],
               lp["W1"], lp["b1"], lp["W2"], lp["b2"], lp["n2w"], lp["n2b"]]

    kern = functools.partial(
        _fused_encoder_kernel, tb=tb, n_pad=n_pad, n_valid=n,
        head_num=H, qkv_dim=D, layer_num=L)

    in_specs = [pl.BlockSpec((tb * n_pad, feat.shape[1]), lambda b: (b, 0))]
    in_specs += [_const_spec(w) for w in weights]

    rows_total = B * n_pad
    flops = int(2 * rows_total * feat.shape[1] * E
                + L * (2 * rows_total * E * 3 * hd        # fused QKV
                       + 4 * B * H * n_pad * n_pad * D    # scores + P@V
                       + 2 * rows_total * hd * E          # Wo
                       + 4 * rows_total * E * FF))        # FFN (W1 + W2)
    transcendentals = int(L * (B * H * n_pad * n_pad + 2 * B * E))
    weight_bytes = sum(int(np.prod(w.shape)) * 4 for w in weights)
    bytes_accessed = int(feat.size) * 4 + rows_total * E * 4 \
        + weight_bytes * (B // tb)

    out_flat = pl.pallas_call(
        kern,
        out_shape=jax.ShapeDtypeStruct((rows_total, E), jnp.float32),
        grid=(B // tb,),
        in_specs=in_specs,
        out_specs=pl.BlockSpec((tb * n_pad, E), lambda b: (b, 0)),
        compiler_params=pltpu.CompilerParams(
            dimension_semantics=("parallel",)),
        cost_estimate=pl.CostEstimate(
            flops=flops, transcendentals=transcendentals,
            bytes_accessed=bytes_accessed),
    )(feat, *weights)

    return out_flat.reshape(B, n_pad, E)[:, :n, :]


# ----------------------------------------------------------------------------
# Deterministic parameter init (synthetic — not a checkpoint load).
# ----------------------------------------------------------------------------
def _dense(key, fan_in, fan_out):
    kw, kb = jax.random.split(key)
    w = jax.random.normal(kw, (fan_in, fan_out), jnp.float32) / math.sqrt(fan_in)
    b = 0.01 * jax.random.normal(kb, (1, fan_out), jnp.float32)
    return w, b


def init_params(key):
    keys = jax.random.split(key, 2 + ENCODER_LAYER_NUM)
    wd, bd = _dense(keys[0], 2, EMBEDDING_DIM)
    wn, bn = _dense(keys[1], 3, EMBEDDING_DIM)
    embed_p = {"Wd": wd, "bd": bd, "Wn": wn, "bn": bn}

    layer_ps = []
    for li in range(ENCODER_LAYER_NUM):
        ks = jax.random.split(keys[2 + li], 8)
        wq, _ = _dense(ks[0], EMBEDDING_DIM, HEAD_NUM * QKV_DIM)   # Wq/Wk/Wv: no bias
        wk, _ = _dense(ks[1], EMBEDDING_DIM, HEAD_NUM * QKV_DIM)
        wv, _ = _dense(ks[2], EMBEDDING_DIM, HEAD_NUM * QKV_DIM)
        wo, bo = _dense(ks[3], HEAD_NUM * QKV_DIM, EMBEDDING_DIM)
        w1, b1 = _dense(ks[4], EMBEDDING_DIM, FF_HIDDEN_DIM)
        w2, b2 = _dense(ks[5], FF_HIDDEN_DIM, EMBEDDING_DIM)
        n1w = 1.0 + 0.01 * jax.random.normal(ks[6], (1, EMBEDDING_DIM), jnp.float32)
        n2w = 1.0 + 0.01 * jax.random.normal(ks[7], (1, EMBEDDING_DIM), jnp.float32)
        n1b = jnp.zeros((1, EMBEDDING_DIM), jnp.float32)
        n2b = jnp.zeros((1, EMBEDDING_DIM), jnp.float32)
        layer_ps.append({"Wq": wq, "Wk": wk, "Wv": wv, "Wo": wo, "bo": bo,
                         "n1w": n1w, "n1b": n1b, "W1": w1, "b1": b1,
                         "W2": w2, "b2": b2, "n2w": n2w, "n2b": n2b})
    return embed_p, layer_ps


# ----------------------------------------------------------------------------
# Pure-JAX reference (mirrors the PyTorch forward) for validation.
# ----------------------------------------------------------------------------
def reference_forward(depot_xy, node_feat, embed_p, layer_ps):
    hi = jax.lax.Precision.HIGHEST
    ed = jnp.einsum("bnf,fe->bne", depot_xy, embed_p["Wd"], precision=hi) + embed_p["bd"][None]
    en = jnp.einsum("bnf,fe->bne", node_feat, embed_p["Wn"], precision=hi) + embed_p["bn"][None]
    out = jnp.concatenate([ed, en], axis=1)
    B, N, E = out.shape
    H, D = HEAD_NUM, QKV_DIM

    def inorm(a, w, b):
        mean = jnp.mean(a, axis=1, keepdims=True)
        var = jnp.mean((a - mean) ** 2, axis=1, keepdims=True)
        return (a - mean) / jnp.sqrt(var + EPS) * w[None] + b[None]

    for p in layer_ps:
        x = out
        q = jnp.einsum("bne,ec->bnc", x, p["Wq"], precision=hi).reshape(B, N, H, D).transpose(0, 2, 1, 3)
        k = jnp.einsum("bne,ec->bnc", x, p["Wk"], precision=hi).reshape(B, N, H, D).transpose(0, 2, 1, 3)
        v = jnp.einsum("bne,ec->bnc", x, p["Wv"], precision=hi).reshape(B, N, H, D).transpose(0, 2, 1, 3)
        s = jnp.einsum("bhnd,bhmd->bhnm", q, k, precision=hi) / math.sqrt(D)
        w = jax.nn.softmax(s, axis=3)
        o = jnp.einsum("bhnm,bhmd->bhnd", w, v, precision=hi).transpose(0, 2, 1, 3).reshape(B, N, H * D)
        mh = jnp.einsum("bnc,ce->bne", o, p["Wo"], precision=hi) + p["bo"][None]
        out1 = inorm(x + mh, p["n1w"], p["n1b"])
        h1 = jax.nn.relu(jnp.einsum("bne,ef->bnf", out1, p["W1"], precision=hi) + p["b1"][None])
        ff = jnp.einsum("bnf,fe->bne", h1, p["W2"], precision=hi) + p["b2"][None]
        out = inorm(out1 + ff, p["n2w"], p["n2b"])
    return out


if __name__ == "__main__":
    key = jax.random.PRNGKey(0)
    k_param, k_depot, k_node = jax.random.split(key, 3)

    B, N_NODES = 2, 8
    depot_xy = jax.random.uniform(k_depot, (B, 1, 2), jnp.float32)
    node_xy_demand_tw = jax.random.uniform(k_node, (B, N_NODES, 3), jnp.float32)

    embed_p, layer_ps = init_params(k_param)

    out = single_encoder_forward(depot_xy, node_xy_demand_tw, embed_p, layer_ps)
    out = jax.block_until_ready(out)

    ref = jax.block_until_ready(
        reference_forward(depot_xy, node_xy_demand_tw, embed_p, layer_ps))

    err = float(jnp.max(jnp.abs(out - ref)))
    if not np.isfinite(err) or err > 5e-3:
        raise AssertionError(f"Pallas output mismatch vs reference: max abs err {err}")

    print("KERNEL_OK")
</pallas_src>

<mosaic_0001>
module attributes {stable_mosaic.version = 11 : i64} {
  func.func @_fused_encoder_kernel(%arg0: i32, %arg1: memref<16x8xf32, #tpu.memory_space<vmem>>, %arg2: memref<8x128xf32, #tpu.memory_space<vmem>>, %arg3: memref<2x128x384xf32, #tpu.memory_space<vmem>>, %arg4: memref<2x128x128xf32, #tpu.memory_space<vmem>>, %arg5: memref<2x1x128xf32, #tpu.memory_space<vmem>>, %arg6: memref<2x1x128xf32, #tpu.memory_space<vmem>>, %arg7: memref<2x1x128xf32, #tpu.memory_space<vmem>>, %arg8: memref<2x128x256xf32, #tpu.memory_space<vmem>>, %arg9: memref<2x1x256xf32, #tpu.memory_space<vmem>>, %arg10: memref<2x256x128xf32, #tpu.memory_space<vmem>>, %arg11: memref<2x1x128xf32, #tpu.memory_space<vmem>>, %arg12: memref<2x1x128xf32, #tpu.memory_space<vmem>>, %arg13: memref<2x1x128xf32, #tpu.memory_space<vmem>>, %arg14: memref<16x128xf32, #tpu.memory_space<vmem>>) attributes {dimension_semantics = [#tpu.dimension_semantics<parallel>], iteration_bounds = array<i64: 2>, scalar_prefetch = 0 : i64, scratch_operands = 0 : i64, tpu.core_type = #tpu.core_type<tc>, window_params = [{transform_indices = @transform_0, window_bounds = array<i64: 16, 8>}, {pipeline_mode = #tpu.pipeline_mode<synchronous>, transform_indices = @transform_1, window_bounds = array<i64: 8, 128>}, {pipeline_mode = #tpu.pipeline_mode<synchronous>, transform_indices = @transform_2, window_bounds = array<i64: 2, 128, 384>}, {pipeline_mode = #tpu.pipeline_mode<synchronous>, transform_indices = @transform_3, window_bounds = array<i64: 2, 128, 128>}, {pipeline_mode = #tpu.pipeline_mode<synchronous>, transform_indices = @transform_4, window_bounds = array<i64: 2, 1, 128>}, {pipeline_mode = #tpu.pipeline_mode<synchronous>, transform_indices = @transform_5, window_bounds = array<i64: 2, 1, 128>}, {pipeline_mode = #tpu.pipeline_mode<synchronous>, transform_indices = @transform_6, window_bounds = array<i64: 2, 1, 128>}, {pipeline_mode = #tpu.pipeline_mode<synchronous>, transform_indices = @transform_7, window_bounds = array<i64: 2, 128, 256>}, {pipeline_mode = #tpu.pipeline_mode<synchronous>, transform_indices = @transform_8, window_bounds = array<i64: 2, 1, 256>}, {pipeline_mode = #tpu.pipeline_mode<synchronous>, transform_indices = @transform_9, window_bounds = array<i64: 2, 256, 128>}, {pipeline_mode = #tpu.pipeline_mode<synchronous>, transform_indices = @transform_10, window_bounds = array<i64: 2, 1, 128>}, {pipeline_mode = #tpu.pipeline_mode<synchronous>, transform_indices = @transform_11, window_bounds = array<i64: 2, 1, 128>}, {pipeline_mode = #tpu.pipeline_mode<synchronous>, transform_indices = @transform_12, window_bounds = array<i64: 2, 1, 128>}, {transform_indices = @transform_13, window_bounds = array<i64: 16, 128>}]} {
    %c0 = arith.constant 0 : index
    %c0_0 = arith.constant 0 : index
    %0 = vector.load %arg1[%c0, %c0_0] : memref<16x8xf32, #tpu.memory_space<vmem>>, vector<16x8xf32>
    %c0_1 = arith.constant 0 : index
    %c0_2 = arith.constant 0 : index
    %1 = vector.load %arg2[%c0_1, %c0_2] : memref<8x128xf32, #tpu.memory_space<vmem>>, vector<8x128xf32>
    %cst = arith.constant dense<0.000000e+00> : vector<16x128xf32>
    %2 = tpu.matmul %0, %1, %cst {dimension_numbers = #tpu.dot_dimension_numbers<[1], [0], [0], [1], [0, 0, 1, 1], [], []>, precision = #tpu.contract_precision<fp32>} : vector<16x8xf32>, vector<8x128xf32>, vector<16x128xf32> -> vector<16x128xf32>
    %3 = tpu.iota {dimensions = array<i32: 2>} : vector<1x16x16xi32>
    %c9_i32 = arith.constant 9 : i32
    %4 = vector.broadcast %c9_i32 : i32 to vector<1x16x16xi32>
    %5 = arith.cmpi slt, %3, %4 : vector<1x16x16xi32>
    %6 = tpu.iota {dimensions = array<i32: 1>} : vector<1x16x1xi32>
    %c9_i32_3 = arith.constant 9 : i32
    %7 = vector.broadcast %c9_i32_3 : i32 to vector<1x16x1xi32>
    %8 = arith.cmpi slt, %6, %7 : vector<1x16x1xi32>
    %9 = arith.extui %8 : vector<1x16x1xi1> to vector<1x16x1xi32>
    %10 = arith.sitofp %9 : vector<1x16x1xi32> to vector<1x16x1xf32>
    %c0_4 = arith.constant 0 : index
    %c0_5 = arith.constant 0 : index
    %c0_6 = arith.constant 0 : index
    %11 = vector.load %arg3[%c0_4, %c0_5, %c0_6] : memref<2x128x384xf32, #tpu.memory_space<vmem>>, vector<1x128x384xf32>
    %12 = vector.shape_cast %11 : vector<1x128x384xf32> to vector<128x384xf32>
    %c0_7 = arith.constant 0 : index
    %c0_8 = arith.constant 0 : index
    %c0_9 = arith.constant 0 : index
    %13 = vector.load %arg4[%c0_7, %c0_8, %c0_9] : memref<2x128x128xf32, #tpu.memory_space<vmem>>, vector<1x128x128xf32>
    %14 = vector.shape_cast %13 : vector<1x128x128xf32> to vector<128x128xf32>
    %cst_10 = arith.constant dense<0.000000e+00> : vector<16x384xf32>
    %15 = tpu.matmul %2, %12, %cst_10 {dimension_numbers = #tpu.dot_dimension_numbers<[1], [0], [0], [1], [0, 0, 1, 1], [], []>, precision = #tpu.contract_precision<fp32>} : vector<16x128xf32>, vector<128x384xf32>, vector<16x384xf32> -> vector<16x384xf32>
    %16 = vector.shape_cast %15 : vector<16x384xf32> to vector<1x16x384xf32>
    %17 = vector.extract_strided_slice %16 {offsets = [0, 0, 0], sizes = [1, 16, 32], strides = [1, 1, 1]} : vector<1x16x384xf32> to vector<1x16x32xf32>
    %18 = vector.extract_strided_slice %16 {offsets = [0, 0, 128], sizes = [1, 16, 32], strides = [1, 1, 1]} : vector<1x16x384xf32> to vector<1x16x32xf32>
    %19 = vector.extract_strided_slice %16 {offsets = [0, 0, 256], sizes = [1, 16, 32], strides = [1, 1, 1]} : vector<1x16x384xf32> to vector<1x16x32xf32>
    "tpu.trace_start"() <{level = 10 : i32, message = "bnd,bmd->bnm"}> : () -> ()
    %cst_11 = arith.constant dense<0.000000e+00> : vector<1x16x16xf32>
    %20 = tpu.matmul %17, %18, %cst_11 {dimension_numbers = #tpu.dot_dimension_numbers<[2], [2], [1], [1], [0, 0, 0, 1, 1, 1], [0], [0]>, precision = #tpu.contract_precision<fp32>} : vector<1x16x32xf32>, vector<1x16x32xf32>, vector<1x16x16xf32> -> vector<1x16x16xf32>
    %cst_12 = arith.constant -1.000000e+30 : f32
    "tpu.trace_stop"() : () -> ()
    %21 = vector.broadcast %cst_12 : f32 to vector<1x16x16xf32>
    %22 = arith.select %5, %20, %21 : vector<1x16x16xi1>, vector<1x16x16xf32>
    %cst_13 = arith.constant dense<0xFF800000> : vector<1x16xf32>
    %23 = vector.multi_reduction <maximumf>, %22, %cst_13 [2] : vector<1x16x16xf32> to vector<1x16xf32>
    %24 = vector.shape_cast %23 : vector<1x16xf32> to vector<1x16x1xf32>
    %25 = vector.broadcast %24 : vector<1x16x1xf32> to vector<1x16x16xf32>
    %26 = arith.subf %22, %25 : vector<1x16x16xf32>
    %27 = math.exp %26 : vector<1x16x16xf32>
    %cst_14 = arith.constant dense<0.000000e+00> : vector<1x16xf32>
    %28 = vector.multi_reduction <add>, %27, %cst_14 [2] : vector<1x16x16xf32> to vector<1x16xf32>
    %29 = vector.shape_cast %28 : vector<1x16xf32> to vector<1x16x1xf32>
    %30 = vector.broadcast %29 : vector<1x16x1xf32> to vector<1x16x16xf32>
    %31 = arith.divf %27, %30 : vector<1x16x16xf32>
    "tpu.trace_start"() <{level = 10 : i32, message = "bnm,bmd->bnd"}> : () -> ()
    %cst_15 = arith.constant dense<0.000000e+00> : vector<1x16x32xf32>
    %32 = tpu.matmul %31, %19, %cst_15 {dimension_numbers = #tpu.dot_dimension_numbers<[2], [1], [1], [2], [0, 0, 0, 1, 1, 2], [0], [0]>, precision = #tpu.contract_precision<fp32>} : vector<1x16x16xf32>, vector<1x16x32xf32>, vector<1x16x32xf32> -> vector<1x16x32xf32>
    "tpu.trace_stop"() : () -> ()
    %33 = vector.shape_cast %32 : vector<1x16x32xf32> to vector<16x32xf32>
    %34 = vector.extract_strided_slice %14 {offsets = [0, 0], sizes = [32, 128], strides = [1, 1]} : vector<128x128xf32> to vector<32x128xf32>
    %cst_16 = arith.constant dense<0.000000e+00> : vector<16x128xf32>
    %35 = tpu.matmul %33, %34, %cst_16 {dimension_numbers = #tpu.dot_dimension_numbers<[1], [0], [0], [1], [0, 0, 1, 1], [], []>, precision = #tpu.contract_precision<fp32>} : vector<16x32xf32>, vector<32x128xf32>, vector<16x128xf32> -> vector<16x128xf32>
    %36 = vector.extract_strided_slice %16 {offsets = [0, 0, 32], sizes = [1, 16, 32], strides = [1, 1, 1]} : vector<1x16x384xf32> to vector<1x16x32xf32>
    %37 = vector.extract_strided_slice %16 {offsets = [0, 0, 160], sizes = [1, 16, 32], strides = [1, 1, 1]} : vector<1x16x384xf32> to vector<1x16x32xf32>
    %38 = vector.extract_strided_slice %16 {offsets = [0, 0, 288], sizes = [1, 16, 32], strides = [1, 1, 1]} : vector<1x16x384xf32> to vector<1x16x32xf32>
    "tpu.trace_start"() <{level = 10 : i32, message = "bnd,bmd->bnm"}> : () -> ()
    %cst_17 = arith.constant dense<0.000000e+00> : vector<1x16x16xf32>
    %39 = tpu.matmul %36, %37, %cst_17 {dimension_numbers = #tpu.dot_dimension_numbers<[2], [2], [1], [1], [0, 0, 0, 1, 1, 1], [0], [0]>, precision = #tpu.contract_precision<fp32>} : vector<1x16x32xf32>, vector<1x16x32xf32>, vector<1x16x16xf32> -> vector<1x16x16xf32>
    %cst_18 = arith.constant -1.000000e+30 : f32
    "tpu.trace_stop"() : () -> ()
    %40 = vector.broadcast %cst_18 : f32 to vector<1x16x16xf32>
    %41 = arith.select %5, %39, %40 : vector<1x16x16xi1>, vector<1x16x16xf32>
    %cst_19 = arith.constant dense<0xFF800000> : vector<1x16xf32>
    %42 = vector.multi_reduction <maximumf>, %41, %cst_19 [2] : vector<1x16x16xf32> to vector<1x16xf32>
    %43 = vector.shape_cast %42 : vector<1x16xf32> to vector<1x16x1xf32>
    %44 = vector.broadcast %43 : vector<1x16x1xf32> to vector<1x16x16xf32>
    %45 = arith.subf %41, %44 : vector<1x16x16xf32>
    %46 = math.exp %45 : vector<1x16x16xf32>
    %cst_20 = arith.constant dense<0.000000e+00> : vector<1x16xf32>
    %47 = vector.multi_reduction <add>, %46, %cst_20 [2] : vector<1x16x16xf32> to vector<1x16xf32>
    %48 = vector.shape_cast %47 : vector<1x16xf32> to vector<1x16x1xf32>
    %49 = vector.broadcast %48 : vector<1x16x1xf32> to vector<1x16x16xf32>
    %50 = arith.divf %46, %49 : vector<1x16x16xf32>
    "tpu.trace_start"() <{level = 10 : i32, message = "bnm,bmd->bnd"}> : () -> ()
    %cst_21 = arith.constant dense<0.000000e+00> : vector<1x16x32xf32>
    %51 = tpu.matmul %50, %38, %cst_21 {dimension_numbers = #tpu.dot_dimension_numbers<[2], [1], [1], [2], [0, 0, 0, 1, 1, 2], [0], [0]>, precision = #tpu.contract_precision<fp32>} : vector<1x16x16xf32>, vector<1x16x32xf32>, vector<1x16x32xf32> -> vector<1x16x32xf32>
    "tpu.trace_stop"() : () -> ()
    %52 = vector.shape_cast %51 : vector<1x16x32xf32> to vector<16x32xf32>
    %53 = vector.extract_strided_slice %14 {offsets = [32, 0], sizes = [32, 128], strides = [1, 1]} : vector<128x128xf32> to vector<32x128xf32>
    %cst_22 = arith.constant dense<0.000000e+00> : vector<16x128xf32>
    %54 = tpu.matmul %52, %53, %cst_22 {dimension_numbers = #tpu.dot_dimension_numbers<[1], [0], [0], [1], [0, 0, 1, 1], [], []>, precision = #tpu.contract_precision<fp32>} : vector<16x32xf32>, vector<32x128xf32>, vector<16x128xf32> -> vector<16x128xf32>
    %55 = arith.addf %35, %54 : vector<16x128xf32>
    %56 = vector.extract_strided_slice %16 {offsets = [0, 0, 64], sizes = [1, 16, 32], strides = [1, 1, 1]} : vector<1x16x384xf32> to vector<1x16x32xf32>
    %57 = vector.extract_strided_slice %16 {offsets = [0, 0, 192], sizes = [1, 16, 32], strides = [1, 1, 1]} : vector<1x16x384xf32> to vector<1x16x32xf32>
    %58 = vector.extract_strided_slice %16 {offsets = [0, 0, 320], sizes = [1, 16, 32], strides = [1, 1, 1]} : vector<1x16x384xf32> to vector<1x16x32xf32>
    "tpu.trace_start"() <{level = 10 : i32, message = "bnd,bmd->bnm"}> : () -> ()
    %cst_23 = arith.constant dense<0.000000e+00> : vector<1x16x16xf32>
    %59 = tpu.matmul %56, %57, %cst_23 {dimension_numbers = #tpu.dot_dimension_numbers<[2], [2], [1], [1], [0, 0, 0, 1, 1, 1], [0], [0]>, precision = #tpu.contract_precision<fp32>} : vector<1x16x32xf32>, vector<1x16x32xf32>, vector<1x16x16xf32> -> vector<1x16x16xf32>
    %cst_24 = arith.constant -1.000000e+30 : f32
    "tpu.trace_stop"() : () -> ()
    %60 = vector.broadcast %cst_24 : f32 to vector<1x16x16xf32>
    %61 = arith.select %5, %59, %60 : vector<1x16x16xi1>, vector<1x16x16xf32>
    %cst_25 = arith.constant dense<0xFF800000> : vector<1x16xf32>
    %62 = vector.multi_reduction <maximumf>, %61, %cst_25 [2] : vector<1x16x16xf32> to vector<1x16xf32>
    %63 = vector.shape_cast %62 : vector<1x16xf32> to vector<1x16x1xf32>
    %64 = vector.broadcast %63 : vector<1x16x1xf32> to vector<1x16x16xf32>
    %65 = arith.subf %61, %64 : vector<1x16x16xf32>
    %66 = math.exp %65 : vector<1x16x16xf32>
    %cst_26 = arith.constant dense<0.000000e+00> : vector<1x16xf32>
    %67 = vector.multi_reduction <add>, %66, %cst_26 [2] : vector<1x16x16xf32> to vector<1x16xf32>
    %68 = vector.shape_cast %67 : vector<1x16xf32> to vector<1x16x1xf32>
    %69 = vector.broadcast %68 : vector<1x16x1xf32> to vector<1x16x16xf32>
    %70 = arith.divf %66, %69 : vector<1x16x16xf32>
    "tpu.trace_start"() <{level = 10 : i32, message = "bnm,bmd->bnd"}> : () -> ()
    %cst_27 = arith.constant dense<0.000000e+00> : vector<1x16x32xf32>
    %71 = tpu.matmul %70, %58, %cst_27 {dimension_numbers = #tpu.dot_dimension_numbers<[2], [1], [1], [2], [0, 0, 0, 1, 1, 2], [0], [0]>, precision = #tpu.contract_precision<fp32>} : vector<1x16x16xf32>, vector<1x16x32xf32>, vector<1x16x32xf32> -> vector<1x16x32xf32>
    "tpu.trace_stop"() : () -> ()
    %72 = vector.shape_cast %71 : vector<1x16x32xf32> to vector<16x32xf32>
    %73 = vector.extract_strided_slice %14 {offsets = [64, 0], sizes = [32, 128], strides = [1, 1]} : vector<128x128xf32> to vector<32x128xf32>
    %cst_28 = arith.constant dense<0.000000e+00> : vector<16x128xf32>
    %74 = tpu.matmul %72, %73, %cst_28 {dimension_numbers = #tpu.dot_dimension_numbers<[1], [0], [0], [1], [0, 0, 1, 1], [], []>, precision = #tpu.contract_precision<fp32>} : vector<16x32xf32>, vector<32x128xf32>, vector<16x128xf32> -> vector<16x128xf32>
    %75 = arith.addf %55, %74 : vector<16x128xf32>
    %76 = vector.extract_strided_slice %16 {offsets = [0, 0, 96], sizes = [1, 16, 32], strides = [1, 1, 1]} : vector<1x16x384xf32> to vector<1x16x32xf32>
    %77 = vector.extract_strided_slice %16 {offsets = [0, 0, 224], sizes = [1, 16, 32], strides = [1, 1, 1]} : vector<1x16x384xf32> to vector<1x16x32xf32>
    %78 = vector.extract_strided_slice %16 {offsets = [0, 0, 352], sizes = [1, 16, 32], strides = [1, 1, 1]} : vector<1x16x384xf32> to vector<1x16x32xf32>
    "tpu.trace_start"() <{level = 10 : i32, message = "bnd,bmd->bnm"}> : () -> ()
    %cst_29 = arith.constant dense<0.000000e+00> : vector<1x16x16xf32>
    %79 = tpu.matmul %76, %77, %cst_29 {dimension_numbers = #tpu.dot_dimension_numbers<[2], [2], [1], [1], [0, 0, 0, 1, 1, 1], [0], [0]>, precision = #tpu.contract_precision<fp32>} : vector<1x16x32xf32>, vector<1x16x32xf32>, vector<1x16x16xf32> -> vector<1x16x16xf32>
    %cst_30 = arith.constant -1.000000e+30 : f32
    "tpu.trace_stop"() : () -> ()
    %80 = vector.broadcast %cst_30 : f32 to vector<1x16x16xf32>
    %81 = arith.select %5, %79, %80 : vector<1x16x16xi1>, vector<1x16x16xf32>
    %cst_31 = arith.constant dense<0xFF800000> : vector<1x16xf32>
    %82 = vector.multi_reduction <maximumf>, %81, %cst_31 [2] : vector<1x16x16xf32> to vector<1x16xf32>
    %83 = vector.shape_cast %82 : vector<1x16xf32> to vector<1x16x1xf32>
    %84 = vector.broadcast %83 : vector<1x16x1xf32> to vector<1x16x16xf32>
    %85 = arith.subf %81, %84 : vector<1x16x16xf32>
    %86 = math.exp %85 : vector<1x16x16xf32>
    %cst_32 = arith.constant dense<0.000000e+00> : vector<1x16xf32>
    %87 = vector.multi_reduction <add>, %86, %cst_32 [2] : vector<1x16x16xf32> to vector<1x16xf32>
    %88 = vector.shape_cast %87 : vector<1x16xf32> to vector<1x16x1xf32>
    %89 = vector.broadcast %88 : vector<1x16x1xf32> to vector<1x16x16xf32>
    %90 = arith.divf %86, %89 : vector<1x16x16xf32>
    "tpu.trace_start"() <{level = 10 : i32, message = "bnm,bmd->bnd"}> : () -> ()
    %cst_33 = arith.constant dense<0.000000e+00> : vector<1x16x32xf32>
    %91 = tpu.matmul %90, %78, %cst_33 {dimension_numbers = #tpu.dot_dimension_numbers<[2], [1], [1], [2], [0, 0, 0, 1, 1, 2], [0], [0]>, precision = #tpu.contract_precision<fp32>} : vector<1x16x16xf32>, vector<1x16x32xf32>, vector<1x16x32xf32> -> vector<1x16x32xf32>
    "tpu.trace_stop"() : () -> ()
    %92 = vector.shape_cast %91 : vector<1x16x32xf32> to vector<16x32xf32>
    %93 = vector.extract_strided_slice %14 {offsets = [96, 0], sizes = [32, 128], strides = [1, 1]} : vector<128x128xf32> to vector<32x128xf32>
    %cst_34 = arith.constant dense<0.000000e+00> : vector<16x128xf32>
    %94 = tpu.matmul %92, %93, %cst_34 {dimension_numbers = #tpu.dot_dimension_numbers<[1], [0], [0], [1], [0, 0, 1, 1], [], []>, precision = #tpu.contract_precision<fp32>} : vector<16x32xf32>, vector<32x128xf32>, vector<16x128xf32> -> vector<16x128xf32>
    %95 = arith.addf %75, %94 : vector<16x128xf32>
    %c0_35 = arith.constant 0 : index
    %c0_36 = arith.constant 0 : index
    %c0_37 = arith.constant 0 : index
    %96 = vector.load %arg5[%c0_35, %c0_36, %c0_37] : memref<2x1x128xf32, #tpu.memory_space<vmem>>, vector<1x1x128xf32>
    %97 = vector.shape_cast %96 : vector<1x1x128xf32> to vector<1x128xf32>
    %98 = vector.broadcast %97 : vector<1x128xf32> to vector<16x128xf32>
    %99 = arith.addf %95, %98 : vector<16x128xf32>
    %100 = arith.addf %2, %99 : vector<16x128xf32>
    %c0_38 = arith.constant 0 : index
    %c0_39 = arith.constant 0 : index
    %c0_40 = arith.constant 0 : index
    %101 = vector.load %arg6[%c0_38, %c0_39, %c0_40] : memref<2x1x128xf32, #tpu.memory_space<vmem>>, vector<1x1x128xf32>
    %102 = vector.shape_cast %101 : vector<1x1x128xf32> to vector<1x128xf32>
    %c0_41 = arith.constant 0 : index
    %c0_42 = arith.constant 0 : index
    %c0_43 = arith.constant 0 : index
    %103 = vector.load %arg7[%c0_41, %c0_42, %c0_43] : memref<2x1x128xf32, #tpu.memory_space<vmem>>, vector<1x1x128xf32>
    %104 = vector.shape_cast %103 : vector<1x1x128xf32> to vector<1x128xf32>
    %105 = vector.shape_cast %100 : vector<16x128xf32> to vector<1x16x128xf32>
    %106 = vector.broadcast %10 : vector<1x16x1xf32> to vector<1x16x128xf32>
    %107 = arith.mulf %105, %106 : vector<1x16x128xf32>
    %cst_44 = arith.constant dense<0.000000e+00> : vector<1x128xf32>
    %108 = vector.multi_reduction <add>, %107, %cst_44 [1] : vector<1x16x128xf32> to vector<1x128xf32>
    %109 = vector.shape_cast %108 : vector<1x128xf32> to vector<1x1x128xf32>
    %cst_45 = arith.constant 0.111111112 : f32
    %110 = vector.broadcast %cst_45 : f32 to vector<1x1x128xf32>
    %111 = arith.mulf %109, %110 : vector<1x1x128xf32>
    %112 = vector.broadcast %111 : vector<1x1x128xf32> to vector<1x16x128xf32>
    %113 = arith.subf %105, %112 : vector<1x16x128xf32>
    %114 = arith.mulf %113, %113 : vector<1x16x128xf32>
    %115 = vector.broadcast %10 : vector<1x16x1xf32> to vector<1x16x128xf32>
    %116 = arith.mulf %114, %115 : vector<1x16x128xf32>
    %cst_46 = arith.constant dense<0.000000e+00> : vector<1x128xf32>
    %117 = vector.multi_reduction <add>, %116, %cst_46 [1] : vector<1x16x128xf32> to vector<1x128xf32>
    %118 = vector.shape_cast %117 : vector<1x128xf32> to vector<1x1x128xf32>
    %cst_47 = arith.constant 0.111111112 : f32
    %119 = vector.broadcast %cst_47 : f32 to vector<1x1x128xf32>
    %120 = arith.mulf %118, %119 : vector<1x1x128xf32>
    %cst_48 = arith.constant 9.99999974E-6 : f32
    %121 = vector.broadcast %cst_48 : f32 to vector<1x1x128xf32>
    %122 = arith.addf %120, %121 : vector<1x1x128xf32>
    %123 = math.rsqrt %122 : vector<1x1x128xf32>
    %124 = vector.broadcast %123 : vector<1x1x128xf32> to vector<1x16x128xf32>
    %125 = arith.mulf %113, %124 : vector<1x16x128xf32>
    %126 = vector.shape_cast %102 : vector<1x128xf32> to vector<1x1x128xf32>
    %127 = vector.broadcast %126 : vector<1x1x128xf32> to vector<1x16x128xf32>
    %128 = arith.mulf %125, %127 : vector<1x16x128xf32>
    %129 = vector.shape_cast %104 : vector<1x128xf32> to vector<1x1x128xf32>
    %130 = vector.broadcast %129 : vector<1x1x128xf32> to vector<1x16x128xf32>
    %131 = arith.addf %128, %130 : vector<1x16x128xf32>
    %132 = vector.shape_cast %131 : vector<1x16x128xf32> to vector<16x128xf32>
    %c0_49 = arith.constant 0 : index
    %c0_50 = arith.constant 0 : index
    %c0_51 = arith.constant 0 : index
    %133 = vector.load %arg8[%c0_49, %c0_50, %c0_51] : memref<2x128x256xf32, #tpu.memory_space<vmem>>, vector<1x128x256xf32>
    %134 = vector.shape_cast %133 : vector<1x128x256xf32> to vector<128x256xf32>
    %cst_52 = arith.constant dense<0.000000e+00> : vector<16x256xf32>
    %135 = tpu.matmul %132, %134, %cst_52 {dimension_numbers = #tpu.dot_dimension_numbers<[1], [0], [0], [1], [0, 0, 1, 1], [], []>, precision = #tpu.contract_precision<fp32>} : vector<16x128xf32>, vector<128x256xf32>, vector<16x256xf32> -> vector<16x256xf32>
    %c0_53 = arith.constant 0 : index
    %c0_54 = arith.constant 0 : index
    %c0_55 = arith.constant 0 : index
    %136 = vector.load %arg9[%c0_53, %c0_54, %c0_55] : memref<2x1x256xf32, #tpu.memory_space<vmem>>, vector<1x1x256xf32>
    %137 = vector.shape_cast %136 : vector<1x1x256xf32> to vector<1x256xf32>
    %138 = vector.broadcast %137 : vector<1x256xf32> to vector<16x256xf32>
    %139 = arith.addf %135, %138 : vector<16x256xf32>
    %cst_56 = arith.constant 0.000000e+00 : f32
    %140 = vector.broadcast %cst_56 : f32 to vector<16x256xf32>
    %141 = arith.maximumf %139, %140 : vector<16x256xf32>
    %c0_57 = arith.constant 0 : index
    %c0_58 = arith.constant 0 : index
    %c0_59 = arith.constant 0 : index
    %142 = vector.load %arg10[%c0_57, %c0_58, %c0_59] : memref<2x256x128xf32, #tpu.memory_space<vmem>>, vector<1x256x128xf32>
    %143 = vector.shape_cast %142 : vector<1x256x128xf32> to vector<256x128xf32>
    %cst_60 = arith.constant dense<0.000000e+00> : vector<16x128xf32>
    %144 = tpu.matmul %141, %143, %cst_60 {dimension_numbers = #tpu.dot_dimension_numbers<[1], [0], [0], [1], [0, 0, 1, 1], [], []>, precision = #tpu.contract_precision<fp32>} : vector<16x256xf32>, vector<256x128xf32>, vector<16x128xf32> -> vector<16x128xf32>
    %c0_61 = arith.constant 0 : index
    %c0_62 = arith.constant 0 : index
    %c0_63 = arith.constant 0 : index
    %145 = vector.load %arg11[%c0_61, %c0_62, %c0_63] : memref<2x1x128xf32, #tpu.memory_space<vmem>>, vector<1x1x128xf32>
    %146 = vector.shape_cast %145 : vector<1x1x128xf32> to vector<1x128xf32>
    %147 = vector.broadcast %146 : vector<1x128xf32> to vector<16x128xf32>
    %148 = arith.addf %144, %147 : vector<16x128xf32>
    %149 = arith.addf %132, %148 : vector<16x128xf32>
    %c0_64 = arith.constant 0 : index
    %c0_65 = arith.constant 0 : index
    %c0_66 = arith.constant 0 : index
    %150 = vector.load %arg12[%c0_64, %c0_65, %c0_66] : memref<2x1x128xf32, #tpu.memory_space<vmem>>, vector<1x1x128xf32>
    %151 = vector.shape_cast %150 : vector<1x1x128xf32> to vector<1x128xf32>
    %c0_67 = arith.constant 0 : index
    %c0_68 = arith.constant 0 : index
    %c0_69 = arith.constant 0 : index
    %152 = vector.load %arg13[%c0_67, %c0_68, %c0_69] : memref<2x1x128xf32, #tpu.memory_space<vmem>>, vector<1x1x128xf32>
    %153 = vector.shape_cast %152 : vector<1x1x128xf32> to vector<1x128xf32>
    %154 = vector.shape_cast %149 : vector<16x128xf32> to vector<1x16x128xf32>
    %155 = vector.broadcast %10 : vector<1x16x1xf32> to vector<1x16x128xf32>
    %156 = arith.mulf %154, %155 : vector<1x16x128xf32>
    %cst_70 = arith.constant dense<0.000000e+00> : vector<1x128xf32>
    %157 = vector.multi_reduction <add>, %156, %cst_70 [1] : vector<1x16x128xf32> to vector<1x128xf32>
    %158 = vector.shape_cast %157 : vector<1x128xf32> to vector<1x1x128xf32>
    %cst_71 = arith.constant 0.111111112 : f32
    %159 = vector.broadcast %cst_71 : f32 to vector<1x1x128xf32>
    %160 = arith.mulf %158, %159 : vector<1x1x128xf32>
    %161 = vector.broadcast %160 : vector<1x1x128xf32> to vector<1x16x128xf32>
    %162 = arith.subf %154, %161 : vector<1x16x128xf32>
    %163 = arith.mulf %162, %162 : vector<1x16x128xf32>
    %164 = vector.broadcast %10 : vector<1x16x1xf32> to vector<1x16x128xf32>
    %165 = arith.mulf %163, %164 : vector<1x16x128xf32>
    %cst_72 = arith.constant dense<0.000000e+00> : vector<1x128xf32>
    %166 = vector.multi_reduction <add>, %165, %cst_72 [1] : vector<1x16x128xf32> to vector<1x128xf32>
    %167 = vector.shape_cast %166 : vector<1x128xf32> to vector<1x1x128xf32>
    %cst_73 = arith.constant 0.111111112 : f32
    %168 = vector.broadcast %cst_73 : f32 to vector<1x1x128xf32>
    %169 = arith.mulf %167, %168 : vector<1x1x128xf32>
    %cst_74 = arith.constant 9.99999974E-6 : f32
    %170 = vector.broadcast %cst_74 : f32 to vector<1x1x128xf32>
    %171 = arith.addf %169, %170 : vector<1x1x128xf32>
    %172 = math.rsqrt %171 : vector<1x1x128xf32>
    %173 = vector.broadcast %172 : vector<1x1x128xf32> to vector<1x16x128xf32>
    %174 = arith.mulf %162, %173 : vector<1x16x128xf32>
    %175 = vector.shape_cast %151 : vector<1x128xf32> to vector<1x1x128xf32>
    %176 = vector.broadcast %175 : vector<1x1x128xf32> to vector<1x16x128xf32>
    %177 = arith.mulf %174, %176 : vector<1x16x128xf32>
    %178 = vector.shape_cast %153 : vector<1x128xf32> to vector<1x1x128xf32>
    %179 = vector.broadcast %178 : vector<1x1x128xf32> to vector<1x16x128xf32>
    %180 = arith.addf %177, %179 : vector<1x16x128xf32>
    %181 = vector.shape_cast %180 : vector<1x16x128xf32> to vector<16x128xf32>
    %c1 = arith.constant 1 : index
    %c0_75 = arith.constant 0 : index
    %c0_76 = arith.constant 0 : index
    %182 = vector.load %arg3[%c1, %c0_75, %c0_76] : memref<2x128x384xf32, #tpu.memory_space<vmem>>, vector<1x128x384xf32>
    %183 = vector.shape_cast %182 : vector<1x128x384xf32> to vector<128x384xf32>
    %c1_77 = arith.constant 1 : index
    %c0_78 = arith.constant 0 : index
    %c0_79 = arith.constant 0 : index
    %184 = vector.load %arg4[%c1_77, %c0_78, %c0_79] : memref<2x128x128xf32, #tpu.memory_space<vmem>>, vector<1x128x128xf32>
    %185 = vector.shape_cast %184 : vector<1x128x128xf32> to vector<128x128xf32>
    %cst_80 = arith.constant dense<0.000000e+00> : vector<16x384xf32>
    %186 = tpu.matmul %181, %183, %cst_80 {dimension_numbers = #tpu.dot_dimension_numbers<[1], [0], [0], [1], [0, 0, 1, 1], [], []>, precision = #tpu.contract_precision<fp32>} : vector<16x128xf32>, vector<128x384xf32>, vector<16x384xf32> -> vector<16x384xf32>
    %187 = vector.shape_cast %186 : vector<16x384xf32> to vector<1x16x384xf32>
    %188 = vector.extract_strided_slice %187 {offsets = [0, 0, 0], sizes = [1, 16, 32], strides = [1, 1, 1]} : vector<1x16x384xf32> to vector<1x16x32xf32>
    %189 = vector.extract_strided_slice %187 {offsets = [0, 0, 128], sizes = [1, 16, 32], strides = [1, 1, 1]} : vector<1x16x384xf32> to vector<1x16x32xf32>
    %190 = vector.extract_strided_slice %187 {offsets = [0, 0, 256], sizes = [1, 16, 32], strides = [1, 1, 1]} : vector<1x16x384xf32> to vector<1x16x32xf32>
    "tpu.trace_start"() <{level = 10 : i32, message = "bnd,bmd->bnm"}> : () -> ()
    %cst_81 = arith.constant dense<0.000000e+00> : vector<1x16x16xf32>
    %191 = tpu.matmul %188, %189, %cst_81 {dimension_numbers = #tpu.dot_dimension_numbers<[2], [2], [1], [1], [0, 0, 0, 1, 1, 1], [0], [0]>, precision = #tpu.contract_precision<fp32>} : vector<1x16x32xf32>, vector<1x16x32xf32>, vector<1x16x16xf32> -> vector<1x16x16xf32>
    %cst_82 = arith.constant -1.000000e+30 : f32
    "tpu.trace_stop"() : () -> ()
    %192 = vector.broadcast %cst_82 : f32 to vector<1x16x16xf32>
    %193 = arith.select %5, %191, %192 : vector<1x16x16xi1>, vector<1x16x16xf32>
    %cst_83 = arith.constant dense<0xFF800000> : vector<1x16xf32>
    %194 = vector.multi_reduction <maximumf>, %193, %cst_83 [2] : vector<1x16x16xf32> to vector<1x16xf32>
    %195 = vector.shape_cast %194 : vector<1x16xf32> to vector<1x16x1xf32>
    %196 = vector.broadcast %195 : vector<1x16x1xf32> to vector<1x16x16xf32>
    %197 = arith.subf %193, %196 : vector<1x16x16xf32>
    %198 = math.exp %197 : vector<1x16x16xf32>
    %cst_84 = arith.constant dense<0.000000e+00> : vector<1x16xf32>
    %199 = vector.multi_reduction <add>, %198, %cst_84 [2] : vector<1x16x16xf32> to vector<1x16xf32>
    %200 = vector.shape_cast %199 : vector<1x16xf32> to vector<1x16x1xf32>
    %201 = vector.broadcast %200 : vector<1x16x1xf32> to vector<1x16x16xf32>
    %202 = arith.divf %198, %201 : vector<1x16x16xf32>
    "tpu.trace_start"() <{level = 10 : i32, message = "bnm,bmd->bnd"}> : () -> ()
    %cst_85 = arith.constant dense<0.000000e+00> : vector<1x16x32xf32>
    %203 = tpu.matmul %202, %190, %cst_85 {dimension_numbers = #tpu.dot_dimension_numbers<[2], [1], [1], [2], [0, 0, 0, 1, 1, 2], [0], [0]>, precision = #tpu.contract_precision<fp32>} : vector<1x16x16xf32>, vector<1x16x32xf32>, vector<1x16x32xf32> -> vector<1x16x32xf32>
    "tpu.trace_stop"() : () -> ()
    %204 = vector.shape_cast %203 : vector<1x16x32xf32> to vector<16x32xf32>
    %205 = vector.extract_strided_slice %185 {offsets = [0, 0], sizes = [32, 128], strides = [1, 1]} : vector<128x128xf32> to vector<32x128xf32>
    %cst_86 = arith.constant dense<0.000000e+00> : vector<16x128xf32>
    %206 = tpu.matmul %204, %205, %cst_86 {dimension_numbers = #tpu.dot_dimension_numbers<[1], [0], [0], [1], [0, 0, 1, 1], [], []>, precision = #tpu.contract_precision<fp32>} : vector<16x32xf32>, vector<32x128xf32>, vector<16x128xf32> -> vector<16x128xf32>
    %207 = vector.extract_strided_slice %187 {offsets = [0, 0, 32], sizes = [1, 16, 32], strides = [1, 1, 1]} : vector<1x16x384xf32> to vector<1x16x32xf32>
    %208 = vector.extract_strided_slice %187 {offsets = [0, 0, 160], sizes = [1, 16, 32], strides = [1, 1, 1]} : vector<1x16x384xf32> to vector<1x16x32xf32>
    %209 = vector.extract_strided_slice %187 {offsets = [0, 0, 288], sizes = [1, 16, 32], strides = [1, 1, 1]} : vector<1x16x384xf32> to vector<1x16x32xf32>
    "tpu.trace_start"() <{level = 10 : i32, message = "bnd,bmd->bnm"}> : () -> ()
    %cst_87 = arith.constant dense<0.000000e+00> : vector<1x16x16xf32>
    %210 = tpu.matmul %207, %208, %cst_87 {dimension_numbers = #tpu.dot_dimension_numbers<[2], [2], [1], [1], [0, 0, 0, 1, 1, 1], [0], [0]>, precision = #tpu.contract_precision<fp32>} : vector<1x16x32xf32>, vector<1x16x32xf32>, vector<1x16x16xf32> -> vector<1x16x16xf32>
    %cst_88 = arith.constant -1.000000e+30 : f32
    "tpu.trace_stop"() : () -> ()
    %211 = vector.broadcast %cst_88 : f32 to vector<1x16x16xf32>
    %212 = arith.select %5, %210, %211 : vector<1x16x16xi1>, vector<1x16x16xf32>
    %cst_89 = arith.constant dense<0xFF800000> : vector<1x16xf32>
    %213 = vector.multi_reduction <maximumf>, %212, %cst_89 [2] : vector<1x16x16xf32> to vector<1x16xf32>
    %214 = vector.shape_cast %213 : vector<1x16xf32> to vector<1x16x1xf32>
    %215 = vector.broadcast %214 : vector<1x16x1xf32> to vector<1x16x16xf32>
    %216 = arith.subf %212, %215 : vector<1x16x16xf32>
    %217 = math.exp %216 : vector<1x16x16xf32>
    %cst_90 = arith.constant dense<0.000000e+00> : vector<1x16xf32>
    %218 = vector.multi_reduction <add>, %217, %cst_90 [2] : vector<1x16x16xf32> to vector<1x16xf32>
    %219 = vector.shape_cast %218 : vector<1x16xf32> to vector<1x16x1xf32>
    %220 = vector.broadcast %219 : vector<1x16x1xf32> to vector<1x16x16xf32>
    %221 = arith.divf %217, %220 : vector<1x16x16xf32>
    "tpu.trace_start"() <{level = 10 : i32, message = "bnm,bmd->bnd"}> : () -> ()
    %cst_91 = arith.constant dense<0.000000e+00> : vector<1x16x32xf32>
    %222 = tpu.matmul %221, %209, %cst_91 {dimension_numbers = #tpu.dot_dimension_numbers<[2], [1], [1], [2], [0, 0, 0, 1, 1, 2], [0], [0]>, precision = #tpu.contract_precision<fp32>} : vector<1x16x16xf32>, vector<1x16x32xf32>, vector<1x16x32xf32> -> vector<1x16x32xf32>
    "tpu.trace_stop"() : () -> ()
    %223 = vector.shape_cast %222 : vector<1x16x32xf32> to vector<16x32xf32>
    %224 = vector.extract_strided_slice %185 {offsets = [32, 0], sizes = [32, 128], strides = [1, 1]} : vector<128x128xf32> to vector<32x128xf32>
    %cst_92 = arith.constant dense<0.000000e+00> : vector<16x128xf32>
    %225 = tpu.matmul %223, %224, %cst_92 {dimension_numbers = #tpu.dot_dimension_numbers<[1], [0], [0], [1], [0, 0, 1, 1], [], []>, precision = #tpu.contract_precision<fp32>} : vector<16x32xf32>, vector<32x128xf32>, vector<16x128xf32> -> vector<16x128xf32>
    %226 = arith.addf %206, %225 : vector<16x128xf32>
    %227 = vector.extract_strided_slice %187 {offsets = [0, 0, 64], sizes = [1, 16, 32], strides = [1, 1, 1]} : vector<1x16x384xf32> to vector<1x16x32xf32>
    %228 = vector.extract_strided_slice %187 {offsets = [0, 0, 192], sizes = [1, 16, 32], strides = [1, 1, 1]} : vector<1x16x384xf32> to vector<1x16x32xf32>
    %229 = vector.extract_strided_slice %187 {offsets = [0, 0, 320], sizes = [1, 16, 32], strides = [1, 1, 1]} : vector<1x16x384xf32> to vector<1x16x32xf32>
    "tpu.trace_start"() <{level = 10 : i32, message = "bnd,bmd->bnm"}> : () -> ()
    %cst_93 = arith.constant dense<0.000000e+00> : vector<1x16x16xf32>
    %230 = tpu.matmul %227, %228, %cst_93 {dimension_numbers = #tpu.dot_dimension_numbers<[2], [2], [1], [1], [0, 0, 0, 1, 1, 1], [0], [0]>, precision = #tpu.contract_precision<fp32>} : vector<1x16x32xf32>, vector<1x16x32xf32>, vector<1x16x16xf32> -> vector<1x16x16xf32>
    %cst_94 = arith.constant -1.000000e+30 : f32
    "tpu.trace_stop"() : () -> ()
    %231 = vector.broadcast %cst_94 : f32 to vector<1x16x16xf32>
    %232 = arith.select %5, %230, %231 : vector<1x16x16xi1>, vector<1x16x16xf32>
    %cst_95 = arith.constant dense<0xFF800000> : vector<1x16xf32>
    %233 = vector.multi_reduction <maximumf>, %232, %cst_95 [2] : vector<1x16x16xf32> to vector<1x16xf32>
    %234 = vector.shape_cast %233 : vector<1x16xf32> to vector<1x16x1xf32>
    %235 = vector.broadcast %234 : vector<1x16x1xf32> to vector<1x16x16xf32>
    %236 = arith.subf %232, %235 : vector<1x16x16xf32>
    %237 = math.exp %236 : vector<1x16x16xf32>
    %cst_96 = arith.constant dense<0.000000e+00> : vector<1x16xf32>
    %238 = vector.multi_reduction <add>, %237, %cst_96 [2] : vector<1x16x16xf32> to vector<1x16xf32>
    %239 = vector.shape_cast %238 : vector<1x16xf32> to vector<1x16x1xf32>
    %240 = vector.broadcast %239 : vector<1x16x1xf32> to vector<1x16x16xf32>
    %241 = arith.divf %237, %240 : vector<1x16x16xf32>
    "tpu.trace_start"() <{level = 10 : i32, message = "bnm,bmd->bnd"}> : () -> ()
    %cst_97 = arith.constant dense<0.000000e+00> : vector<1x16x32xf32>
    %242 = tpu.matmul %241, %229, %cst_97 {dimension_numbers = #tpu.dot_dimension_numbers<[2], [1], [1], [2], [0, 0, 0, 1, 1, 2], [0], [0]>, precision = #tpu.contract_precision<fp32>} : vector<1x16x16xf32>, vector<1x16x32xf32>, vector<1x16x32xf32> -> vector<1x16x32xf32>
    "tpu.trace_stop"() : () -> ()
    %243 = vector.shape_cast %242 : vector<1x16x32xf32> to vector<16x32xf32>
    %244 = vector.extract_strided_slice %185 {offsets = [64, 0], sizes = [32, 128], strides = [1, 1]} : vector<128x128xf32> to vector<32x128xf32>
    %cst_98 = arith.constant dense<0.000000e+00> : vector<16x128xf32>
    %245 = tpu.matmul %243, %244, %cst_98 {dimension_numbers = #tpu.dot_dimension_numbers<[1], [0], [0], [1], [0, 0, 1, 1], [], []>, precision = #tpu.contract_precision<fp32>} : vector<16x32xf32>, vector<32x128xf32>, vector<16x128xf32> -> vector<16x128xf32>
    %246 = arith.addf %226, %245 : vector<16x128xf32>
    %247 = vector.extract_strided_slice %187 {offsets = [0, 0, 96], sizes = [1, 16, 32], strides = [1, 1, 1]} : vector<1x16x384xf32> to vector<1x16x32xf32>
    %248 = vector.extract_strided_slice %187 {offsets = [0, 0, 224], sizes = [1, 16, 32], strides = [1, 1, 1]} : vector<1x16x384xf32> to vector<1x16x32xf32>
    %249 = vector.extract_strided_slice %187 {offsets = [0, 0, 352], sizes = [1, 16, 32], strides = [1, 1, 1]} : vector<1x16x384xf32> to vector<1x16x32xf32>
    "tpu.trace_start"() <{level = 10 : i32, message = "bnd,bmd->bnm"}> : () -> ()
    %cst_99 = arith.constant dense<0.000000e+00> : vector<1x16x16xf32>
    %250 = tpu.matmul %247, %248, %cst_99 {dimension_numbers = #tpu.dot_dimension_numbers<[2], [2], [1], [1], [0, 0, 0, 1, 1, 1], [0], [0]>, precision = #tpu.contract_precision<fp32>} : vector<1x16x32xf32>, vector<1x16x32xf32>, vector<1x16x16xf32> -> vector<1x16x16xf32>
    %cst_100 = arith.constant -1.000000e+30 : f32
    "tpu.trace_stop"() : () -> ()
    %251 = vector.broadcast %cst_100 : f32 to vector<1x16x16xf32>
    %252 = arith.select %5, %250, %251 : vector<1x16x16xi1>, vector<1x16x16xf32>
    %cst_101 = arith.constant dense<0xFF800000> : vector<1x16xf32>
    %253 = vector.multi_reduction <maximumf>, %252, %cst_101 [2] : vector<1x16x16xf32> to vector<1x16xf32>
    %254 = vector.shape_cast %253 : vector<1x16xf32> to vector<1x16x1xf32>
    %255 = vector.broadcast %254 : vector<1x16x1xf32> to vector<1x16x16xf32>
    %256 = arith.subf %252, %255 : vector<1x16x16xf32>
    %257 = math.exp %256 : vector<1x16x16xf32>
    %cst_102 = arith.constant dense<0.000000e+00> : vector<1x16xf32>
    %258 = vector.multi_reduction <add>, %257, %cst_102 [2] : vector<1x16x16xf32> to vector<1x16xf32>
    %259 = vector.shape_cast %258 : vector<1x16xf32> to vector<1x16x1xf32>
    %260 = vector.broadcast %259 : vector<1x16x1xf32> to vector<1x16x16xf32>
    %261 = arith.divf %257, %260 : vector<1x16x16xf32>
    "tpu.trace_start"() <{level = 10 : i32, message = "bnm,bmd->bnd"}> : () -> ()
    %cst_103 = arith.constant dense<0.000000e+00> : vector<1x16x32xf32>
    %262 = tpu.matmul %261, %249, %cst_103 {dimension_numbers = #tpu.dot_dimension_numbers<[2], [1], [1], [2], [0, 0, 0, 1, 1, 2], [0], [0]>, precision = #tpu.contract_precision<fp32>} : vector<1x16x16xf32>, vector<1x16x32xf32>, vector<1x16x32xf32> -> vector<1x16x32xf32>
    "tpu.trace_stop"() : () -> ()
    %263 = vector.shape_cast %262 : vector<1x16x32xf32> to vector<16x32xf32>
    %264 = vector.extract_strided_slice %185 {offsets = [96, 0], sizes = [32, 128], strides = [1, 1]} : vector<128x128xf32> to vector<32x128xf32>
    %cst_104 = arith.constant dense<0.000000e+00> : vector<16x128xf32>
    %265 = tpu.matmul %263, %264, %cst_104 {dimension_numbers = #tpu.dot_dimension_numbers<[1], [0], [0], [1], [0, 0, 1, 1], [], []>, precision = #tpu.contract_precision<fp32>} : vector<16x32xf32>, vector<32x128xf32>, vector<16x128xf32> -> vector<16x128xf32>
    %266 = arith.addf %246, %265 : vector<16x128xf32>
    %c1_105 = arith.constant 1 : index
    %c0_106 = arith.constant 0 : index
    %c0_107 = arith.constant 0 : index
    %267 = vector.load %arg5[%c1_105, %c0_106, %c0_107] : memref<2x1x128xf32, #tpu.memory_space<vmem>>, vector<1x1x128xf32>
    %268 = vector.shape_cast %267 : vector<1x1x128xf32> to vector<1x128xf32>
    %269 = vector.broadcast %268 : vector<1x128xf32> to vector<16x128xf32>
    %270 = arith.addf %266, %269 : vector<16x128xf32>
    %271 = arith.addf %181, %270 : vector<16x128xf32>
    %c1_108 = arith.constant 1 : index
    %c0_109 = arith.constant 0 : index
    %c0_110 = arith.constant 0 : index
    %272 = vector.load %arg6[%c1_108, %c0_109, %c0_110] : memref<2x1x128xf32, #tpu.memory_space<vmem>>, vector<1x1x128xf32>
    %273 = vector.shape_cast %272 : vector<1x1x128xf32> to vector<1x128xf32>
    %c1_111 = arith.constant 1 : index
    %c0_112 = arith.constant 0 : index
    %c0_113 = arith.constant 0 : index
    %274 = vector.load %arg7[%c1_111, %c0_112, %c0_113] : memref<2x1x128xf32, #tpu.memory_space<vmem>>, vector<1x1x128xf32>
    %275 = vector.shape_cast %274 : vector<1x1x128xf32> to vector<1x128xf32>
    %276 = vector.shape_cast %271 : vector<16x128xf32> to vector<1x16x128xf32>
    %277 = vector.broadcast %10 : vector<1x16x1xf32> to vector<1x16x128xf32>
    %278 = arith.mulf %276, %277 : vector<1x16x128xf32>
    %cst_114 = arith.constant dense<0.000000e+00> : vector<1x128xf32>
    %279 = vector.multi_reduction <add>, %278, %cst_114 [1] : vector<1x16x128xf32> to vector<1x128xf32>
    %280 = vector.shape_cast %279 : vector<1x128xf32> to vector<1x1x128xf32>
    %cst_115 = arith.constant 0.111111112 : f32
    %281 = vector.broadcast %cst_115 : f32 to vector<1x1x128xf32>
    %282 = arith.mulf %280, %281 : vector<1x1x128xf32>
    %283 = vector.broadcast %282 : vector<1x1x128xf32> to vector<1x16x128xf32>
    %284 = arith.subf %276, %283 : vector<1x16x128xf32>
    %285 = arith.mulf %284, %284 : vector<1x16x128xf32>
    %286 = vector.broadcast %10 : vector<1x16x1xf32> to vector<1x16x128xf32>
    %287 = arith.mulf %285, %286 : vector<1x16x128xf32>
    %cst_116 = arith.constant dense<0.000000e+00> : vector<1x128xf32>
    %288 = vector.multi_reduction <add>, %287, %cst_116 [1] : vector<1x16x128xf32> to vector<1x128xf32>
    %289 = vector.shape_cast %288 : vector<1x128xf32> to vector<1x1x128xf32>
    %cst_117 = arith.constant 0.111111112 : f32
    %290 = vector.broadcast %cst_117 : f32 to vector<1x1x128xf32>
    %291 = arith.mulf %289, %290 : vector<1x1x128xf32>
    %cst_118 = arith.constant 9.99999974E-6 : f32
    %292 = vector.broadcast %cst_118 : f32 to vector<1x1x128xf32>
    %293 = arith.addf %291, %292 : vector<1x1x128xf32>
    %294 = math.rsqrt %293 : vector<1x1x128xf32>
    %295 = vector.broadcast %294 : vector<1x1x128xf32> to vector<1x16x128xf32>
    %296 = arith.mulf %284, %295 : vector<1x16x128xf32>
    %297 = vector.shape_cast %273 : vector<1x128xf32> to vector<1x1x128xf32>
    %298 = vector.broadcast %297 : vector<1x1x128xf32> to vector<1x16x128xf32>
    %299 = arith.mulf %296, %298 : vector<1x16x128xf32>
    %300 = vector.shape_cast %275 : vector<1x128xf32> to vector<1x1x128xf32>
    %301 = vector.broadcast %300 : vector<1x1x128xf32> to vector<1x16x128xf32>
    %302 = arith.addf %299, %301 : vector<1x16x128xf32>
    %303 = vector.shape_cast %302 : vector<1x16x128xf32> to vector<16x128xf32>
    %c1_119 = arith.constant 1 : index
    %c0_120 = arith.constant 0 : index
    %c0_121 = arith.constant 0 : index
    %304 = vector.load %arg8[%c1_119, %c0_120, %c0_121] : memref<2x128x256xf32, #tpu.memory_space<vmem>>, vector<1x128x256xf32>
    %305 = vector.shape_cast %304 : vector<1x128x256xf32> to vector<128x256xf32>
    %cst_122 = arith.constant dense<0.000000e+00> : vector<16x256xf32>
    %306 = tpu.matmul %303, %305, %cst_122 {dimension_numbers = #tpu.dot_dimension_numbers<[1], [0], [0], [1], [0, 0, 1, 1], [], []>, precision = #tpu.contract_precision<fp32>} : vector<16x128xf32>, vector<128x256xf32>, vector<16x256xf32> -> vector<16x256xf32>
    %c1_123 = arith.constant 1 : index
    %c0_124 = arith.constant 0 : index
    %c0_125 = arith.constant 0 : index
    %307 = vector.load %arg9[%c1_123, %c0_124, %c0_125] : memref<2x1x256xf32, #tpu.memory_space<vmem>>, vector<1x1x256xf32>
    %308 = vector.shape_cast %307 : vector<1x1x256xf32> to vector<1x256xf32>
    %309 = vector.broadcast %308 : vector<1x256xf32> to vector<16x256xf32>
    %310 = arith.addf %306, %309 : vector<16x256xf32>
    %cst_126 = arith.constant 0.000000e+00 : f32
    %311 = vector.broadcast %cst_126 : f32 to vector<16x256xf32>
    %312 = arith.maximumf %310, %311 : vector<16x256xf32>
    %c1_127 = arith.constant 1 : index
    %c0_128 = arith.constant 0 : index
    %c0_129 = arith.constant 0 : index
    %313 = vector.load %arg10[%c1_127, %c0_128, %c0_129] : memref<2x256x128xf32, #tpu.memory_space<vmem>>, vector<1x256x128xf32>
    %314 = vector.shape_cast %313 : vector<1x256x128xf32> to vector<256x128xf32>
    %cst_130 = arith.constant dense<0.000000e+00> : vector<16x128xf32>
    %315 = tpu.matmul %312, %314, %cst_130 {dimension_numbers = #tpu.dot_dimension_numbers<[1], [0], [0], [1], [0, 0, 1, 1], [], []>, precision = #tpu.contract_precision<fp32>} : vector<16x256xf32>, vector<256x128xf32>, vector<16x128xf32> -> vector<16x128xf32>
    %c1_131 = arith.constant 1 : index
    %c0_132 = arith.constant 0 : index
    %c0_133 = arith.constant 0 : index
    %316 = vector.load %arg11[%c1_131, %c0_132, %c0_133] : memref<2x1x128xf32, #tpu.memory_space<vmem>>, vector<1x1x128xf32>
    %317 = vector.shape_cast %316 : vector<1x1x128xf32> to vector<1x128xf32>
    %318 = vector.broadcast %317 : vector<1x128xf32> to vector<16x128xf32>
    %319 = arith.addf %315, %318 : vector<16x128xf32>
    %320 = arith.addf %303, %319 : vector<16x128xf32>
    %c1_134 = arith.constant 1 : index
    %c0_135 = arith.constant 0 : index
    %c0_136 = arith.constant 0 : index
    %321 = vector.load %arg12[%c1_134, %c0_135, %c0_136] : memref<2x1x128xf32, #tpu.memory_space<vmem>>, vector<1x1x128xf32>
    %322 = vector.shape_cast %321 : vector<1x1x128xf32> to vector<1x128xf32>
    %c1_137 = arith.constant 1 : index
    %c0_138 = arith.constant 0 : index
    %c0_139 = arith.constant 0 : index
    %323 = vector.load %arg13[%c1_137, %c0_138, %c0_139] : memref<2x1x128xf32, #tpu.memory_space<vmem>>, vector<1x1x128xf32>
    %324 = vector.shape_cast %323 : vector<1x1x128xf32> to vector<1x128xf32>
    %325 = vector.shape_cast %320 : vector<16x128xf32> to vector<1x16x128xf32>
    %326 = vector.broadcast %10 : vector<1x16x1xf32> to vector<1x16x128xf32>
    %327 = arith.mulf %325, %326 : vector<1x16x128xf32>
    %cst_140 = arith.constant dense<0.000000e+00> : vector<1x128xf32>
    %328 = vector.multi_reduction <add>, %327, %cst_140 [1] : vector<1x16x128xf32> to vector<1x128xf32>
    %329 = vector.shape_cast %328 : vector<1x128xf32> to vector<1x1x128xf32>
    %cst_141 = arith.constant 0.111111112 : f32
    %330 = vector.broadcast %cst_141 : f32 to vector<1x1x128xf32>
    %331 = arith.mulf %329, %330 : vector<1x1x128xf32>
    %332 = vector.broadcast %331 : vector<1x1x128xf32> to vector<1x16x128xf32>
    %333 = arith.subf %325, %332 : vector<1x16x128xf32>
    %334 = arith.mulf %333, %333 : vector<1x16x128xf32>
    %335 = vector.broadcast %10 : vector<1x16x1xf32> to vector<1x16x128xf32>
    %336 = arith.mulf %334, %335 : vector<1x16x128xf32>
    %cst_142 = arith.constant dense<0.000000e+00> : vector<1x128xf32>
    %337 = vector.multi_reduction <add>, %336, %cst_142 [1] : vector<1x16x128xf32> to vector<1x128xf32>
    %338 = vector.shape_cast %337 : vector<1x128xf32> to vector<1x1x128xf32>
    %cst_143 = arith.constant 0.111111112 : f32
    %339 = vector.broadcast %cst_143 : f32 to vector<1x1x128xf32>
    %340 = arith.mulf %338, %339 : vector<1x1x128xf32>
    %cst_144 = arith.constant 9.99999974E-6 : f32
    %341 = vector.broadcast %cst_144 : f32 to vector<1x1x128xf32>
    %342 = arith.addf %340, %341 : vector<1x1x128xf32>
    %343 = math.rsqrt %342 : vector<1x1x128xf32>
    %344 = vector.broadcast %343 : vector<1x1x128xf32> to vector<1x16x128xf32>
    %345 = arith.mulf %333, %344 : vector<1x16x128xf32>
    %346 = vector.shape_cast %322 : vector<1x128xf32> to vector<1x1x128xf32>
    %347 = vector.broadcast %346 : vector<1x1x128xf32> to vector<1x16x128xf32>
    %348 = arith.mulf %345, %347 : vector<1x16x128xf32>
    %349 = vector.shape_cast %324 : vector<1x128xf32> to vector<1x1x128xf32>
    %350 = vector.broadcast %349 : vector<1x1x128xf32> to vector<1x16x128xf32>
    %351 = arith.addf %348, %350 : vector<1x16x128xf32>
    %352 = vector.shape_cast %351 : vector<1x16x128xf32> to vector<16x128xf32>
    %c0_145 = arith.constant 0 : index
    %c0_146 = arith.constant 0 : index
    %353 = vector.load %arg14[%c0_145, %c0_146] : memref<16x128xf32, #tpu.memory_space<vmem>>, vector<16x128xf32>
    tpu.vector_store %arg14[%c0_145, %c0_146], %352 {strides = array<i32>} : memref<16x128xf32, #tpu.memory_space<vmem>>, vector<16x128xf32>,
    return
  }
  func.func @transform_0(%arg0: i32) -> (i32, i32) {
    %c0_i32 = arith.constant 0 : i32
    %c0_i32_0 = arith.constant 0 : i32
    return %arg0, %c0_i32 : i32, i32
  }
  func.func @transform_1(%arg0: i32) -> (i32, i32) {
    %c0_i32 = arith.constant 0 : i32
    %c0_i32_0 = arith.constant 0 : i32
    %c0_i32_1 = arith.constant 0 : i32
    return %c0_i32, %c0_i32_0 : i32, i32
  }
  func.func @transform_2(%arg0: i32) -> (i32, i32, i32) {
    %c0_i32 = arith.constant 0 : i32
    %c0_i32_0 = arith.constant 0 : i32
    %c0_i32_1 = arith.constant 0 : i32
    %c0_i32_2 = arith.constant 0 : i32
    return %c0_i32, %c0_i32_0, %c0_i32_1 : i32, i32, i32
  }
  func.func @transform_3(%arg0: i32) -> (i32, i32, i32) {
    %c0_i32 = arith.constant 0 : i32
    %c0_i32_0 = arith.constant 0 : i32
    %c0_i32_1 = arith.constant 0 : i32
    %c0_i32_2 = arith.constant 0 : i32
    return %c0_i32, %c0_i32_0, %c0_i32_1 : i32, i32, i32
  }
  func.func @transform_4(%arg0: i32) -> (i32, i32, i32) {
    %c0_i32 = arith.constant 0 : i32
    %c0_i32_0 = arith.constant 0 : i32
    %c0_i32_1 = arith.constant 0 : i32
    %c0_i32_2 = arith.constant 0 : i32
    return %c0_i32, %c0_i32_0, %c0_i32_1 : i32, i32, i32
  }
  func.func @transform_5(%arg0: i32) -> (i32, i32, i32) {
    %c0_i32 = arith.constant 0 : i32
    %c0_i32_0 = arith.constant 0 : i32
    %c0_i32_1 = arith.constant 0 : i32
    %c0_i32_2 = arith.constant 0 : i32
    return %c0_i32, %c0_i32_0, %c0_i32_1 : i32, i32, i32
  }
  func.func @transform_6(%arg0: i32) -> (i32, i32, i32) {
    %c0_i32 = arith.constant 0 : i32
    %c0_i32_0 = arith.constant 0 : i32
    %c0_i32_1 = arith.constant 0 : i32
    %c0_i32_2 = arith.constant 0 : i32
    return %c0_i32, %c0_i32_0, %c0_i32_1 : i32, i32, i32
  }
  func.func @transform_7(%arg0: i32) -> (i32, i32, i32) {
    %c0_i32 = arith.constant 0 : i32
    %c0_i32_0 = arith.constant 0 : i32
    %c0_i32_1 = arith.constant 0 : i32
    %c0_i32_2 = arith.constant 0 : i32
    return %c0_i32, %c0_i32_0, %c0_i32_1 : i32, i32, i32
  }
  func.func @transform_8(%arg0: i32) -> (i32, i32, i32) {
    %c0_i32 = arith.constant 0 : i32
    %c0_i32_0 = arith.constant 0 : i32
    %c0_i32_1 = arith.constant 0 : i32
    %c0_i32_2 = arith.constant 0 : i32
    return %c0_i32, %c0_i32_0, %c0_i32_1 : i32, i32, i32
  }
  func.func @transform_9(%arg0: i32) -> (i32, i32, i32) {
    %c0_i32 = arith.constant 0 : i32
    %c0_i32_0 = arith.constant 0 : i32
    %c0_i32_1 = arith.constant 0 : i32
    %c0_i32_2 = arith.constant 0 : i32
    return %c0_i32, %c0_i32_0, %c0_i32_1 : i32, i32, i32
  }
  func.func @transform_10(%arg0: i32) -> (i32, i32, i32) {
    %c0_i32 = arith.constant 0 : i32
    %c0_i32_0 = arith.constant 0 : i32
    %c0_i32_1 = arith.constant 0 : i32
    %c0_i32_2 = arith.constant 0 : i32
    return %c0_i32, %c0_i32_0, %c0_i32_1 : i32, i32, i32
  }
  func.func @transform_11(%arg0: i32) -> (i32, i32, i32) {
    %c0_i32 = arith.constant 0 : i32
    %c0_i32_0 = arith.constant 0 : i32
    %c0_i32_1 = arith.constant 0 : i32
    %c0_i32_2 = arith.constant 0 : i32
    return %c0_i32, %c0_i32_0, %c0_i32_1 : i32, i32, i32
  }
  func.func @transform_12(%arg0: i32) -> (i32, i32, i32) {
    %c0_i32 = arith.constant 0 : i32
    %c0_i32_0 = arith.constant 0 : i32
    %c0_i32_1 = arith.constant 0 : i32
    %c0_i32_2 = arith.constant 0 : i32
    return %c0_i32, %c0_i32_0, %c0_i32_1 : i32, i32, i32
  }
  func.func @transform_13(%arg0: i32) -> (i32, i32) {
    %c0_i32 = arith.constant 0 : i32
    %c0_i32_0 = arith.constant 0 : i32
    return %arg0, %c0_i32 : i32, i32
  }
}

</mosaic_0001>

<bundles_post_ra>
// kernel: tpu_custom_call.1
= control target key start
LH: loop header
LB: loop body
LE: loop exit
PB: predicated region body
PF: predicated region fallthrough
CT: control target
= control target key end

     0   :  { %s17320_s0 = inlined_call_operand.vmem [shape: f32[32,8], index: 0, kind: input, shape index: {}]   ;;  %s17321_s1 = inlined_call_operand.vmem [shape: f32[8,128], index: 1, kind: input, shape index: {}]   ;;  %s17322_s2 = inlined_call_operand.hbm [shape: f32[2,128,384], index: 2, kind: input, shape index: {}]   ;;  %s17323_s3 = inlined_call_operand.hbm [shape: f32[2,128,128], index: 3, kind: input, shape index: {}]   ;;  %s17324_s4 = inlined_call_operand.vmem [shape: f32[2,1,128], index: 4, kind: input, shape index: {}]   ;;  %s17325_s5 = inlined_call_operand.vmem [shape: f32[2,1,128], index: 5, kind: input, shape index: {}]   ;;  %s17326_s6 = inlined_call_operand.vmem [shape: f32[2,1,128], index: 6, kind: input, shape index: {}]   ;;  %s17327_s7 = inlined_call_operand.hbm [shape: f32[2,128,256], index: 7, kind: input, shape index: {}]   ;;  %s17328_s8 = inlined_call_operand.vmem [shape: f32[2,1,256], index: 8, kind: input, shape index: {}]   ;;  %s17329_s9 = inlined_call_operand.hbm [shape: f32[2,256,128], index: 9, kind: input, shape index: {}]   ;;  %s17330_s10 = inlined_call_operand.vmem [shape: f32[2,1,128], index: 10, kind: input, shape index: {}]   ;;  %s17331_s11 = inlined_call_operand.vmem [shape: f32[2,1,128], index: 11, kind: input, shape index: {}]   ;;  %s17332_s12 = inlined_call_operand.vmem [shape: f32[2,1,128], index: 12, kind: input, shape index: {}]   ;;  %s17333_s13 = inlined_call_operand.hbm [shape: f32[32,128], index: 13, kind: output, shape index: {}]  }
   0x1   :  { %17398 = sst [smem:[#allocation23_spill]] %s17322_s2 }
   0x2   :  { %17399 = sst [smem:[#allocation24_spill]] %s17323_s3 }
   0x3   :  { %17400 = sst [smem:[#allocation25_spill]] %s17332_s12 }
   0x4   :  { %17401 = sst [smem:[#allocation26_spill]] %s17333_s13 }
   0x5   :  { %18 = vsyncpa [#allocation3], 0 }
   0x6   :  { %19 = vsyncpa [#allocation6], 0 }
   0x7   :  { %20 = vsyncpa [#allocation9], 0 }
   0x8   :  { %21 = vsyncpa [#allocation4], 0 }
   0x9   :  { %23 = vsyncpa [#allocation4 + $0x1], 0  ;;  %s12471_s25 = smov 0   ;;  %s12473_s26 = smov 0  }
   0xa   :  { %s12475_s27 = smov 0   ;;  %s12477_s28 = smov 0  }
   0xb LB: > { %17402 = sst [smem:[#allocation15_spill]] %s12371_s25  ;;  %s12492_s29 = sadd.s32 4294967295, %s12383_s28   ;;  %s12383_s28 = sphi %s12477_s28, %s17480_s28   ;;  %s12379_s27 = sphi %s12475_s27, %s17483_s27   ;;  %s12375_s26 = sphi %s12473_s26, %s17482_s26   ;;  %s12371_s25 = sphi %s12471_s25, %s17481_s25  }
   0xc   : > { %17403 = sst [smem:[#allocation16_spill]] %s12375_s26  ;;  %s11982_s30 = sadd.s32 4294967294, %s12383_s28  }
   0xd   : > { %17404 = sst [smem:[#allocation17_spill]] %s12379_s27  ;;  %s12496_s14 = sadd.s32 1, %s12383_s28  }
   0xe   : > { %17405 = sst [smem:[#allocation18_spill]] %s12383_s28  ;;  %s314_s15 = sadd.s32 1, %s12379_s27 }
   0xf   : > { %17406 = sst [smem:[#allocation19_spill]] %s12496_s14  ;;  %s311_s16 = ssub.s32 %s12383_s28, %s12496_s14 }
  0x10   : > { %p324_p0 = scmp.ne.s32.totalorder %s12379_s27, %s12375_s26  ;;  %p312_p1 = scmp.eq.s32.totalorder %s311_s16, 0 }
  0x11   : > { %p325_p2 = scmp.eq.s32.totalorder %s12492_s29, 1  ;;  %p330_p3 = scmp.ne.s32.totalorder %s12375_s26, %s12371_s25 }
  0x12   : > { %p331_p4 = scmp.eq.s32.totalorder %s11982_s30, 1  ;;  %p11983_p7 = scmp.ge.s32.totalorder %s12383_s28, 1 }
  0x13   : > { %s12507_s17 = scalar_select %p312_p1, %s12379_s27, %s314_s15  }
  0x14   : > { %p12509_p5 = por %p325_p2, %p324_p0  ;;  %p12513_p6 = por %p331_p4, %p330_p3 }
  0x15   : > { %17407 = sst [smem:[#allocation20_spill]] %s12507_s17  ;;  %p338_p8 = scmp.lt.s32.totalorder %s12383_s28, 3 }
  0x16   : > { %s17408_s18 = scalar_select %p12509_p5, 1, 0 }
  0x17   : > { %s17410_s19 = scalar_select %p12513_p6, 1, 0 }
  0x18   : > { %17409 = sst [smem:[#allocation21_spill]] %s17408_s18  ;;  %p12048_p9 = scmp.eq.s32.totalorder %s12492_s29, 0 }
  0x19   : > { %17411 = sst [smem:[#allocation22_spill]] %s17410_s19  ;;  %p12520_p10 = pnand %p11983_p7, %p338_p8 }
  0x1a   : > { %s17413_s3 = sld [smem:[#allocation24_spill]]  ;;  %s12385_s24 = smov [#allocation5]  }
  0x1b   : > { %p12031_p11 = pneg %p12520_p10  ;;  %s368_s30 = sshll.u32 %s12385_s24, 4  ;;  %s369_s30 = int_to_ptr.vmem [resolvable:$true] %s368_s30 }
  0x1c   : > { %s17415_s2 = sld [smem:[#allocation23_spill]]  ;;  %s12386_s21 = smov 128  }
  0x1d   : > { %p12531_p12 = pnand %p12048_p9, %p12031_p11  ;;  %s12387_s22 = smov 8  }
  0x1e   : > { %s12389_s14 = smov 384   ;;  %s12390_s19 = smov 24  }
  0x1f   : > { %s389_s17 = sshll.u32 %s17327_s7, 4  ;;  %s12391_s16 = smov [#allocation7]   ;;  %s390_s17 = int_to_ptr.hbm [resolvable:$true] %s389_s17 }
  0x20   : > { %s366_s23 = sshll.u32 %s17413_s3, 4  ;;  %s12388_s3 = smov [#allocation2]   ;;  %s367_s23 = int_to_ptr.hbm [resolvable:$true] %s366_s23 }
  0x21   : > { %12037 = dma.hbm_to_vmem [thread:$0]  (!%p12531_p12), %s367_s23, 4096, %s369_s30, [#allocation6], %s12386_s21, %s12386_s21, %s12387_s22  }
  0x22   : > { %s352_s27 = sshll.u32 %s17415_s2, 4  ;;  %s354_s24 = sshll.u32 %s12388_s3, 4  ;;  %s353_s27 = int_to_ptr.hbm [resolvable:$true] %s352_s27  ;;  %s355_s24 = int_to_ptr.vmem [resolvable:$true] %s354_s24 }
  0x23   : > { %12034 = dma.hbm_to_vmem [thread:$0]  (!%p12531_p12), %s353_s27, 12288, %s355_s24, [#allocation3], %s12389_s14, %s12389_s14, %s12390_s19  }
  0x24   : > { %s391_s2 = sshll.u32 %s12391_s16, 4  ;;  %s406_s23 = sshll.u32 %s17329_s9, 4  ;;  %s392_s2 = int_to_ptr.vmem [resolvable:$true] %s391_s2  ;;  %s407_s23 = int_to_ptr.hbm [resolvable:$true] %s406_s23 }
  0x25   : > { %s12392_s30 = smov 256   ;;  %s12393_s3 = smov 16  }
  0x26   : > { %12040 = dma.hbm_to_vmem [thread:$0]  (!%p12531_p12), %s390_s17, 8192, %s392_s2, [#allocation6], %s12392_s30, %s12392_s30, %s12393_s3  }
  0x27   : > { %s12394_s26 = smov [#allocation8]   ;;  %442 = sbr.rel (%p12520_p10) target bundleno = 6518 (0x1976), region = 72 }
  0x28   : > { %s408_s12 = sshll.u32 %s12394_s26, 4  ;;  %s409_s12 = int_to_ptr.vmem [resolvable:$true] %s408_s12 }
  0x29   : > { %12043 = dma.hbm_to_vmem [thread:$0]  (!%p12531_p12), %s407_s23, 8192, %s409_s12, [#allocation9], %s12386_s21, %s12386_s21, %s12387_s22  }
  0x2c   : > { %12354 = dma.done.wait (%p12048_p9), [#allocation3], 12288  }
  0x2d   : > { %12356 = vsyncadd (%p12048_p9), [#allocation3], 4294955008 }
  0x2e   : > { %12358 = dma.done.wait (%p12048_p9), [#allocation6], 12288  }
  0x2f   : > { %12360 = vsyncadd (%p12048_p9), [#allocation6], 4294955008 }
  0x30   : > { %12362 = dma.done.wait (%p12048_p9), [#allocation9], 8192  }
  0x31   : > { %12364 = vsyncadd (%p12048_p9), [#allocation9], 4294959104  ;;  %s11995_s2 = sshll.u32 %s12492_s29, 1  ;;  %vm512_vm0 = vcmask 64512   ;;  %v511_v0 = vld [vmem:[%s17321_s1] sm:$0xff]  ;;  %v753_v6 = vld [vmem:[#allocation2 + $0x168] sm:$0xff] }
  0x32   : > { %p503_p13 = scmp.lt.s32.totalorder %s11995_s2, 3  ;;  %v12573_v3 = vand.u32 4294901760, %v511_v0  ;;  %v750_v7 = vld [vmem:[#allocation2 + $0x150] sm:$0xff]  ;;  %v747_v8 = vld [vmem:[#allocation2 + $0x138] sm:$0xff]  ;;  %v12579_v11 = vand.u32 4294901760, %v753_v6  ;;  %v744_v13 = vld [vmem:[#allocation2 + $0x120] sm:$0xff] }
  0x33   : > { %v12581_v12 = vand.u32 4294901760, %v750_v7  ;;  %v741_v14 = vld [vmem:[#allocation2 + $0x108] sm:$0xff]  ;;  %v12586_v16 = vand.u32 4294901760, %v747_v8  ;;  %v12588_v17 = vand.u32 4294901760, %v744_v13  ;;  %v738_v30 = vld [vmem:[#allocation2 + $0xf0] sm:$0xff]  ;;  %v735_v34 = vld [vmem:[#allocation2 + $0xd8] sm:$0xff] }
  0x34   : > { %s17485_s2 = smov (!%p503_p13, %s11995_s2), 3  ;;  %12011 = vmatpush.msra.mxu2 %v12573_v3  ;;  %v569_v15 = vsub.f32 %v511_v0, %v12573_v3  ;;  %535 = vmatpush.msra.mxu0 %v12573_v3  ;;  %v12590_v18 = vand.u32 4294901760, %v741_v14  ;;  %v12599_v21 = vsub.f32 %v753_v6, %v12579_v11  ;;  %v732_v35 = vld [vmem:[#allocation2 + $0xc0] sm:$0xff]  ;;  %v729_v36 = vld [vmem:[#allocation2 + $0xa8] sm:$0xff]  ;;  %v12635_v48 = vand.u32 4294901760, %v738_v30  ;;  %v726_v49 = vld [vmem:[#allocation2 + $0x90] sm:$0xff] }
  0x35   : > { %s11996_s12 = sshll.u32 %s17485_s2, 3  ;;  %v12602_v22 = vsub.f32 %v750_v7, %v12581_v12  ;;  %v12605_v24 = vsub.f32 %v747_v8, %v12586_v16  ;;  %v12608_v25 = vsub.f32 %v744_v13, %v12588_v17  ;;  %v12638_v51 = vand.u32 4294901760, %v735_v34  ;;  %v723_v56 = vld [vmem:[#allocation2 + $0x78] sm:$0xff]  ;;  %v720_v63 = vld [vmem:[#allocation2 + $0x60] sm:$0xff]  ;;  %v717_v6 = vld [vmem:[#allocation2 + $0x48] sm:$0xff]  ;;  %s12395_s14 = smov 96  }
  0x36   : > { %s506_s26 = scalar_lea.vmem %s17320_s0, %s11996_s12  ;;  %v570_v23 = vand.u32 4294901760, %v569_v15  ;;  %600 = vmatpush.msrb.mxu2 %v569_v15  ;;  %v823_v28 = vand.u32 4294901760, %v12599_v21  ;;  %v12616_v33 = vsub.f32 %v741_v14, %v12590_v18  ;;  %v12640_v52 = vand.u32 4294901760, %v732_v35  ;;  %s12396_s18 = smov 64  }
  0x37   : > { %v510_v1 = vld [vmem:[%s506_s26 + $0x8] sm:$0xff]  ;;  %v509_v2 = vld [vmem:[%s506_s26] sm:$0xff]  ;;  %v829_v29 = vand.u32 4294901760, %v12602_v22  ;;  %v835_v32 = vand.u32 4294901760, %v12605_v24  ;;  %v841_v42 = vand.u32 4294901760, %v12608_v25  ;;  %v12642_v53 = vand.u32 4294901760, %v729_v36 }
  0x38   : > { %v517_v4 = vsel %vm512_vm0, %v510_v1, 0  ;;  %v514_v5 = vsel %vm512_vm0, %v509_v2, 0  ;;  %v571_v31 = vsub.f32 %v569_v15, %v570_v23  ;;  %660 = vmatpush.msrb.mxu0 %v570_v23  ;;  %v824_v39 = vsub.f32 %v12599_v21, %v823_v28  ;;  %v714_v15 = vld [vmem:[#allocation2 + $0x30] sm:$0xff]  ;;  %s12397_s19 = smov 32   ;;  %s17444_s26 = sld [smem:[#allocation25_spill]] }
  0x39   : > { %v12575_v9 = vand.u32 4294901760, %v517_v4  ;;  %v12577_v10 = vand.u32 4294901760, %v514_v5  ;;  %v830_v40 = vsub.f32 %v12602_v22, %v829_v29  ;;  %v836_v46 = vsub.f32 %v12605_v24, %v835_v32  ;;  %s17473_s16 = sld [smem:[#allocation16_spill]]  ;;  %s12010_s3 = sshll.u32 %s12492_s29, 4 }
  0x3a   : > { %v572_v41 = vand.u32 4294901760, %v571_v31  ;;  %v825_v45 = vand.u32 4294901760, %v824_v39  ;;  %v847_v47 = vand.u32 4294901760, %v12616_v33  ;;  %v842_v54 = vsub.f32 %v12608_v25, %v841_v42  ;;  %v708_v39 = vld [vmem:[#allocation2] sm:$0xff] }
  0x3b   : > { %v12593_v19 = vsub.f32 %v517_v4, %v12575_v9  ;;  %v12596_v20 = vsub.f32 %v514_v5, %v12577_v10  ;;  %v831_v50 = vand.u32 4294901760, %v830_v40  ;;  %v12649_v55 = vsub.f32 %v738_v30, %v12635_v48 }
  0x3c   : > { %12012 = vmatpush.msra.mxu3 %v572_v41  ;;  %573 = vmatpush.msra.mxu1 %v572_v41  ;;  %v837_v57 = vand.u32 4294901760, %v836_v46  ;;  %v12653_v58 = vsub.f32 %v735_v34, %v12638_v51  ;;  %v12656_v59 = vsub.f32 %v732_v35, %v12640_v52  ;;  %v12658_v60 = vand.u32 4294901760, %v726_v49 }
  0x3d   : > { %v546_v26 = vand.u32 4294901760, %v12593_v19  ;;  %v538_v27 = vand.u32 4294901760, %v12596_v20  ;;  %579 = vmatmul.f32.vlgmr.msra.gmra.mxu3 %v12575_v9  ;;  %575 = vmatmul.f32.vlgmr.msra.gmra.mxu1 %v12577_v10  ;;  %v848_v61 = vsub.f32 %v12616_v33, %v847_v47  ;;  %v853_v62 = vand.u32 4294901760, %v12649_v55 }
  0x3e   : > { %628 = vmatpush.msrb.mxu3 %v12573_v3  ;;  %686 = vmatpush.msrb.mxu1 %v12573_v3  ;;  %v859_v0 = vand.u32 4294901760, %v12653_v58  ;;  %v12669_v1 = vsub.f32 %v729_v36, %v12642_v53  ;;  %v12671_v2 = vand.u32 4294901760, %v723_v56  ;;  %v843_v3 = vand.u32 4294901760, %v842_v54  ;;  %v711_v36 = vld [vmem:[#allocation2 + $0x18] sm:$0xff]  ;;  %s17445_s20 = smov %s17444_s26 }
  0x3f   : > { %v547_v37 = vsub.f32 %v12593_v19, %v546_v26  ;;  %v539_v38 = vsub.f32 %v12596_v20, %v538_v27  ;;  %v854_v4 = vsub.f32 %v12649_v55, %v853_v62  ;;  %v865_v5 = vand.u32 4294901760, %v12656_v59  ;;  %s499_s23 = sand.u32 1, %s17473_s16  }
  0x40   : > { %826 = vmatpush.msra.mxu3 %v825_v45  ;;  %986 = vmatpush.msra.mxu1 %v12579_v11  ;;  %v12681_v7 = vsub.f32 %v726_v49, %v12658_v60  ;;  %v12683_v8 = vand.u32 4294901760, %v720_v63  ;;  %v849_v13 = vand.u32 4294901760, %v848_v61  ;;  %v860_v14 = vsub.f32 %v12653_v58, %v859_v0  ;;  %s11994_s30 = sshll.u32 %s499_s23, 4  ;;  %s11864_s22 = scalar_lea.sflag [#allocation4], %s499_s23 }
  0x41   : > { %v548_v43 = vand.u32 4294901760, %v547_v37  ;;  %v540_v44 = vand.u32 4294901760, %v539_v38  ;;  %v871_v23 = vand.u32 4294901760, %v12669_v1  ;;  %v12695_v30 = vsub.f32 %v723_v56, %v12671_v2 }
  0x42   : > { %832 = vmatpush.msra.mxu3 %v831_v50  ;;  %988 = vmatpush.msra.mxu1 %v12581_v12  ;;  %v12697_v31 = vand.u32 4294901760, %v717_v6  ;;  %v855_v34 = vand.u32 4294901760, %v854_v4  ;;  %v866_v35 = vsub.f32 %v12656_v59, %v865_v5  ;;  %v12709_v37 = vand.u32 4294901760, %v714_v15 }
  0x43   : > { %549 = vmatmul.f32.vlgmr.msra.gmra.mxu2 %v548_v43  ;;  %541 = vmatmul.f32.vlgmr.msra.gmra.mxu0 %v540_v44  ;;  %v861_v38 = vand.u32 4294901760, %v860_v14  ;;  %v883_v40 = vand.u32 4294901760, %v12695_v30  ;;  %v12721_v43 = vand.u32 4294901760, %v711_v36  ;;  %v12733_v50 = vand.u32 4294901760, %v708_v39 }
  0x44   : > { %928 = vmatpush.msra.mxu0 %v12599_v21  ;;  %773 = vmatpush.msra.mxu2 %v12579_v11  ;;  %v12719_v41 = vsub.f32 %v717_v6, %v12697_v31  ;;  %v867_v44 = vand.u32 4294901760, %v866_v35  ;;  %v12731_v49 = vsub.f32 %v714_v15, %v12709_v37  ;;  %v751_v6 = vld [vmem:[#allocation2 + $0x158] sm:$0xff]  ;;  %vm1888_vm1 = vcmask 261120  }
  0x45   : > { %838 = vmatpush.msra.mxu3 %v837_v57  ;;  %688 = vmatmul.f32.vlgmr.msrb.gmra.mxu1 %v12577_v10  ;;  %v884_v56 = vsub.f32 %v12695_v30, %v883_v40  ;;  %v12744_v61 = vsub.f32 %v711_v36, %v12721_v43  ;;  %v12754_v4 = vsub.f32 %v708_v39, %v12733_v50  ;;  %v748_v39 = vld [vmem:[#allocation2 + $0x140] sm:$0xff]  ;;  %vm2093_vm3 = vcmask 130048  }
  0x46   : > { %931 = vmatpush.msra.mxu0 %v12602_v22  ;;  %775 = vmatpush.msra.mxu2 %v12581_v12  ;;  %v895_v57 = vand.u32 4294901760, %v12719_v41 }
  0x47   : > { %632 = vmatmul.f32.vlgmr.msrb.gmra.mxu3 %v538_v27  ;;  %v12707_v27 = vsub.f32 %v720_v63, %v12683_v8  ;;  %990 = vmatpush.msra.mxu1 %v12586_v16  ;;  %v754_v63 = vld [vmem:[#allocation2 + $0x170] sm:$0xff]  ;;  %v907_v14 = vand.u32 4294901760, %v12744_v61  ;;  %v17345_v36 = vand.u32 4294901760, %v12754_v4 }
  0x48   : > { %934 = vmatpush.msra.mxu0 %v12605_v24  ;;  %844 = vmatpush.msra.mxu3 %v843_v3  ;;  %v901_v3 = vand.u32 4294901760, %v12731_v49  ;;  %v12763_v15 = vand.u32 4294901760, %v754_v63  ;;  %v736_v24 = vld [vmem:[#allocation2 + $0xe0] sm:$0xff] }
  0x49   : > { %777 = vmatpush.msra.mxu2 %v12586_v16  ;;  %992 = vmatpush.msra.mxu1 %v12588_v17  ;;  %v889_v46 = vand.u32 4294901760, %v12707_v27 }
  0x4a   : > { %937 = vmatpush.msra.mxu0 %v12608_v25  ;;  %850 = vmatpush.msra.mxu3 %v849_v13  ;;  %v896_v13 = vsub.f32 %v12719_v41, %v895_v57  ;;  %v902_v35 = vsub.f32 %v12731_v49, %v901_v3 }
  0x4b   : > { %603 = vmatmul.f32.vlgmr.msrb.gmra.mxu2 %v12596_v20  ;;  %662 = vmatmul.f32.vlgmr.msrb.gmra.mxu0 %v12577_v10  ;;  %v877_v20 = vand.u32 4294901760, %v12681_v7  ;;  %v872_v10 = vsub.f32 %v12669_v1, %v871_v23 }
  0x4c   : > { %940 = vmatpush.msra.mxu0 %v12616_v33  ;;  %856 = vmatpush.msra.mxu3 %v855_v34 }
  0x4d   : > { %779 = vmatpush.msra.mxu2 %v12588_v17  ;;  %v878_v45 = vsub.f32 %v12681_v7, %v877_v20  ;;  %994 = vmatpush.msra.mxu1 %v12590_v18  ;;  %v873_v54 = vand.u32 4294901760, %v872_v10  ;;  %v897_v10 = vand.u32 4294901760, %v896_v13 }
  0x4e   : > { %943 = vmatpush.msra.mxu0 %v12649_v55  ;;  %862 = vmatpush.msra.mxu3 %v861_v38  ;;  %v12772_v38 = vand.u32 4294901760, %v751_v6 }
  0x4f   : > { %638 = vmatmul.f32.gmra.mxu3 %v546_v26  ;;  %692 = vmatmul.f32.gmra.mxu1 %v12575_v9  ;;  %v890_v26 = vsub.f32 %v12707_v27, %v889_v46 }
  0x50   : > { %868 = vmatpush.msra.mxu3 %v867_v44  ;;  %946 = vmatpush.msra.mxu0 %v12653_v58  ;;  %v908_v44 = vsub.f32 %v12744_v61, %v907_v14 }
  0x51   : > { %996 = vmatpush.msra.mxu1 %v12635_v48  ;;  %781 = vmatpush.msra.mxu2 %v12590_v18  ;;  %v891_v34 = vand.u32 4294901760, %v890_v26  ;;  %v914_v26 = vsub.f32 %v12754_v4, %v17345_v36 }
  0x52   : > { %874 = vmatpush.msra.mxu3 %v873_v54  ;;  %949 = vmatpush.msra.mxu0 %v12656_v59  ;;  %v745_v54 = vld [vmem:[#allocation2 + $0x128] sm:$0xff]  ;;  %v909_v13 = vand.u32 4294901760, %v908_v44 }
  0x53   : > { %608 = vmatmul.f32.gmra.mxu2 %v12593_v19  ;;  %666 = vmatmul.f32.gmra.mxu0 %v12575_v9  ;;  %v879_v19 = vand.u32 4294901760, %v878_v45  ;;  %v885_v9 = vand.u32 4294901760, %v884_v56  ;;  %v12781_v45 = vsub.f32 %v754_v63, %v12763_v15  ;;  %v12785_v56 = vand.u32 4294901760, %v748_v39 }
  0x54   : > { %998 = vmatpush.msra.mxu1 %v12638_v51  ;;  %783 = vmatpush.msra.mxu2 %v12635_v48  ;;  %v12796_v63 = vand.u32 4294901760, %v745_v54 }
  0x55   : > { %880 = vmatpush.msra.mxu3 %v879_v19  ;;  %952 = vmatpush.msra.mxu0 %v12669_v1  ;;  %v903_v19 = vand.u32 4294901760, %v902_v35  ;;  %v12803_v35 = vsub.f32 %v748_v39, %v12785_v56 }
  0x56   : > { %1000 = vmatpush.msra.mxu1 %v12640_v52  ;;  %785 = vmatpush.msra.mxu2 %v12638_v51 }
  0x57   : > { %886 = vmatpush.msra.mxu3 %v885_v9  ;;  %955 = vmatpush.msra.mxu0 %v12681_v7  ;;  %v12792_v9 = vsub.f32 %v751_v6, %v12772_v38  ;;  %v915_v6 = vand.u32 4294901760, %v914_v26  ;;  %v1207_v44 = vand.u32 4294901760, %v12803_v35  ;;  %v724_v7 = vld [vmem:[#allocation2 + $0x80] sm:$0xff] }
  0x58   : > { %1002 = vmatpush.msra.mxu1 %v12642_v53  ;;  %787 = vmatpush.msra.mxu2 %v12640_v52 }
  0x59   : > { %892 = vmatpush.msra.mxu3 %v891_v34  ;;  %958 = vmatpush.msra.mxu0 %v12695_v30  ;;  %v1195_v34 = vand.u32 4294901760, %v12781_v45  ;;  %v1201_v36 = vand.u32 4294901760, %v12792_v9  ;;  %v12937_v30 = vand.u32 4294901760, %v724_v7 }
  0x5a   : > { %1004 = vmatpush.msra.mxu1 %v12658_v60  ;;  %789 = vmatpush.msra.mxu2 %v12642_v53 }
  0x5b   : > { %898 = vmatpush.msra.mxu3 %v897_v10  ;;  %961 = vmatpush.msra.mxu0 %v12707_v27  ;;  %v12810_v10 = vsub.f32 %v745_v54, %v12796_v63  ;;  %v1196_v39 = vsub.f32 %v12781_v45, %v1195_v34  ;;  %v1202_v54 = vsub.f32 %v12792_v9, %v1201_v36  ;;  %v721_v27 = vld [vmem:[#allocation2 + $0x68] sm:$0xff] }
  0x5c   : > { %1006 = vmatpush.msra.mxu1 %v12671_v2  ;;  %791 = vmatpush.msra.mxu2 %v12658_v60 }
  0x5d   : > { %904 = vmatpush.msra.mxu3 %v903_v19  ;;  %964 = vmatpush.msra.mxu0 %v12719_v41  ;;  %v1213_v19 = vand.u32 4294901760, %v12810_v10  ;;  %v1197_v26 = vand.u32 4294901760, %v1196_v39  ;;  %v742_v39 = vld [vmem:[#allocation2 + $0x110] sm:$0xff]  ;;  %v12950_v41 = vand.u32 4294901760, %v721_v27 }
  0x5e   : > { %1008 = vmatpush.msra.mxu1 %v12683_v8  ;;  %793 = vmatpush.msra.mxu2 %v12671_v2 }
  0x5f   : > { %910 = vmatpush.msra.mxu3 %v909_v13  ;;  %967 = vmatpush.msra.mxu0 %v12731_v49  ;;  %v1208_v13 = vsub.f32 %v12803_v35, %v1207_v44  ;;  %v718_v49 = vld [vmem:[#allocation2 + $0x50] sm:$0xff] }
  0x60   : > { %1010 = vmatpush.msra.mxu1 %v12697_v31  ;;  %795 = vmatpush.msra.mxu2 %v12683_v8 }
  0x61   : > { %916 = vmatpush.msra.mxu3 %v915_v6  ;;  %970 = vmatpush.msra.mxu0 %v12744_v61  ;;  %v1214_v6 = vsub.f32 %v12810_v10, %v1213_v19 }
  0x62   : > { %1012 = vmatpush.msra.mxu1 %v12709_v37  ;;  %797 = vmatpush.msra.mxu2 %v12697_v31 }
  0x63   : > { %1104 = vmatpush.msrb.mxu3 %v12579_v11  ;;  %973 = vmatpush.msra.mxu0 %v12754_v4  ;;  %v1203_v11 = vand.u32 4294901760, %v1202_v54  ;;  %v12849_v54 = vand.u32 4294901760, %v742_v39 }
  0x64   : > { %1014 = vmatpush.msra.mxu1 %v12721_v43  ;;  %799 = vmatpush.msra.mxu2 %v12709_v37 }
  0x65   : > { %1106 = vmatpush.msrb.mxu3 %v12581_v12  ;;  %1145 = vmatpush.msrb.mxu0 %v12763_v15  ;;  %v1209_v12 = vand.u32 4294901760, %v1208_v13  ;;  %v12896_v22 = vsub.f32 %v742_v39, %v12849_v54  ;;  %v712_v39 = vld [vmem:[#allocation2 + $0x20] sm:$0xff] }
  0x66   : > { %1016 = vmatpush.msra.mxu1 %v12733_v50  ;;  %801 = vmatpush.msra.mxu2 %v12721_v43 }
  0x67   : > { %1108 = vmatpush.msrb.mxu3 %v12586_v16  ;;  %1147 = vmatpush.msrb.mxu0 %v12772_v38  ;;  %v1215_v16 = vand.u32 4294901760, %v1214_v6  ;;  %v1219_v25 = vand.u32 4294901760, %v12896_v22 }
  0x68   : > { %1198 = vmatpush.msrb.mxu1 %v1197_v26  ;;  %803 = vmatpush.msra.mxu2 %v12733_v50 }
  0x69   : > { %1110 = vmatpush.msrb.mxu3 %v12588_v17  ;;  %1149 = vmatpush.msrb.mxu0 %v12785_v56  ;;  %v17416_v17 = vand.u32 4294901760, %v12754_v4  ;;  %v1220_v33 = vsub.f32 %v12896_v22, %v1219_v25  ;;  %v12963_v4 = vsub.f32 %v721_v27, %v12950_v41 }
  0x6a   : > { %1204 = vmatpush.msrb.mxu1 %v1203_v11  ;;  %1033 = vmatpush.msrb.mxu2 %v823_v28  ;;  %v12900_v28 = vand.u32 4294901760, %v736_v24 }
  0x6b   : > { %1112 = vmatpush.msrb.mxu3 %v12590_v18  ;;  %1151 = vmatpush.msrb.mxu0 %v12796_v63  ;;  %v739_v18 = vld [vmem:[#allocation2 + $0xf8] sm:$0xff] }
  0x6c   : > { %1210 = vmatpush.msrb.mxu1 %v1209_v12  ;;  %1037 = vmatpush.msrb.mxu2 %v829_v29  ;;  %v12893_v21 = vand.u32 4294901760, %v739_v18  ;;  %v1261_v12 = vand.u32 4294901760, %v12963_v4 }
  0x6d   : > { %1114 = vmatpush.msrb.mxu3 %v12635_v48  ;;  %1153 = vmatpush.msrb.mxu0 %v12849_v54  ;;  %v12913_v48 = vsub.f32 %v736_v24, %v12900_v28 }
  0x6e   : > { %1216 = vmatpush.msrb.mxu1 %v1215_v16  ;;  %1041 = vmatpush.msrb.mxu2 %v835_v32  ;;  %v12903_v29 = vsub.f32 %v739_v18, %v12893_v21  ;;  %v733_v32 = vld [vmem:[#allocation2 + $0xc8] sm:$0xff]  ;;  %v12977_v18 = vand.u32 4294901760, %v712_v39 }
  0x6f   : > { %1116 = vmatpush.msrb.mxu3 %v12638_v51  ;;  %1155 = vmatpush.msrb.mxu0 %v12893_v21  ;;  %v730_v51 = vld [vmem:[#allocation2 + $0xb0] sm:$0xff]  ;;  %v1231_v55 = vand.u32 4294901760, %v12913_v48 }
  0x70   : > { %1045 = vmatpush.msrb.mxu2 %v841_v42  ;;  %v1225_v42 = vand.u32 4294901760, %v12903_v29  ;;  %v12920_v58 = vand.u32 4294901760, %v730_v51 }
  0x71   : > { %1118 = vmatpush.msrb.mxu3 %v12640_v52  ;;  %1157 = vmatpush.msrb.mxu0 %v12900_v28  ;;  %v1221_v52 = vand.u32 4294901760, %v1220_v33 }
  0x72   : > { %1049 = vmatpush.msrb.mxu2 %v847_v47  ;;  %v12910_v47 = vand.u32 4294901760, %v733_v32 }
  0x73   : > { %1120 = vmatpush.msrb.mxu3 %v12642_v53  ;;  %v1226_v53 = vsub.f32 %v12903_v29, %v1225_v42  ;;  %1222 = vmatpush.msrb.mxu1 %v1221_v52  ;;  %v709_v52 = vld [vmem:[#allocation2 + $0x8] sm:$0xff] }
  0x74   : > { %1053 = vmatpush.msrb.mxu2 %v853_v62  ;;  %1159 = vmatpush.msrb.mxu0 %v12910_v47  ;;  %v12923_v59 = vsub.f32 %v733_v32, %v12910_v47  ;;  %v1262_v32 = vsub.f32 %v12963_v4, %v1261_v12 }
  0x75   : > { %1122 = vmatpush.msrb.mxu3 %v12658_v60  ;;  %v727_v60 = vld [vmem:[#allocation2 + $0x98] sm:$0xff]  ;;  %v1227_v62 = vand.u32 4294901760, %v1226_v53 }
  0x76   : > { %1057 = vmatpush.msrb.mxu2 %v859_v0  ;;  %v1232_v0 = vsub.f32 %v12913_v48, %v1231_v55  ;;  %1161 = vmatpush.msrb.mxu0 %v12920_v58  ;;  %v12929_v1 = vand.u32 4294901760, %v727_v60  ;;  %v1263_v53 = vand.u32 4294901760, %v1262_v32 }
  0x77   : > { %1124 = vmatpush.msrb.mxu3 %v12671_v2  ;;  %v12932_v2 = vsub.f32 %v730_v51, %v12920_v58  ;;  %1228 = vmatpush.msrb.mxu1 %v1227_v62  ;;  %v12993_v62 = vsub.f32 %v712_v39, %v12977_v18 }
  0x78   : > { %1061 = vmatpush.msrb.mxu2 %v865_v5  ;;  %v1237_v5 = vand.u32 4294901760, %v12923_v59  ;;  %1163 = vmatpush.msrb.mxu0 %v12929_v1 }
  0x79   : > { %1126 = vmatpush.msrb.mxu3 %v12683_v8  ;;  %v1233_v8 = vand.u32 4294901760, %v1232_v0 }
  0x7a   : > { %1065 = vmatpush.msrb.mxu2 %v871_v23  ;;  %v1243_v23 = vand.u32 4294901760, %v12932_v2  ;;  %1165 = vmatpush.msrb.mxu0 %v12937_v30 }
  0x7b   : > { %1128 = vmatpush.msrb.mxu3 %v12697_v31  ;;  %v12940_v31 = vsub.f32 %v727_v60, %v12929_v1  ;;  %1234 = vmatpush.msrb.mxu1 %v1233_v8  ;;  %v12990_v60 = vand.u32 4294901760, %v709_v52  ;;  %v17346_v8 = vand.u32 4294901760, %v12993_v62 }
  0x7c   : > { %1069 = vmatpush.msrb.mxu2 %v877_v20  ;;  %v1238_v20 = vsub.f32 %v12923_v59, %v1237_v5  ;;  %1167 = vmatpush.msrb.mxu0 %v12950_v41 }
  0x7d   : > { %1130 = vmatpush.msrb.mxu3 %v12709_v37  ;;  %v1244_v37 = vsub.f32 %v12932_v2, %v1243_v23 }
  0x7e   : > { %1073 = vmatpush.msrb.mxu2 %v883_v40  ;;  %v1249_v40 = vand.u32 4294901760, %v12940_v31 }
  0x7f   : > { %1132 = vmatpush.msrb.mxu3 %v12721_v43  ;;  %v12953_v43 = vsub.f32 %v724_v7, %v12937_v30 }
  0x80   : > { %1077 = vmatpush.msrb.mxu2 %v889_v46  ;;  %v1239_v46 = vand.u32 4294901760, %v1238_v20  ;;  %v13001_v20 = vsub.f32 %v709_v52, %v12990_v60 }
  0x81   : > { %1134 = vmatpush.msrb.mxu3 %v12733_v50  ;;  %v1245_v50 = vand.u32 4294901760, %v1244_v37  ;;  %v1255_v61 = vand.u32 4294901760, %v12953_v43  ;;  %v1280_v37 = vsub.f32 %v12993_v62, %v17346_v8 }
  0x82   : > { %1081 = vmatpush.msrb.mxu2 %v895_v57  ;;  %v1250_v57 = vsub.f32 %v12940_v31, %v1249_v40  ;;  %1240 = vmatpush.msrb.mxu1 %v1239_v46  ;;  %v17348_v46 = vand.u32 4294901760, %v13001_v20 }
  0x83   : > { %v1256_v13 = vsub.f32 %v12953_v43, %v1255_v61 }
  0x84   : > { %1085 = vmatpush.msrb.mxu2 %v901_v3  ;;  %v12960_v3 = vand.u32 4294901760, %v718_v49  ;;  %v1251_v26 = vand.u32 4294901760, %v1250_v57  ;;  %1246 = vmatpush.msrb.mxu1 %v1245_v50  ;;  %v1286_v50 = vsub.f32 %v13001_v20, %v17348_v46 }
  0x85   : > { %v1257_v16 = vand.u32 4294901760, %v1256_v13 }
  0x86   : > { %1089 = vmatpush.msrb.mxu2 %v907_v14  ;;  %v715_v14 = vld [vmem:[#allocation2 + $0x38] sm:$0xff]  ;;  %1169 = vmatpush.msrb.mxu0 %v12960_v3  ;;  %v12972_v6 = vsub.f32 %v718_v49, %v12960_v3  ;;  %v1281_v49 = vand.u32 4294901760, %v1280_v37  ;;  %v1287_v57 = vand.u32 4294901760, %v1286_v50 }
  0x87   : > { %v12969_v11 = vand.u32 4294901760, %v715_v14  ;;  %1252 = vmatpush.msrb.mxu1 %v1251_v26 }
  0x88   : > { %1093 = vmatpush.msrb.mxu2 %v17416_v17  ;;  %v1267_v17 = vand.u32 4294901760, %v12972_v6 }
  0x89   : > { %1171 = vmatpush.msrb.mxu0 %v12969_v11  ;;  %v12980_v24 = vsub.f32 %v715_v14, %v12969_v11  ;;  %1258 = vmatpush.msrb.mxu1 %v1257_v16 }
  0x8a   : > { %v1268_v33 = vsub.f32 %v12972_v6, %v1267_v17 }
  0x8b   : > { %1173 = vmatpush.msrb.mxu0 %v12977_v18  ;;  %v17347_v51 = vand.u32 4294901760, %v12980_v24  ;;  %1264 = vmatpush.msrb.mxu1 %v1263_v53 }
  0x8c   : > { %v1269_v0 = vand.u32 4294901760, %v1268_v33 }
  0x8d   : > { %v1274_v7 = vsub.f32 %v12980_v24, %v17347_v51  ;;  %1175 = vmatpush.msrb.mxu0 %v12990_v60 }
  0x8e   : > { %1270 = vmatpush.msrb.mxu1 %v1269_v0 }
  0x8f   : > { %v1275_v27 = vand.u32 4294901760, %v1274_v7 }
  0x91   : > { %1276 = vmatpush.msrb.mxu1 %v1275_v27 }
  0x93   : > { %1282 = vmatpush.msrb.mxu1 %v1281_v49 }
  0x95   : > { %1288 = vmatpush.msrb.mxu1 %v1287_v57 }
  0xba   : > { %v576_v39 = vpop.f32.mrf.mxu1 }
  0xc0   : > { %v542_v14 = vpop.f32.mrf.mxu0  ;;  %v580_v13 = vpop.f32.mrf.mxu3 }
  0xc1   : > { %v577_v16 = vadd.f32 %v576_v39, %v542_v14 }
  0xc2   : > { %v689_v0 = vpop.f32.mrf.mxu1 }
  0xc6   : > { %v550_v26 = vpop.f32.mrf.mxu2 }
  0xc7   : > { %v581_v37 = vadd.f32 %v580_v13, %v550_v26 }
  0xc8   : > { %v663_v32 = vpop.f32.mrf.mxu0 }
  0xca   : > { %v633_v52 = vpop.f32.mrf.mxu3 }
  0xce   : > { %v604_v33 = vpop.f32.mrf.mxu2 }
  0xcf   : > { %v605_v53 = vadd.f32 %v604_v33, %v577_v16  ;;  %v693_v16 = vpop.f32.mrf.mxu1 }
  0xd0   : > { %v667_v57 = vpop.f32.mrf.mxu0 }
  0xd1   : > { %v634_v7 = vadd.f32 %v633_v52, %v605_v53  ;;  %v731_v52 = vld [vmem:[#allocation2 + $0xb8] sm:$0xff]  ;;  %v17418_v53 = vand.u32 4294901760, %v12993_v62 }
  0xd2   : > { %v639_v46 = vpop.f32.mrf.mxu3 }
  0xd3   : > { %v664_v27 = vadd.f32 %v663_v32, %v634_v7  ;;  %v728_v7 = vld [vmem:[#allocation2 + $0xa0] sm:$0xff] }
  0xd5   : > { %v13010_v8 = vadd.f32 %v689_v0, %v664_v27  ;;  %v13185_v27 = vand.u32 4294901760, %v731_v52 }
  0xd6   : > { %v609_v51 = vpop.f32.mrf.mxu2 }
  0xd7   : > { %v13013_v49 = vand.u32 4294901760, %v13010_v8  ;;  %v610_v50 = vadd.f32 %v609_v51, %v581_v37  ;;  %v17419_v37 = vand.u32 4294901760, %v13001_v20 }
  0xd9   : > { %v13017_v14 = vsub.f32 %v13010_v8, %v13013_v49  ;;  %v640_v39 = vadd.f32 %v639_v46, %v610_v50  ;;  %918 = vmatmul.f32.vlgmr.msra.gmra.mxu3 %v13013_v49 }
  0xda   : > { %1358 = vmatpush.msra.mxu3 %v12763_v15 }
  0xdb   : > { %v668_v26 = vadd.f32 %v667_v57, %v640_v39  ;;  %976 = vmatmul.f32.vlgmr.msra.gmra.mxu0 %v13017_v14  ;;  %v13023_v13 = vand.u32 4294901760, %v13017_v14 }
  0xdc   : > { %1360 = vmatpush.msra.mxu3 %v12772_v38  ;;  %1405 = vmatpush.msra.mxu0 %v1195_v34 }
  0xdd   : > { %v13028_v51 = vadd.f32 %v693_v16, %v668_v26  ;;  %1020 = vmatmul.f32.vlgmr.msra.gmra.mxu1 %v13023_v13  ;;  %v807_v46 = vsub.f32 %v13017_v14, %v13023_v13  ;;  %v725_v16 = vld [vmem:[#allocation2 + $0x88] sm:$0xff]  ;;  %v13198_v26 = vand.u32 4294901760, %v728_v7 }
  0xde   : > { %1362 = vmatpush.msra.mxu3 %v12785_v56  ;;  %1409 = vmatpush.msra.mxu0 %v1201_v36 }
  0xdf   : > { %v13037_v32 = vand.u32 4294901760, %v13028_v51  ;;  %1476 = vmatpush.msra.mxu1 %v12763_v15  ;;  %v13040_v33 = vand.u32 4294901760, %v807_v46 }
  0xe0   : > { %1364 = vmatpush.msra.mxu3 %v12796_v63  ;;  %1413 = vmatpush.msra.mxu0 %v1207_v44  ;;  %v746_v44 = vld [vmem:[#allocation2 + $0x130] sm:$0xff] }
  0xe1   : > { %v13047_v34 = vsub.f32 %v13028_v51, %v13037_v32  ;;  %1478 = vmatpush.msra.mxu1 %v12772_v38  ;;  %809 = vmatmul.f32.vlgmr.msra.gmra.mxu2 %v13040_v33 }
  0xe2   : > { %922 = vmatmul.f32.gmra.mxu3 %v13037_v32  ;;  %1300 = vmatpush.msra.mxu2 %v12781_v45  ;;  %v755_v45 = vld [vmem:[#allocation2 + $0x178] sm:$0xff] }
  0xe3   : > { %1366 = vmatpush.msra.mxu3 %v12849_v54  ;;  %1417 = vmatpush.msra.mxu0 %v1213_v19  ;;  %v13057_v15 = vand.u32 4294901760, %v13047_v34 }
  0xe4   : > { %1480 = vmatpush.msra.mxu1 %v12785_v56  ;;  %981 = vmatmul.f32.gmra.mxu0 %v13047_v34  ;;  %v13082_v56 = vand.u32 4294901760, %v755_v45 }
  0xe5   : > { %1303 = vmatpush.msra.mxu2 %v12792_v9  ;;  %1368 = vmatpush.msra.mxu3 %v12893_v21  ;;  %v815_v36 = vsub.f32 %v13047_v34, %v13057_v15  ;;  %v752_v9 = vld [vmem:[#allocation2 + $0x160] sm:$0xff] }
  0xe6   : > { %1421 = vmatpush.msra.mxu0 %v1219_v25  ;;  %1482 = vmatpush.msra.mxu1 %v12796_v63  ;;  %v13091_v63 = vand.u32 4294901760, %v752_v9  ;;  %v13114_v25 = vand.u32 4294901760, %v746_v44 }
  0xe7   : > { %1026 = vmatmul.f32.gmra.mxu1 %v13057_v15  ;;  %1306 = vmatpush.msra.mxu2 %v12803_v35  ;;  %v13070_v38 = vand.u32 4294901760, %v815_v36  ;;  %v749_v35 = vld [vmem:[#allocation2 + $0x148] sm:$0xff]  ;;  %v722_v36 = vld [vmem:[#allocation2 + $0x70] sm:$0xff] }
  0xe8   : > { %1370 = vmatpush.msra.mxu3 %v12900_v28  ;;  %1425 = vmatpush.msra.mxu0 %v1225_v42  ;;  %v13103_v19 = vand.u32 4294901760, %v749_v35 }
  0xe9   : > { %1484 = vmatpush.msra.mxu1 %v12849_v54  ;;  %1309 = vmatpush.msra.mxu2 %v12810_v10  ;;  %v13096_v10 = vsub.f32 %v755_v45, %v13082_v56  ;;  %v13109_v54 = vsub.f32 %v752_v9, %v13091_v63  ;;  %v13206_v45 = vsub.f32 %v731_v52, %v13185_v27  ;;  %v13208_v9 = vand.u32 4294901760, %v725_v16 }
  0xea   : > { %1372 = vmatpush.msra.mxu3 %v12910_v47  ;;  %1429 = vmatpush.msra.mxu0 %v1231_v55  ;;  %v13136_v55 = vsub.f32 %v746_v44, %v13114_v25  ;;  %v719_v44 = vld [vmem:[#allocation2 + $0x58] sm:$0xff] }
  0xeb   : > { %1486 = vmatpush.msra.mxu1 %v12893_v21  ;;  %817 = vmatmul.f32.gmra.mxu2 %v13070_v38  ;;  %v743_v21 = vld [vmem:[#allocation2 + $0x118] sm:$0xff]  ;;  %v1573_v42 = vand.u32 4294901760, %v13109_v54 }
  0xec   : > { %1136 = vmatmul.f32.vlgmr.msrb.gmra.mxu3 %v13013_v49  ;;  %1312 = vmatpush.msra.mxu2 %v12896_v22  ;;  %v1567_v22 = vand.u32 4294901760, %v13096_v10 }
  0xed   : > { %1374 = vmatpush.msra.mxu3 %v12920_v58  ;;  %1433 = vmatpush.msra.mxu0 %v1237_v5  ;;  %v1574_v5 = vsub.f32 %v13109_v54, %v1573_v42 }
  0xee   : > { %1488 = vmatpush.msra.mxu1 %v12900_v28  ;;  %1181 = vmatmul.f32.vlgmr.msrb.gmra.mxu0 %v13040_v33  ;;  %v13122_v28 = vsub.f32 %v749_v35, %v13103_v19 }
  0xef   : > { %1315 = vmatpush.msra.mxu2 %v12903_v29  ;;  %1376 = vmatpush.msra.mxu3 %v12929_v1  ;;  %v13124_v29 = vand.u32 4294901760, %v743_v21 }
  0xf0   : > { %1437 = vmatpush.msra.mxu0 %v1243_v23  ;;  %1490 = vmatpush.msra.mxu1 %v12910_v47  ;;  %v740_v47 = vld [vmem:[#allocation2 + $0x100] sm:$0xff]  ;;  %v734_v23 = vld [vmem:[#allocation2 + $0xd0] sm:$0xff] }
  0xf1   : > { %1290 = vmatmul.f32.vlgmr.msrb.gmra.mxu1 %v13013_v49  ;;  %1318 = vmatpush.msra.mxu2 %v12913_v48  ;;  %v1568_v48 = vsub.f32 %v13096_v10, %v1567_v22 }
  0xf2   : > { %1378 = vmatpush.msra.mxu3 %v12937_v30  ;;  %1441 = vmatpush.msra.mxu0 %v1249_v40 }
  0xf3   : > { %1492 = vmatpush.msra.mxu1 %v12920_v58  ;;  %1321 = vmatpush.msra.mxu2 %v12923_v59  ;;  %v737_v58 = vld [vmem:[#allocation2 + $0xe8] sm:$0xff]  ;;  %v1579_v59 = vand.u32 4294901760, %v13122_v28 }
  0xf4   : > { %1380 = vmatpush.msra.mxu3 %v12950_v41  ;;  %1445 = vmatpush.msra.mxu0 %v1255_v61  ;;  %v13157_v40 = vand.u32 4294901760, %v737_v58  ;;  %v17417_v61 = vand.u32 4294901760, %v12980_v24 }
  0xf5   : > { %1494 = vmatpush.msra.mxu1 %v12929_v1  ;;  %1095 = vmatmul.f32.vlgmr.msrb.gmra.mxu2 %v13013_v49  ;;  %v13144_v1 = vsub.f32 %v743_v21, %v13124_v29  ;;  %v13220_v21 = vand.u32 4294901760, %v722_v36 }
  0xf6   : > { %1140 = vmatmul.f32.gmra.mxu3 %v13037_v32  ;;  %1324 = vmatpush.msra.mxu2 %v12932_v2  ;;  %v13146_v2 = vand.u32 4294901760, %v740_v47  ;;  %v13181_v0 = vsub.f32 %v737_v58, %v13157_v40  ;;  %v1615_v58 = vand.u32 4294901760, %v13206_v45 }
  0xf7   : > { %1382 = vmatpush.msra.mxu3 %v12960_v3  ;;  %1449 = vmatpush.msra.mxu0 %v1261_v12  ;;  %v13242_v52 = vsub.f32 %v722_v36, %v13220_v21 }
  0xf8   : > { %1496 = vmatpush.msra.mxu1 %v12937_v30  ;;  %1189 = vmatmul.f32.gmra.mxu0 %v13070_v38  ;;  %v1569_v30 = vand.u32 4294901760, %v1568_v48  ;;  %v13169_v12 = vsub.f32 %v740_v47, %v13146_v2  ;;  %v1603_v46 = vand.u32 4294901760, %v13181_v0  ;;  %v716_v48 = vld [vmem:[#allocation2 + $0x40] sm:$0xff] }
  0xf9   : > { %1327 = vmatpush.msra.mxu2 %v12940_v31  ;;  %1384 = vmatpush.msra.mxu3 %v12969_v11  ;;  %v1585_v31 = vand.u32 4294901760, %v13136_v55 }
  0xfa   : > { %1453 = vmatpush.msra.mxu0 %v1267_v17  ;;  %1498 = vmatpush.msra.mxu1 %v12950_v41  ;;  %v1580_v41 = vsub.f32 %v13122_v28, %v1579_v59  ;;  %v13171_v17 = vand.u32 4294901760, %v734_v23  ;;  %v1597_v57 = vand.u32 4294901760, %v13169_v12  ;;  %v1604_v47 = vsub.f32 %v13181_v0, %v1603_v46 }
  0xfb   : > { %1294 = vmatmul.f32.gmra.mxu1 %v13037_v32  ;;  %1330 = vmatpush.msra.mxu2 %v12953_v43  ;;  %v1591_v43 = vand.u32 4294901760, %v13144_v1 }
  0xfc   : > { %1386 = vmatpush.msra.mxu3 %v12977_v18  ;;  %1457 = vmatpush.msra.mxu0 %v17417_v61  ;;  %v13195_v39 = vsub.f32 %v734_v23, %v13171_v17  ;;  %v713_v61 = vld [vmem:[#allocation2 + $0x28] sm:$0xff] }
  0xfd   : > { %1500 = vmatpush.msra.mxu1 %v12960_v3  ;;  %1333 = vmatpush.msra.mxu2 %v12963_v4  ;;  %v1575_v3 = vand.u32 4294901760, %v1574_v5  ;;  %v1586_v4 = vsub.f32 %v13136_v55, %v1585_v31  ;;  %v1592_v50 = vsub.f32 %v13144_v1, %v1591_v43  ;;  %v13232_v5 = vand.u32 4294901760, %v719_v44 }
  0xfe   : > { %1388 = vmatpush.msra.mxu3 %v12990_v60  ;;  %1461 = vmatpush.msra.mxu0 %v17418_v53  ;;  %v1609_v35 = vand.u32 4294901760, %v13195_v39  ;;  %v13244_v53 = vand.u32 4294901760, %v716_v48 }
  0xff   : > { %1502 = vmatpush.msra.mxu1 %v12969_v11  ;;  %1099 = vmatmul.f32.gmra.mxu2 %v13037_v32  ;;  %v1581_v11 = vand.u32 4294901760, %v1580_v41 }
 0x100   : > { %1570 = vmatpush.msrb.mxu3 %v1569_v30  ;;  %1336 = vmatpush.msra.mxu2 %v12972_v6  ;;  %v1587_v6 = vand.u32 4294901760, %v1586_v4  ;;  %v1610_v30 = vsub.f32 %v13195_v39, %v1609_v35  ;;  %v1616_v4 = vsub.f32 %v13206_v45, %v1615_v58  ;;  %v13267_v36 = vsub.f32 %v716_v48, %v13244_v53 }
 0x101   : > { %1392 = vmatmul.f32.vlgmr.msra.gmra.mxu3 %v13023_v13  ;;  %1465 = vmatpush.msra.mxu0 %v17419_v37  ;;  %v13255_v37 = vsub.f32 %v719_v44, %v13232_v5 }
 0x102   : > { %1504 = vmatpush.msra.mxu1 %v12977_v18  ;;  %1576 = vmatpush.msrb.mxu3 %v1575_v3  ;;  %v1593_v18 = vand.u32 4294901760, %v1592_v50  ;;  %v710_v3 = vld [vmem:[#allocation2 + $0x10] sm:$0xff]  ;;  %v1611_v50 = vand.u32 4294901760, %v1610_v30 }
 0x103   : > { %1672 = vmatpush.msrb.mxu0 %v13096_v10  ;;  %1339 = vmatpush.msra.mxu2 %v12980_v24  ;;  %v1598_v24 = vsub.f32 %v13169_v12, %v1597_v57 }
 0x104   : > { %1467 = vmatmul.f32.vlgmr.msra.gmra.mxu0 %v13013_v49  ;;  %1506 = vmatpush.msra.mxu1 %v12990_v60  ;;  %v13218_v60 = vsub.f32 %v728_v7, %v13198_v26 }
 0x105   : > { %1582 = vmatpush.msrb.mxu3 %v1581_v11  ;;  %1675 = vmatpush.msrb.mxu0 %v13109_v54  ;;  %v1599_v23 = vand.u32 4294901760, %v1598_v24  ;;  %v13257_v11 = vand.u32 4294901760, %v713_v61  ;;  %v1617_v24 = vand.u32 4294901760, %v1616_v4 }
 0x106   : > { %1730 = vmatpush.msrb.mxu1 %v13082_v56  ;;  %1342 = vmatpush.msra.mxu2 %v12993_v62  ;;  %v13230_v62 = vsub.f32 %v725_v16, %v13208_v9  ;;  %v1621_v41 = vand.u32 4294901760, %v13218_v60 }
 0x107   : > { %1508 = vmatmul.f32.vlgmr.msra.gmra.mxu1 %v13013_v49  ;;  %1588 = vmatpush.msrb.mxu3 %v1587_v6  ;;  %v17350_v6 = vand.u32 4294901760, %v13242_v52 }
 0x108   : > { %1678 = vmatpush.msrb.mxu0 %v13122_v28  ;;  %1732 = vmatpush.msrb.mxu1 %v13091_v63  ;;  %v1627_v7 = vand.u32 4294901760, %v13230_v62  ;;  %v1622_v16 = vsub.f32 %v13218_v60, %v1621_v41 }
 0x109   : > { %1345 = vmatpush.msra.mxu2 %v13001_v20  ;;  %1594 = vmatpush.msrb.mxu3 %v1593_v18  ;;  %v1605_v20 = vand.u32 4294901760, %v1604_v47  ;;  %v13269_v18 = vand.u32 4294901760, %v710_v3  ;;  %v17349_v47 = vand.u32 4294901760, %v13255_v37  ;;  %v1634_v30 = vsub.f32 %v13242_v52, %v17350_v6 }
 0x10a   : > { %1681 = vmatpush.msrb.mxu0 %v13136_v55  ;;  %1734 = vmatpush.msrb.mxu1 %v13103_v19  ;;  %v1628_v44 = vsub.f32 %v13230_v62, %v1627_v7  ;;  %v1623_v48 = vand.u32 4294901760, %v1622_v16 }
 0x10b   : > { %1517 = vmatpush.msrb.mxu2 %v13082_v56  ;;  %1398 = vmatmul.f32.gmra.mxu3 %v13057_v15  ;;  %v13289_v4 = vsub.f32 %v710_v3, %v13269_v18  ;;  %v1635_v3 = vand.u32 4294901760, %v1634_v30 }
 0x10c   : > { %1348 = vmatmul.f32.vlgmr.msra.gmra.mxu2 %v13017_v14  ;;  %1600 = vmatpush.msrb.mxu3 %v1599_v23  ;;  %v13279_v23 = vsub.f32 %v713_v61, %v13257_v11  ;;  %v1629_v61 = vand.u32 4294901760, %v1628_v44 }
 0x10d   : > { %1519 = vmatpush.msrb.mxu2 %v13091_v63  ;;  %1684 = vmatpush.msrb.mxu0 %v13144_v1  ;;  %v1657_v44 = vand.u32 4294901760, %v13289_v4 }
 0x10e   : > { %1736 = vmatpush.msrb.mxu1 %v13114_v25  ;;  %1471 = vmatmul.f32.gmra.mxu0 %v13037_v32  ;;  %v1651_v16 = vand.u32 4294901760, %v13279_v23 }
 0x10f   : > { %1521 = vmatpush.msrb.mxu2 %v13103_v19  ;;  %1606 = vmatpush.msrb.mxu3 %v1605_v20  ;;  %v1645_v20 = vand.u32 4294901760, %v13267_v36  ;;  %v1658_v30 = vsub.f32 %v13289_v4, %v1657_v44 }
 0x110   : > { %1687 = vmatpush.msrb.mxu0 %v13169_v12  ;;  %1738 = vmatpush.msrb.mxu1 %v13124_v29  ;;  %v1652_v6 = vsub.f32 %v13279_v23, %v1651_v16 }
 0x111   : > { %1512 = vmatmul.f32.gmra.mxu1 %v13037_v32  ;;  %1523 = vmatpush.msrb.mxu2 %v13114_v25 }
 0x112   : > { %1612 = vmatpush.msrb.mxu3 %v1611_v50  ;;  %1690 = vmatpush.msrb.mxu0 %v13181_v0  ;;  %v1640_v50 = vsub.f32 %v13255_v37, %v17349_v47 }
 0x113   : > { %1740 = vmatpush.msrb.mxu1 %v13146_v2  ;;  %1525 = vmatpush.msrb.mxu2 %v13124_v29 }
 0x114   : > { %1618 = vmatpush.msrb.mxu3 %v1617_v24  ;;  %1693 = vmatpush.msrb.mxu0 %v13195_v39  ;;  %v1646_v24 = vsub.f32 %v13267_v36, %v1645_v20  ;;  %v1641_v47 = vand.u32 4294901760, %v1640_v50  ;;  %v1659_v50 = vand.u32 4294901760, %v1658_v30 }
 0x115   : > { %1742 = vmatpush.msrb.mxu1 %v13157_v40  ;;  %1353 = vmatmul.f32.gmra.mxu2 %v13047_v34 }
 0x116   : > { %1527 = vmatpush.msrb.mxu2 %v13146_v2  ;;  %1624 = vmatpush.msrb.mxu3 %v1623_v48  ;;  %v1647_v48 = vand.u32 4294901760, %v1646_v24 }
 0x117   : > { %1696 = vmatpush.msrb.mxu0 %v13206_v45  ;;  %1744 = vmatpush.msrb.mxu1 %v13171_v17 }
 0x118   : > { %1529 = vmatpush.msrb.mxu2 %v13157_v40  ;;  %1630 = vmatpush.msrb.mxu3 %v1629_v61  ;;  %v1653_v61 = vand.u32 4294901760, %v1652_v6 }
 0x119   : > { %1699 = vmatpush.msrb.mxu0 %v13218_v60  ;;  %1746 = vmatpush.msrb.mxu1 %v13185_v27 }
 0x11a   : > { %1531 = vmatpush.msrb.mxu2 %v13171_v17  ;;  %1636 = vmatpush.msrb.mxu3 %v1635_v3 }
 0x11b   : > { %1702 = vmatpush.msrb.mxu0 %v13230_v62  ;;  %1748 = vmatpush.msrb.mxu1 %v13198_v26 }
 0x11c   : > { %1533 = vmatpush.msrb.mxu2 %v13185_v27  ;;  %1642 = vmatpush.msrb.mxu3 %v1641_v47 }
 0x11d   : > { %1705 = vmatpush.msrb.mxu0 %v13242_v52  ;;  %1750 = vmatpush.msrb.mxu1 %v13208_v9 }
 0x11e   : > { %1535 = vmatpush.msrb.mxu2 %v13198_v26  ;;  %1648 = vmatpush.msrb.mxu3 %v1647_v48 }
 0x11f   : > { %1708 = vmatpush.msrb.mxu0 %v13255_v37  ;;  %1752 = vmatpush.msrb.mxu1 %v13220_v21 }
 0x120   : > { %1537 = vmatpush.msrb.mxu2 %v13208_v9  ;;  %1654 = vmatpush.msrb.mxu3 %v1653_v61 }
 0x121   : > { %1711 = vmatpush.msrb.mxu0 %v13267_v36  ;;  %1754 = vmatpush.msrb.mxu1 %v13232_v5 }
 0x122   : > { %1539 = vmatpush.msrb.mxu2 %v13220_v21  ;;  %1660 = vmatpush.msrb.mxu3 %v1659_v50 }
 0x123   : > { %1714 = vmatpush.msrb.mxu0 %v13279_v23  ;;  %1756 = vmatpush.msrb.mxu1 %v13244_v53 }
 0x124   : > { %1662 = vmatmul.f32.vlgmr.msrb.gmra.mxu3 %v13013_v49  ;;  %1541 = vmatpush.msrb.mxu2 %v13232_v5 }
 0x125   : > { %1848 = vmatpush.msra.mxu3 %v13082_v56  ;;  %1717 = vmatpush.msrb.mxu0 %v13289_v4 }
 0x126   : > { %1758 = vmatpush.msrb.mxu1 %v13257_v11  ;;  %1720 = vmatmul.f32.vlgmr.msrb.gmra.mxu0 %v13017_v14  ;;  %v17420_v14 = vand.u32 4294901760, %v13242_v52 }
 0x127   : > { %1850 = vmatpush.msra.mxu3 %v13091_v63  ;;  %1543 = vmatpush.msrb.mxu2 %v13244_v53 }
 0x128   : > { %1760 = vmatpush.msrb.mxu1 %v13269_v18 }
 0x129   : > { %1764 = vmatmul.f32.vlgmr.msrb.gmra.mxu1 %v13023_v13  ;;  %1852 = vmatpush.msra.mxu3 %v13103_v19  ;;  %v17421_v13 = vand.u32 4294901760, %v13255_v37 }
 0x12a   : > { %1545 = vmatpush.msrb.mxu2 %v13257_v11 }
 0x12b   : > { %1854 = vmatpush.msra.mxu3 %v13114_v25 }
 0x12c   : > { %1547 = vmatpush.msrb.mxu2 %v13269_v18  ;;  %1666 = vmatmul.f32.gmra.mxu3 %v13037_v32 }
 0x12d   : > { %1553 = vmatmul.f32.vlgmr.msrb.gmra.mxu2 %v13040_v33  ;;  %1856 = vmatpush.msra.mxu3 %v13124_v29 }
 0x12e   : > { %1777 = vmatpush.msra.mxu2 %v1567_v22  ;;  %1725 = vmatmul.f32.gmra.mxu0 %v13047_v34 }
 0x12f   : > { %1858 = vmatpush.msra.mxu3 %v13146_v2 }
 0x130   : > { %1781 = vmatpush.msra.mxu2 %v1573_v42 }
 0x131   : > { %1770 = vmatmul.f32.gmra.mxu1 %v13057_v15  ;;  %1860 = vmatpush.msra.mxu3 %v13157_v40 }
 0x132   : > { %1785 = vmatpush.msra.mxu2 %v1579_v59 }
 0x133   : > { %1862 = vmatpush.msra.mxu3 %v13171_v17 }
 0x134   : > { %1789 = vmatpush.msra.mxu2 %v1585_v31 }
 0x135   : > { %1561 = vmatmul.f32.gmra.mxu2 %v13070_v38  ;;  %1864 = vmatpush.msra.mxu3 %v13185_v27 }
 0x136   : > { %1793 = vmatpush.msra.mxu2 %v1591_v43 }
 0x137   : > { %1866 = vmatpush.msra.mxu3 %v13198_v26 }
 0x138   : > { %1797 = vmatpush.msra.mxu2 %v1597_v57 }
 0x139   : > { %1868 = vmatpush.msra.mxu3 %v13208_v9 }
 0x13a   : > { %1801 = vmatpush.msra.mxu2 %v1603_v46 }
 0x13b   : > { %1870 = vmatpush.msra.mxu3 %v13220_v21 }
 0x13c   : > { %1805 = vmatpush.msra.mxu2 %v1609_v35 }
 0x13d   : > { %1872 = vmatpush.msra.mxu3 %v13232_v5 }
 0x13e   : > { %1809 = vmatpush.msra.mxu2 %v1615_v58 }
 0x13f   : > { %1874 = vmatpush.msra.mxu3 %v13244_v53 }
 0x140   : > { %1813 = vmatpush.msra.mxu2 %v1621_v41 }
 0x141   : > { %1876 = vmatpush.msra.mxu3 %v13257_v11 }
 0x142   : > { %1817 = vmatpush.msra.mxu2 %v1627_v7 }
 0x143   : > { %1878 = vmatpush.msra.mxu3 %v13269_v18 }
 0x144   : > { %1821 = vmatpush.msra.mxu2 %v17420_v14  ;;  %1880 = vmatmul.f32.vlgmr.msra.gmra.mxu3 %v13013_v49 }
 0x146   : > { %1825 = vmatpush.msra.mxu2 %v17421_v13 }
 0x148   : > { %1829 = vmatpush.msra.mxu2 %v1645_v20 }
 0x14a   : > { %1833 = vmatpush.msra.mxu2 %v1651_v16 }
 0x14c   : > { %1837 = vmatpush.msra.mxu2 %v1657_v44  ;;  %1884 = vmatmul.f32.gmra.mxu3 %v13037_v32 }
 0x14d   : > { %1839 = vmatmul.f32.vlgmr.msra.gmra.mxu2 %v13013_v49 }
 0x155   : > { %1843 = vmatmul.f32.gmra.mxu2 %v13037_v32 }
 0x158   : > { %v977_v15 = vpop.f32.mrf.mxu0 }
 0x15a   : > { %v1021_v38 = vpop.f32.mrf.mxu1 }
 0x15c   : > { %v919_v34 = vpop.f32.mrf.mxu3 }
 0x161   : > { %v982_v10 = vpop.f32.mrf.mxu0 }
 0x164   : > { %v810_v33 = vpop.f32.mrf.mxu2  ;;  %v1027_v19 = vpop.f32.mrf.mxu1 }
 0x165   : > { %v923_v63 = vpop.f32.mrf.mxu3  ;;  %v920_v29 = vadd.f32 %v919_v34, %v810_v33 }
 0x167   : > { %v978_v59 = vadd.f32 %v977_v15, %v920_v29 }
 0x169   : > { %v1022_v32 = vadd.f32 %v1021_v38, %v978_v59 }
 0x16b   : > { %v1182_v25 = vpop.f32.mrf.mxu0 }
 0x16e   : > { %v818_v56 = vpop.f32.mrf.mxu2  ;;  %v1291_v28 = vpop.f32.mrf.mxu1 }
 0x16f   : > { %v1137_v22 = vpop.f32.mrf.mxu3  ;;  %v924_v2 = vadd.f32 %v923_v63, %v818_v56  ;;  %v1292_v31 = vadd.f32 %v1291_v28, %v1182_v25 }
 0x171   : > { %v983_v17 = vadd.f32 %v982_v10, %v924_v2 }
 0x173   : > { %v1028_v45 = vadd.f32 %v1027_v19, %v983_v17 }
 0x175   : > { %v1190_v1 = vpop.f32.mrf.mxu0 }
 0x178   : > { %v1096_v54 = vpop.f32.mrf.mxu2  ;;  %v1295_v49 = vpop.f32.mrf.mxu1 }
 0x179   : > { %v1141_v55 = vpop.f32.mrf.mxu3  ;;  %v1097_v40 = vadd.f32 %v1096_v54, %v1022_v32  ;;  %v1296_v60 = vadd.f32 %v1295_v49, %v1190_v1 }
 0x17b   : > { %v13398_v57 = vadd.f32 %v1137_v22, %v1097_v40 }
 0x17d   : > { %v1890_v9 = vsel %vm1888_vm1, %v13398_v57, 0 }
 0x17e   : > { %v1919_v62 = vand.u32 4294901760, %v1890_v9 }
 0x180   : > { %v1920_v6 = vsub.f32 %v1890_v9, %v1919_v62 }
 0x181   : > { %v1468_v39 = vpop.f32.mrf.mxu0 }
 0x182   : > { %v1100_v42 = vpop.f32.mrf.mxu2  ;;  %v1921_v4 = vand.u32 4294901760, %v1920_v6 }
 0x183   : > { %v1101_v35 = vadd.f32 %v1100_v42, %v1028_v45 }
 0x184   : > { %v1393_v0 = vpop.f32.mrf.mxu3  ;;  %v1509_v46 = vpop.f32.mrf.mxu1  ;;  %v1922_v48 = vsub.f32 %v1920_v6, %v1921_v4 }
 0x185   : > { %v13404_v41 = vadd.f32 %v1141_v55, %v1101_v35 }
 0x186   : > { %v1923_v13 = vand.u32 4294901760, %v1922_v48 }
 0x187   : > { %v1893_v47 = vsel %vm1888_vm1, %v13404_v41, 0 }
 0x188   : > { %v1927_v16 = vand.u32 4294901760, %v1893_v47 }
 0x18a   : > { %v1928_v30 = vsub.f32 %v1893_v47, %v1927_v16 }
 0x18b   : > { %v1472_v37 = vpop.f32.mrf.mxu0 }
 0x18c   : > { %v1929_v33 = vand.u32 4294901760, %v1928_v30 }
 0x18e   : > { %v1399_v52 = vpop.f32.mrf.mxu3  ;;  %v1513_v36 = vpop.f32.mrf.mxu1  ;;  %v1930_v38 = vsub.f32 %v1928_v30, %v1929_v33 }
 0x18f   : > { %v1349_v43 = vpop.f32.mrf.mxu2 }
 0x190   : > { %v1350_v12 = vadd.f32 %v1349_v43, %v1292_v31  ;;  %v1931_v63 = vand.u32 4294901760, %v1930_v38 }
 0x192   : > { %v1394_v27 = vadd.f32 %v1393_v0, %v1350_v12 }
 0x194   : > { %v1469_v26 = vadd.f32 %v1468_v39, %v1394_v27 }
 0x196   : > { %v13402_v21 = vadd.f32 %v1509_v46, %v1469_v26 }
 0x198   : > { %v1354_v58 = vpop.f32.mrf.mxu2  ;;  %v1896_v7 = vsel %vm1888_vm1, %v13402_v21, 0 }
 0x199   : > { %v1355_v5 = vadd.f32 %v1354_v58, %v1296_v60  ;;  %v1917_v18 = vand.u32 4294901760, %v1896_v7 }
 0x19b   : > { %v1400_v53 = vadd.f32 %v1399_v52, %v1355_v5  ;;  %v1957_v24 = vsub.f32 %v1896_v7, %v1917_v18 }
 0x19d   : > { %v1473_v11 = vadd.f32 %v1472_v37, %v1400_v53  ;;  %v1958_v50 = vand.u32 4294901760, %v1957_v24 }
 0x19f   : > { %v13410_v23 = vadd.f32 %v1513_v36, %v1473_v11  ;;  %v1959_v15 = vsub.f32 %v1957_v24, %v1958_v50 }
 0x1a1   : > { %2344 = vrot.lane.b32.xlu2 %v13410_v23, %s12395_s14  ;;  %v1899_v20 = vsel %vm1888_vm1, %v13410_v23, 0  ;;  %v1960_v56 = vand.u32 4294901760, %v1959_v15 }
 0x1a2   : > { %v1915_v3 = vand.u32 4294901760, %v1899_v20 }
 0x1a3   : > { %v1721_v54 = vpop.f32.mrf.mxu0 }
 0x1a4   : > { %1916 = vmatpush.xpose.msra.mxu0 %v1915_v3  ;;  %v1951_v44 = vsub.f32 %v1899_v20, %v1915_v3  ;;  %2079 = vmatpush.xpose.msrb.mxu3 %v1915_v3 }
 0x1a6   : > { %v1952_v61 = vand.u32 4294901760, %v1951_v44  ;;  %v1765_v42 = vpop.f32.mrf.mxu1 }
 0x1a7   : > { %v1663_v10 = vpop.f32.mrf.mxu3 }
 0x1a8   : > { %1918 = vmatpush.xpose.msra.mxu0 %v1917_v18  ;;  %2050 = vmatpush.xpose.msrb.mxu2 %v1952_v61  ;;  %v1953_v14 = vsub.f32 %v1951_v44, %v1952_v61 }
 0x1a9   : > { %2081 = vmatpush.xpose.msrb.mxu3 %v1917_v18  ;;  %2342 = vrot.lane.b32.xlu2 %v13402_v21, %s12395_s14 }
 0x1aa   : > { %v1954_v34 = vand.u32 4294901760, %v1953_v14 }
 0x1ab   : > { %1924 = vmatmul.f32.vlgmr.msra.gmra.mxu0 %v1923_v13  ;;  %v1726_v32 = vpop.f32.mrf.mxu0  ;;  %v17351_v13 = vlaneseq }
 0x1ac   : > { %1987 = vmatpush.xpose.msrb.mxu0 %v1951_v44  ;;  %2083 = vmatmul.f32.vlgmr.msrb.gmra.mxu3 %v1919_v62 }
 0x1ad   : > { %1955 = vmatpush.xpose.msra.mxu1 %v1954_v34  ;;  %2054 = vmatpush.xpose.msrb.mxu2 %v1958_v50 }
 0x1ae   : > { %v1771_v43 = vpop.f32.mrf.mxu1 }
 0x1af   : > { %v1667_v25 = vpop.f32.mrf.mxu3 }
 0x1b0   : > { %1990 = vmatpush.xpose.msrb.mxu0 %v1957_v24  ;;  %2056 = vmatmul.f32.vlgmr.msrb.gmra.mxu2 %v1919_v62  ;;  %v1554_v19 = vpop.f32.mrf.mxu2 }
 0x1b1   : > { %1961 = vmatpush.xpose.msra.mxu1 %v1960_v56  ;;  %v1664_v22 = vadd.f32 %v1663_v10, %v1554_v19  ;;  %v13449_v56 = vand.u32 127, %v17351_v13 }
 0x1b3   : > { %1932 = vmatmul.f32.gmra.mxu0 %v1931_v63  ;;  %v1722_v29 = vadd.f32 %v1721_v54, %v1664_v22  ;;  %vm698_vm2 = vcmp.lt.s32.totalorder %v13449_v56, 9 }
 0x1b4   : > { %1963 = vmatmul.f32.vlgmr.msra.gmra.mxu1 %v1919_v62  ;;  %2087 = vmatmul.f32.gmra.mxu3 %v1927_v16 }
 0x1b5   : > { %2017 = vmatpush.xpose.msrb.mxu1 %v1915_v3  ;;  %v1766_v59 = vadd.f32 %v1765_v42, %v1722_v29 }
 0x1b8   : > { %2060 = vmatmul.f32.gmra.mxu2 %v1927_v16  ;;  %v1562_v28 = vpop.f32.mrf.mxu2 }
 0x1b9   : > { %2019 = vmatpush.xpose.msrb.mxu1 %v1917_v18  ;;  %v1668_v55 = vadd.f32 %v1667_v25, %v1562_v28 }
 0x1bb   : > { %1993 = vmatmul.f32.vlgmr.msrb.gmra.mxu0 %v1920_v6  ;;  %v1727_v31 = vadd.f32 %v1726_v32, %v1668_v55 }
 0x1bc   : > { %1967 = vmatmul.f32.gmra.mxu1 %v1927_v16 }
 0x1bd   : > { %v1772_v12 = vadd.f32 %v1771_v43, %v1727_v31 }
 0x1c3   : > { %1998 = vmatmul.f32.gmra.mxu0 %v1928_v30 }
 0x1c4   : > { %2023 = vmatmul.f32.vlgmr.msrb.gmra.mxu1 %v1921_v4 }
 0x1c7   : > { %v1881_v1 = vpop.f32.mrf.mxu3 }
 0x1cc   : > { %2029 = vmatmul.f32.gmra.mxu1 %v1929_v33 }
 0x1cf   : > { %v1885_v39 = vpop.f32.mrf.mxu3 }
 0x1d0   : > { %v1840_v49 = vpop.f32.mrf.mxu2 }
 0x1d1   : > { %v1841_v2 = vadd.f32 %v1840_v49, %v1766_v59 }
 0x1d3   : > { %v13418_v40 = vadd.f32 %v1881_v1, %v1841_v2 }
 0x1d5   : > { %v2164_v17 = vand.u32 4294901760, %v13418_v40 }
 0x1d7   : > { %v2204_v46 = vsub.f32 %v13418_v40, %v2164_v17 }
 0x1d8   : > { %v1844_v0 = vpop.f32.mrf.mxu2 }
 0x1d9   : > { %v1845_v27 = vadd.f32 %v1844_v0, %v1772_v12  ;;  %v2205_v35 = vand.u32 4294901760, %v2204_v46 }
 0x1db   : > { %v13421_v26 = vadd.f32 %v1885_v39, %v1845_v27  ;;  %v2206_v62 = vsub.f32 %v2204_v46, %v2205_v35 }
 0x1dd   : > { %v2162_v45 = vand.u32 4294901760, %v13421_v26  ;;  %v2207_v52 = vand.u32 4294901760, %v2206_v62 }
 0x1df   : > { %2163 = vmatpush.msra.mxu0 %v2162_v45  ;;  %2264 = vmatpush.msra.mxu3 %v2162_v45  ;;  %v2198_v9 = vsub.f32 %v13421_v26, %v2162_v45 }
 0x1e1   : > { %2165 = vmatpush.msra.mxu0 %v2164_v17  ;;  %2234 = vmatpush.msra.mxu2 %v2198_v9  ;;  %v2199_v60 = vand.u32 4294901760, %v2198_v9 }
 0x1e2   : > { %2266 = vmatpush.msra.mxu3 %v2164_v17 }
 0x1e3   : > { %2237 = vmatpush.msra.mxu2 %v2204_v46  ;;  %2297 = vmatpush.msrb.mxu0 %v2199_v60  ;;  %v2200_v58 = vsub.f32 %v2198_v9, %v2199_v60 }
 0x1e5   : > { %2301 = vmatpush.msrb.mxu0 %v2205_v35  ;;  %v2201_v5 = vand.u32 4294901760, %v2200_v58 }
 0x1e7   : > { %2202 = vmatpush.msra.mxu1 %v2201_v5 }
 0x1e9   : > { %2208 = vmatpush.msra.mxu1 %v2207_v52 }
 0x1eb   : > { %2326 = vmatpush.msrb.mxu1 %v2162_v45 }
 0x1ed   : > { %2328 = vmatpush.msrb.mxu1 %v2164_v17 }
 0x1fb   : > { %v2345_v53 = vpop.permute.xlu2 %2344 }
 0x1fc   : > { %v2352_v7 = vsel %vm1888_vm1, %v2345_v53, 0 }
 0x1fd   : > { %v13427_v37 = vand.u32 4294901760, %v2352_v7 }
 0x1ff   : > { %v13430_v11 = vsub.f32 %v2352_v7, %v13427_v37  ;;  %2369 = vmatpush.xpose.msrb.mxu2 %v13427_v37 }
 0x201   : > { %v2405_v6 = vand.u32 4294901760, %v13430_v11 }
 0x203   : > { %v2406_v36 = vsub.f32 %v13430_v11, %v2405_v6  ;;  %v2343_v18 = vpop.permute.xlu2 %2342 }
 0x204   : > { %v2350_v47 = vsel %vm1888_vm1, %v2343_v18, 0 }
 0x205   : > { %v2407_v20 = vand.u32 4294901760, %v2406_v36  ;;  %v13438_v4 = vand.u32 4294901760, %v2350_v47 }
 0x207   : > { %v13441_v16 = vsub.f32 %v2350_v47, %v13438_v4  ;;  %2371 = vmatpush.xpose.msrb.mxu2 %v13438_v4  ;;  %2408 = vmatpush.xpose.msrb.mxu3 %v2407_v20 }
 0x209   : > { %v2411_v3 = vand.u32 4294901760, %v13441_v16 }
 0x20b   : > { %v2412_v24 = vsub.f32 %v13441_v16, %v2411_v3 }
 0x20d   : > { %v2413_v44 = vand.u32 4294901760, %v2412_v24 }
 0x20f   : > { %2414 = vmatpush.xpose.msrb.mxu3 %v2413_v44 }
 0x228   : > { %v1925_v48 = vpop.f32.mrf.mxu0 }
 0x22f   : > { %v2084_v10 = vpop.f32.mrf.mxu3 }
 0x230   : > { %v1933_v30 = vpop.f32.mrf.mxu0 }
 0x231   : > { %v1964_v61 = vpop.f32.mrf.mxu1 }
 0x232   : > { %v1965_v33 = vadd.f32 %v1964_v61, %v1925_v48 }
 0x233   : > { %v2057_v15 = vpop.f32.mrf.mxu2 }
 0x237   : > { %v2088_v2 = vpop.f32.mrf.mxu3 }
 0x238   : > { %v1994_v14 = vpop.f32.mrf.mxu0 }
 0x239   : > { %v1968_v50 = vpop.f32.mrf.mxu1  ;;  %v1995_v34 = vadd.f32 %v1994_v14, %v1965_v33 }
 0x23a   : > { %v1969_v22 = vadd.f32 %v1968_v50, %v1933_v30 }
 0x23b   : > { %v2061_v1 = vpop.f32.mrf.mxu2 }
 0x240   : > { %v1999_v54 = vpop.f32.mrf.mxu0 }
 0x241   : > { %v2024_v38 = vpop.f32.mrf.mxu1  ;;  %v2000_v28 = vadd.f32 %v1999_v54, %v1969_v22 }
 0x242   : > { %v2025_v63 = vadd.f32 %v2024_v38, %v1995_v34 }
 0x244   : > { %v2058_v19 = vadd.f32 %v2057_v15, %v2025_v63 }
 0x246   : > { %v2085_v25 = vadd.f32 %v2084_v10, %v2058_v19 }
 0x248   : > { %v2091_v29 = vsel %vm698_vm2, %v2085_v25, -1e+30 }
 0x249   : > { %v2030_v42 = vpop.f32.mrf.mxu1  ;;  %v2094_v55 = vsel %vm2093_vm3, %v2091_v29, -inf }
 0x24a   : > { %v2031_v59 = vadd.f32 %v2030_v42, %v2000_v28  ;;  %2095 = vmax.xlane.f32.xlu0 %v2094_v55 }
 0x24c   : > { %v2062_v49 = vadd.f32 %v2061_v1, %v2031_v59 }
 0x24e   : > { %v2089_v32 = vadd.f32 %v2088_v2, %v2062_v49 }
 0x250   : > { %v2092_v31 = vsel %vm698_vm2, %v2089_v32, -1e+30 }
 0x251   : > { %v2097_v43 = vsel %vm2093_vm3, %v2092_v31, -inf }
 0x252   : > { %2098 = vmax.xlane.f32.xlu0 %v2097_v43 }
 0x266   : > { %2338 = vrot.lane.b32.xlu0 %v13398_v57, %s12395_s14 }
 0x2bd   : > { %v2096_v12 = vpop.xlane.xlu0 %2095 }
 0x2be   : > { %v2100_v17 = vsub.f32 %v2091_v29, %v2096_v12 }
 0x2c0   : > { %v2102_v0 = vmul.f32 1.442695, %v2100_v17 }
 0x2c2   : > { %12117 = vpow2.f32 %v2102_v0 }
 0x2c5   : > { %v2099_v27 = vpop.xlane.xlu0 %2098 }
 0x2c6   : > { %v2101_v39 = vsub.f32 %v2092_v31, %v2099_v27 }
 0x2c8   : > { %v12118_v46 = vpop.eup %12117  ;;  %v2104_v45 = vmul.f32 1.442695, %v2101_v39 }
 0x2c9   : > { %v2106_v9 = vsel %vm2093_vm3, %v12118_v46, 0.0 }
 0x2ca   : > { %12119 = vpow2.f32 %v2104_v45  ;;  %2107 = vadd.xlane.f32.xlu1 %v2106_v9 }
 0x2d0   : > { %v12120_v35 = vpop.eup %12119 }
 0x2d1   : > { %v2109_v60 = vsel %vm2093_vm3, %v12120_v35, 0.0 }
 0x2d2   : > { %2110 = vadd.xlane.f32.xlu1 %v2109_v60 }
 0x2d8   : > { %v2339_v44 = vpop.permute.xlu0 %2338 }
 0x2d9   : > { %v2346_v33 = vsel %vm1888_vm1, %v2339_v44, 0 }
 0x2da   : > { %v2372_v54 = vand.u32 4294901760, %v2346_v33 }
 0x2dc   : > { %v2373_v59 = vsub.f32 %v2346_v33, %v2372_v54 }
 0x2de   : > { %v2374_v31 = vand.u32 4294901760, %v2373_v59 }
 0x2e0   : > { %v2375_v0 = vsub.f32 %v2373_v59, %v2374_v31 }
 0x2eb   : > { %2340 = vrot.lane.b32.xlu1 %v13404_v41, %s12395_s14 }
 0x33d   : > { %v2108_v58 = vpop.xlane.xlu1 %2107 }
 0x33e   : > { %12121 = vrcp.f32 %v2108_v58  ;;  %v2123_v7 = vand.u32 2147483648, %v2108_v58  ;;  %v2121_v18 = vand.u32 2147483647, %v2108_v58  ;;  %vm2117_vm5 = vweird.f32 %v2108_v58 }
 0x340   : > { %v2124_v24 = vor.u32 1.1754944e-38, %v2123_v7  ;;  %vm2122_vm7 = vcmp.eq.f32.partialorder %v2121_v18, 8.507059e+37 }
 0x344   : > { %v12122_v62 = vpop.eup %12121 }
 0x345   : > { %v2113_v5 = vmul.f32 %v12122_v62, %v2108_v58  ;;  %v2111_v52 = vpop.xlane.xlu1 %2110  ;;  %vm2118_vm4 = vweird.f32 %v12122_v62 }
 0x346   : > { %12123 = vrcp.f32 %v2111_v52  ;;  %vm2119_vm6 = vmor %vm2117_vm5, %vm2118_vm4  ;;  %v2138_v34 = vand.u32 2147483648, %v2111_v52  ;;  %v2136_v38 = vand.u32 2147483647, %v2111_v52  ;;  %vm2132_vm9 = vweird.f32 %v2111_v52 }
 0x347   : > { %v2114_v53 = vsub.f32 1.0, %v2113_v5 }
 0x348   : > { %v2139_v22 = vor.u32 1.1754944e-38, %v2138_v34  ;;  %vm2137_vm11 = vcmp.eq.f32.partialorder %v2136_v38, 8.507059e+37 }
 0x349   : > { %v2115_v36 = vmul.f32 %v12122_v62, %v2114_v53 }
 0x34b   : > { %v2116_v47 = vadd.f32 %v12122_v62, %v2115_v36 }
 0x34c   : > { %v12124_v20 = vpop.eup %12123 }
 0x34d   : > { %v2120_v48 = vsel %vm2119_vm6, %v12122_v62, %v2116_v47  ;;  %v2128_v30 = vmul.f32 %v12124_v20, %v2111_v52  ;;  %vm2133_vm8 = vweird.f32 %v12124_v20 }
 0x34e   : > { %v2125_v61 = vsel %vm2122_vm7, %v2124_v24, %v2120_v48  ;;  %vm2134_vm10 = vmor %vm2132_vm9, %vm2133_vm8 }
 0x34f   : > { %v2129_v50 = vsub.f32 1.0, %v2128_v30  ;;  %v2126_v14 = vmul.f32 %v12118_v46, %v2125_v61  ;;  %v2376_v46 = vand.u32 4294901760, %v2375_v0 }
 0x351   : > { %v2130_v15 = vmul.f32 %v12124_v20, %v2129_v50  ;;  %v2143_v63 = vsel %vm2093_vm3, %v2126_v14, 0 }
 0x352   : > { %v2166_v10 = vand.u32 4294901760, %v2143_v63 }
 0x353   : > { %v2131_v19 = vadd.f32 %v12124_v20, %v2130_v15 }
 0x354   : > { %2210 = vmatmul.f32.vlgmr.msra.gmra.mxu1 %v2166_v10  ;;  %v2167_v25 = vsub.f32 %v2143_v63, %v2166_v10 }
 0x355   : > { %v2135_v28 = vsel %vm2134_vm10, %v12124_v20, %v2131_v19  ;;  %2470 = vmatpush.xpose.msra.mxu1 %v13427_v37 }
 0x356   : > { %v2140_v29 = vsel %vm2137_vm11, %v2139_v22, %v2135_v28  ;;  %2240 = vmatmul.f32.vlgmr.msra.gmra.mxu2 %v2167_v25  ;;  %v2168_v42 = vand.u32 4294901760, %v2167_v25 }
 0x357   : > { %2503 = vmatpush.xpose.msra.mxu2 %v2405_v6  ;;  %v2141_v55 = vmul.f32 %v12120_v35, %v2140_v29 }
 0x358   : > { %2270 = vmatmul.f32.vlgmr.msra.gmra.mxu3 %v2168_v42  ;;  %v2169_v1 = vsub.f32 %v2167_v25, %v2168_v42 }
 0x359   : > { %2472 = vmatpush.xpose.msra.mxu1 %v13438_v4  ;;  %2532 = vmatpush.xpose.msra.mxu3 %v13427_v37  ;;  %v2146_v49 = vsel %vm2093_vm3, %v2141_v55, 0 }
 0x35a   : > { %v2170_v2 = vand.u32 4294901760, %v2169_v1  ;;  %v2174_v32 = vand.u32 4294901760, %v2146_v49 }
 0x35b   : > { %2507 = vmatpush.xpose.msra.mxu2 %v2411_v3 }
 0x35c   : > { %2171 = vmatmul.f32.vlgmr.msra.gmra.mxu0 %v2170_v2  ;;  %2214 = vmatmul.f32.gmra.mxu1 %v2174_v32  ;;  %v2175_v43 = vsub.f32 %v2146_v49, %v2174_v32 }
 0x35d   : > { %2440 = vmatpush.xpose.msra.mxu0 %v13430_v11  ;;  %2534 = vmatpush.xpose.msra.mxu3 %v13438_v4  ;;  %v2341_v6 = vpop.permute.xlu1 %2340 }
 0x35e   : > { %v2348_v12 = vsel %vm1888_vm1, %v2341_v6, 0  ;;  %2245 = vmatmul.f32.gmra.mxu2 %v2175_v43  ;;  %v2176_v37 = vand.u32 4294901760, %v2175_v43 }
 0x35f   : > { %v2380_v17 = vand.u32 4294901760, %v2348_v12 }
 0x360   : > { %2276 = vmatmul.f32.gmra.mxu3 %v2176_v37  ;;  %v2177_v27 = vsub.f32 %v2175_v43, %v2176_v37 }
 0x361   : > { %v2381_v39 = vsub.f32 %v2348_v12, %v2380_v17  ;;  %2443 = vmatpush.xpose.msra.mxu0 %v13441_v16 }
 0x362   : > { %v2178_v3 = vand.u32 4294901760, %v2177_v27 }
 0x363   : > { %v2382_v45 = vand.u32 4294901760, %v2381_v39 }
 0x364   : > { %2179 = vmatmul.f32.gmra.mxu0 %v2178_v3  ;;  %2330 = vmatmul.f32.vlgmr.msrb.gmra.mxu1 %v2166_v10 }
 0x365   : > { %v2383_v11 = vsub.f32 %v2381_v39, %v2382_v45 }
 0x366   : > { %2377 = vmatmul.f32.vlgmr.msrb.gmra.mxu2 %v2376_v46 }
 0x367   : > { %v2384_v4 = vand.u32 4294901760, %v2383_v11 }
 0x368   : > { %2416 = vmatmul.f32.vlgmr.msrb.gmra.mxu3 %v2372_v54 }
 0x36c   : > { %2303 = vmatmul.f32.vlgmr.msrb.gmra.mxu0 %v2166_v10  ;;  %2334 = vmatmul.f32.gmra.mxu1 %v2174_v32 }
 0x36e   : > { %2385 = vmatmul.f32.gmra.mxu2 %v2384_v4 }
 0x370   : > { %2420 = vmatmul.f32.gmra.mxu3 %v2380_v17 }
 0x374   : > { %2307 = vmatmul.f32.gmra.mxu0 %v2174_v32  ;;  %2476 = vmatmul.f32.vlgmr.msra.gmra.mxu1 %v2374_v31 }
 0x376   : > { %2509 = vmatmul.f32.vlgmr.msra.gmra.mxu2 %v2372_v54 }
 0x378   : > { %2536 = vmatmul.f32.vlgmr.msra.gmra.mxu3 %v2372_v54 }
 0x37c   : > { %2446 = vmatmul.f32.vlgmr.msra.gmra.mxu0 %v2373_v59  ;;  %2482 = vmatmul.f32.gmra.mxu1 %v2382_v45 }
 0x37e   : > { %2513 = vmatmul.f32.gmra.mxu2 %v2380_v17 }
 0x380   : > { %2540 = vmatmul.f32.gmra.mxu3 %v2380_v17 }
 0x384   : > { %2451 = vmatmul.f32.gmra.mxu0 %v2381_v39 }
 0x3d1   : > { %v13478_v16 = vpop.f32.mrf.mxu1 }
 0x3d9   : > { %v13480_v9 = vpop.f32.mrf.mxu0  ;;  %v13482_v35 = vpop.f32.mrf.mxu2 }
 0x3da   : > { %v13484_v60 = vpop.f32.mrf.mxu1 }
 0x3db   : > { %v13486_v58 = vpop.f32.mrf.mxu3 }
 0x3e1   : > { %v13488_v62 = vpop.f32.mrf.mxu0  ;;  %v13490_v5 = vpop.f32.mrf.mxu2 }
 0x3e2   : > { %v13494_v53 = vpop.f32.mrf.mxu1 }
 0x3e3   : > { %v13492_v52 = vpop.f32.mrf.mxu3 }
 0x3e9   : > { %v13496_v7 = vpop.f32.mrf.mxu0  ;;  %v2378_v36 = vpop.f32.mrf.mxu2 }
 0x3ea   : > { %v13498_v47 = vpop.f32.mrf.mxu1 }
 0x3eb   : > { %v2417_v18 = vpop.f32.mrf.mxu3 }
 0x3ec   : > { %v2418_v48 = vadd.f32 %v2417_v18, %v2378_v36 }
 0x3f1   : > { %v13500_v20 = vpop.f32.mrf.mxu0  ;;  %v2386_v24 = vpop.f32.mrf.mxu2 }
 0x3f2   : > { %v2477_v30 = vpop.f32.mrf.mxu1 }
 0x3f3   : > { %v2421_v44 = vpop.f32.mrf.mxu3 }
 0x3f4   : > { %v2422_v38 = vadd.f32 %v2421_v44, %v2386_v24 }
 0x3f9   : > { %v2447_v61 = vpop.f32.mrf.mxu0  ;;  %v2510_v14 = vpop.f32.mrf.mxu2 }
 0x3fa   : > { %v2448_v50 = vadd.f32 %v2447_v61, %v2418_v48  ;;  %v2483_v22 = vpop.f32.mrf.mxu1 }
 0x3fb   : > { %v2537_v34 = vpop.f32.mrf.mxu3 }
 0x3fc   : > { %v2478_v33 = vadd.f32 %v2477_v30, %v2448_v50 }
 0x3fe   : > { %v2511_v15 = vadd.f32 %v2510_v14, %v2478_v33 }
 0x400   : > { %v2538_v63 = vadd.f32 %v2537_v34, %v2511_v15 }
 0x401   : > { %v2452_v10 = vpop.f32.mrf.mxu0  ;;  %v2514_v29 = vpop.f32.mrf.mxu2 }
 0x402   : > { %v2453_v19 = vadd.f32 %v2452_v10, %v2422_v38  ;;  %v2544_v54 = vsel %vm698_vm2, %v2538_v63, -1e+30 }
 0x403   : > { %v2546_v25 = vsel %vm2093_vm3, %v2544_v54, -inf  ;;  %v2541_v55 = vpop.f32.mrf.mxu3 }
 0x404   : > { %v2484_v28 = vadd.f32 %v2483_v22, %v2453_v19  ;;  %2547 = vmax.xlane.f32.xlu2 %v2546_v25 }
 0x406   : > { %v2515_v42 = vadd.f32 %v2514_v29, %v2484_v28 }
 0x408   : > { %v2542_v59 = vadd.f32 %v2541_v55, %v2515_v42 }
 0x40a   : > { %v2545_v1 = vsel %vm698_vm2, %v2542_v59, -1e+30 }
 0x40b   : > { %v2549_v49 = vsel %vm2093_vm3, %v2545_v1, -inf }
 0x40c   : > { %2550 = vmax.xlane.f32.xlu0 %v2549_v49 }
 0x420   : > { %2596 = vrot.lane.b32.xlu0 %v13418_v40, %s12395_s14 }
 0x428   : > { %3244 = vrot.lane.b32.xlu0 %v13404_v41, %s12396_s18 }
 0x477   : > { %v2548_v2 = vpop.xlane.xlu2 %2547 }
 0x478   : > { %v2552_v32 = vsub.f32 %v2544_v54, %v2548_v2 }
 0x47a   : > { %v2554_v31 = vmul.f32 1.442695, %v2552_v32 }
 0x47c   : > { %12125 = vpow2.f32 %v2554_v31 }
 0x47f   : > { %v2551_v43 = vpop.xlane.xlu0 %2550 }
 0x480   : > { %v2553_v6 = vsub.f32 %v2545_v1, %v2551_v43 }
 0x482   : > { %v12126_v12 = vpop.eup %12125  ;;  %v2556_v37 = vmul.f32 1.442695, %v2553_v6 }
 0x483   : > { %v2558_v17 = vsel %vm2093_vm3, %v12126_v12, 0.0 }
 0x484   : > { %12127 = vpow2.f32 %v2556_v37  ;;  %2559 = vadd.xlane.f32.xlu1 %v2558_v17 }
 0x48a   : > { %v13513_v0 = vpop.eup %12127 }
 0x48b   : > { %v2561_v27 = vsel %vm2093_vm3, %v13513_v0, 0.0 }
 0x48c   : > { %2562 = vadd.xlane.f32.xlu2 %v2561_v27 }
 0x492   : > { %v2597_v46 = vpop.permute.xlu0 %2596 }
 0x493   : > { %v2624_v36 = vand.u32 4294901760, %v2597_v46 }
 0x495   : > { %v2664_v61 = vsub.f32 %v2597_v46, %v2624_v36 }
 0x497   : > { %v2665_v54 = vand.u32 4294901760, %v2664_v61 }
 0x499   : > { %v2666_v2 = vsub.f32 %v2664_v61, %v2665_v54 }
 0x49b   : > { %v2667_v37 = vand.u32 4294901760, %v2666_v2  ;;  %v758_v2 = vld [vmem:[#allocation5 + $0x10] sm:$0xff] }
 0x49d   : > { %3248 = vrot.lane.b32.xlu1 %v13410_v23, %s12396_s18 }
 0x4a4   : > { %2598 = vrot.lane.b32.xlu2 %v13421_v26, %s12395_s14 }
 0x4ac   : > { %3246 = vrot.lane.b32.xlu2 %v13402_v21, %s12396_s18 }
 0x4b4   : > { %3242 = vrot.lane.b32.xlu2 %v13398_v57, %s12396_s18 }
 0x4f7   : > { %v2560_v39 = vpop.xlane.xlu1 %2559 }
 0x4f8   : > { %12129 = vrcp.f32 %v2560_v39  ;;  %v2575_v18 = vand.u32 2147483648, %v2560_v39  ;;  %v2573_v44 = vand.u32 2147483647, %v2560_v39  ;;  %vm2569_vm13 = vweird.f32 %v2560_v39 }
 0x4fa   : > { %v2576_v50 = vor.u32 1.1754944e-38, %v2575_v18  ;;  %vm2574_vm15 = vcmp.eq.f32.partialorder %v2573_v44, 8.507059e+37  ;;  %v762_v44 = vld [vmem:[#allocation5 + $0x30] sm:$0xff] }
 0x4fe   : > { %v12130_v3 = vpop.eup %12129 }
 0x4ff   : > { %v2565_v45 = vmul.f32 %v12130_v3, %v2560_v39  ;;  %v2563_v11 = vpop.xlane.xlu2 %2562  ;;  %vm2570_vm12 = vweird.f32 %v12130_v3 }
 0x500   : > { %12131 = vrcp.f32 %v2563_v11  ;;  %vm2571_vm14 = vmor %vm2569_vm13, %vm2570_vm12  ;;  %v2590_v25 = vand.u32 2147483648, %v2563_v11  ;;  %v2588_v29 = vand.u32 2147483647, %v2563_v11  ;;  %vm2584_vm4 = vweird.f32 %v2563_v11 }
 0x501   : > { %v2566_v4 = vsub.f32 1.0, %v2565_v45 }
 0x502   : > { %v2591_v32 = vor.u32 1.1754944e-38, %v2590_v25  ;;  %vm2589_vm6 = vcmp.eq.f32.partialorder %v2588_v29, 8.507059e+37 }
 0x503   : > { %v2567_v24 = vmul.f32 %v12130_v3, %v2566_v4 }
 0x505   : > { %v2568_v48 = vadd.f32 %v12130_v3, %v2567_v24 }
 0x506   : > { %v12132_v30 = vpop.eup %12131 }
 0x507   : > { %v2572_v14 = vsel %vm2571_vm14, %v12130_v3, %v2568_v48  ;;  %v2580_v33 = vmul.f32 %v12132_v30, %v2563_v11  ;;  %v2599_v34 = vpop.permute.xlu2 %2598  ;;  %vm2585_vm0 = vweird.f32 %v12132_v30 }
 0x508   : > { %v2577_v15 = vsel %vm2574_vm15, %v2576_v50, %v2572_v14  ;;  %v2622_v38 = vand.u32 4294901760, %v2599_v34  ;;  %vm2586_vm5 = vmor %vm2584_vm4, %vm2585_vm0 }
 0x509   : > { %v2581_v63 = vsub.f32 1.0, %v2580_v33  ;;  %v2578_v10 = vmul.f32 %v12126_v12, %v2577_v15  ;;  %v760_v33 = vld [vmem:[#allocation5 + $0x20] sm:$0xff] }
 0x50a   : > { %v2658_v19 = vsub.f32 %v2599_v34, %v2622_v38  ;;  %2623 = vmatpush.msrb.mxu0 %v2622_v38  ;;  %2724 = vmatpush.msrb.mxu3 %v2622_v38 }
 0x50b   : > { %v2582_v22 = vmul.f32 %v12132_v30, %v2581_v63  ;;  %v2603_v28 = vsel %vm2093_vm3, %v2578_v10, 0  ;;  %v2822_v63 = vand.u32 4294901760, %v760_v33 }
 0x50c   : > { %v2659_v42 = vand.u32 4294901760, %v2658_v19  ;;  %2625 = vmatpush.msrb.mxu0 %v2624_v36  ;;  %2694 = vmatpush.msrb.mxu2 %v2658_v19  ;;  %v2626_v55 = vand.u32 4294901760, %v2603_v28 }
 0x50d   : > { %v2583_v59 = vadd.f32 %v12132_v30, %v2582_v22  ;;  %2726 = vmatpush.msrb.mxu3 %v2624_v36  ;;  %v2872_v22 = vsub.f32 %v760_v33, %v2822_v63 }
 0x50e   : > { %v2660_v1 = vsub.f32 %v2658_v19, %v2659_v42  ;;  %2697 = vmatpush.msrb.mxu2 %v2664_v61  ;;  %2757 = vmatpush.msra.mxu0 %v2659_v42  ;;  %v2627_v49 = vsub.f32 %v2603_v28, %v2626_v55  ;;  %v761_v61 = vld [vmem:[#allocation5 + $0x28] sm:$0xff] }
 0x50f   : > { %v2587_v31 = vsel %vm2586_vm5, %v12132_v30, %v2583_v59  ;;  %v2818_v30 = vand.u32 4294901760, %v762_v44  ;;  %v2820_v14 = vand.u32 4294901760, %v761_v61  ;;  %v2873_v29 = vand.u32 4294901760, %v2872_v22  ;;  %v759_v59 = vld [vmem:[#allocation5 + $0x18] sm:$0xff] }
 0x510   : > { %v2661_v43 = vand.u32 4294901760, %v2660_v1  ;;  %2700 = vmatmul.f32.vlgmr.msrb.gmra.mxu2 %v2627_v49  ;;  %2761 = vmatpush.msra.mxu0 %v2665_v54  ;;  %v2628_v6 = vand.u32 4294901760, %v2627_v49  ;;  %v2592_v12 = vsel %vm2589_vm6, %v2591_v32, %v2587_v31  ;;  %v13528_v1 = vand.u32 4294901760, %v759_v59 }
 0x511   : > { %v2593_v27 = vmul.f32 %v13513_v0, %v2592_v12  ;;  %v763_v0 = vld [vmem:[#allocation5 + $0x38] sm:$0xff]  ;;  %v2860_v50 = vsub.f32 %v762_v44, %v2818_v30  ;;  %v13534_v31 = vand.u32 4294901760, %v758_v2 }
 0x512   : > { %2662 = vmatpush.msrb.mxu1 %v2661_v43  ;;  %2730 = vmatmul.f32.vlgmr.msrb.gmra.mxu3 %v2628_v6  ;;  %v2629_v17 = vsub.f32 %v2627_v49, %v2628_v6  ;;  %v2816_v24 = vand.u32 4294901760, %v763_v0  ;;  %v13532_v32 = vsub.f32 %v759_v59, %v13528_v1  ;;  %v757_v43 = vld [vmem:[#allocation5 + $0x8] sm:$0xff] }
 0x513   : > { %v2606_v3 = vsel %vm2093_vm3, %v2593_v27, 0  ;;  %v2861_v15 = vand.u32 4294901760, %v2860_v50  ;;  %v13538_v12 = vand.u32 4294901760, %v757_v43 }
 0x514   : > { %2668 = vmatpush.msrb.mxu1 %v2667_v37  ;;  %v2630_v39 = vand.u32 4294901760, %v2629_v17  ;;  %v2634_v46 = vand.u32 4294901760, %v2606_v3  ;;  %v2854_v48 = vsub.f32 %v763_v0, %v2816_v24  ;;  %2817 = vmatpush.msra.mxu2 %v2816_v24  ;;  %v3077_v6 = vand.u32 4294901760, %v13532_v32  ;;  %v756_v17 = vld [vmem:[#allocation5] sm:$0xff] }
 0x515   : > { %2670 = vmatmul.f32.vlgmr.msrb.gmra.mxu1 %v2626_v55  ;;  %v2862_v19 = vsub.f32 %v2860_v50, %v2861_v15  ;;  %v13541_v37 = vsub.f32 %v758_v2, %v13534_v31 }
 0x516   : > { %2786 = vmatpush.msra.mxu1 %v2622_v38  ;;  %2631 = vmatmul.f32.vlgmr.msrb.gmra.mxu0 %v2630_v39  ;;  %v2635_v45 = vsub.f32 %v2606_v3, %v2634_v46  ;;  %v2866_v38 = vsub.f32 %v761_v61, %v2820_v14  ;;  %v3078_v27 = vsub.f32 %v13532_v32, %v3077_v6  ;;  %v13548_v3 = vand.u32 4294901760, %v756_v17 }
 0x517   : > { %2900 = vmatpush.msrb.mxu0 %v2854_v48  ;;  %2819 = vmatpush.msra.mxu2 %v2818_v30  ;;  %v2863_v25 = vand.u32 4294901760, %v2862_v19  ;;  %v3083_v39 = vand.u32 4294901760, %v13541_v37  ;;  %v2212_v61 = vadd.f32 %v13478_v16, %v13480_v9  ;;  %v2216_v16 = vadd.f32 %v13484_v60, %v13488_v62 }
 0x518   : > { %2788 = vmatpush.msra.mxu1 %v2624_v36  ;;  %2705 = vmatmul.f32.gmra.mxu2 %v2635_v45  ;;  %v2636_v11 = vand.u32 4294901760, %v2635_v45  ;;  %v2855_v36 = vand.u32 4294901760, %v2854_v48  ;;  %v2867_v54 = vand.u32 4294901760, %v2866_v38 }
 0x519   : > { %2903 = vmatpush.msrb.mxu0 %v2860_v50  ;;  %2821 = vmatpush.msra.mxu2 %v2820_v14 }
 0x51a   : > { %2736 = vmatmul.f32.gmra.mxu3 %v2636_v11  ;;  %v2637_v4 = vsub.f32 %v2635_v45, %v2636_v11  ;;  %2934 = vmatpush.msrb.mxu1 %v2816_v24  ;;  %v2856_v34 = vsub.f32 %v2854_v48, %v2855_v36  ;;  %v2868_v28 = vsub.f32 %v2866_v38, %v2867_v54 }
 0x51b   : > { %2906 = vmatpush.msrb.mxu0 %v2866_v38  ;;  %2823 = vmatpush.msra.mxu2 %v2822_v63 }
 0x51c   : > { %v2638_v18 = vand.u32 4294901760, %v2637_v4  ;;  %2936 = vmatpush.msrb.mxu1 %v2818_v30  ;;  %v2857_v10 = vand.u32 4294901760, %v2856_v34  ;;  %v2869_v42 = vand.u32 4294901760, %v2868_v28  ;;  %v3079_v4 = vand.u32 4294901760, %v3078_v27 }
 0x51d   : > { %2674 = vmatmul.f32.gmra.mxu1 %v2634_v46  ;;  %2909 = vmatpush.msrb.mxu0 %v2872_v22  ;;  %v2242_v34 = vadd.f32 %v13482_v35, %v2212_v61 }
 0x51e   : > { %2639 = vmatmul.f32.gmra.mxu0 %v2638_v18  ;;  %2938 = vmatpush.msrb.mxu1 %v2820_v14  ;;  %v3084_v18 = vsub.f32 %v13541_v37, %v3083_v39 }
 0x51f   : > { %2858 = vmatpush.msra.mxu3 %v2857_v10  ;;  %2969 = vmatpush.msrb.mxu2 %v2855_v36  ;;  %v2272_v10 = vadd.f32 %v13486_v58, %v2242_v34 }
 0x520   : > { %2940 = vmatpush.msrb.mxu1 %v2822_v63  ;;  %v3085_v44 = vand.u32 4294901760, %v3084_v18 }
 0x521   : > { %2864 = vmatpush.msra.mxu3 %v2863_v25  ;;  %2973 = vmatpush.msrb.mxu2 %v2861_v15 }
 0x523   : > { %2870 = vmatpush.msra.mxu3 %v2869_v42  ;;  %2977 = vmatpush.msrb.mxu2 %v2867_v54  ;;  %v2305_v54 = vadd.f32 %v13496_v7, %v2272_v10 }
 0x525   : > { %2790 = vmatmul.f32.vlgmr.msra.gmra.mxu1 %v2626_v55  ;;  %2981 = vmatpush.msrb.mxu2 %v2873_v29  ;;  %v2332_v35 = vadd.f32 %v13494_v53, %v2305_v54 }
 0x526   : > { %2763 = vmatmul.f32.vlgmr.msra.gmra.mxu0 %v2626_v55  ;;  %v2874_v55 = vsub.f32 %v2872_v22, %v2873_v29  ;;  %3080 = vmatpush.msra.mxu1 %v3079_v4  ;;  %v2247_v22 = vadd.f32 %v13490_v5, %v2216_v16  ;;  %v3247_v5 = vpop.permute.xlu2 %3246 }
 0x527   : > { %3039 = vmatpush.msra.mxu0 %v13528_v1  ;;  %v3021_v62 = vsel %vm1888_vm1, %v2332_v35, 0 }
 0x528   : > { %v2875_v49 = vand.u32 4294901760, %v2874_v55  ;;  %3086 = vmatpush.msra.mxu1 %v3085_v44  ;;  %v3249_v55 = vpop.permute.xlu1 %3248  ;;  %v2278_v58 = vadd.f32 %v13492_v52, %v2247_v22  ;;  %v13586_v4 = vand.u32 4294901760, %v3021_v62  ;;  %v3254_v52 = vsel %vm1888_vm1, %v3247_v5, 0 }
 0x529   : > { %3041 = vmatpush.msra.mxu0 %v13534_v31  ;;  %v3256_v60 = vsel %vm1888_vm1, %v3249_v55, 0  ;;  %v3245_v55 = vpop.permute.xlu0 %3244 }
 0x52a   : > { %2876 = vmatpush.msra.mxu3 %v2875_v49  ;;  %v2309_v7 = vadd.f32 %v13500_v20, %v2278_v58  ;;  %v13584_v53 = vand.u32 4294901760, %v3256_v60  ;;  %v13602_v34 = vsub.f32 %v3021_v62, %v13586_v4 }
 0x52b   : > { %3043 = vmatpush.msra.mxu0 %v13538_v12 }
 0x52c   : > { %3004 = vmatpush.msrb.mxu3 %v2816_v24  ;;  %v13559_v24 = vsub.f32 %v756_v17, %v13548_v3  ;;  %v2336_v20 = vadd.f32 %v13498_v47, %v2309_v7 }
 0x52d   : > { %2794 = vmatmul.f32.gmra.mxu1 %v2634_v46  ;;  %3045 = vmatpush.msra.mxu0 %v13548_v3 }
 0x52e   : > { %2767 = vmatmul.f32.gmra.mxu0 %v2634_v46  ;;  %3006 = vmatpush.msrb.mxu3 %v2818_v30  ;;  %v13551_v46 = vsub.f32 %v757_v43, %v13538_v12  ;;  %v3095_v30 = vand.u32 4294901760, %v13559_v24 }
 0x530   : > { %3008 = vmatpush.msrb.mxu3 %v2820_v14  ;;  %v3089_v0 = vand.u32 4294901760, %v13551_v46  ;;  %v3096_v50 = vsub.f32 %v13559_v24, %v3095_v30 }
 0x532   : > { %3010 = vmatpush.msrb.mxu3 %v2822_v63  ;;  %v3090_v48 = vsub.f32 %v13551_v46, %v3089_v0  ;;  %v3097_v14 = vand.u32 4294901760, %v3096_v50  ;;  %v13594_v50 = vsub.f32 %v3256_v60, %v13584_v53 }
 0x534   : > { %v3091_v36 = vand.u32 4294901760, %v3090_v48 }
 0x536   : > { %3092 = vmatpush.msra.mxu1 %v3091_v36 }
 0x538   : > { %3098 = vmatpush.msra.mxu1 %v3097_v14  ;;  %v13596_v14 = vand.u32 4294901760, %v3254_v52 }
 0x53a   : > { %v13612_v16 = vsub.f32 %v3254_v52, %v13596_v14 }
 0x53c   : > { %v3315_v22 = vand.u32 4294901760, %v13612_v16 }
 0x592   : > { %v2671_v45 = vpop.f32.mrf.mxu1 }
 0x593   : > { %v2632_v11 = vpop.f32.mrf.mxu0  ;;  %v2701_v38 = vpop.f32.mrf.mxu2 }
 0x594   : > { %v2672_v15 = vadd.f32 %v2671_v45, %v2632_v11 }
 0x595   : > { %v2731_v19 = vpop.f32.mrf.mxu3 }
 0x596   : > { %v2702_v9 = vadd.f32 %v2701_v38, %v2672_v15  ;;  %v3024_v15 = vsel %vm1888_vm1, %v2336_v20, 0 }
 0x598   : > { %v2732_v25 = vadd.f32 %v2731_v19, %v2702_v9  ;;  %v3048_v9 = vand.u32 4294901760, %v13602_v34  ;;  %v3054_v19 = vand.u32 4294901760, %v3024_v15 }
 0x59a   : > { %v2675_v33 = vpop.f32.mrf.mxu1 }
 0x59b   : > { %v2640_v63 = vpop.f32.mrf.mxu0  ;;  %v2706_v49 = vpop.f32.mrf.mxu2 }
 0x59c   : > { %v2676_v28 = vadd.f32 %v2675_v33, %v2640_v63 }
 0x59d   : > { %v2737_v27 = vpop.f32.mrf.mxu3 }
 0x59e   : > { %v2707_v2 = vadd.f32 %v2706_v49, %v2676_v28  ;;  %v3252_v49 = vsel %vm1888_vm1, %v3245_v55, 0 }
 0x59f   : > { %v3284_v58 = vand.u32 4294901760, %v3252_v49 }
 0x5a0   : > { %v2738_v11 = vadd.f32 %v2737_v27, %v2707_v2 }
 0x5a2   : > { %v2791_v29 = vpop.f32.mrf.mxu1 }
 0x5a3   : > { %v2764_v42 = vpop.f32.mrf.mxu0 }
 0x5a4   : > { %v2765_v59 = vadd.f32 %v2764_v42, %v2732_v25  ;;  %v3055_v25 = vsub.f32 %v3024_v15, %v3054_v19 }
 0x5a6   : > { %v2792_v43 = vadd.f32 %v2791_v29, %v2765_v59  ;;  %v3316_v29 = vsub.f32 %v13612_v16, %v3315_v22 }
 0x5a8   : > { %v2799_v17 = vsel %vm1888_vm1, %v2792_v43, 0  ;;  %v3285_v43 = vsub.f32 %v3252_v49, %v3284_v58 }
 0x5a9   : > { %v13582_v45 = vand.u32 4294901760, %v2799_v17 }
 0x5aa   : > { %v2795_v36 = vpop.f32.mrf.mxu1  ;;  %v3286_v7 = vand.u32 4294901760, %v3285_v43 }
 0x5ab   : > { %v2825_v18 = vsub.f32 %v2799_v17, %v13582_v45  ;;  %v2768_v44 = vpop.f32.mrf.mxu0  ;;  %2878 = vmatmul.f32.vlgmr.msra.gmra.mxu3 %v13582_v45 }
 0x5ac   : > { %v2769_v48 = vadd.f32 %v2768_v44, %v2738_v11  ;;  %3156 = vmatpush.msra.mxu3 %v13528_v1  ;;  %v3287_v5 = vsub.f32 %v3285_v43, %v3286_v7 }
 0x5ad   : > { %v2826_v61 = vand.u32 4294901760, %v2825_v18  ;;  %2912 = vmatmul.f32.vlgmr.msrb.gmra.mxu0 %v2825_v18 }
 0x5ae   : > { %v2796_v33 = vadd.f32 %v2795_v36, %v2769_v48  ;;  %3158 = vmatpush.msra.mxu3 %v13534_v31  ;;  %3191 = vmatpush.msrb.mxu0 %v3077_v6  ;;  %v3309_v6 = vand.u32 4294901760, %v13594_v50  ;;  %v3288_v17 = vand.u32 4294901760, %v3287_v5 }
 0x5af   : > { %2944 = vmatmul.f32.vlgmr.msrb.gmra.mxu1 %v2826_v61  ;;  %v2827_v47 = vsub.f32 %v2825_v18, %v2826_v61 }
 0x5b0   : > { %v2802_v38 = vsel %vm1888_vm1, %v2796_v33, 0  ;;  %3160 = vmatpush.msra.mxu3 %v13538_v12  ;;  %3195 = vmatpush.msrb.mxu0 %v3083_v39  ;;  %v3310_v54 = vsub.f32 %v13594_v50, %v3309_v6 }
 0x5b1   : > { %v2832_v63 = vand.u32 4294901760, %v2802_v38  ;;  %v2828_v10 = vand.u32 4294901760, %v2827_v47  ;;  %3226 = vmatpush.msrb.mxu1 %v13528_v1 }
 0x5b2   : > { %3162 = vmatpush.msra.mxu3 %v13548_v3  ;;  %3199 = vmatpush.msrb.mxu0 %v3089_v0  ;;  %v3049_v0 = vsub.f32 %v13602_v34, %v3048_v9 }
 0x5b3   : > { %2829 = vmatmul.f32.vlgmr.msra.gmra.mxu2 %v2828_v10  ;;  %2882 = vmatmul.f32.gmra.mxu3 %v2832_v63  ;;  %v2833_v39 = vsub.f32 %v2802_v38, %v2832_v63 }
 0x5b4   : > { %3228 = vmatpush.msrb.mxu1 %v13534_v31  ;;  %3122 = vmatpush.msra.mxu2 %v13532_v32  ;;  %v3311_v31 = vand.u32 4294901760, %v3310_v54  ;;  %v3050_v42 = vand.u32 4294901760, %v3049_v0 }
 0x5b5   : > { %2917 = vmatmul.f32.gmra.mxu0 %v2833_v39  ;;  %v2834_v1 = vand.u32 4294901760, %v2833_v39 }
 0x5b6   : > { %3203 = vmatpush.msrb.mxu0 %v3095_v30  ;;  %3230 = vmatpush.msrb.mxu1 %v13538_v12  ;;  %v3056_v12 = vand.u32 4294901760, %v3055_v25 }
 0x5b7   : > { %2950 = vmatmul.f32.gmra.mxu1 %v2834_v1  ;;  %v2835_v28 = vsub.f32 %v2833_v39, %v2834_v1  ;;  %3125 = vmatpush.msra.mxu2 %v13541_v37  ;;  %v3317_v37 = vand.u32 4294901760, %v3316_v29 }
 0x5b8   : > { %3232 = vmatpush.msrb.mxu1 %v13548_v3  ;;  %v3057_v3 = vsub.f32 %v3055_v25, %v3056_v12 }
 0x5b9   : > { %v2836_v32 = vand.u32 4294901760, %v2835_v28  ;;  %3128 = vmatpush.msra.mxu2 %v13551_v46 }
 0x5ba   : > { %v3058_v46 = vand.u32 4294901760, %v3057_v3 }
 0x5bb   : > { %2837 = vmatmul.f32.gmra.mxu2 %v2836_v32  ;;  %3012 = vmatmul.f32.vlgmr.msrb.gmra.mxu3 %v13582_v45 }
 0x5bc   : > { %3312 = vmatpush.xpose.msrb.mxu3 %v3311_v31  ;;  %3131 = vmatpush.msra.mxu2 %v13559_v24  ;;  %v3243_v24 = vpop.permute.xlu2 %3242 }
 0x5bd   : > { %3051 = vmatmul.f32.vlgmr.msra.gmra.mxu0 %v3050_v42  ;;  %v3250_v30 = vsel %vm1888_vm1, %v3243_v24, 0 }
 0x5be   : > { %3344 = vmatpush.xpose.msra.mxu0 %v13594_v50  ;;  %v3276_v35 = vand.u32 4294901760, %v3250_v30 }
 0x5bf   : > { %3100 = vmatmul.f32.vlgmr.msra.gmra.mxu1 %v13586_v4 }
 0x5c0   : > { %3318 = vmatpush.xpose.msrb.mxu3 %v3317_v37  ;;  %3374 = vmatpush.xpose.msra.mxu1 %v13584_v53  ;;  %v3277_v59 = vsub.f32 %v3250_v30, %v3276_v35 }
 0x5c2   : > { %3347 = vmatpush.xpose.msra.mxu0 %v13612_v16  ;;  %v3278_v2 = vand.u32 4294901760, %v3277_v59 }
 0x5c3   : > { %2983 = vmatmul.f32.vlgmr.msrb.gmra.mxu2 %v13582_v45  ;;  %3016 = vmatmul.f32.gmra.mxu3 %v2832_v63 }
 0x5c4   : > { %3273 = vmatpush.xpose.msrb.mxu2 %v13584_v53  ;;  %3376 = vmatpush.xpose.msra.mxu1 %v13596_v14  ;;  %v3279_v60 = vsub.f32 %v3277_v59, %v3278_v2 }
 0x5c5   : > { %3059 = vmatmul.f32.gmra.mxu0 %v3058_v46 }
 0x5c6   : > { %v3280_v62 = vand.u32 4294901760, %v3279_v60 }
 0x5c7   : > { %3104 = vmatmul.f32.gmra.mxu1 %v3054_v19 }
 0x5c8   : > { %3275 = vmatpush.xpose.msrb.mxu2 %v13596_v14 }
 0x5cb   : > { %2987 = vmatmul.f32.gmra.mxu2 %v2832_v63  ;;  %3166 = vmatmul.f32.vlgmr.msra.gmra.mxu3 %v3048_v9 }
 0x5cc   : > { %3436 = vmatpush.xpose.msra.mxu3 %v13584_v53 }
 0x5cd   : > { %3205 = vmatmul.f32.vlgmr.msrb.gmra.mxu0 %v13586_v4 }
 0x5cf   : > { %3234 = vmatmul.f32.vlgmr.msrb.gmra.mxu1 %v13586_v4 }
 0x5d0   : > { %3438 = vmatpush.xpose.msra.mxu3 %v13596_v14 }
 0x5d3   : > { %3134 = vmatmul.f32.vlgmr.msra.gmra.mxu2 %v13602_v34  ;;  %3172 = vmatmul.f32.gmra.mxu3 %v3056_v12 }
 0x5d4   : > { %3407 = vmatpush.xpose.msra.mxu2 %v3309_v6 }
 0x5d5   : > { %3209 = vmatmul.f32.gmra.mxu0 %v3054_v19 }
 0x5d7   : > { %3238 = vmatmul.f32.gmra.mxu1 %v3054_v19 }
 0x5d8   : > { %3411 = vmatpush.xpose.msra.mxu2 %v3315_v22 }
 0x5db   : > { %3139 = vmatmul.f32.gmra.mxu2 %v3055_v25  ;;  %3320 = vmatmul.f32.vlgmr.msrb.gmra.mxu3 %v3276_v35 }
 0x5dd   : > { %3350 = vmatmul.f32.vlgmr.msra.gmra.mxu0 %v3277_v59 }
 0x5df   : > { %3380 = vmatmul.f32.vlgmr.msra.gmra.mxu1 %v3278_v2 }
 0x5e3   : > { %3281 = vmatmul.f32.vlgmr.msrb.gmra.mxu2 %v3280_v62  ;;  %3324 = vmatmul.f32.gmra.mxu3 %v3284_v58 }
 0x5e5   : > { %3355 = vmatmul.f32.gmra.mxu0 %v3285_v43 }
 0x5e7   : > { %3386 = vmatmul.f32.gmra.mxu1 %v3286_v7 }
 0x5eb   : > { %3289 = vmatmul.f32.gmra.mxu2 %v3288_v17  ;;  %3440 = vmatmul.f32.vlgmr.msra.gmra.mxu3 %v3276_v35 }
 0x5f3   : > { %3413 = vmatmul.f32.vlgmr.msra.gmra.mxu2 %v3276_v35  ;;  %3444 = vmatmul.f32.gmra.mxu3 %v3284_v58 }
 0x5fb   : > { %3417 = vmatmul.f32.gmra.mxu2 %v3284_v58 }
 0x62a   : > { %v13649_v45 = vpop.f32.mrf.mxu0 }
 0x62c   : > { %v13651_v53 = vpop.f32.mrf.mxu1 }
 0x62e   : > { %v13647_v27 = vpop.f32.mrf.mxu3 }
 0x632   : > { %v13657_v52 = vpop.f32.mrf.mxu0 }
 0x634   : > { %v13663_v20 = vpop.f32.mrf.mxu1 }
 0x636   : > { %v13653_v11 = vpop.f32.mrf.mxu2  ;;  %v13655_v4 = vpop.f32.mrf.mxu3 }
 0x63a   : > { %v13665_v48 = vpop.f32.mrf.mxu0 }
 0x63c   : > { %v13671_v50 = vpop.f32.mrf.mxu1 }
 0x63e   : > { %v13659_v18 = vpop.f32.mrf.mxu2  ;;  %v13661_v44 = vpop.f32.mrf.mxu3 }
 0x642   : > { %v13677_v34 = vpop.f32.mrf.mxu0 }
 0x644   : > { %v13679_v47 = vpop.f32.mrf.mxu1 }
 0x646   : > { %v13667_v61 = vpop.f32.mrf.mxu2  ;;  %v13669_v36 = vpop.f32.mrf.mxu3 }
 0x64a   : > { %v13685_v63 = vpop.f32.mrf.mxu0 }
 0x64c   : > { %v13687_v10 = vpop.f32.mrf.mxu1 }
 0x64e   : > { %v13673_v14 = vpop.f32.mrf.mxu2  ;;  %v13675_v33 = vpop.f32.mrf.mxu3 }
 0x652   : > { %v13691_v9 = vpop.f32.mrf.mxu0 }
 0x654   : > { %v13693_v39 = vpop.f32.mrf.mxu1 }
 0x656   : > { %v13681_v15 = vpop.f32.mrf.mxu2  ;;  %v13683_v38 = vpop.f32.mrf.mxu3 }
 0x65a   : > { %v3351_v22 = vpop.f32.mrf.mxu0 }
 0x65c   : > { %v3381_v28 = vpop.f32.mrf.mxu1 }
 0x65e   : > { %v13689_v6 = vpop.f32.mrf.mxu2  ;;  %v3321_v16 = vpop.f32.mrf.mxu3 }
 0x662   : > { %v3356_v37 = vpop.f32.mrf.mxu0 }
 0x664   : > { %v3387_v30 = vpop.f32.mrf.mxu1 }
 0x666   : > { %v3282_v19 = vpop.f32.mrf.mxu2  ;;  %v3325_v1 = vpop.f32.mrf.mxu3 }
 0x667   : > { %v3322_v54 = vadd.f32 %v3321_v16, %v3282_v19 }
 0x669   : > { %v3352_v25 = vadd.f32 %v3351_v22, %v3322_v54 }
 0x66b   : > { %v3382_v31 = vadd.f32 %v3381_v28, %v3352_v25 }
 0x66e   : > { %v3290_v0 = vpop.f32.mrf.mxu2  ;;  %v3441_v29 = vpop.f32.mrf.mxu3 }
 0x66f   : > { %v3326_v32 = vadd.f32 %v3325_v1, %v3290_v0 }
 0x671   : > { %v3357_v3 = vadd.f32 %v3356_v37, %v3326_v32 }
 0x673   : > { %v3388_v55 = vadd.f32 %v3387_v30, %v3357_v3 }
 0x676   : > { %v3414_v42 = vpop.f32.mrf.mxu2  ;;  %v3445_v58 = vpop.f32.mrf.mxu3 }
 0x677   : > { %v3415_v12 = vadd.f32 %v3414_v42, %v3382_v31 }
 0x679   : > { %v3442_v46 = vadd.f32 %v3441_v29, %v3415_v12 }
 0x67b   : > { %v3448_v24 = vsel %vm698_vm2, %v3442_v46, -1e+30 }
 0x67c   : > { %v3450_v35 = vsel %vm2093_vm3, %v3448_v24, -inf }
 0x67d   : > { %3451 = vmax.xlane.f32.xlu2 %v3450_v35 }
 0x67e   : > { %v3418_v59 = vpop.f32.mrf.mxu2 }
 0x67f   : > { %v3419_v49 = vadd.f32 %v3418_v59, %v3388_v55 }
 0x681   : > { %v3446_v2 = vadd.f32 %v3445_v58, %v3419_v49 }
 0x683   : > { %v3449_v43 = vsel %vm698_vm2, %v3446_v2, -1e+30 }
 0x684   : > { %v3453_v60 = vsel %vm2093_vm3, %v3449_v43, -inf }
 0x685   : > { %3454 = vmax.xlane.f32.xlu0 %v3453_v60 }
 0x699   : > { %3500 = vrot.lane.b32.xlu0 %v13421_v26, %s12396_s18 }
 0x6a1   : > { %3928 = vrot.lane.b32.xlu0 %v13402_v21, %s12397_s19 }
 0x6a9   : > { %3926 = vrot.lane.b32.xlu0 %v13404_v41, %s12397_s19 }
 0x6f0   : > { %v3452_v62 = vpop.xlane.xlu2 %3451 }
 0x6f1   : > { %v3456_v7 = vsub.f32 %v3448_v24, %v3452_v62 }
 0x6f3   : > { %v3458_v5 = vmul.f32 1.442695, %v3456_v7 }
 0x6f5   : > { %12133 = vpow2.f32 %v3458_v5 }
 0x6f8   : > { %v3455_v17 = vpop.xlane.xlu0 %3454 }
 0x6f9   : > { %v3457_v16 = vsub.f32 %v3449_v43, %v3455_v17  ;;  %v767_v17 = vld [vmem:[#allocation5 + $0x58] sm:$0xff] }
 0x6fb   : > { %v12134_v19 = vpop.eup %12133  ;;  %v3460_v1 = vmul.f32 1.442695, %v3457_v16 }
 0x6fc   : > { %v3462_v54 = vsel %vm2093_vm3, %v12134_v19, 0.0 }
 0x6fd   : > { %12135 = vpow2.f32 %v3460_v1  ;;  %3463 = vadd.xlane.f32.xlu1 %v3462_v54 }
 0x703   : > { %v12136_v22 = vpop.eup %12135 }
 0x704   : > { %v3465_v0 = vsel %vm2093_vm3, %v12136_v22, 0.0 }
 0x705   : > { %3466 = vadd.xlane.f32.xlu2 %v3465_v0 }
 0x70b   : > { %v3501_v21 = vpop.permute.xlu0 %3500 }
 0x70c   : > { %v13709_v25 = vand.u32 4294901760, %v3501_v21 }
 0x70e   : > { %v3560_v41 = vsub.f32 %v3501_v21, %v13709_v25  ;;  %3525 = vmatpush.msrb.mxu0 %v13709_v25  ;;  %3626 = vmatpush.msrb.mxu3 %v13709_v25 }
 0x710   : > { %v3561_v28 = vand.u32 4294901760, %v3560_v41  ;;  %3596 = vmatpush.msrb.mxu2 %v3560_v41 }
 0x712   : > { %v3562_v32 = vsub.f32 %v3560_v41, %v3561_v28  ;;  %v766_v41 = vld [vmem:[#allocation5 + $0x50] sm:$0xff] }
 0x714   : > { %v3563_v31 = vand.u32 4294901760, %v3562_v32 }
 0x716   : > { %3498 = vrot.lane.b32.xlu1 %v13418_v40, %s12396_s18  ;;  %3564 = vmatpush.msrb.mxu1 %v3563_v31 }
 0x71d   : > { %3930 = vrot.lane.b32.xlu2 %v13410_v23, %s12397_s19 }
 0x71e   : > { %3924 = vrot.lane.b32.xlu1 %v13398_v57, %s12397_s19 }
 0x770   : > { %v3464_v29 = vpop.xlane.xlu1 %3463 }
 0x771   : > { %12137 = vrcp.f32 %v3464_v29  ;;  %v3479_v46 = vand.u32 2147483648, %v3464_v29  ;;  %v3477_v30 = vand.u32 2147483647, %v3464_v29  ;;  %vm3473_vm8 = vweird.f32 %v3464_v29 }
 0x773   : > { %v3480_v59 = vor.u32 1.1754944e-38, %v3479_v46  ;;  %vm3478_vm10 = vcmp.eq.f32.partialorder %v3477_v30, 8.507059e+37 }
 0x777   : > { %v12138_v42 = vpop.eup %12137 }
 0x778   : > { %v3469_v12 = vmul.f32 %v12138_v42, %v3464_v29  ;;  %v3467_v37 = vpop.xlane.xlu2 %3466  ;;  %vm3474_vm7 = vweird.f32 %v12138_v42 }
 0x779   : > { %12139 = vrcp.f32 %v3467_v37  ;;  %vm3475_vm9 = vmor %vm3473_vm8, %vm3474_vm7  ;;  %v3494_v43 = vand.u32 2147483648, %v3467_v37  ;;  %v3492_v7 = vand.u32 2147483647, %v3467_v37  ;;  %vm3488_vm12 = vweird.f32 %v3467_v37 }
 0x77a   : > { %v3470_v3 = vsub.f32 1.0, %v3469_v12  ;;  %v765_v12 = vld [vmem:[#allocation5 + $0x48] sm:$0xff] }
 0x77b   : > { %v3495_v54 = vor.u32 1.1754944e-38, %v3494_v43  ;;  %vm3493_vm14 = vcmp.eq.f32.partialorder %v3492_v7, 8.507059e+37 }
 0x77c   : > { %v3471_v24 = vmul.f32 %v12138_v42, %v3470_v3 }
 0x77e   : > { %v3472_v35 = vadd.f32 %v12138_v42, %v3471_v24 }
 0x77f   : > { %v12140_v55 = vpop.eup %12139 }
 0x780   : > { %v3476_v23 = vsel %vm3475_vm9, %v12138_v42, %v3472_v35  ;;  %v3484_v49 = vmul.f32 %v12140_v55, %v3467_v37  ;;  %vm3489_vm11 = vweird.f32 %v12140_v55  ;;  %v13726_v37 = vand.u32 4294901760, %v766_v41  ;;  %v3931_v35 = vpop.permute.xlu2 %3930 }
 0x781   : > { %v3481_v57 = vsel %vm3478_vm10, %v3480_v59, %v3476_v23  ;;  %vm3490_vm13 = vmor %vm3488_vm12, %vm3489_vm11 }
 0x782   : > { %v3482_v58 = vmul.f32 %v12134_v19, %v3481_v57  ;;  %v3485_v2 = vsub.f32 1.0, %v3484_v49  ;;  %v13724_v19 = vand.u32 4294901760, %v767_v17  ;;  %v764_v49 = vld [vmem:[#allocation5 + $0x40] sm:$0xff] }
 0x783   : > { %v13737_v43 = vand.u32 4294901760, %v764_v49 }
 0x784   : > { %v3505_v60 = vsel %vm2093_vm3, %v3482_v58, 0  ;;  %v3486_v62 = vmul.f32 %v12140_v55, %v3485_v2  ;;  %v13730_v30 = vsub.f32 %v767_v17, %v13724_v19  ;;  %v3762_v2 = vsub.f32 %v766_v41, %v13726_v37 }
 0x785   : > { %v13721_v5 = vand.u32 4294901760, %v3505_v60 }
 0x786   : > { %v3487_v16 = vadd.f32 %v12140_v55, %v3486_v62 }
 0x787   : > { %v3529_v1 = vsub.f32 %v3505_v60, %v13721_v5  ;;  %v3929_v60 = vpop.permute.xlu0 %3928 }
 0x788   : > { %v3491_v0 = vsel %vm3490_vm13, %v12140_v55, %v3487_v16  ;;  %v3499_v21 = vpop.permute.xlu1 %3498 }
 0x789   : > { %v3496_v32 = vsel %vm3493_vm14, %v3495_v54, %v3491_v0  ;;  %v3526_v31 = vand.u32 4294901760, %v3499_v21  ;;  %v3530_v29 = vand.u32 4294901760, %v3529_v1  ;;  %v3936_v54 = vsel %vm1888_vm1, %v3929_v60, 0 }
 0x78a   : > { %v3497_v42 = vmul.f32 %v12136_v22, %v3496_v32  ;;  %v13732_v22 = vand.u32 4294901760, %v765_v12  ;;  %v3774_v0 = vsub.f32 %v764_v49, %v13737_v43  ;;  %v13748_v41 = vand.u32 4294901760, %v3936_v54 }
 0x78b   : > { %v3566_v3 = vsub.f32 %v3499_v21, %v3526_v31  ;;  %3527 = vmatpush.msrb.mxu0 %v3526_v31  ;;  %3628 = vmatpush.msrb.mxu3 %v3526_v31  ;;  %v3531_v46 = vsub.f32 %v3529_v1, %v3530_v29 }
 0x78c   : > { %3632 = vmatmul.f32.vlgmr.msrb.gmra.mxu3 %v3530_v29  ;;  %v3508_v24 = vsel %vm2093_vm3, %v3497_v42, 0  ;;  %v3768_v17 = vsub.f32 %v765_v12, %v13732_v22  ;;  %v13757_v29 = vsub.f32 %v3936_v54, %v13748_v41  ;;  %v3775_v60 = vand.u32 4294901760, %v3774_v0 }
 0x78d   : > { %3659 = vmatpush.msra.mxu0 %v3561_v28  ;;  %3599 = vmatpush.msrb.mxu2 %v3566_v3  ;;  %v3532_v55 = vand.u32 4294901760, %v3531_v46  ;;  %v3567_v59 = vand.u32 4294901760, %v3566_v3  ;;  %v3536_v23 = vand.u32 4294901760, %v3508_v24  ;;  %v3938_v28 = vsel %vm1888_vm1, %v3931_v35, 0 }
 0x78e   : > { %3602 = vmatmul.f32.vlgmr.msrb.gmra.mxu2 %v3529_v1  ;;  %v13742_v16 = vand.u32 4294901760, %v3938_v28 }
 0x78f   : > { %3533 = vmatmul.f32.vlgmr.msrb.gmra.mxu0 %v3532_v55  ;;  %v3568_v57 = vsub.f32 %v3566_v3, %v3567_v59  ;;  %v3537_v58 = vsub.f32 %v3508_v24, %v3536_v23  ;;  %3719 = vmatpush.msra.mxu2 %v13724_v19  ;;  %v3757_v24 = vand.u32 4294901760, %v13730_v30  ;;  %v3763_v55 = vand.u32 4294901760, %v3762_v2 }
 0x790   : > { %3663 = vmatpush.msra.mxu0 %v3567_v59  ;;  %v13751_v32 = vsub.f32 %v3938_v28, %v13742_v16 }
 0x791   : > { %v3569_v62 = vand.u32 4294901760, %v3568_v57  ;;  %v3538_v7 = vand.u32 4294901760, %v3537_v58  ;;  %3721 = vmatpush.msra.mxu2 %v13726_v37  ;;  %v3758_v35 = vsub.f32 %v13730_v30, %v3757_v24  ;;  %v3764_v49 = vsub.f32 %v3762_v2, %v3763_v55 }
 0x792   : > { %3802 = vmatpush.msrb.mxu0 %v13730_v30  ;;  %v3769_v57 = vand.u32 4294901760, %v3768_v17 }
 0x793   : > { %3570 = vmatpush.msrb.mxu1 %v3569_v62  ;;  %v3539_v1 = vsub.f32 %v3537_v58, %v3538_v7  ;;  %3723 = vmatpush.msra.mxu2 %v13732_v22  ;;  %v3759_v59 = vand.u32 4294901760, %v3758_v35  ;;  %v3776_v62 = vsub.f32 %v3774_v0, %v3775_v60 }
 0x794   : > { %3805 = vmatpush.msrb.mxu0 %v3762_v2  ;;  %3572 = vmatmul.f32.vlgmr.msrb.gmra.mxu1 %v13721_v5  ;;  %v3770_v28 = vsub.f32 %v3768_v17, %v3769_v57 }
 0x795   : > { %3638 = vmatmul.f32.gmra.mxu3 %v3538_v7  ;;  %3688 = vmatpush.msra.mxu1 %v13709_v25  ;;  %v3540_v21 = vand.u32 4294901760, %v3539_v1  ;;  %v3991_v25 = vand.u32 4294901760, %v13751_v32 }
 0x796   : > { %3808 = vmatpush.msrb.mxu0 %v3768_v17  ;;  %3607 = vmatmul.f32.gmra.mxu2 %v3537_v58  ;;  %v3765_v58 = vand.u32 4294901760, %v3764_v49 }
 0x797   : > { %3690 = vmatpush.msra.mxu1 %v3526_v31  ;;  %3541 = vmatmul.f32.gmra.mxu0 %v3540_v21  ;;  %v3997_v31 = vand.u32 4294901760, %v13757_v29  ;;  %v3992_v42 = vsub.f32 %v13751_v32, %v3991_v25 }
 0x798   : > { %3811 = vmatpush.msrb.mxu0 %v3774_v0  ;;  %3725 = vmatpush.msra.mxu2 %v13737_v43 }
 0x799   : > { %3836 = vmatpush.msrb.mxu1 %v13724_v19  ;;  %v3993_v12 = vand.u32 4294901760, %v3992_v42  ;;  %v3998_v3 = vsub.f32 %v13757_v29, %v3997_v31  ;;  %3760 = vmatpush.msra.mxu3 %v3759_v59 }
 0x79a   : > { %3871 = vmatpush.msrb.mxu2 %v3757_v24 }
 0x79b   : > { %3838 = vmatpush.msrb.mxu1 %v13726_v37  ;;  %v3999_v46 = vand.u32 4294901760, %v3998_v3  ;;  %3766 = vmatpush.msra.mxu3 %v3765_v58 }
 0x79c   : > { %3576 = vmatmul.f32.gmra.mxu1 %v3536_v23  ;;  %3875 = vmatpush.msrb.mxu2 %v3763_v55 }
 0x79d   : > { %3840 = vmatpush.msrb.mxu1 %v13732_v22 }
 0x79e   : > { %3879 = vmatpush.msrb.mxu2 %v3769_v57 }
 0x79f   : > { %3665 = vmatmul.f32.vlgmr.msra.gmra.mxu0 %v13721_v5  ;;  %3842 = vmatpush.msrb.mxu1 %v13737_v43 }
 0x7a0   : > { %3955 = vmatpush.xpose.msra.mxu0 %v13742_v16  ;;  %3883 = vmatpush.msrb.mxu2 %v3775_v60 }
 0x7a4   : > { %3957 = vmatpush.xpose.msra.mxu0 %v13748_v41  ;;  %3692 = vmatmul.f32.vlgmr.msra.gmra.mxu1 %v13721_v5  ;;  %v3771_v5 = vand.u32 4294901760, %v3770_v28 }
 0x7a5   : > { %3994 = vmatpush.xpose.msra.mxu1 %v3993_v12 }
 0x7a6   : > { %3772 = vmatpush.msra.mxu3 %v3771_v5 }
 0x7a7   : > { %3669 = vmatmul.f32.gmra.mxu0 %v3536_v23 }
 0x7a9   : > { %4000 = vmatpush.xpose.msra.mxu1 %v3999_v46  ;;  %v3925_v46 = vpop.permute.xlu1 %3924 }
 0x7ac   : > { %3696 = vmatmul.f32.gmra.mxu1 %v3536_v23  ;;  %v3777_v23 = vand.u32 4294901760, %v3776_v62  ;;  %v3927_v62 = vpop.permute.xlu0 %3926 }
 0x7ae   : > { %3778 = vmatpush.msra.mxu3 %v3777_v23 }
 0x7b0   : > { %3906 = vmatpush.msrb.mxu3 %v13724_v19 }
 0x7b2   : > { %3908 = vmatpush.msrb.mxu3 %v13726_v37 }
 0x7b4   : > { %3910 = vmatpush.msrb.mxu3 %v13732_v22  ;;  %v3932_v22 = vsel %vm1888_vm1, %v3925_v46, 0 }
 0x7b5   : > { %v3958_v28 = vand.u32 4294901760, %v3932_v22 }
 0x7b6   : > { %3912 = vmatpush.msrb.mxu3 %v13737_v43 }
 0x80c   : > { %v3534_v30 = vpop.f32.mrf.mxu0 }
 0x80f   : > { %v3633_v0 = vpop.f32.mrf.mxu3 }
 0x811   : > { %v3573_v2 = vpop.f32.mrf.mxu1  ;;  %v3603_v1 = vpop.f32.mrf.mxu2 }
 0x812   : > { %v3574_v17 = vadd.f32 %v3573_v2, %v3534_v30 }
 0x814   : > { %v3542_v7 = vpop.f32.mrf.mxu0  ;;  %v3604_v21 = vadd.f32 %v3603_v1, %v3574_v17  ;;  %v3934_v1 = vsel %vm1888_vm1, %v3927_v62, 0 }
 0x816   : > { %v3634_v3 = vadd.f32 %v3633_v0, %v3604_v21 }
 0x818   : > { %v3639_v59 = vpop.f32.mrf.mxu3 }
 0x819   : > { %v3577_v54 = vpop.f32.mrf.mxu1  ;;  %v3608_v19 = vpop.f32.mrf.mxu2 }
 0x81a   : > { %v3578_v12 = vadd.f32 %v3577_v54, %v3542_v7  ;;  %v3959_v7 = vsub.f32 %v3932_v22, %v3958_v28 }
 0x81c   : > { %v3666_v42 = vpop.f32.mrf.mxu0  ;;  %v3609_v37 = vadd.f32 %v3608_v19, %v3578_v12  ;;  %v3960_v12 = vand.u32 4294901760, %v3959_v7 }
 0x81d   : > { %v3667_v24 = vadd.f32 %v3666_v42, %v3634_v3  ;;  %v3966_v42 = vand.u32 4294901760, %v3934_v1 }
 0x81e   : > { %v3640_v58 = vadd.f32 %v3639_v59, %v3609_v37 }
 0x81f   : > { %v3967_v46 = vsub.f32 %v3934_v1, %v3966_v42 }
 0x821   : > { %v3693_v35 = vpop.f32.mrf.mxu1 }
 0x822   : > { %v3694_v55 = vadd.f32 %v3693_v35, %v3667_v24  ;;  %v3961_v24 = vsub.f32 %v3959_v7, %v3960_v12  ;;  %v3968_v35 = vand.u32 4294901760, %v3967_v46 }
 0x824   : > { %v3701_v43 = vsel %vm1888_vm1, %v3694_v55, 0  ;;  %v3670_v57 = vpop.f32.mrf.mxu0  ;;  %v3969_v37 = vsub.f32 %v3967_v46, %v3968_v35 }
 0x825   : > { %v3726_v49 = vand.u32 4294901760, %v3701_v43  ;;  %v3671_v5 = vadd.f32 %v3670_v57, %v3640_v58 }
 0x827   : > { %v3727_v60 = vsub.f32 %v3701_v43, %v3726_v49  ;;  %3780 = vmatmul.f32.vlgmr.msra.gmra.mxu3 %v3726_v49 }
 0x828   : > { %4056 = vmatpush.xpose.msra.mxu3 %v13742_v16 }
 0x829   : > { %v3728_v23 = vand.u32 4294901760, %v3727_v60  ;;  %v3697_v30 = vpop.f32.mrf.mxu1  ;;  %3814 = vmatmul.f32.vlgmr.msrb.gmra.mxu0 %v3727_v60 }
 0x82a   : > { %v3698_v2 = vadd.f32 %v3697_v30, %v3671_v5  ;;  %4089 = vmatpush.xpose.msrb.mxu0 %v3991_v25 }
 0x82b   : > { %v3729_v17 = vsub.f32 %v3727_v60, %v3728_v23  ;;  %3846 = vmatmul.f32.vlgmr.msrb.gmra.mxu1 %v3728_v23 }
 0x82c   : > { %v3704_v54 = vsel %vm1888_vm1, %v3698_v2, 0  ;;  %4058 = vmatpush.xpose.msra.mxu3 %v13748_v41  ;;  %4118 = vmatpush.xpose.msrb.mxu1 %v13742_v16 }
 0x82d   : > { %v3730_v21 = vand.u32 4294901760, %v3729_v17  ;;  %v3734_v0 = vand.u32 4294901760, %v3704_v54 }
 0x82e   : > { %4093 = vmatpush.xpose.msrb.mxu0 %v3997_v31  ;;  %v3962_v31 = vand.u32 4294901760, %v3961_v24 }
 0x82f   : > { %3731 = vmatmul.f32.vlgmr.msra.gmra.mxu2 %v3730_v21  ;;  %3784 = vmatmul.f32.gmra.mxu3 %v3734_v0  ;;  %v3735_v25 = vsub.f32 %v3704_v54, %v3734_v0 }
 0x830   : > { %4026 = vmatpush.xpose.msra.mxu2 %v13751_v32  ;;  %4120 = vmatpush.xpose.msrb.mxu1 %v13748_v41  ;;  %v3970_v32 = vand.u32 4294901760, %v3969_v37 }
 0x831   : > { %3819 = vmatmul.f32.gmra.mxu0 %v3735_v25  ;;  %v3736_v3 = vand.u32 4294901760, %v3735_v25 }
 0x833   : > { %3852 = vmatmul.f32.gmra.mxu1 %v3736_v3  ;;  %v3737_v16 = vsub.f32 %v3735_v25, %v3736_v3 }
 0x834   : > { %4029 = vmatpush.xpose.msra.mxu2 %v13757_v29 }
 0x835   : > { %v3738_v19 = vand.u32 4294901760, %v3737_v16 }
 0x837   : > { %3739 = vmatmul.f32.gmra.mxu2 %v3738_v19  ;;  %3914 = vmatmul.f32.vlgmr.msrb.gmra.mxu3 %v3726_v49 }
 0x839   : > { %3963 = vmatmul.f32.vlgmr.msra.gmra.mxu0 %v3962_v31 }
 0x83b   : > { %4002 = vmatmul.f32.vlgmr.msra.gmra.mxu1 %v3958_v28 }
 0x83f   : > { %3885 = vmatmul.f32.vlgmr.msrb.gmra.mxu2 %v3726_v49  ;;  %3918 = vmatmul.f32.gmra.mxu3 %v3734_v0 }
 0x841   : > { %3971 = vmatmul.f32.gmra.mxu0 %v3970_v32 }
 0x843   : > { %4006 = vmatmul.f32.gmra.mxu1 %v3966_v42 }
 0x847   : > { %3889 = vmatmul.f32.gmra.mxu2 %v3734_v0  ;;  %4062 = vmatmul.f32.vlgmr.msra.gmra.mxu3 %v3960_v12 }
 0x849   : > { %4095 = vmatmul.f32.vlgmr.msrb.gmra.mxu0 %v3958_v28 }
 0x84b   : > { %4122 = vmatmul.f32.vlgmr.msrb.gmra.mxu1 %v3958_v28 }
 0x84f   : > { %4032 = vmatmul.f32.vlgmr.msra.gmra.mxu2 %v3959_v7  ;;  %4068 = vmatmul.f32.gmra.mxu3 %v3968_v35 }
 0x851   : > { %4099 = vmatmul.f32.gmra.mxu0 %v3966_v42 }
 0x853   : > { %4126 = vmatmul.f32.gmra.mxu1 %v3966_v42 }
 0x857   : > { %4037 = vmatmul.f32.gmra.mxu2 %v3967_v46 }
 0x8a6   : > { %v13796_v29 = vpop.f32.mrf.mxu0 }
 0x8a8   : > { %v13798_v55 = vpop.f32.mrf.mxu1 }
 0x8aa   : > { %v13794_v41 = vpop.f32.mrf.mxu3 }
 0x8ae   : > { %v13804_v59 = vpop.f32.mrf.mxu0 }
 0x8b0   : > { %v13806_v49 = vpop.f32.mrf.mxu1 }
 0x8b2   : > { %v13800_v22 = vpop.f32.mrf.mxu2  ;;  %v13802_v43 = vpop.f32.mrf.mxu3 }
 0x8b6   : > { %v3964_v28 = vpop.f32.mrf.mxu0 }
 0x8b8   : > { %v4003_v60 = vpop.f32.mrf.mxu1 }
 0x8b9   : > { %v4004_v7 = vadd.f32 %v4003_v60, %v3964_v28 }
 0x8ba   : > { %v13808_v57 = vpop.f32.mrf.mxu2  ;;  %v13810_v58 = vpop.f32.mrf.mxu3 }
 0x8be   : > { %v3972_v23 = vpop.f32.mrf.mxu0 }
 0x8c0   : > { %v4007_v2 = vpop.f32.mrf.mxu1 }
 0x8c1   : > { %v4008_v25 = vadd.f32 %v4007_v2, %v3972_v23 }
 0x8c2   : > { %v13812_v5 = vpop.f32.mrf.mxu2  ;;  %v13814_v62 = vpop.f32.mrf.mxu3 }
 0x8c6   : > { %v4096_v21 = vpop.f32.mrf.mxu0 }
 0x8c8   : > { %v4123_v42 = vpop.f32.mrf.mxu1 }
 0x8ca   : > { %v13816_v30 = vpop.f32.mrf.mxu2  ;;  %v4063_v17 = vpop.f32.mrf.mxu3 }
 0x8ce   : > { %v4100_v37 = vpop.f32.mrf.mxu0 }
 0x8d0   : > { %v4127_v28 = vpop.f32.mrf.mxu1 }
 0x8d2   : > { %v4033_v1 = vpop.f32.mrf.mxu2  ;;  %v4069_v19 = vpop.f32.mrf.mxu3 }
 0x8d3   : > { %v4034_v54 = vadd.f32 %v4033_v1, %v4004_v7 }
 0x8d5   : > { %v4064_v0 = vadd.f32 %v4063_v17, %v4034_v54 }
 0x8d7   : > { %v4097_v12 = vadd.f32 %v4096_v21, %v4064_v0 }
 0x8d9   : > { %v4124_v3 = vadd.f32 %v4123_v42, %v4097_v12 }
 0x8da   : > { %v4038_v46 = vpop.f32.mrf.mxu2 }
 0x8db   : > { %v4039_v24 = vadd.f32 %v4038_v46, %v4008_v25  ;;  %v4130_v16 = vsel %vm698_vm2, %v4124_v3, -1e+30 }
 0x8dc   : > { %v4132_v35 = vsel %vm2093_vm3, %v4130_v16, -inf }
 0x8dd   : > { %v4070_v31 = vadd.f32 %v4069_v19, %v4039_v24  ;;  %4133 = vmax.xlane.f32.xlu2 %v4132_v35 }
 0x8df   : > { %v4101_v32 = vadd.f32 %v4100_v37, %v4070_v31 }
 0x8e1   : > { %v4128_v60 = vadd.f32 %v4127_v28, %v4101_v32 }
 0x8e3   : > { %v4131_v7 = vsel %vm698_vm2, %v4128_v60, -1e+30 }
 0x8e4   : > { %v4135_v23 = vsel %vm2093_vm3, %v4131_v7, -inf }
 0x8e5   : > { %4136 = vmax.xlane.f32.xlu1 %v4135_v23 }
 0x8fe   : > { %4182 = vrot.lane.b32.xlu1 %v13421_v26, %s12397_s19 }
 0x950   : > { %v4134_v2 = vpop.xlane.xlu2 %4133 }
 0x951   : > { %v4138_v17 = vsub.f32 %v4130_v16, %v4134_v2 }
 0x953   : > { %v4140_v1 = vmul.f32 1.442695, %v4138_v17 }
 0x955   : > { %12141 = vpow2.f32 %v4140_v1 }
 0x958   : > { %v4137_v54 = vpop.xlane.xlu1 %4136 }
 0x959   : > { %v4139_v21 = vsub.f32 %v4131_v7, %v4137_v54 }
 0x95b   : > { %v12142_v0 = vpop.eup %12141  ;;  %v4142_v42 = vmul.f32 1.442695, %v4139_v21 }
 0x95c   : > { %v4144_v12 = vsel %vm2093_vm3, %v12142_v0, 0.0 }
 0x95d   : > { %12143 = vpow2.f32 %v4142_v42  ;;  %4145 = vadd.xlane.f32.xlu0 %v4144_v12 }
 0x963   : > { %v12144_v25 = vpop.eup %12143 }
 0x964   : > { %v4147_v3 = vsel %vm2093_vm3, %v12144_v25, 0.0 }
 0x965   : > { %4148 = vadd.xlane.f32.xlu2 %v4147_v3 }
 0x970   : > { %v4183_v46 = vpop.permute.xlu1 %4182 }
 0x971   : > { %v13828_v24 = vand.u32 4294901760, %v4183_v46  ;;  %4180 = vrot.lane.b32.xlu0 %v13418_v40, %s12397_s19 }
 0x973   : > { %v4242_v26 = vsub.f32 %v4183_v46, %v13828_v24  ;;  %4207 = vmatpush.msrb.mxu2 %v13828_v24  ;;  %4308 = vmatpush.msra.mxu1 %v13828_v24 }
 0x975   : > { %v4243_v16 = vand.u32 4294901760, %v4242_v26  ;;  %4278 = vmatpush.msra.mxu0 %v4242_v26 }
 0x977   : > { %v4244_v19 = vsub.f32 %v4242_v26, %v4243_v16 }
 0x979   : > { %v4245_v35 = vand.u32 4294901760, %v4244_v19 }
 0x97b   : > { %4246 = vmatpush.msrb.mxu3 %v4245_v35 }
 0x9d0   : > { %v4146_v31 = vpop.xlane.xlu0 %4145 }
 0x9d1   : > { %12145 = vrcp.f32 %v4146_v31  ;;  %v4161_v7 = vand.u32 2147483648, %v4146_v31  ;;  %v4159_v23 = vand.u32 2147483647, %v4146_v31  ;;  %vm4155_vm0 = vweird.f32 %v4146_v31 }
 0x9d3   : > { %v4162_v1 = vor.u32 1.1754944e-38, %v4161_v7  ;;  %vm4160_vm5 = vcmp.eq.f32.partialorder %v4159_v23, 8.507059e+37 }
 0x9d7   : > { %v12146_v37 = vpop.eup %12145 }
 0x9d8   : > { %v4151_v32 = vmul.f32 %v12146_v37, %v4146_v31  ;;  %v4149_v28 = vpop.xlane.xlu2 %4148  ;;  %vm4156_vm15 = vweird.f32 %v12146_v37 }
 0x9d9   : > { %12147 = vrcp.f32 %v4149_v28  ;;  %vm4157_vm4 = vmor %vm4155_vm0, %vm4156_vm15  ;;  %v4174_v46 = vand.u32 2147483647, %v4149_v28  ;;  %v4176_v26 = vand.u32 2147483648, %v4149_v28  ;;  %vm4170_vm7 = vweird.f32 %v4149_v28 }
 0x9da   : > { %v4152_v60 = vsub.f32 1.0, %v4151_v32 }
 0x9db   : > { %vm4175_vm9 = vcmp.eq.f32.partialorder %v4174_v46, 8.507059e+37 }
 0x9dc   : > { %v4153_v40 = vmul.f32 %v12146_v37, %v4152_v60 }
 0x9de   : > { %v4154_v2 = vadd.f32 %v12146_v37, %v4153_v40 }
 0x9df   : > { %v12148_v17 = vpop.eup %12147 }
 0x9e0   : > { %v4158_v54 = vsel %vm4157_vm4, %v12146_v37, %v4154_v2  ;;  %v4166_v21 = vmul.f32 %v12148_v17, %v4149_v28  ;;  %vm4171_vm6 = vweird.f32 %v12148_v17  ;;  %v4177_v37 = vor.u32 1.1754944e-38, %v4176_v26 }
 0x9e1   : > { %v4163_v42 = vsel %vm4160_vm5, %v4162_v1, %v4158_v54  ;;  %vm4172_vm8 = vmor %vm4170_vm7, %vm4171_vm6 }
 0x9e2   : > { %v4164_v12 = vmul.f32 %v12142_v0, %v4163_v42  ;;  %v4167_v3 = vsub.f32 1.0, %v4166_v21 }
 0x9e3   : > { %v4181_v19 = vpop.permute.xlu0 %4180 }
 0x9e4   : > { %v4168_v35 = vmul.f32 %v12148_v17, %v4167_v3  ;;  %v4208_v32 = vand.u32 4294901760, %v4181_v19  ;;  %v4187_v60 = vsel %vm2093_vm3, %v4164_v12, 0 }
 0x9e5   : > { %v4210_v13 = vand.u32 4294901760, %v4187_v60 }
 0x9e6   : > { %v4169_v40 = vadd.f32 %v12148_v17, %v4168_v35  ;;  %v4248_v31 = vsub.f32 %v4181_v19, %v4208_v32  ;;  %4209 = vmatpush.msrb.mxu2 %v4208_v32  ;;  %4310 = vmatpush.msra.mxu1 %v4208_v32 }
 0x9e7   : > { %v4211_v7 = vsub.f32 %v4187_v60, %v4210_v13  ;;  %v770_v60 = vld [vmem:[#allocation5 + $0x70] sm:$0xff] }
 0x9e8   : > { %4341 = vmatpush.msra.mxu2 %v4243_v16  ;;  %4281 = vmatpush.msra.mxu0 %v4248_v31  ;;  %v4249_v0 = vand.u32 4294901760, %v4248_v31  ;;  %v4173_v23 = vsel %vm4172_vm8, %v12148_v17, %v4169_v40 }
 0x9e9   : > { %4284 = vmatmul.f32.vlgmr.msra.gmra.mxu0 %v4211_v7  ;;  %v4212_v2 = vand.u32 4294901760, %v4211_v7  ;;  %v4178_v1 = vsel %vm4175_vm9, %v4177_v37, %v4173_v23 }
 0x9ea   : > { %4345 = vmatpush.msra.mxu2 %v4249_v0  ;;  %v4250_v54 = vsub.f32 %v4248_v31, %v4249_v0  ;;  %v4179_v21 = vmul.f32 %v12144_v25, %v4178_v1  ;;  %v771_v25 = vld [vmem:[#allocation5 + $0x78] sm:$0xff]  ;;  %v4402_v31 = vand.u32 4294901760, %v770_v60  ;;  %v768_v0 = vld [vmem:[#allocation5 + $0x60] sm:$0xff] }
 0x9eb   : > { %4314 = vmatmul.f32.vlgmr.msra.gmra.mxu1 %v4212_v2  ;;  %v4213_v42 = vsub.f32 %v4211_v7, %v4212_v2  ;;  %v4400_v35 = vand.u32 4294901760, %v771_v25  ;;  %v4406_v1 = vand.u32 4294901760, %v768_v0 }
 0x9ec   : > { %v4251_v28 = vand.u32 4294901760, %v4250_v54  ;;  %v4190_v12 = vsel %vm2093_vm3, %v4179_v21, 0  ;;  %v4444_v7 = vsub.f32 %v770_v60, %v4402_v31 }
 0x9ed   : > { %v4214_v3 = vand.u32 4294901760, %v4213_v42  ;;  %v4218_v19 = vand.u32 4294901760, %v4190_v12  ;;  %v4438_v40 = vsub.f32 %v771_v25, %v4400_v35  ;;  %4401 = vmatpush.msrb.mxu0 %v4400_v35 }
 0x9ee   : > { %4252 = vmatpush.msrb.mxu3 %v4251_v28  ;;  %v4445_v2 = vand.u32 4294901760, %v4444_v7  ;;  %v4456_v28 = vsub.f32 %v768_v0, %v4406_v1 }
 0x9ef   : > { %4215 = vmatmul.f32.vlgmr.msrb.gmra.mxu2 %v4214_v3  ;;  %4254 = vmatmul.f32.vlgmr.msrb.gmra.mxu3 %v4210_v13  ;;  %v4219_v16 = vsub.f32 %v4190_v12, %v4218_v19  ;;  %v4439_v37 = vand.u32 4294901760, %v4438_v40 }
 0x9f0   : > { %4370 = vmatpush.msra.mxu3 %v13828_v24  ;;  %v769_v24 = vld [vmem:[#allocation5 + $0x68] sm:$0xff]  ;;  %4484 = vmatpush.msrb.mxu2 %v4438_v40  ;;  %v4446_v21 = vsub.f32 %v4444_v7, %v4445_v2 }
 0x9f1   : > { %4289 = vmatmul.f32.gmra.mxu0 %v4219_v16  ;;  %v4220_v17 = vand.u32 4294901760, %v4219_v16  ;;  %v4440_v23 = vsub.f32 %v4438_v40, %v4439_v37 }
 0x9f2   : > { %4372 = vmatpush.msra.mxu3 %v4208_v32  ;;  %v4404_v32 = vand.u32 4294901760, %v769_v24  ;;  %4403 = vmatpush.msrb.mxu0 %v4402_v31  ;;  %v4447_v12 = vand.u32 4294901760, %v4446_v21 }
 0x9f3   : > { %4320 = vmatmul.f32.gmra.mxu1 %v4220_v17  ;;  %v4221_v46 = vsub.f32 %v4219_v16, %v4220_v17  ;;  %4487 = vmatpush.msrb.mxu2 %v4444_v7  ;;  %v4441_v54 = vand.u32 4294901760, %v4440_v23 }
 0x9f4   : > { %4518 = vmatpush.msrb.mxu3 %v4400_v35  ;;  %4405 = vmatpush.msrb.mxu0 %v4404_v32 }
 0x9f5   : > { %v4222_v26 = vand.u32 4294901760, %v4221_v46  ;;  %4442 = vmatpush.msrb.mxu1 %v4441_v54 }
 0x9f6   : > { %4520 = vmatpush.msrb.mxu3 %v4402_v31  ;;  %4407 = vmatpush.msrb.mxu0 %v4406_v1 }
 0x9f7   : > { %4223 = vmatmul.f32.gmra.mxu2 %v4222_v26  ;;  %4258 = vmatmul.f32.gmra.mxu3 %v4218_v19 }
 0x9f8   : > { %4522 = vmatpush.msrb.mxu3 %v4404_v32  ;;  %4553 = vmatpush.msra.mxu0 %v4439_v37 }
 0x9f9   : > { %4448 = vmatpush.msrb.mxu1 %v4447_v12 }
 0x9fa   : > { %4524 = vmatpush.msrb.mxu3 %v4406_v1  ;;  %4557 = vmatpush.msra.mxu0 %v4445_v2 }
 0x9ff   : > { %4347 = vmatmul.f32.vlgmr.msra.gmra.mxu2 %v4210_v13  ;;  %4374 = vmatmul.f32.vlgmr.msra.gmra.mxu3 %v4210_v13  ;;  %v4450_v13 = vsub.f32 %v769_v24, %v4404_v32 }
 0xa01   : > { %v4451_v42 = vand.u32 4294901760, %v4450_v13  ;;  %4490 = vmatpush.msrb.mxu2 %v4450_v13 }
 0xa03   : > { %v4452_v3 = vsub.f32 %v4450_v13, %v4451_v42  ;;  %4493 = vmatpush.msrb.mxu2 %v4456_v28  ;;  %4561 = vmatpush.msra.mxu0 %v4451_v42 }
 0xa05   : > { %v4453_v16 = vand.u32 4294901760, %v4452_v3 }
 0xa07   : > { %4351 = vmatmul.f32.gmra.mxu2 %v4218_v19  ;;  %4378 = vmatmul.f32.gmra.mxu3 %v4218_v19  ;;  %v4457_v19 = vand.u32 4294901760, %v4456_v28 }
 0xa08   : > { %4454 = vmatpush.msrb.mxu1 %v4453_v16 }
 0xa09   : > { %v4458_v17 = vsub.f32 %v4456_v28, %v4457_v19  ;;  %4565 = vmatpush.msra.mxu0 %v4457_v19 }
 0xa0b   : > { %v4459_v46 = vand.u32 4294901760, %v4458_v17 }
 0xa0d   : > { %4460 = vmatpush.msrb.mxu1 %v4459_v46 }
 0xa0f   : > { %4588 = vmatpush.msra.mxu1 %v4400_v35 }
 0xa11   : > { %4590 = vmatpush.msra.mxu1 %v4402_v31 }
 0xa13   : > { %4592 = vmatpush.msra.mxu1 %v4404_v32 }
 0xa15   : > { %4594 = vmatpush.msra.mxu1 %v4406_v1 }
 0xa66   : > { %v4285_v60 = vpop.f32.mrf.mxu0 }
 0xa68   : > { %v4315_v0 = vpop.f32.mrf.mxu1 }
 0xa6e   : > { %v4290_v42 = vpop.f32.mrf.mxu0 }
 0xa70   : > { %v4321_v32 = vpop.f32.mrf.mxu1 }
 0xa72   : > { %v4216_v26 = vpop.f32.mrf.mxu2  ;;  %v4255_v25 = vpop.f32.mrf.mxu3 }
 0xa73   : > { %v4256_v40 = vadd.f32 %v4255_v25, %v4216_v26 }
 0xa75   : > { %v4286_v37 = vadd.f32 %v4285_v60, %v4256_v40 }
 0xa77   : > { %v4316_v13 = vadd.f32 %v4315_v0, %v4286_v37 }
 0xa7a   : > { %v4224_v24 = vpop.f32.mrf.mxu2  ;;  %v4259_v7 = vpop.f32.mrf.mxu3 }
 0xa7b   : > { %v4260_v23 = vadd.f32 %v4259_v7, %v4224_v24 }
 0xa7d   : > { %v4291_v28 = vadd.f32 %v4290_v42, %v4260_v23 }
 0xa7f   : > { %v4322_v3 = vadd.f32 %v4321_v32, %v4291_v28 }
 0xa82   : > { %v4348_v2 = vpop.f32.mrf.mxu2  ;;  %v4375_v54 = vpop.f32.mrf.mxu3 }
 0xa83   : > { %v4349_v21 = vadd.f32 %v4348_v2, %v4316_v13  ;;  %v2880_v13 = vadd.f32 %v13647_v27, %v13653_v11 }
 0xa85   : > { %v4376_v35 = vadd.f32 %v4375_v54, %v4349_v21  ;;  %v2914_v2 = vadd.f32 %v13649_v45, %v2880_v13  ;;  %v2884_v21 = vadd.f32 %v13655_v4, %v13659_v18  ;;  %v4693_v18 = vld [vmem:[#allocation7 + $0xf0] sm:$0xff]  ;;  %v4683_v13 = vld [vmem:[#allocation7 + $0xa0] sm:$0xff] }
 0xa87   : > { %v4383_v31 = vsel %vm1888_vm1, %v4376_v35, 0  ;;  %v2946_v54 = vadd.f32 %v13651_v53, %v2914_v2  ;;  %v2919_v28 = vadd.f32 %v13657_v52, %v2884_v21  ;;  %v13856_v52 = vand.u32 4294901760, %v4693_v18 }
 0xa88   : > { %v4408_v12 = vand.u32 4294901760, %v4383_v31  ;;  %v13915_v21 = vand.u32 4294901760, %v4683_v13 }
 0xa89   : > { %v2985_v42 = vadd.f32 %v13667_v61, %v2946_v54  ;;  %4702 = vmatpush.msra.mxu2 %v13856_v52 }
 0xa8a   : > { %v4409_v1 = vsub.f32 %v4383_v31, %v4408_v12  ;;  %v4352_v19 = vpop.f32.mrf.mxu2  ;;  %4462 = vmatmul.f32.vlgmr.msrb.gmra.mxu1 %v4408_v12  ;;  %v4379_v46 = vpop.f32.mrf.mxu3  ;;  %v2952_v31 = vadd.f32 %v13663_v20, %v2919_v28  ;;  %v4691_v20 = vld [vmem:[#allocation7 + $0xe0] sm:$0xff] }
 0xa8b   : > { %v4353_v16 = vadd.f32 %v4352_v19, %v4322_v3  ;;  %v3014_v35 = vadd.f32 %v13661_v44, %v2985_v42  ;;  %4915 = vmatpush.msrb.mxu1 %v13856_v52 }
 0xa8c   : > { %v4410_v17 = vand.u32 4294901760, %v4409_v1  ;;  %4496 = vmatmul.f32.vlgmr.msrb.gmra.mxu2 %v4409_v1 }
 0xa8d   : > { %v4380_v26 = vadd.f32 %v4379_v46, %v4353_v16  ;;  %v3053_v32 = vadd.f32 %v13665_v48, %v3014_v35  ;;  %v13860_v48 = vsub.f32 %v4693_v18, %v13856_v52 }
 0xa8e   : > { %v4411_v25 = vsub.f32 %v4409_v1, %v4410_v17  ;;  %4528 = vmatmul.f32.vlgmr.msrb.gmra.mxu3 %v4410_v17 }
 0xa8f   : > { %v4386_v60 = vsel %vm1888_vm1, %v4380_v26, 0  ;;  %v3102_v45 = vadd.f32 %v13671_v50, %v3053_v32  ;;  %v3786_v50 = vadd.f32 %v13802_v43, %v13808_v57  ;;  %v4752_v3 = vand.u32 4294901760, %v13860_v48  ;;  %v4687_v57 = vld [vmem:[#allocation7 + $0xc0] sm:$0xff] }
 0xa90   : > { %v4412_v40 = vand.u32 4294901760, %v4411_v25  ;;  %v4416_v24 = vand.u32 4294901760, %v4386_v60 }
 0xa91   : > { %v3136_v11 = vadd.f32 %v13681_v15, %v3102_v45  ;;  %v4689_v15 = vld [vmem:[#allocation7 + $0xd0] sm:$0xff]  ;;  %v4753_v17 = vsub.f32 %v13860_v48, %v4752_v3  ;;  %v3821_v25 = vadd.f32 %v13804_v59, %v3786_v50 }
 0xa92   : > { %4413 = vmatmul.f32.vlgmr.msrb.gmra.mxu0 %v4412_v40  ;;  %4466 = vmatmul.f32.gmra.mxu1 %v4416_v24  ;;  %v4417_v7 = vsub.f32 %v4386_v60, %v4416_v24  ;;  %v13876_v19 = vand.u32 4294901760, %v4689_v15  ;;  %v13893_v60 = vand.u32 4294901760, %v4687_v57 }
 0xa93   : > { %v3168_v44 = vadd.f32 %v13675_v33, %v3136_v11  ;;  %4857 = vmatpush.msrb.mxu0 %v13860_v48  ;;  %v4754_v40 = vand.u32 4294901760, %v4753_v17  ;;  %v3854_v28 = vadd.f32 %v13806_v49, %v3821_v25 }
 0xa94   : > { %4501 = vmatmul.f32.gmra.mxu2 %v4417_v7  ;;  %v4418_v37 = vand.u32 4294901760, %v4417_v7  ;;  %v13887_v26 = vsub.f32 %v4689_v15, %v13876_v19  ;;  %v13905_v59 = vsub.f32 %v4687_v57, %v13893_v60 }
 0xa95   : > { %4755 = vmatpush.msra.mxu3 %v4754_v40 }
 0xa96   : > { %4534 = vmatmul.f32.gmra.mxu3 %v4418_v37  ;;  %v4419_v0 = vsub.f32 %v4417_v7, %v4418_v37  ;;  %v4764_v7 = vand.u32 4294901760, %v13887_v26  ;;  %v4770_v35 = vand.u32 4294901760, %v13905_v59 }
 0xa98   : > { %v4420_v23 = vand.u32 4294901760, %v4419_v0 }
 0xa9a   : > { %4421 = vmatmul.f32.gmra.mxu0 %v4420_v23  ;;  %4596 = vmatmul.f32.vlgmr.msra.gmra.mxu1 %v4408_v12 }
 0xaa2   : > { %4567 = vmatmul.f32.vlgmr.msra.gmra.mxu0 %v4408_v12  ;;  %4600 = vmatmul.f32.gmra.mxu1 %v4416_v24  ;;  %v2989_v12 = vadd.f32 %v13673_v14, %v2952_v31  ;;  %v13862_v14 = vand.u32 4294901760, %v4691_v20 }
 0xaa4   : > { %v3018_v53 = vadd.f32 %v13669_v36, %v2989_v12  ;;  %v3782_v36 = vadd.f32 %v13794_v41, %v13800_v22  ;;  %v13873_v1 = vsub.f32 %v4691_v20, %v13862_v14  ;;  %4917 = vmatpush.msrb.mxu1 %v13862_v14  ;;  %v3207_v41 = vadd.f32 %v13685_v63, %v3168_v44 }
 0xaa5   : > { %4704 = vmatpush.msra.mxu2 %v13862_v14  ;;  %v3891_v44 = vadd.f32 %v13816_v30, %v3854_v28  ;;  %v4677_v30 = vld [vmem:[#allocation7 + $0x70] sm:$0xff] }
 0xaa6   : > { %v3061_v61 = vadd.f32 %v13677_v34, %v3018_v53  ;;  %v4758_v46 = vand.u32 4294901760, %v13873_v1  ;;  %4860 = vmatpush.msrb.mxu0 %v13873_v1  ;;  %4919 = vmatpush.msrb.mxu1 %v13876_v19  ;;  %v3816_v63 = vadd.f32 %v13796_v29, %v3782_v36  ;;  %v13902_v37 = vadd.f32 %v13687_v10, %v3207_v41 }
 0xaa7   : > { %4706 = vmatpush.msra.mxu2 %v13876_v19  ;;  %v4765_v10 = vsub.f32 %v13887_v26, %v4764_v7  ;;  %v13963_v25 = vand.u32 4294901760, %v4677_v30  ;;  %v3920_v40 = vadd.f32 %v13814_v62, %v3891_v44 }
 0xaa8   : > { %v3106_v33 = vadd.f32 %v13679_v47, %v3061_v61  ;;  %4863 = vmatpush.msrb.mxu0 %v13887_v26  ;;  %4921 = vmatpush.msrb.mxu1 %v13893_v60  ;;  %v3848_v42 = vadd.f32 %v13798_v55, %v3816_v63  ;;  %v4679_v61 = vld [vmem:[#allocation7 + $0x80] sm:$0xff] }
 0xaa9   : > { %4708 = vmatpush.msra.mxu2 %v13893_v60  ;;  %v4766_v12 = vand.u32 4294901760, %v4765_v10  ;;  %v13943_v36 = vand.u32 4294901760, %v4679_v61  ;;  %v4673_v10 = vld [vmem:[#allocation7 + $0x50] sm:$0xff] }
 0xaaa   : > { %4571 = vmatmul.f32.gmra.mxu0 %v4416_v24  ;;  %v3141_v47 = vadd.f32 %v13689_v6, %v3106_v33  ;;  %v4685_v6 = vld [vmem:[#allocation7 + $0xb0] sm:$0xff]  ;;  %v4759_v24 = vsub.f32 %v13873_v1, %v4758_v46  ;;  %v3887_v55 = vadd.f32 %v13812_v5, %v3848_v42 }
 0xaab   : > { %v13907_v23 = vand.u32 4294901760, %v4685_v6  ;;  %4866 = vmatpush.msrb.mxu0 %v13905_v59 }
 0xaac   : > { %v3174_v2 = vadd.f32 %v13683_v38, %v3141_v47  ;;  %v4760_v54 = vand.u32 4294901760, %v4759_v24  ;;  %v4681_v38 = vld [vmem:[#allocation7 + $0x90] sm:$0xff]  ;;  %v3916_v57 = vadd.f32 %v13810_v58, %v3887_v55  ;;  %v17422_v47 = vlaneseq }
 0xaad   : > { %v13921_v31 = vsub.f32 %v4685_v6, %v13907_v23  ;;  %4923 = vmatpush.msrb.mxu1 %v13907_v23  ;;  %v13928_v45 = vand.u32 4294901760, %v4681_v38  ;;  %4710 = vmatpush.msra.mxu2 %v13907_v23  ;;  %v4675_v6 = vld [vmem:[#allocation7 + $0x60] sm:$0xff] }
 0xaae   : > { %4761 = vmatpush.msra.mxu3 %v4760_v54  ;;  %v3211_v50 = vadd.f32 %v13691_v9, %v3174_v2  ;;  %v13957_v9 = vsub.f32 %v4679_v61, %v13943_v36  ;;  %v700_v17 = vshrl.u32 %v17422_v47, 7  ;;  %v13974_v54 = vsub.f32 %v4677_v30, %v13963_v25 }
 0xaaf   : > { %v4776_v18 = vand.u32 4294901760, %v13921_v31  ;;  %4869 = vmatpush.msrb.mxu0 %v13921_v31  ;;  %4925 = vmatpush.msrb.mxu1 %v13915_v21  ;;  %v13941_v5 = vsub.f32 %v4681_v38, %v13928_v45  ;;  %v13977_v62 = vand.u32 4294901760, %v4675_v6 }
 0xab0   : > { %4767 = vmatpush.msra.mxu3 %v4766_v12  ;;  %4712 = vmatpush.msra.mxu2 %v13915_v21  ;;  %v3240_v58 = vadd.f32 %v13693_v39, %v3211_v50  ;;  %v3922_v39 = vadd.f32 %v3916_v57, %v13902_v37  ;;  %v701_v12 = vadd.s32 8, %v700_v17 }
 0xab1   : > { %v4777_v41 = vsub.f32 %v13921_v31, %v4776_v18  ;;  %4927 = vmatpush.msrb.mxu1 %v13928_v45  ;;  %v4682_v31 = vld [vmem:[#allocation7 + $0x98] sm:$0xff] }
 0xab2   : > { %4714 = vmatpush.msra.mxu2 %v13928_v45  ;;  %vm703_vm10 = vcmp.lt.s32.totalorder %v701_v12, 9 }
 0xab3   : > { %v4778_v63 = vand.u32 4294901760, %v4777_v41  ;;  %4929 = vmatpush.msrb.mxu1 %v13943_v36 }
 0xab4   : > { %4716 = vmatpush.msra.mxu2 %v13943_v36 }
 0xab5   : > { %4931 = vmatpush.msrb.mxu1 %v13963_v25 }
 0xab6   : > { %4718 = vmatpush.msra.mxu2 %v13963_v25 }
 0xab7   : > { %4933 = vmatpush.msrb.mxu1 %v13977_v62 }
 0xab8   : > { %4720 = vmatpush.msra.mxu2 %v13977_v62 }
 0xb07   : > { %v4463_v27 = vpop.f32.mrf.mxu1 }
 0xb0f   : > { %v4414_v4 = vpop.f32.mrf.mxu0  ;;  %v4467_v34 = vpop.f32.mrf.mxu1 }
 0xb10   : > { %v4464_v22 = vadd.f32 %v4463_v27, %v4414_v4  ;;  %v4497_v16 = vpop.f32.mrf.mxu2  ;;  %v13926_v27 = vsub.f32 %v4683_v13, %v13915_v21  ;;  %v4771_v4 = vsub.f32 %v13905_v59, %v4770_v35 }
 0xb11   : > { %v4529_v0 = vpop.f32.mrf.mxu3 }
 0xb12   : > { %v4498_v29 = vadd.f32 %v4497_v16, %v4464_v22  ;;  %v4782_v20 = vand.u32 4294901760, %v13926_v27  ;;  %v4772_v33 = vand.u32 4294901760, %v4771_v4  ;;  %4872 = vmatpush.msrb.mxu0 %v13926_v27  ;;  %v3923_v4 = vadd.f32 %v3920_v40, %v3240_v58  ;;  %v4667_v40 = vld [vmem:[#allocation7 + $0x20] sm:$0xff] }
 0xb14   : > { %v4530_v49 = vadd.f32 %v4529_v0, %v4498_v29  ;;  %v4783_v16 = vsub.f32 %v13926_v27, %v4782_v20  ;;  %4773 = vmatpush.msra.mxu3 %v4772_v33  ;;  %4875 = vmatpush.msrb.mxu0 %v13941_v5  ;;  %v4794_v0 = vand.u32 4294901760, %v13957_v9  ;;  %v4680_v27 = vld [vmem:[#allocation7 + $0x88] sm:$0xff] }
 0xb16   : > { %v4784_v24 = vand.u32 4294901760, %v4783_v16  ;;  %4779 = vmatpush.msra.mxu3 %v4778_v63  ;;  %4878 = vmatpush.msrb.mxu0 %v13957_v9  ;;  %v4795_v38 = vsub.f32 %v13957_v9, %v4794_v0  ;;  %v4676_v9 = vld [vmem:[#allocation7 + $0x68] sm:$0xff] }
 0xb17   : > { %v4422_v43 = vpop.f32.mrf.mxu0  ;;  %v4597_v53 = vpop.f32.mrf.mxu1 }
 0xb18   : > { %v4468_v32 = vadd.f32 %v4467_v34, %v4422_v43  ;;  %v4502_v34 = vpop.f32.mrf.mxu2  ;;  %v4788_v43 = vand.u32 4294901760, %v13941_v5  ;;  %4785 = vmatpush.msra.mxu3 %v4784_v24  ;;  %4881 = vmatpush.msrb.mxu0 %v13974_v54  ;;  %v4796_v44 = vand.u32 4294901760, %v4795_v38 }
 0xb19   : > { %v4535_v13 = vpop.f32.mrf.mxu3 }
 0xb1a   : > { %v4503_v22 = vadd.f32 %v4502_v34, %v4468_v32  ;;  %v4789_v29 = vsub.f32 %v13941_v5, %v4788_v43  ;;  %v13982_v32 = vand.u32 4294901760, %v4673_v10  ;;  %v12105_v34 = vld [vmem:[%s17324_s4] ss:$0 sm:$0xff] }
 0xb1c   : > { %v4536_v42 = vadd.f32 %v4535_v13, %v4503_v22  ;;  %v4790_v28 = vand.u32 4294901760, %v4789_v29  ;;  %v13993_v50 = vsub.f32 %v4673_v10, %v13982_v32  ;;  %v4669_v22 = vld [vmem:[#allocation7 + $0x30] sm:$0xff]  ;;  %4935 = vmatpush.msrb.mxu1 %v13982_v32  ;;  %4722 = vmatpush.msra.mxu2 %v13982_v32  ;;  %v14025_v13 = vand.u32 4294901760, %v4667_v40 }
 0xb1d   : > { %v14008_v47 = vand.u32 4294901760, %v4669_v22 }
 0xb1e   : > { %4791 = vmatpush.msra.mxu3 %v4790_v28  ;;  %v4812_v57 = vand.u32 4294901760, %v13993_v50  ;;  %v4665_v28 = vld [vmem:[#allocation7 + $0x10] sm:$0xff] }
 0xb1f   : > { %v4568_v11 = vpop.f32.mrf.mxu0  ;;  %v14023_v58 = vsub.f32 %v4669_v22, %v14008_v47 }
 0xb20   : > { %v4569_v15 = vadd.f32 %v4568_v11, %v4530_v49  ;;  %v4800_v49 = vand.u32 4294901760, %v13974_v54  ;;  %v4671_v11 = vld [vmem:[#allocation7 + $0x40] sm:$0xff]  ;;  %4797 = vmatpush.msra.mxu3 %v4796_v44  ;;  %v4813_v29 = vsub.f32 %v13993_v50, %v4812_v57 }
 0xb21   : > { %v14005_v30 = vand.u32 4294901760, %v4671_v11 }
 0xb22   : > { %v4598_v2 = vadd.f32 %v4597_v53, %v4569_v15  ;;  %v13989_v53 = vsub.f32 %v4675_v6, %v13977_v62  ;;  %v4601_v15 = vpop.f32.mrf.mxu1  ;;  %v4801_v33 = vsub.f32 %v13974_v54, %v4800_v49 }
 0xb23   : > { %v14016_v6 = vsub.f32 %v4671_v11, %v14005_v30  ;;  %4937 = vmatpush.msrb.mxu1 %v14005_v30  ;;  %4724 = vmatpush.msra.mxu2 %v14005_v30  ;;  %v14033_v11 = vsub.f32 %v4667_v40, %v14025_v13 }
 0xb24   : > { %v4604_v37 = vadd.f32 %v4598_v2, %v3922_v39  ;;  %v4806_v41 = vand.u32 4294901760, %v13989_v53  ;;  %4884 = vmatpush.msrb.mxu0 %v13989_v53  ;;  %v4802_v17 = vand.u32 4294901760, %v4801_v33  ;;  %v4814_v39 = vand.u32 4294901760, %v4813_v29 }
 0xb25   : > { %4939 = vmatpush.msrb.mxu1 %v14008_v47  ;;  %4726 = vmatpush.msra.mxu2 %v14008_v47  ;;  %v17353_v12 = vand.u32 4294901760, %v14033_v11 }
 0xb26   : > { %v4807_v63 = vsub.f32 %v13989_v53, %v4806_v41  ;;  %4887 = vmatpush.msrb.mxu0 %v13993_v50  ;;  %v4610_v2 = vadd.f32 %v12105_v34, %v4604_v37  ;;  %4803 = vmatpush.msra.mxu3 %v4802_v17  ;;  %v14044_v37 = vand.u32 4294901760, %v4665_v28 }
 0xb27   : > { %v4572_v55 = vpop.f32.mrf.mxu0  ;;  %4941 = vmatpush.msrb.mxu1 %v14025_v13  ;;  %4728 = vmatpush.msra.mxu2 %v14025_v13 }
 0xb28   : > { %v4573_v61 = vadd.f32 %v4572_v55, %v4536_v42  ;;  %v4808_v10 = vand.u32 4294901760, %v4807_v63  ;;  %v4818_v42 = vand.u32 4294901760, %v14016_v6  ;;  %4890 = vmatpush.msrb.mxu0 %v14016_v6  ;;  %v4824_v55 = vand.u32 4294901760, %v14023_v58 }
 0xb29   : > { %4943 = vmatpush.msrb.mxu1 %v14044_v37  ;;  %4730 = vmatpush.msra.mxu2 %v14044_v37 }
 0xb2a   : > { %v4602_v16 = vadd.f32 %v4601_v15, %v4573_v61  ;;  %4809 = vmatpush.msra.mxu3 %v4808_v10  ;;  %v4819_v44 = vsub.f32 %v14016_v6, %v4818_v42  ;;  %4893 = vmatpush.msrb.mxu0 %v14023_v58  ;;  %v4825_v33 = vsub.f32 %v14023_v58, %v4824_v55  ;;  %v17423_v58 = vand.u32 4294901760, %v14033_v11 }
 0xb2c   : > { %v4605_v24 = vadd.f32 %v4602_v16, %v3923_v4  ;;  %v12398_v4 = vmov 0.0   ;;  %v14058_v16 = vadd.f32 %v4610_v2, %v13010_v8  ;;  %4815 = vmatpush.msra.mxu3 %v4814_v39  ;;  %v4820_v17 = vand.u32 4294901760, %v4819_v44  ;;  %4896 = vmatpush.msrb.mxu0 %v14033_v11 }
 0xb2d   : > { %v14038_v61 = vsel %vm703_vm10, 1.0, %v12398_v4  ;;  %v4826_v40 = vand.u32 4294901760, %v4825_v33  ;;  %v4692_v33 = vld [vmem:[#allocation7 + $0xe8] sm:$0xff] }
 0xb2e   : > { %v4611_v38 = vadd.f32 %v12105_v34, %v4605_v24  ;;  %v4663_v34 = vld [vmem:[#allocation7] sm:$0xff]  ;;  %v4831_v24 = vsub.f32 %v14033_v11, %v17353_v12  ;;  %4821 = vmatpush.msra.mxu3 %v4820_v17  ;;  %v4690_v12 = vld [vmem:[#allocation7 + $0xd8] sm:$0xff] }
 0xb2f   : > { %v14053_v22 = vand.u32 4294901760, %v4663_v34 }
 0xb30   : > { %v14047_v15 = vadd.f32 %v4611_v38, %v13028_v51  ;;  %v14061_v51 = vsub.f32 %v4665_v28, %v14044_v37  ;;  %v4832_v10 = vand.u32 4294901760, %v4831_v24  ;;  %v4694_v38 = vld [vmem:[#allocation7 + $0xf8] sm:$0xff]  ;;  %4827 = vmatpush.msra.mxu3 %v4826_v40  ;;  %v14095_v40 = vand.u32 4294901760, %v4692_v33 }
 0xb31   : > { %v14070_v29 = vsub.f32 %v4663_v34, %v14053_v22  ;;  %4945 = vmatpush.msrb.mxu1 %v14053_v22  ;;  %4732 = vmatpush.msra.mxu2 %v14053_v22  ;;  %v14084_v4 = vand.u32 4294901760, %v4694_v38 }
 0xb32   : > { %v4617_v63 = vmul.f32 %v14038_v61, %v14047_v15  ;;  %v17352_v8 = vand.u32 4294901760, %v14061_v51  ;;  %4899 = vmatpush.msrb.mxu0 %v14061_v51  ;;  %4833 = vmatpush.msra.mxu3 %v4832_v10  ;;  %v14104_v10 = vsub.f32 %v4692_v33, %v14095_v40  ;;  %v4686_v33 = vld [vmem:[#allocation7 + $0xb8] sm:$0xff] }
 0xb33   : > { %v4842_v28 = vand.u32 4294901760, %v14070_v29  ;;  %4962 = vmatpush.msrb.mxu2 %v4752_v3  ;;  %v14101_v3 = vand.u32 4294901760, %v4690_v12 }
 0xb34   : > { %v4618_v2 = vadd.f32 %v4617_v63, %v14058_v16  ;;  %v4837_v39 = vsub.f32 %v14061_v51, %v17352_v8  ;;  %4902 = vmatpush.msrb.mxu0 %v14070_v29  ;;  %v14093_v63 = vsub.f32 %v4694_v38, %v14084_v4 }
 0xb35   : > { %v4843_v34 = vsub.f32 %v14070_v29, %v4842_v28  ;;  %4966 = vmatpush.msrb.mxu2 %v4758_v46  ;;  %v5130_v46 = vand.u32 4294901760, %v14104_v10 }
 0xb36   : > { %v4619_v44 = vrot.slane %v4618_v2, 4  ;;  %v4838_v17 = vand.u32 4294901760, %v4837_v39  ;;  %5074 = vmatpush.msra.mxu0 %v14084_v4  ;;  %v5124_v48 = vand.u32 4294901760, %v14093_v63  ;;  %v4688_v39 = vld [vmem:[#allocation7 + $0xc8] sm:$0xff] }
 0xb37   : > { %v4844_v8 = vand.u32 4294901760, %v4843_v34  ;;  %4970 = vmatpush.msrb.mxu2 %v4764_v7  ;;  %v5131_v7 = vsub.f32 %v14104_v10, %v5130_v46 }
 0xb38   : > { %v4620_v24 = vadd.f32 %v4619_v44, %v4618_v2  ;;  %4839 = vmatpush.msra.mxu3 %v4838_v17  ;;  %5076 = vmatpush.msra.mxu0 %v14095_v40  ;;  %v5125_v1 = vsub.f32 %v14093_v63, %v5124_v48  ;;  %v14113_v2 = vand.u32 4294901760, %v4688_v39  ;;  %v14116_v44 = vsub.f32 %v4690_v12, %v14101_v3 }
 0xb39   : > { %4974 = vmatpush.msrb.mxu2 %v4770_v35  ;;  %v14126_v17 = vand.u32 4294901760, %v4686_v33  ;;  %v5132_v59 = vand.u32 4294901760, %v5131_v7  ;;  %v14149_v7 = vand.u32 4294901760, %v4682_v31 }
 0xb3a   : > { %v4621_v38 = vrot.slane %v4620_v24, 2  ;;  %4845 = vmatpush.msra.mxu3 %v4844_v8  ;;  %5078 = vmatpush.msra.mxu0 %v14101_v3  ;;  %v5126_v26 = vand.u32 4294901760, %v5125_v1  ;;  %v5136_v8 = vand.u32 4294901760, %v14116_v44 }
 0xb3b   : > { %4978 = vmatpush.msrb.mxu2 %v4776_v18  ;;  %v14141_v1 = vsub.f32 %v4686_v33, %v14126_v17 }
 0xb3c   : > { %v4622_v34 = vadd.f32 %v4621_v38, %v4620_v24  ;;  %5033 = vmatpush.msrb.mxu3 %v13856_v52  ;;  %5080 = vmatpush.msra.mxu0 %v14113_v2  ;;  %v14130_v52 = vsub.f32 %v4688_v39, %v14113_v2  ;;  %v4684_v24 = vld [vmem:[#allocation7 + $0xa8] sm:$0xff]  ;;  %v5137_v35 = vsub.f32 %v14116_v44, %v5136_v8 }
 0xb3d   : > { %5127 = vmatpush.msra.mxu1 %v5126_v26  ;;  %v14138_v38 = vand.u32 4294901760, %v4684_v24  ;;  %4982 = vmatpush.msrb.mxu2 %v4782_v20  ;;  %v5148_v26 = vand.u32 4294901760, %v14141_v1 }
 0xb3e   : > { %v4623_v12 = vrot.slane %v4622_v34, 1  ;;  %5035 = vmatpush.msrb.mxu3 %v13862_v14  ;;  %5082 = vmatpush.msra.mxu0 %v14126_v17  ;;  %v5142_v39 = vand.u32 4294901760, %v14130_v52  ;;  %v5138_v18 = vand.u32 4294901760, %v5137_v35  ;;  %v4678_v35 = vld [vmem:[#allocation7 + $0x78] sm:$0xff] }
 0xb3f   : > { %5133 = vmatpush.msra.mxu1 %v5132_v59  ;;  %v14152_v33 = vsub.f32 %v4684_v24, %v14138_v38  ;;  %4986 = vmatpush.msrb.mxu2 %v4788_v43  ;;  %v5149_v20 = vsub.f32 %v14141_v1, %v5148_v26  ;;  %v14165_v24 = vand.u32 4294901760, %v4680_v27 }
 0xb40   : > { %v4624_v14 = vadd.f32 %v4623_v12, %v4622_v34  ;;  %5037 = vmatpush.msrb.mxu3 %v13876_v19  ;;  %5084 = vmatpush.msra.mxu0 %v14138_v38  ;;  %v5143_v19 = vsub.f32 %v14130_v52, %v5142_v39 }
 0xb41   : > { %5139 = vmatpush.msra.mxu1 %v5138_v18  ;;  %v17355_v12 = vand.u32 4294901760, %v14152_v33  ;;  %4990 = vmatpush.msrb.mxu2 %v4794_v0 }
 0xb42   : > { %v4625_v34 = vmul.f32 0.11111111, %v4624_v14  ;;  %5039 = vmatpush.msrb.mxu3 %v13893_v60  ;;  %5086 = vmatpush.msra.mxu0 %v14149_v7  ;;  %v14168_v60 = vsub.f32 %v4682_v31, %v14149_v7  ;;  %v5144_v43 = vand.u32 4294901760, %v5143_v19  ;;  %v5150_v14 = vand.u32 4294901760, %v5149_v20 }
 0xb43   : > { %v5155_v18 = vsub.f32 %v14152_v33, %v17355_v12  ;;  %v14184_v31 = vand.u32 4294901760, %v4678_v35  ;;  %v14196_v19 = vand.u32 4294901760, %v4676_v9  ;;  %4994 = vmatpush.msrb.mxu2 %v4800_v49 }
 0xb44   : > { %v14171_v59 = vsub.f32 %v14058_v16, %v4625_v34  ;;  %v14174_v5 = vsub.f32 %v14047_v15, %v4625_v34  ;;  %5041 = vmatpush.msrb.mxu3 %v13907_v23  ;;  %5088 = vmatpush.msra.mxu0 %v14165_v24  ;;  %v17354_v16 = vand.u32 4294901760, %v14168_v60  ;;  %v14190_v23 = vsub.f32 %v4680_v27, %v14165_v24 }
 0xb45   : > { %5145 = vmatpush.msra.mxu1 %v5144_v43  ;;  %v5156_v0 = vand.u32 4294901760, %v5155_v18  ;;  %v14199_v20 = vsub.f32 %v4678_v35, %v14184_v31  ;;  %v4674_v18 = vld [vmem:[#allocation7 + $0x58] sm:$0xff]  ;;  %v14213_v54 = vsub.f32 %v4676_v9, %v14196_v19  ;;  %4998 = vmatpush.msrb.mxu2 %v4806_v41 }
 0xb46   : > { %v4629_v15 = vmul.f32 %v14174_v5, %v14174_v5  ;;  %5043 = vmatpush.msrb.mxu3 %v13915_v21  ;;  %v5161_v34 = vsub.f32 %v14168_v60, %v17354_v16  ;;  %5090 = vmatpush.msra.mxu0 %v14184_v31  ;;  %v4628_v21 = vmul.f32 %v14171_v59, %v14171_v59  ;;  %v5166_v43 = vand.u32 4294901760, %v14190_v23 }
 0xb47   : > { %5151 = vmatpush.msra.mxu1 %v5150_v14  ;;  %v17356_v35 = vand.u32 4294901760, %v14199_v20  ;;  %v14210_v12 = vand.u32 4294901760, %v4674_v18  ;;  %v4672_v14 = vld [vmem:[#allocation7 + $0x48] sm:$0xff]  ;;  %v5178_v9 = vand.u32 4294901760, %v14213_v54  ;;  %5002 = vmatpush.msrb.mxu2 %v4812_v57 }
 0xb48   : > { %v4631_v27 = vmul.f32 %v14038_v61, %v4629_v15  ;;  %5045 = vmatpush.msrb.mxu3 %v13928_v45  ;;  %v5162_v16 = vand.u32 4294901760, %v5161_v34  ;;  %5092 = vmatpush.msra.mxu0 %v14196_v19  ;;  %v5167_v45 = vsub.f32 %v14190_v23, %v5166_v43  ;;  %v14226_v34 = vand.u32 4294901760, %v4672_v14  ;;  %v4668_v57 = vld [vmem:[#allocation7 + $0x28] sm:$0xff] }
 0xb49   : > { %5157 = vmatpush.msra.mxu1 %v5156_v0  ;;  %v5173_v15 = vsub.f32 %v14199_v20, %v17356_v35  ;;  %v14229_v53 = vsub.f32 %v4674_v18, %v14210_v12  ;;  %v4670_v0 = vld [vmem:[#allocation7 + $0x38] sm:$0xff]  ;;  %5006 = vmatpush.msrb.mxu2 %v4818_v42 }
 0xb4a   : > { %v4632_v49 = vadd.f32 %v4631_v27, %v4628_v21  ;;  %5047 = vmatpush.msrb.mxu3 %v13943_v36  ;;  %5094 = vmatpush.msra.mxu0 %v14210_v12  ;;  %v5168_v41 = vand.u32 4294901760, %v5167_v45  ;;  %v5179_v27 = vsub.f32 %v14213_v54, %v5178_v9  ;;  %v14239_v18 = vand.u32 4294901760, %v4670_v0 }
 0xb4b   : > { %5163 = vmatpush.msra.mxu1 %v5162_v16  ;;  %v5174_v21 = vand.u32 4294901760, %v5173_v15  ;;  %v5184_v35 = vand.u32 4294901760, %v14229_v53  ;;  %v14251_v15 = vand.u32 4294901760, %v4668_v57  ;;  %5010 = vmatpush.msrb.mxu2 %v4824_v55 }
 0xb4c   : > { %v4633_v36 = vrot.slane %v4632_v49, 4  ;;  %5049 = vmatpush.msrb.mxu3 %v13963_v25  ;;  %5096 = vmatpush.msra.mxu0 %v14226_v34  ;;  %v14245_v25 = vsub.f32 %v4672_v14, %v14226_v34  ;;  %v5180_v16 = vand.u32 4294901760, %v5179_v27  ;;  %v14254_v6 = vsub.f32 %v4670_v0, %v14239_v18 }
 0xb4d   : > { %5169 = vmatpush.msra.mxu1 %v5168_v41  ;;  %v5185_v45 = vsub.f32 %v14229_v53, %v5184_v35  ;;  %v14265_v0 = vsub.f32 %v4668_v57, %v14251_v15  ;;  %5014 = vmatpush.msrb.mxu2 %v17423_v58 }
 0xb4e   : > { %v4634_v50 = vadd.f32 %v4633_v36, %v4632_v49  ;;  %5051 = vmatpush.msrb.mxu3 %v13977_v62  ;;  %5098 = vmatpush.msra.mxu0 %v14239_v18  ;;  %v5190_v42 = vand.u32 4294901760, %v14245_v25  ;;  %v4666_v49 = vld [vmem:[#allocation7 + $0x18] sm:$0xff]  ;;  %v17357_v36 = vand.u32 4294901760, %v14254_v6 }
 0xb4f   : > { %5175 = vmatpush.msra.mxu1 %v5174_v21  ;;  %v5186_v14 = vand.u32 4294901760, %v5185_v45  ;;  %v14262_v41 = vand.u32 4294901760, %v4666_v49  ;;  %v4664_v21 = vld [vmem:[#allocation7 + $0x8] sm:$0xff]  ;;  %v5202_v57 = vand.u32 4294901760, %v14265_v0 }
 0xb50   : > { %v4635_v62 = vrot.slane %v4634_v50, 2  ;;  %5053 = vmatpush.msrb.mxu3 %v13982_v32  ;;  %5100 = vmatpush.msra.mxu0 %v14251_v15  ;;  %v5191_v32 = vsub.f32 %v14245_v25, %v5190_v42  ;;  %v5197_v27 = vsub.f32 %v14254_v6, %v17357_v36  ;;  %v14278_v45 = vand.u32 4294901760, %v4664_v21 }
 0xb51   : > { %5181 = vmatpush.msra.mxu1 %v5180_v16  ;;  %v14281_v11 = vsub.f32 %v4666_v49, %v14262_v41  ;;  %v5203_v58 = vsub.f32 %v14265_v0, %v5202_v57 }
 0xb52   : > { %v4636_v55 = vadd.f32 %v4635_v62, %v4634_v50  ;;  %5055 = vmatpush.msrb.mxu3 %v14005_v30  ;;  %5102 = vmatpush.msra.mxu0 %v14262_v41  ;;  %v17424_v30 = vand.u32 4294901760, %v14061_v51  ;;  %v5192_v16 = vand.u32 4294901760, %v5191_v32  ;;  %v5198_v62 = vand.u32 4294901760, %v5197_v27 }
 0xb53   : > { %5187 = vmatpush.msra.mxu1 %v5186_v14  ;;  %v5208_v36 = vand.u32 4294901760, %v14281_v11  ;;  %v14292_v49 = vsub.f32 %v4664_v21, %v14278_v45 }
 0xb54   : > { %5018 = vmatpush.msrb.mxu2 %v17424_v30  ;;  %v4637_v50 = vrot.slane %v4636_v55, 1  ;;  %5057 = vmatpush.msrb.mxu3 %v14008_v47  ;;  %v5204_v47 = vand.u32 4294901760, %v5203_v58 }
 0xb55   : > { %5104 = vmatpush.msra.mxu0 %v14278_v45  ;;  %5193 = vmatpush.msra.mxu1 %v5192_v16  ;;  %v5209_v14 = vsub.f32 %v14281_v11, %v5208_v36  ;;  %v5214_v32 = vand.u32 4294901760, %v14292_v49 }
 0xb56   : > { %5022 = vmatpush.msrb.mxu2 %v4842_v28  ;;  %v4638_v51 = vadd.f32 %v4637_v50, %v4636_v55  ;;  %5059 = vmatpush.msrb.mxu3 %v14025_v13 }
 0xb57   : > { %5199 = vmatpush.msra.mxu1 %v5198_v62  ;;  %v5210_v21 = vand.u32 4294901760, %v5209_v14  ;;  %v5215_v29 = vsub.f32 %v14292_v49, %v5214_v32  ;;  %v12106_v62 = vld [vmem:[%s17325_s5] ss:$0 sm:$0xff] }
 0xb58   : > { %v4639_v27 = vmul.f32 0.11111111, %v4638_v51  ;;  %5061 = vmatpush.msrb.mxu3 %v14044_v37  ;;  %v12107_v14 = vld [vmem:[%s17326_s6] ss:$0 sm:$0xff] }
 0xb59   : > { %5205 = vmatpush.msra.mxu1 %v5204_v47  ;;  %v5216_v13 = vand.u32 4294901760, %v5215_v29 }
 0xb5a   : > { %v4640_v28 = vadd.f32 1e-05, %v4639_v27  ;;  %5063 = vmatpush.msrb.mxu3 %v14053_v22 }
 0xb5b   : > { %5211 = vmatpush.msra.mxu1 %v5210_v21 }
 0xb5c   : > { %12149 = vrsqrt.f32 %v4640_v28  ;;  %vm4647_vm12 = vweird.f32 %v4640_v28 }
 0xb5d   : > { %5217 = vmatpush.msra.mxu1 %v5216_v13 }
 0xb62   : > { %v12150_v55 = vpop.eup %12149 }
 0xb63   : > { %v4642_v30 = vmul.f32 %v12150_v55, %v4640_v28  ;;  %vm4648_vm11 = vweird.f32 %v12150_v55 }
 0xb64   : > { %vm4649_vm13 = vmor %vm4647_vm12, %vm4648_vm11 }
 0xb65   : > { %v4643_v50 = vmul.f32 %v12150_v55, %v4642_v30 }
 0xb67   : > { %v4644_v16 = vmul.f32 0.5, %v4643_v50 }
 0xb69   : > { %v4645_v58 = vsub.f32 1.5, %v4644_v16 }
 0xb6b   : > { %v4646_v37 = vmul.f32 %v12150_v55, %v4645_v58 }
 0xb6d   : > { %v4650_v51 = vsel %vm4649_vm13, %v12150_v55, %v4646_v37  ;;  %v5456_v37 = vld [vmem:[#allocation8 + $0x38] sm:$0xff] }
 0xb6e   : > { %v4651_v22 = vmul.f32 %v4650_v51, %v14171_v59  ;;  %v4652_v47 = vmul.f32 %v4650_v51, %v14174_v5 }
 0xb70   : > { %v4656_v27 = vmul.f32 %v12106_v62, %v4651_v22  ;;  %v4657_v21 = vmul.f32 %v12106_v62, %v4652_v47  ;;  %v5455_v22 = vld [vmem:[#allocation8 + $0x30] sm:$0xff] }
 0xb72   : > { %v14314_v29 = vadd.f32 %v12107_v14, %v4656_v27  ;;  %v14316_v13 = vadd.f32 %v12107_v14, %v4657_v21  ;;  %v14477_v14 = vand.u32 4294901760, %v5456_v37  ;;  %v5454_v27 = vld [vmem:[#allocation8 + $0x28] sm:$0xff] }
 0xb74   : > { %v14319_v28 = vand.u32 4294901760, %v14314_v29  ;;  %v14322_v30 = vand.u32 4294901760, %v14316_v13 }
 0xb76   : > { %4847 = vmatmul.f32.vlgmr.msra.gmra.mxu3 %v14319_v28  ;;  %v14327_v59 = vsub.f32 %v14314_v29, %v14319_v28  ;;  %v14342_v50 = vsub.f32 %v14316_v13, %v14322_v30 }
 0xb77   : > { %5287 = vmatpush.msra.mxu3 %v14084_v4 }
 0xb78   : > { %4905 = vmatmul.f32.vlgmr.msrb.gmra.mxu0 %v14327_v59  ;;  %v14332_v5 = vand.u32 4294901760, %v14327_v59 }
 0xb79   : > { %5289 = vmatpush.msra.mxu3 %v14095_v40  ;;  %5334 = vmatpush.msrb.mxu0 %v5124_v48  ;;  %v14353_v48 = vand.u32 4294901760, %v14342_v50 }
 0xb7a   : > { %4949 = vmatmul.f32.vlgmr.msrb.gmra.mxu1 %v14332_v5  ;;  %v4736_v55 = vsub.f32 %v14327_v59, %v14332_v5 }
 0xb7b   : > { %5291 = vmatpush.msra.mxu3 %v14101_v3  ;;  %5338 = vmatpush.msrb.mxu0 %v5130_v46  ;;  %v5463_v46 = vld [vmem:[#allocation8 + $0x70] sm:$0xff] }
 0xb7c   : > { %5405 = vmatpush.msrb.mxu1 %v14084_v4  ;;  %v4737_v16 = vand.u32 4294901760, %v4736_v55  ;;  %v4744_v4 = vsub.f32 %v14342_v50, %v14353_v48 }
 0xb7d   : > { %5293 = vmatpush.msra.mxu3 %v14113_v2  ;;  %5342 = vmatpush.msrb.mxu0 %v5136_v8  ;;  %v5462_v8 = vld [vmem:[#allocation8 + $0x68] sm:$0xff] }
 0xb7e   : > { %5407 = vmatpush.msrb.mxu1 %v14095_v40  ;;  %4738 = vmatmul.f32.vlgmr.msra.gmra.mxu2 %v4737_v16  ;;  %v4745_v40 = vand.u32 4294901760, %v4744_v4  ;;  %v14501_v4 = vsub.f32 %v5456_v37, %v14477_v14 }
 0xb7f   : > { %4851 = vmatmul.f32.gmra.mxu3 %v14322_v30  ;;  %5229 = vmatpush.msra.mxu2 %v14093_v63  ;;  %v17425_v63 = vand.u32 4294901760, %v14152_v33 }
 0xb80   : > { %5295 = vmatpush.msra.mxu3 %v14126_v17  ;;  %5346 = vmatpush.msrb.mxu0 %v5142_v39  ;;  %v5460_v39 = vld [vmem:[#allocation8 + $0x58] sm:$0xff] }
 0xb81   : > { %5409 = vmatpush.msrb.mxu1 %v14101_v3  ;;  %4910 = vmatmul.f32.gmra.mxu0 %v14342_v50  ;;  %v17426_v3 = vand.u32 4294901760, %v14168_v60 }
 0xb82   : > { %5232 = vmatpush.msra.mxu2 %v14104_v10  ;;  %5297 = vmatpush.msra.mxu3 %v14138_v38  ;;  %v5464_v10 = vld [vmem:[#allocation8 + $0x78] sm:$0xff] }
 0xb83   : > { %5350 = vmatpush.msrb.mxu0 %v5148_v26  ;;  %5411 = vmatpush.msrb.mxu1 %v14113_v2  ;;  %v17427_v2 = vand.u32 4294901760, %v14199_v20 }
 0xb84   : > { %4955 = vmatmul.f32.gmra.mxu1 %v14353_v48  ;;  %5235 = vmatpush.msra.mxu2 %v14116_v44  ;;  %v14391_v44 = vand.u32 4294901760, %v5464_v10 }
 0xb85   : > { %5299 = vmatpush.msra.mxu3 %v14149_v7  ;;  %5354 = vmatpush.msrb.mxu0 %v17425_v63  ;;  %v14503_v63 = vand.u32 4294901760, %v5454_v27 }
 0xb86   : > { %5413 = vmatpush.msrb.mxu1 %v14126_v17  ;;  %5238 = vmatpush.msra.mxu2 %v14130_v52  ;;  %v14395_v17 = vand.u32 4294901760, %v5463_v46  ;;  %v5461_v52 = vld [vmem:[#allocation8 + $0x60] sm:$0xff] }
 0xb87   : > { %5301 = vmatpush.msra.mxu3 %v14165_v24  ;;  %5358 = vmatpush.msrb.mxu0 %v17426_v3 }
 0xb88   : > { %5415 = vmatpush.msrb.mxu1 %v14138_v38  ;;  %4746 = vmatmul.f32.gmra.mxu2 %v4745_v40  ;;  %v14403_v38 = vsub.f32 %v5464_v10, %v14391_v44  ;;  %v14413_v26 = vsub.f32 %v5463_v46, %v14395_v17  ;;  %v5584_v46 = vand.u32 4294901760, %v14501_v4 }
 0xb89   : > { %5065 = vmatmul.f32.vlgmr.msrb.gmra.mxu3 %v14319_v28  ;;  %5241 = vmatpush.msra.mxu2 %v14141_v1  ;;  %v14405_v1 = vand.u32 4294901760, %v5462_v8 }
 0xb8a   : > { %5303 = vmatpush.msra.mxu3 %v14184_v31  ;;  %5362 = vmatpush.msrb.mxu0 %v5166_v43 }
 0xb8b   : > { %5417 = vmatpush.msrb.mxu1 %v14149_v7  ;;  %5110 = vmatmul.f32.vlgmr.msra.gmra.mxu0 %v4737_v16  ;;  %v14415_v7 = vand.u32 4294901760, %v5461_v52  ;;  %v14491_v16 = vand.u32 4294901760, %v5455_v22 }
 0xb8c   : > { %5244 = vmatpush.msra.mxu2 %v14152_v33  ;;  %5305 = vmatpush.msra.mxu3 %v14196_v19  ;;  %v5459_v33 = vld [vmem:[#allocation8 + $0x50] sm:$0xff] }
 0xb8d   : > { %5366 = vmatpush.msrb.mxu0 %v17427_v2  ;;  %5419 = vmatpush.msrb.mxu1 %v14165_v24  ;;  %v5536_v24 = vand.u32 4294901760, %v14403_v38  ;;  %v14435_v43 = vsub.f32 %v5461_v52, %v14415_v7  ;;  %v14513_v3 = vsub.f32 %v5455_v22, %v14491_v16  ;;  %v14525_v2 = vsub.f32 %v5454_v27, %v14503_v63  ;;  %v5451_v27 = vld [vmem:[#allocation8 + $0x10] sm:$0xff] }
 0xb8e   : > { %5219 = vmatmul.f32.vlgmr.msra.gmra.mxu1 %v14319_v28  ;;  %5247 = vmatpush.msra.mxu2 %v14168_v60  ;;  %v14424_v60 = vsub.f32 %v5462_v8, %v14405_v1 }
 0xb8f   : > { %5307 = vmatpush.msra.mxu3 %v14210_v12  ;;  %5370 = vmatpush.msrb.mxu0 %v5178_v9  ;;  %v5554_v62 = vand.u32 4294901760, %v14435_v43  ;;  %v5590_v8 = vand.u32 4294901760, %v14513_v3 }
 0xb90   : > { %5421 = vmatpush.msrb.mxu1 %v14184_v31  ;;  %5250 = vmatpush.msra.mxu2 %v14190_v23  ;;  %v14426_v31 = vand.u32 4294901760, %v5460_v39  ;;  %v5458_v23 = vld [vmem:[#allocation8 + $0x48] sm:$0xff] }
 0xb91   : > { %5309 = vmatpush.msra.mxu3 %v14226_v34  ;;  %5374 = vmatpush.msrb.mxu0 %v5184_v35  ;;  %v17428_v35 = vand.u32 4294901760, %v14254_v6  ;;  %v14440_v9 = vand.u32 4294901760, %v5458_v23  ;;  %v5555_v21 = vsub.f32 %v14435_v43, %v5554_v62 }
 0xb92   : > { %5423 = vmatpush.msrb.mxu1 %v14196_v19  ;;  %5024 = vmatmul.f32.vlgmr.msrb.gmra.mxu2 %v14319_v28  ;;  %v14429_v19 = vand.u32 4294901760, %v5459_v33  ;;  %v14449_v58 = vsub.f32 %v5460_v39, %v14426_v31  ;;  %v5585_v39 = vsub.f32 %v14501_v4, %v5584_v46 }
 0xb93   : > { %5069 = vmatmul.f32.gmra.mxu3 %v14322_v30  ;;  %5253 = vmatpush.msra.mxu2 %v14199_v20  ;;  %v5542_v20 = vand.u32 4294901760, %v14413_v26 }
 0xb94   : > { %5311 = vmatpush.msra.mxu3 %v14239_v18  ;;  %5378 = vmatpush.msrb.mxu0 %v5190_v42  ;;  %v5548_v42 = vand.u32 4294901760, %v14424_v60  ;;  %v5560_v47 = vand.u32 4294901760, %v14449_v58 }
 0xb95   : > { %5425 = vmatpush.msrb.mxu1 %v14210_v12  ;;  %5118 = vmatmul.f32.gmra.mxu0 %v4745_v40  ;;  %v5457_v12 = vld [vmem:[#allocation8 + $0x40] sm:$0xff] }
 0xb96   : > { %5256 = vmatpush.msra.mxu2 %v14213_v54  ;;  %5313 = vmatpush.msra.mxu3 %v14251_v15  ;;  %v5537_v54 = vsub.f32 %v14403_v38, %v5536_v24  ;;  %v14463_v51 = vand.u32 4294901760, %v5457_v12 }
 0xb97   : > { %5382 = vmatpush.msrb.mxu0 %v17428_v35  ;;  %5427 = vmatpush.msrb.mxu1 %v14226_v34  ;;  %v14455_v34 = vsub.f32 %v5459_v33, %v14429_v19  ;;  %v5596_v33 = vand.u32 4294901760, %v14525_v2  ;;  %v5591_v35 = vsub.f32 %v14513_v3, %v5590_v8 }
 0xb98   : > { %5223 = vmatmul.f32.gmra.mxu1 %v14322_v30  ;;  %5259 = vmatpush.msra.mxu2 %v14229_v53  ;;  %v5543_v53 = vsub.f32 %v14413_v26, %v5542_v20  ;;  %v14489_v55 = vsub.f32 %v5457_v12, %v14463_v51 }
 0xb99   : > { %5315 = vmatpush.msra.mxu3 %v14262_v41  ;;  %5386 = vmatpush.msrb.mxu0 %v5202_v57  ;;  %v14469_v57 = vsub.f32 %v5458_v23, %v14440_v9  ;;  %v5592_v37 = vand.u32 4294901760, %v5591_v35 }
 0xb9a   : > { %5429 = vmatpush.msrb.mxu1 %v14239_v18  ;;  %5262 = vmatpush.msra.mxu2 %v14245_v25  ;;  %v5538_v18 = vand.u32 4294901760, %v5537_v54  ;;  %v5549_v25 = vsub.f32 %v14424_v60, %v5548_v42  ;;  %v5578_v40 = vand.u32 4294901760, %v14489_v55  ;;  %v5597_v54 = vsub.f32 %v14525_v2, %v5596_v33 }
 0xb9b   : > { %5317 = vmatpush.msra.mxu3 %v14278_v45  ;;  %5390 = vmatpush.msrb.mxu0 %v5208_v36  ;;  %v5566_v36 = vand.u32 4294901760, %v14455_v34 }
 0xb9c   : > { %5431 = vmatpush.msrb.mxu1 %v14251_v15  ;;  %5028 = vmatmul.f32.gmra.mxu2 %v14322_v30  ;;  %v5544_v15 = vand.u32 4294901760, %v5543_v53 }
 0xb9d   : > { %5321 = vmatmul.f32.vlgmr.msra.gmra.mxu3 %v14332_v5  ;;  %5265 = vmatpush.msra.mxu2 %v14254_v6  ;;  %v5572_v6 = vand.u32 4294901760, %v14469_v57  ;;  %v5453_v5 = vld [vmem:[#allocation8 + $0x20] sm:$0xff] }
 0xb9e   : > { %5394 = vmatpush.msrb.mxu0 %v5214_v32  ;;  %5433 = vmatpush.msrb.mxu1 %v14262_v41  ;;  %v5550_v41 = vand.u32 4294901760, %v5549_v25  ;;  %v5561_v32 = vsub.f32 %v14449_v58, %v5560_v47  ;;  %v14515_v10 = vand.u32 4294901760, %v5453_v5 }
 0xb9f   : > { %5396 = vmatmul.f32.vlgmr.msrb.gmra.mxu0 %v14319_v28  ;;  %5268 = vmatpush.msra.mxu2 %v14265_v0  ;;  %v5567_v0 = vsub.f32 %v14455_v34, %v5566_v36 }
 0xba0   : > { %5435 = vmatpush.msrb.mxu1 %v14278_v45  ;;  %5539 = vmatpush.msrb.mxu3 %v5538_v18  ;;  %v5556_v45 = vand.u32 4294901760, %v5555_v21  ;;  %v14535_v52 = vsub.f32 %v5453_v5, %v14515_v10  ;;  %v5452_v18 = vld [vmem:[#allocation8 + $0x18] sm:$0xff]  ;;  %v14591_v21 = vand.u32 4294901760, %v5451_v27  ;;  %v5450_v5 = vld [vmem:[#allocation8 + $0x8] sm:$0xff] }
 0xba1   : > { %5437 = vmatmul.f32.vlgmr.msrb.gmra.mxu1 %v14319_v28  ;;  %5271 = vmatpush.msra.mxu2 %v14281_v11  ;;  %v5562_v11 = vand.u32 4294901760, %v5561_v32  ;;  %v5573_v28 = vsub.f32 %v14469_v57, %v5572_v6  ;;  %v14586_v25 = vand.u32 4294901760, %v5452_v18 }
 0xba2   : > { %5545 = vmatpush.msrb.mxu3 %v5544_v15  ;;  %5699 = vmatpush.msra.mxu1 %v14391_v44  ;;  %v5602_v12 = vand.u32 4294901760, %v14535_v52  ;;  %v14597_v32 = vsub.f32 %v5451_v27, %v14591_v21 }
 0xba3   : > { %5274 = vmatpush.msra.mxu2 %v14292_v49  ;;  %5641 = vmatpush.msra.mxu0 %v14403_v38  ;;  %v5568_v49 = vand.u32 4294901760, %v5567_v0  ;;  %v14589_v15 = vsub.f32 %v5452_v18, %v14586_v25  ;;  %v14599_v0 = vand.u32 4294901760, %v5450_v5 }
 0xba4   : > { %5277 = vmatmul.f32.vlgmr.msra.gmra.mxu2 %v14327_v59  ;;  %5551 = vmatpush.msrb.mxu3 %v5550_v41  ;;  %v5579_v59 = vsub.f32 %v14489_v55, %v5578_v40  ;;  %v5603_v53 = vsub.f32 %v14535_v52, %v5602_v12 }
 0xba5   : > { %5327 = vmatmul.f32.gmra.mxu3 %v14353_v48  ;;  %5701 = vmatpush.msra.mxu1 %v14395_v17  ;;  %v5574_v48 = vand.u32 4294901760, %v5573_v28  ;;  %v5608_v41 = vand.u32 4294901760, %v14589_v15  ;;  %v5614_v28 = vand.u32 4294901760, %v14597_v32 }
 0xba6   : > { %5557 = vmatpush.msrb.mxu3 %v5556_v45  ;;  %5486 = vmatpush.msrb.mxu2 %v14391_v44  ;;  %v5580_v23 = vand.u32 4294901760, %v5579_v59  ;;  %v5604_v22 = vand.u32 4294901760, %v5603_v53  ;;  %v5449_v45 = vld [vmem:[#allocation8] sm:$0xff]  ;;  %v5480_v53 = vld [vmem:[#allocation8 + $0xf8] sm:$0xff] }
 0xba7   : > { %5400 = vmatmul.f32.gmra.mxu0 %v14322_v30  ;;  %5703 = vmatpush.msra.mxu1 %v14405_v1  ;;  %v14611_v59 = vand.u32 4294901760, %v5449_v45 }
 0xba8   : > { %5563 = vmatpush.msrb.mxu3 %v5562_v11  ;;  %5488 = vmatpush.msrb.mxu2 %v14395_v17  ;;  %v5609_v11 = vsub.f32 %v14589_v15, %v5608_v41 }
 0xba9   : > { %5441 = vmatmul.f32.gmra.mxu1 %v14322_v30  ;;  %5644 = vmatpush.msra.mxu0 %v14413_v26  ;;  %v5586_v30 = vand.u32 4294901760, %v5585_v39  ;;  %v5615_v39 = vsub.f32 %v14597_v32, %v5614_v28  ;;  %v14621_v35 = vsub.f32 %v5449_v45, %v14611_v59 }
 0xbaa   : > { %5569 = vmatpush.msrb.mxu3 %v5568_v49  ;;  %5705 = vmatpush.msra.mxu1 %v14415_v7  ;;  %v14609_v49 = vsub.f32 %v5450_v5, %v14599_v0 }
 0xbab   : > { %5490 = vmatpush.msrb.mxu2 %v14405_v1  ;;  %5647 = vmatpush.msra.mxu0 %v14424_v60  ;;  %v5477_v60 = vld [vmem:[#allocation8 + $0xe0] sm:$0xff] }
 0xbac   : > { %5282 = vmatmul.f32.gmra.mxu2 %v14342_v50  ;;  %5575 = vmatpush.msrb.mxu3 %v5574_v48  ;;  %v5598_v50 = vand.u32 4294901760, %v5597_v54  ;;  %v5610_v48 = vand.u32 4294901760, %v5609_v11 }
 0xbad   : > { %5707 = vmatpush.msra.mxu1 %v14426_v31  ;;  %5492 = vmatpush.msrb.mxu2 %v14415_v7 }
 0xbae   : > { %5581 = vmatpush.msrb.mxu3 %v5580_v23  ;;  %5650 = vmatpush.msra.mxu0 %v14435_v43  ;;  %v5620_v23 = vand.u32 4294901760, %v14609_v49  ;;  %v5476_v43 = vld [vmem:[#allocation8 + $0xd8] sm:$0xff] }
 0xbaf   : > { %5709 = vmatpush.msra.mxu1 %v14429_v19  ;;  %5494 = vmatpush.msrb.mxu2 %v14426_v31 }
 0xbb0   : > { %5587 = vmatpush.msrb.mxu3 %v5586_v30  ;;  %5653 = vmatpush.msra.mxu0 %v14449_v58  ;;  %v5616_v30 = vand.u32 4294901760, %v5615_v39  ;;  %v5621_v54 = vsub.f32 %v14609_v49, %v5620_v23  ;;  %v14680_v58 = vand.u32 4294901760, %v5476_v43 }
 0xbb1   : > { %5711 = vmatpush.msra.mxu1 %v14440_v9  ;;  %5496 = vmatpush.msrb.mxu2 %v14429_v19 }
 0xbb2   : > { %5593 = vmatpush.msrb.mxu3 %v5592_v37  ;;  %5656 = vmatpush.msra.mxu0 %v14455_v34  ;;  %v5626_v37 = vand.u32 4294901760, %v14621_v35  ;;  %v5622_v38 = vand.u32 4294901760, %v5621_v54  ;;  %v14691_v34 = vsub.f32 %v5476_v43, %v14680_v58  ;;  %v5473_v43 = vld [vmem:[#allocation8 + $0xc0] sm:$0xff] }
 0xbb3   : > { %5713 = vmatpush.msra.mxu1 %v14463_v51  ;;  %5498 = vmatpush.msrb.mxu2 %v14440_v9 }
 0xbb4   : > { %5599 = vmatpush.msrb.mxu3 %v5598_v50  ;;  %5659 = vmatpush.msra.mxu0 %v14469_v57  ;;  %v14632_v50 = vand.u32 4294901760, %v5480_v53 }
 0xbb5   : > { %5715 = vmatpush.msra.mxu1 %v14477_v14  ;;  %5500 = vmatpush.msrb.mxu2 %v14463_v51 }
 0xbb6   : > { %5605 = vmatpush.msrb.mxu3 %v5604_v22  ;;  %5662 = vmatpush.msra.mxu0 %v14489_v55  ;;  %v5479_v22 = vld [vmem:[#allocation8 + $0xf0] sm:$0xff]  ;;  %v14641_v18 = vsub.f32 %v5480_v53, %v14632_v50 }
 0xbb7   : > { %5717 = vmatpush.msra.mxu1 %v14491_v16  ;;  %5502 = vmatpush.msrb.mxu2 %v14477_v14  ;;  %v14643_v27 = vand.u32 4294901760, %v5479_v22 }
 0xbb8   : > { %5665 = vmatpush.msra.mxu0 %v14501_v4  ;;  %5611 = vmatpush.msrb.mxu3 %v5610_v48  ;;  %v5908_v5 = vand.u32 4294901760, %v14641_v18 }
 0xbb9   : > { %5719 = vmatpush.msra.mxu1 %v14503_v63  ;;  %5504 = vmatpush.msrb.mxu2 %v14491_v16  ;;  %v14650_v45 = vsub.f32 %v5479_v22, %v14643_v27 }
 0xbba   : > { %5668 = vmatpush.msra.mxu0 %v14513_v3  ;;  %5617 = vmatpush.msrb.mxu3 %v5616_v30  ;;  %v14665_v30 = vand.u32 4294901760, %v5477_v60 }
 0xbbb   : > { %5721 = vmatpush.msra.mxu1 %v14515_v10  ;;  %5506 = vmatpush.msrb.mxu2 %v14503_v63  ;;  %v5914_v48 = vand.u32 4294901760, %v14650_v45 }
 0xbbc   : > { %5671 = vmatpush.msra.mxu0 %v14525_v2  ;;  %5623 = vmatpush.msrb.mxu3 %v5622_v38  ;;  %v14676_v53 = vsub.f32 %v5477_v60, %v14665_v30 }
 0xbbd   : > { %5508 = vmatpush.msrb.mxu2 %v14515_v10  ;;  %5723 = vmatpush.msra.mxu1 %v14586_v25 }
 0xbbe   : > { %5674 = vmatpush.msra.mxu0 %v14535_v52 }
 0xbbf   : > { %5510 = vmatpush.msrb.mxu2 %v14586_v25  ;;  %5725 = vmatpush.msra.mxu1 %v14591_v21 }
 0xbc0   : > { %5677 = vmatpush.msra.mxu0 %v14589_v15 }
 0xbc1   : > { %5512 = vmatpush.msrb.mxu2 %v14591_v21  ;;  %5727 = vmatpush.msra.mxu1 %v14599_v0 }
 0xbc2   : > { %5680 = vmatpush.msra.mxu0 %v14597_v32 }
 0xbc3   : > { %5514 = vmatpush.msrb.mxu2 %v14599_v0  ;;  %5729 = vmatpush.msra.mxu1 %v14611_v59 }
 0xbc4   : > { %5683 = vmatpush.msra.mxu0 %v14609_v49 }
 0xbc5   : > { %5516 = vmatpush.msrb.mxu2 %v14611_v59 }
 0xbc6   : > { %5686 = vmatpush.msra.mxu0 %v14621_v35 }
 0xbc7   : > { %5746 = vmatpush.msra.mxu2 %v5536_v24  ;;  %v5627_v24 = vsub.f32 %v14621_v35, %v5626_v37 }
 0xbc8   : > { %5858 = vmatpush.msrb.mxu0 %v14632_v50 }
 0xbc9   : > { %5750 = vmatpush.msra.mxu2 %v5542_v20  ;;  %v5628_v26 = vand.u32 4294901760, %v5627_v24  ;;  %v5478_v20 = vld [vmem:[#allocation8 + $0xe8] sm:$0xff]  ;;  %v17370_v24 = vand.u32 4294901760, %v14676_v53 }
 0xbca   : > { %v14652_v11 = vand.u32 4294901760, %v5478_v20  ;;  %5860 = vmatpush.msrb.mxu0 %v14643_v27 }
 0xbcb   : > { %5754 = vmatpush.msra.mxu2 %v5548_v42  ;;  %5629 = vmatpush.msrb.mxu3 %v5628_v26  ;;  %v5909_v42 = vsub.f32 %v14641_v18, %v5908_v5  ;;  %v5927_v26 = vsub.f32 %v14676_v53, %v17370_v24 }
 0xbcc   : > { %v14663_v39 = vsub.f32 %v5478_v20, %v14652_v11  ;;  %5862 = vmatpush.msrb.mxu0 %v14652_v11 }
 0xbcd   : > { %5758 = vmatpush.msra.mxu2 %v5554_v62  ;;  %5817 = vmatpush.msra.mxu3 %v14391_v44  ;;  %v5910_v44 = vand.u32 4294901760, %v5909_v42  ;;  %v5915_v62 = vsub.f32 %v14650_v45, %v5914_v48  ;;  %v17369_v42 = vand.u32 4294901760, %v14691_v34 }
 0xbce   : > { %v17371_v54 = vand.u32 4294901760, %v14663_v39  ;;  %5864 = vmatpush.msrb.mxu0 %v14665_v30 }
 0xbcf   : > { %5762 = vmatpush.msra.mxu2 %v5560_v47  ;;  %5819 = vmatpush.msra.mxu3 %v14395_v17  ;;  %v5475_v47 = vld [vmem:[#allocation8 + $0xd0] sm:$0xff]  ;;  %v5916_v17 = vand.u32 4294901760, %v5915_v62  ;;  %v5933_v62 = vsub.f32 %v14691_v34, %v17369_v42 }
 0xbd0   : > { %5911 = vmatpush.msrb.mxu1 %v5910_v44  ;;  %v5921_v38 = vsub.f32 %v14663_v39, %v17371_v54  ;;  %v14688_v22 = vand.u32 4294901760, %v5475_v47  ;;  %5866 = vmatpush.msrb.mxu0 %v14680_v58  ;;  %v14714_v44 = vand.u32 4294901760, %v5473_v43 }
 0xbd1   : > { %5766 = vmatpush.msra.mxu2 %v5566_v36  ;;  %5821 = vmatpush.msra.mxu3 %v14405_v1  ;;  %v5474_v36 = vld [vmem:[#allocation8 + $0xc8] sm:$0xff] }
 0xbd2   : > { %5917 = vmatpush.msrb.mxu1 %v5916_v17  ;;  %v5922_v1 = vand.u32 4294901760, %v5921_v38  ;;  %v14701_v20 = vsub.f32 %v5475_v47, %v14688_v22  ;;  %v14703_v60 = vand.u32 4294901760, %v5474_v36  ;;  %5868 = vmatpush.msrb.mxu0 %v14688_v22  ;;  %v5472_v47 = vld [vmem:[#allocation8 + $0xb8] sm:$0xff]  ;;  %v5934_v38 = vand.u32 4294901760, %v5933_v62 }
 0xbd3   : > { %5770 = vmatpush.msra.mxu2 %v5572_v6  ;;  %5823 = vmatpush.msra.mxu3 %v14415_v7  ;;  %v5928_v7 = vand.u32 4294901760, %v5927_v26  ;;  %v14730_v17 = vand.u32 4294901760, %v5472_v47 }
 0xbd4   : > { %5923 = vmatpush.msrb.mxu1 %v5922_v1  ;;  %v17367_v57 = vand.u32 4294901760, %v14701_v20  ;;  %v14712_v6 = vsub.f32 %v5474_v36, %v14703_v60  ;;  %5870 = vmatpush.msrb.mxu0 %v14703_v60  ;;  %v5471_v36 = vld [vmem:[#allocation8 + $0xb0] sm:$0xff] }
 0xbd5   : > { %5774 = vmatpush.msra.mxu2 %v5578_v40  ;;  %5825 = vmatpush.msra.mxu3 %v14426_v31  ;;  %v14728_v40 = vsub.f32 %v5473_v43, %v14714_v44  ;;  %v14741_v1 = vsub.f32 %v5472_v47, %v14730_v17  ;;  %v14743_v26 = vand.u32 4294901760, %v5471_v36  ;;  %v5470_v43 = vld [vmem:[#allocation8 + $0xa8] sm:$0xff]  ;;  %v5469_v47 = vld [vmem:[#allocation8 + $0xa0] sm:$0xff] }
 0xbd6   : > { %5929 = vmatpush.msrb.mxu1 %v5928_v7  ;;  %v5939_v31 = vsub.f32 %v14701_v20, %v17367_v57  ;;  %v17366_v55 = vand.u32 4294901760, %v14712_v6  ;;  %5872 = vmatpush.msrb.mxu0 %v14714_v44  ;;  %v14752_v7 = vand.u32 4294901760, %v5470_v43 }
 0xbd7   : > { %5778 = vmatpush.msra.mxu2 %v5584_v46  ;;  %5827 = vmatpush.msra.mxu3 %v14429_v19  ;;  %v17365_v46 = vand.u32 4294901760, %v14728_v40  ;;  %v14756_v62 = vsub.f32 %v5471_v36, %v14743_v26  ;;  %v5468_v36 = vld [vmem:[#allocation8 + $0x98] sm:$0xff] }
 0xbd8   : > { %v5940_v19 = vand.u32 4294901760, %v5939_v31  ;;  %v5945_v4 = vsub.f32 %v14712_v6, %v17366_v55  ;;  %5935 = vmatpush.msrb.mxu1 %v5934_v38  ;;  %5874 = vmatpush.msrb.mxu0 %v14730_v17  ;;  %v14767_v31 = vand.u32 4294901760, %v5469_v47 }
 0xbd9   : > { %5782 = vmatpush.msra.mxu2 %v5590_v8  ;;  %5829 = vmatpush.msra.mxu3 %v14440_v9  ;;  %v5951_v3 = vsub.f32 %v14728_v40, %v17365_v46  ;;  %v17364_v8 = vand.u32 4294901760, %v14741_v1  ;;  %v17363_v38 = vand.u32 4294901760, %v14756_v62 }
 0xbda   : > { %v5946_v9 = vand.u32 4294901760, %v5945_v4  ;;  %5941 = vmatpush.msrb.mxu1 %v5940_v19  ;;  %5876 = vmatpush.msrb.mxu0 %v14743_v26  ;;  %v14778_v19 = vand.u32 4294901760, %v5468_v36 }
 0xbdb   : > { %5786 = vmatpush.msra.mxu2 %v5596_v33  ;;  %5831 = vmatpush.msra.mxu3 %v14463_v51  ;;  %v5952_v51 = vand.u32 4294901760, %v5951_v3  ;;  %v5957_v2 = vsub.f32 %v14741_v1, %v17364_v8  ;;  %v14765_v33 = vsub.f32 %v5470_v43, %v14752_v7  ;;  %v5963_v4 = vsub.f32 %v14756_v62, %v17363_v38  ;;  %v5467_v43 = vld [vmem:[#allocation8 + $0x90] sm:$0xff] }
 0xbdc   : > { %5947 = vmatpush.msrb.mxu1 %v5946_v9  ;;  %5878 = vmatpush.msrb.mxu0 %v14752_v7  ;;  %v14794_v9 = vand.u32 4294901760, %v5467_v43 }
 0xbdd   : > { %5790 = vmatpush.msra.mxu2 %v5602_v12  ;;  %5833 = vmatpush.msra.mxu3 %v14477_v14  ;;  %v5958_v14 = vand.u32 4294901760, %v5957_v2  ;;  %v17362_v52 = vand.u32 4294901760, %v14765_v33  ;;  %v14776_v12 = vsub.f32 %v5469_v47, %v14767_v31  ;;  %v5964_v3 = vand.u32 4294901760, %v5963_v4  ;;  %v5466_v47 = vld [vmem:[#allocation8 + $0x88] sm:$0xff] }
 0xbde   : > { %5953 = vmatpush.msrb.mxu1 %v5952_v51  ;;  %5880 = vmatpush.msrb.mxu0 %v14767_v31  ;;  %v14805_v51 = vsub.f32 %v5467_v43, %v14794_v9  ;;  %v14808_v2 = vand.u32 4294901760, %v5466_v47 }
 0xbdf   : > { %5794 = vmatpush.msra.mxu2 %v5608_v41  ;;  %5835 = vmatpush.msra.mxu3 %v14491_v16  ;;  %v5969_v16 = vsub.f32 %v14765_v33, %v17362_v52  ;;  %v17361_v15 = vand.u32 4294901760, %v14776_v12  ;;  %v14792_v41 = vsub.f32 %v5468_v36, %v14778_v19  ;;  %v5465_v36 = vld [vmem:[#allocation8 + $0x80] sm:$0xff] }
 0xbe0   : > { %5959 = vmatpush.msrb.mxu1 %v5958_v14  ;;  %5882 = vmatpush.msrb.mxu0 %v14778_v19  ;;  %v14817_v14 = vand.u32 4294901760, %v5465_v36  ;;  %v14821_v4 = vsub.f32 %v5466_v47, %v14808_v2 }
 0xbe1   : > { %5798 = vmatpush.msra.mxu2 %v5614_v28  ;;  %5837 = vmatpush.msra.mxu3 %v14503_v63  ;;  %v5970_v63 = vand.u32 4294901760, %v5969_v16  ;;  %v5975_v32 = vsub.f32 %v14776_v12, %v17361_v15  ;;  %v17360_v28 = vand.u32 4294901760, %v14792_v41 }
 0xbe2   : > { %5965 = vmatpush.msrb.mxu1 %v5964_v3  ;;  %5884 = vmatpush.msrb.mxu0 %v14794_v9  ;;  %v17358_v43 = vand.u32 4294901760, %v14821_v4 }
 0xbe3   : > { %5802 = vmatpush.msra.mxu2 %v5620_v23  ;;  %5839 = vmatpush.msra.mxu3 %v14515_v10  ;;  %v5976_v10 = vand.u32 4294901760, %v5975_v32  ;;  %v5981_v49 = vsub.f32 %v14792_v41, %v17360_v28  ;;  %v17359_v23 = vand.u32 4294901760, %v14805_v51  ;;  %v14841_v32 = vld [vmem:[%s17328_s8] sm:$0x3] }
 0xbe4   : > { %5971 = vmatpush.msrb.mxu1 %v5970_v63  ;;  %5886 = vmatpush.msrb.mxu0 %v14808_v2 }
 0xbe5   : > { %5806 = vmatpush.msra.mxu2 %v5626_v37  ;;  %5841 = vmatpush.msra.mxu3 %v14586_v25  ;;  %v5982_v35 = vand.u32 4294901760, %v5981_v49  ;;  %v5987_v25 = vsub.f32 %v14805_v51, %v17359_v23  ;;  %v14828_v37 = vsub.f32 %v5465_v36, %v14817_v14 }
 0xbe6   : > { %5977 = vmatpush.msrb.mxu1 %v5976_v10  ;;  %5888 = vmatpush.msrb.mxu0 %v14817_v14 }
 0xbe7   : > { %5843 = vmatpush.msra.mxu3 %v14591_v21  ;;  %v5988_v3 = vand.u32 4294901760, %v5987_v25  ;;  %v17368_v47 = vand.u32 4294901760, %v14828_v37  ;;  %v5993_v21 = vsub.f32 %v14821_v4, %v17358_v43  ;;  %v4697_v25 = vperm.slane %v14841_v32, 0 }
 0xbe8   : > { %5983 = vmatpush.msrb.mxu1 %v5982_v35 }
 0xbe9   : > { %5845 = vmatpush.msra.mxu3 %v14599_v0  ;;  %v5999_v0 = vsub.f32 %v14828_v37, %v17368_v47  ;;  %v5994_v10 = vand.u32 4294901760, %v5993_v21 }
 0xbea   : > { %5989 = vmatpush.msrb.mxu1 %v5988_v3 }
 0xbeb   : > { %5847 = vmatpush.msra.mxu3 %v14611_v59  ;;  %v6000_v35 = vand.u32 4294901760, %v5999_v0 }
 0xbec   : > { %5995 = vmatpush.msrb.mxu1 %v5994_v10 }
 0xbee   : > { %6001 = vmatpush.msrb.mxu1 %v6000_v35  ;;  %v4698_v35 = vperm.slane %v14841_v32, 1 }
 0xbf5   : > { %v4906_v63 = vpop.f32.mrf.mxu0 }
 0xbf7   : > { %v4950_v49 = vpop.f32.mrf.mxu1 }
 0xbf9   : > { %v4848_v16 = vpop.f32.mrf.mxu3 }
 0xbfe   : > { %v4911_v28 = vpop.f32.mrf.mxu0 }
 0xc01   : > { %v4739_v36 = vpop.f32.mrf.mxu2  ;;  %v4956_v38 = vpop.f32.mrf.mxu1 }
 0xc02   : > { %v4740_v43 = vadd.f32 %v4739_v36, %v4697_v25  ;;  %v4852_v23 = vpop.f32.mrf.mxu3 }
 0xc04   : > { %v4849_v52 = vadd.f32 %v4848_v16, %v4740_v43 }
 0xc06   : > { %v4907_v8 = vadd.f32 %v4906_v63, %v4849_v52 }
 0xc08   : > { %v4951_v55 = vadd.f32 %v4950_v49, %v4907_v8  ;;  %v5111_v57 = vpop.f32.mrf.mxu0 }
 0xc0b   : > { %v4747_v15 = vpop.f32.mrf.mxu2  ;;  %v5220_v42 = vpop.f32.mrf.mxu1 }
 0xc0c   : > { %v4748_v59 = vadd.f32 %v4747_v15, %v4697_v25  ;;  %v5066_v46 = vpop.f32.mrf.mxu3 }
 0xc0e   : > { %v4853_v3 = vadd.f32 %v4852_v23, %v4748_v59 }
 0xc10   : > { %v4912_v54 = vadd.f32 %v4911_v28, %v4853_v3  ;;  %v5112_v28 = vadd.f32 %v5111_v57, %v4698_v35  ;;  %v17430_v3 = vand.u32 4294901760, %v14676_v53 }
 0xc12   : > { %v4957_v16 = vadd.f32 %v4956_v38, %v4912_v54  ;;  %v5119_v52 = vpop.f32.mrf.mxu0  ;;  %v5221_v38 = vadd.f32 %v5220_v42, %v5112_v28  ;;  %v17437_v28 = vand.u32 4294901760, %v14765_v33 }
 0xc13   : > { %v5120_v42 = vadd.f32 %v5119_v52, %v4698_v35 }
 0xc15   : > { %v5025_v47 = vpop.f32.mrf.mxu2 }
 0xc16   : > { %v5026_v21 = vadd.f32 %v5025_v47, %v4951_v55  ;;  %v5070_v36 = vpop.f32.mrf.mxu3 }
 0xc18   : > { %v5067_v0 = vadd.f32 %v5066_v46, %v5026_v21  ;;  %v5224_v46 = vpop.f32.mrf.mxu1 }
 0xc1a   : > { %v5445_v24 = vmax.f32 %v5067_v0, 0.0  ;;  %v17431_v0 = vand.u32 4294901760, %v14691_v34 }
 0xc1c   : > { %v14848_v10 = vand.u32 4294901760, %v5445_v24 }
 0xc1e   : > { %v5518_v43 = vsub.f32 %v5445_v24, %v14848_v10  ;;  %5631 = vmatmul.f32.vlgmr.msrb.gmra.mxu3 %v14848_v10 }
 0xc1f   : > { %v5029_v8 = vpop.f32.mrf.mxu2  ;;  %6071 = vmatpush.msrb.mxu3 %v14632_v50 }
 0xc20   : > { %v5519_v15 = vand.u32 4294901760, %v5518_v43  ;;  %v5030_v55 = vadd.f32 %v5029_v8, %v4957_v16  ;;  %5689 = vmatmul.f32.vlgmr.msra.gmra.mxu0 %v5518_v43  ;;  %v5322_v57 = vpop.f32.mrf.mxu3  ;;  %v5438_v25 = vpop.f32.mrf.mxu1  ;;  %v17432_v16 = vand.u32 4294901760, %v14701_v20 }
 0xc21   : > { %6073 = vmatpush.msrb.mxu3 %v14643_v27  ;;  %6118 = vmatpush.msra.mxu0 %v5908_v5  ;;  %v17429_v5 = vand.u32 4294901760, %v14663_v39 }
 0xc22   : > { %v5520_v23 = vsub.f32 %v5518_v43, %v5519_v15  ;;  %v5071_v47 = vadd.f32 %v5070_v36, %v5030_v55  ;;  %5733 = vmatmul.f32.vlgmr.msra.gmra.mxu1 %v5519_v15 }
 0xc23   : > { %6075 = vmatpush.msrb.mxu3 %v14652_v11  ;;  %6189 = vmatpush.msra.mxu1 %v14632_v50 }
 0xc24   : > { %v5521_v54 = vand.u32 4294901760, %v5520_v23  ;;  %v5447_v24 = vmax.f32 %v5071_v47, 0.0  ;;  %6122 = vmatpush.msra.mxu0 %v5914_v48  ;;  %v5397_v48 = vpop.f32.mrf.mxu0 }
 0xc25   : > { %6077 = vmatpush.msrb.mxu3 %v14665_v30  ;;  %6191 = vmatpush.msra.mxu1 %v14643_v27 }
 0xc26   : > { %v14863_v63 = vand.u32 4294901760, %v5447_v24  ;;  %5522 = vmatmul.f32.vlgmr.msrb.gmra.mxu2 %v5521_v54  ;;  %6126 = vmatpush.msra.mxu0 %v17429_v5 }
 0xc27   : > { %v5278_v32 = vpop.f32.mrf.mxu2  ;;  %6013 = vmatpush.msrb.mxu2 %v14641_v18  ;;  %6079 = vmatpush.msrb.mxu3 %v14680_v58 }
 0xc28   : > { %v5279_v50 = vadd.f32 %v5278_v32, %v5221_v38  ;;  %5635 = vmatmul.f32.gmra.mxu3 %v14863_v63  ;;  %6193 = vmatpush.msra.mxu1 %v14652_v11  ;;  %v5526_v27 = vsub.f32 %v5447_v24, %v14863_v63 }
 0xc29   : > { %6016 = vmatpush.msrb.mxu2 %v14650_v45  ;;  %6081 = vmatpush.msrb.mxu3 %v14688_v22  ;;  %v5225_v45 = vadd.f32 %v5224_v46, %v5120_v42 }
 0xc2a   : > { %v5323_v49 = vadd.f32 %v5322_v57, %v5279_v50  ;;  %5694 = vmatmul.f32.gmra.mxu0 %v5526_v27  ;;  %6195 = vmatpush.msra.mxu1 %v14665_v30  ;;  %v5527_v18 = vand.u32 4294901760, %v5526_v27 }
 0xc2b   : > { %6019 = vmatpush.msrb.mxu2 %v14663_v39  ;;  %6083 = vmatpush.msrb.mxu3 %v14703_v60 }
 0xc2c   : > { %v5398_v59 = vadd.f32 %v5397_v48, %v5323_v49  ;;  %5739 = vmatmul.f32.gmra.mxu1 %v5527_v18  ;;  %v5528_v11 = vsub.f32 %v5526_v27, %v5527_v18  ;;  %6130 = vmatpush.msra.mxu0 %v17430_v3  ;;  %v6326_v27 = vld [vmem:[#allocation2 + $0x2e8] sm:$0xff]  ;;  %v6323_v18 = vld [vmem:[#allocation2 + $0x2d0] sm:$0xff]  ;;  %v6320_v3 = vld [vmem:[#allocation2 + $0x2b8] sm:$0xff] }
 0xc2d   : > { %6197 = vmatpush.msra.mxu1 %v14680_v58  ;;  %6022 = vmatpush.msrb.mxu2 %v14676_v53  ;;  %v5328_v58 = vpop.f32.mrf.mxu3  ;;  %v14952_v42 = vand.u32 4294901760, %v6326_v27 }
 0xc2e   : > { %v5439_v21 = vadd.f32 %v5438_v25, %v5398_v59  ;;  %6085 = vmatpush.msrb.mxu3 %v14714_v44  ;;  %v5529_v30 = vand.u32 4294901760, %v5528_v11  ;;  %6134 = vmatpush.msra.mxu0 %v17431_v0  ;;  %v14957_v59 = vand.u32 4294901760, %v6323_v18 }
 0xc2f   : > { %v5283_v39 = vpop.f32.mrf.mxu2  ;;  %6199 = vmatpush.msra.mxu1 %v14688_v22  ;;  %6025 = vmatpush.msrb.mxu2 %v14691_v34  ;;  %v5401_v22 = vpop.f32.mrf.mxu0  ;;  %v14955_v25 = vsub.f32 %v6326_v27, %v14952_v42 }
 0xc30   : > { %v5446_v36 = vmax.f32 %v5439_v21, 0.0  ;;  %v5284_v35 = vadd.f32 %v5283_v39, %v5225_v45  ;;  %5530 = vmatmul.f32.gmra.mxu2 %v5529_v30  ;;  %5849 = vmatmul.f32.vlgmr.msra.gmra.mxu3 %v14848_v10  ;;  %v14963_v21 = vsub.f32 %v6323_v18, %v14957_v59  ;;  %v14966_v30 = vand.u32 4294901760, %v6320_v3 }
 0xc31   : > { %6087 = vmatpush.msrb.mxu3 %v14730_v17  ;;  %6201 = vmatpush.msra.mxu1 %v14703_v60  ;;  %v5442_v60 = vpop.f32.mrf.mxu1  ;;  %v6397_v45 = vand.u32 4294901760, %v14955_v25 }
 0xc32   : > { %v14889_v53 = vand.u32 4294901760, %v5446_v36  ;;  %v5329_v43 = vadd.f32 %v5328_v58, %v5284_v35  ;;  %6028 = vmatpush.msrb.mxu2 %v14701_v20  ;;  %6138 = vmatpush.msra.mxu0 %v17432_v16  ;;  %v17433_v20 = vand.u32 4294901760, %v14712_v6 }
 0xc33   : > { %6089 = vmatpush.msrb.mxu3 %v14743_v26  ;;  %6203 = vmatpush.msra.mxu1 %v14714_v44  ;;  %v6398_v58 = vsub.f32 %v14955_v25, %v6397_v45 }
 0xc34   : > { %v5890_v34 = vsub.f32 %v5446_v36, %v14889_v53  ;;  %v5402_v52 = vadd.f32 %v5401_v22, %v5329_v43  ;;  %6003 = vmatmul.f32.vlgmr.msrb.gmra.mxu1 %v14889_v53  ;;  %6031 = vmatpush.msrb.mxu2 %v14712_v6  ;;  %v17434_v6 = vand.u32 4294901760, %v14728_v40  ;;  %v6317_v36 = vld [vmem:[#allocation2 + $0x2a0] sm:$0xff]  ;;  %v14975_v43 = vsub.f32 %v6320_v3, %v14966_v30  ;;  %v6314_v22 = vld [vmem:[#allocation2 + $0x288] sm:$0xff] }
 0xc35   : > { %6091 = vmatpush.msrb.mxu3 %v14752_v7  ;;  %6205 = vmatpush.msra.mxu1 %v14730_v17  ;;  %v14979_v16 = vand.u32 4294901760, %v6317_v36 }
 0xc36   : > { %v5443_v8 = vadd.f32 %v5442_v60, %v5402_v52  ;;  %6034 = vmatpush.msrb.mxu2 %v14728_v40  ;;  %6142 = vmatpush.msra.mxu0 %v17433_v20  ;;  %v5891_v15 = vand.u32 4294901760, %v5890_v34  ;;  %v6399_v60 = vand.u32 4294901760, %v6398_v58  ;;  %v6409_v20 = vand.u32 4294901760, %v14975_v43  ;;  %v6296_v58 = vld [vmem:[#allocation2 + $0x1f8] sm:$0xff] }
 0xc37   : > { %6093 = vmatpush.msrb.mxu3 %v14767_v31  ;;  %6207 = vmatpush.msra.mxu1 %v14743_v26 }
 0xc38   : > { %v5448_v44 = vmax.f32 %v5443_v8, 0.0  ;;  %5808 = vmatmul.f32.vlgmr.msra.gmra.mxu2 %v14848_v10  ;;  %5853 = vmatmul.f32.gmra.mxu3 %v14863_v63  ;;  %v5892_v55 = vsub.f32 %v5890_v34, %v5891_v15  ;;  %v17436_v10 = vand.u32 4294901760, %v14756_v62 }
 0xc39   : > { %6037 = vmatpush.msrb.mxu2 %v14741_v1  ;;  %6095 = vmatpush.msrb.mxu3 %v14778_v19 }
 0xc3a   : > { %6209 = vmatpush.msra.mxu1 %v14752_v7  ;;  %6146 = vmatpush.msra.mxu0 %v17434_v6  ;;  %v5893_v17 = vand.u32 4294901760, %v5892_v55  ;;  %v5897_v46 = vand.u32 4294901760, %v5448_v44  ;;  %v17435_v7 = vand.u32 4294901760, %v14741_v1  ;;  %v14992_v6 = vsub.f32 %v6317_v36, %v14979_v16 }
 0xc3b   : > { %6040 = vmatpush.msrb.mxu2 %v14756_v62  ;;  %6097 = vmatpush.msrb.mxu3 %v14794_v9  ;;  %v17438_v62 = vand.u32 4294901760, %v14776_v12 }
 0xc3c   : > { %6211 = vmatpush.msra.mxu1 %v14767_v31  ;;  %5894 = vmatmul.f32.vlgmr.msrb.gmra.mxu0 %v5893_v17  ;;  %v5898_v26 = vsub.f32 %v5448_v44, %v5897_v46  ;;  %v6311_v17 = vld [vmem:[#allocation2 + $0x270] sm:$0xff] }
 0xc3d   : > { %6007 = vmatmul.f32.gmra.mxu1 %v5897_v46  ;;  %6043 = vmatpush.msrb.mxu2 %v14765_v33  ;;  %v17440_v33 = vand.u32 4294901760, %v14805_v51 }
 0xc3e   : > { %6099 = vmatpush.msrb.mxu3 %v14808_v2  ;;  %6150 = vmatpush.msra.mxu0 %v17435_v7  ;;  %v5899_v40 = vand.u32 4294901760, %v5898_v26  ;;  %v6410_v7 = vsub.f32 %v14975_v43, %v6409_v20 }
 0xc3f   : > { %6213 = vmatpush.msra.mxu1 %v14778_v19  ;;  %6046 = vmatpush.msrb.mxu2 %v14776_v12  ;;  %v17439_v19 = vand.u32 4294901760, %v14792_v41  ;;  %v17442_v12 = vand.u32 4294901760, %v14828_v37 }
 0xc40   : > { %6101 = vmatpush.msrb.mxu3 %v14817_v14  ;;  %6154 = vmatpush.msra.mxu0 %v17436_v10  ;;  %v5900_v31 = vsub.f32 %v5898_v26, %v5899_v40  ;;  %v15004_v10 = vand.u32 4294901760, %v6311_v17 }
 0xc41   : > { %6215 = vmatpush.msra.mxu1 %v14794_v9  ;;  %5812 = vmatmul.f32.gmra.mxu2 %v14863_v63  ;;  %v17441_v9 = vand.u32 4294901760, %v14821_v4 }
 0xc42   : > { %6105 = vmatmul.f32.vlgmr.msrb.gmra.mxu3 %v5891_v15  ;;  %6049 = vmatpush.msrb.mxu2 %v14792_v41  ;;  %v5901_v1 = vand.u32 4294901760, %v5900_v31  ;;  %v14989_v15 = vand.u32 4294901760, %v6314_v22 }
 0xc43   : > { %6158 = vmatpush.msra.mxu0 %v17437_v28  ;;  %6217 = vmatpush.msra.mxu1 %v14808_v2  ;;  %v6308_v28 = vld [vmem:[#allocation2 + $0x258] sm:$0xff] }
 0xc44   : > { %6052 = vmatpush.msrb.mxu2 %v14805_v51  ;;  %5902 = vmatmul.f32.gmra.mxu0 %v5901_v1  ;;  %v12108_v51 = vld [vmem:[%s17330_s10] ss:$0 sm:$0xff]  ;;  %v6415_v1 = vand.u32 4294901760, %v14992_v6 }
 0xc45   : > { %6162 = vmatpush.msra.mxu0 %v17438_v62  ;;  %6219 = vmatpush.msra.mxu1 %v14817_v14  ;;  %v6411_v62 = vand.u32 4294901760, %v6410_v7 }
 0xc46   : > { %6221 = vmatmul.f32.vlgmr.msra.gmra.mxu1 %v14889_v53  ;;  %6055 = vmatpush.msrb.mxu2 %v14821_v4 }
 0xc47   : > { %6166 = vmatpush.msra.mxu0 %v17439_v19  ;;  %6560 = vmatpush.msrb.mxu1 %v14952_v42 }
 0xc48   : > { %6058 = vmatpush.msrb.mxu2 %v14828_v37  ;;  %6400 = vmatpush.msra.mxu3 %v6399_v60 }
 0xc49   : > { %6170 = vmatpush.msra.mxu0 %v17440_v33  ;;  %6061 = vmatmul.f32.vlgmr.msrb.gmra.mxu2 %v5890_v34  ;;  %v15011_v33 = vsub.f32 %v6311_v17, %v15004_v10 }
 0xc4a   : > { %6111 = vmatmul.f32.gmra.mxu3 %v5899_v40  ;;  %6347 = vmatpush.msra.mxu2 %v14952_v42  ;;  %v15002_v40 = vsub.f32 %v6314_v22, %v14989_v15 }
 0xc4b   : > { %6174 = vmatpush.msra.mxu0 %v17441_v9  ;;  %6562 = vmatpush.msrb.mxu1 %v14957_v59  ;;  %v15013_v9 = vand.u32 4294901760, %v6308_v28 }
 0xc4c   : > { %6349 = vmatpush.msra.mxu2 %v14957_v59  ;;  %v6421_v19 = vand.u32 4294901760, %v15002_v40 }
 0xc4d   : > { %6178 = vmatpush.msra.mxu0 %v17442_v12  ;;  %6564 = vmatpush.msrb.mxu1 %v14966_v30 }
 0xc4e   : > { %6180 = vmatmul.f32.vlgmr.msra.gmra.mxu0 %v14889_v53  ;;  %6225 = vmatmul.f32.gmra.mxu1 %v5897_v46  ;;  %v6403_v53 = vand.u32 4294901760, %v14963_v21 }
 0xc4f   : > { %6502 = vmatpush.msrb.mxu0 %v14955_v25  ;;  %6351 = vmatpush.msra.mxu2 %v14966_v30 }
 0xc50   : > { %v6404_v8 = vsub.f32 %v14963_v21, %v6403_v53  ;;  %6566 = vmatpush.msrb.mxu1 %v14979_v16 }
 0xc51   : > { %6066 = vmatmul.f32.gmra.mxu2 %v5898_v26  ;;  %6505 = vmatpush.msrb.mxu0 %v14963_v21 }
 0xc52   : > { %6353 = vmatpush.msra.mxu2 %v14979_v16  ;;  %v6405_v26 = vand.u32 4294901760, %v6404_v8  ;;  %6568 = vmatpush.msrb.mxu1 %v14989_v15 }
 0xc53   : > { %6508 = vmatpush.msrb.mxu0 %v14975_v43 }
 0xc54   : > { %6406 = vmatpush.msra.mxu3 %v6405_v26  ;;  %6355 = vmatpush.msra.mxu2 %v14989_v15 }
 0xc55   : > { %6511 = vmatpush.msrb.mxu0 %v14992_v6  ;;  %6570 = vmatpush.msrb.mxu1 %v15004_v10 }
 0xc56   : > { %6184 = vmatmul.f32.gmra.mxu0 %v5897_v46  ;;  %6412 = vmatpush.msra.mxu3 %v6411_v62 }
 0xc57   : > { %6514 = vmatpush.msrb.mxu0 %v15002_v40  ;;  %6357 = vmatpush.msra.mxu2 %v15004_v10 }
 0xc58   : > { %6572 = vmatpush.msrb.mxu1 %v15013_v9 }
 0xc59   : > { %6517 = vmatpush.msrb.mxu0 %v15011_v33  ;;  %6359 = vmatpush.msra.mxu2 %v15013_v9 }
 0xc9d   : > { %v5690_v2 = vpop.f32.mrf.mxu0 }
 0xc9f   : > { %v5734_v14 = vpop.f32.mrf.mxu1 }
 0xca1   : > { %v5632_v41 = vpop.f32.mrf.mxu3 }
 0xca7   : > { %v5695_v54 = vpop.f32.mrf.mxu0 }
 0xca9   : > { %v5523_v23 = vpop.f32.mrf.mxu2  ;;  %v5740_v4 = vpop.f32.mrf.mxu1 }
 0xcaa   : > { %v5524_v24 = vadd.f32 %v12108_v51, %v5523_v23  ;;  %v6427_v23 = vand.u32 4294901760, %v15011_v33 }
 0xcab   : > { %v5636_v47 = vpop.f32.mrf.mxu3 }
 0xcac   : > { %v5633_v37 = vadd.f32 %v5632_v41, %v5524_v24  ;;  %v6416_v41 = vsub.f32 %v14992_v6, %v6415_v1  ;;  %v6302_v24 = vld [vmem:[#allocation2 + $0x228] sm:$0xff] }
 0xcad   : > { %v15043_v27 = vand.u32 4294901760, %v6302_v24 }
 0xcae   : > { %v5691_v32 = vadd.f32 %v5690_v2, %v5633_v37  ;;  %v6305_v2 = vld [vmem:[#allocation2 + $0x240] sm:$0xff] }
 0xcb0   : > { %v5735_v11 = vadd.f32 %v5734_v14, %v5691_v32  ;;  %v6422_v14 = vsub.f32 %v15002_v40, %v6421_v19  ;;  %v6309_v40 = vld [vmem:[#allocation2 + $0x260] sm:$0xff] }
 0xcb1   : > { %v14950_v48 = vpop.f32.mrf.mxu1 }
 0xcb3   : > { %v5531_v38 = vpop.f32.mrf.mxu2  ;;  %v5850_v63 = vpop.f32.mrf.mxu3 }
 0xcb4   : > { %v5532_v5 = vadd.f32 %v12108_v51, %v5531_v38  ;;  %v15028_v51 = vand.u32 4294901760, %v6305_v2 }
 0xcb6   : > { %v5637_v49 = vadd.f32 %v5636_v47, %v5532_v5  ;;  %v15026_v47 = vsub.f32 %v6308_v28, %v15013_v9  ;;  %v6428_v5 = vsub.f32 %v15011_v33, %v6427_v23  ;;  %v15038_v32 = vsub.f32 %v6305_v2, %v15028_v51  ;;  %6574 = vmatpush.msrb.mxu1 %v15028_v51  ;;  %v6306_v33 = vld [vmem:[#allocation2 + $0x248] sm:$0xff] }
 0xcb7   : > { %6361 = vmatpush.msra.mxu2 %v15028_v51 }
 0xcb8   : > { %v5696_v39 = vadd.f32 %v5695_v54, %v5637_v49  ;;  %6520 = vmatpush.msrb.mxu0 %v15026_v47  ;;  %v6299_v49 = vld [vmem:[#allocation2 + $0x210] sm:$0xff]  ;;  %6576 = vmatpush.msrb.mxu1 %v15043_v27 }
 0xcb9   : > { %v5895_v57 = vpop.f32.mrf.mxu0  ;;  %6363 = vmatpush.msra.mxu2 %v15043_v27 }
 0xcba   : > { %v5741_v55 = vadd.f32 %v5740_v4, %v5696_v39  ;;  %v14996_v46 = vpop.f32.mrf.mxu1  ;;  %v6417_v4 = vand.u32 4294901760, %v6416_v41  ;;  %v15049_v39 = vand.u32 4294901760, %v6299_v49  ;;  %6523 = vmatpush.msrb.mxu0 %v15038_v32  ;;  %v6290_v41 = vld [vmem:[#allocation2 + $0x1c8] sm:$0xff] }
 0xcbb   : > { %v5809_v50 = vpop.f32.mrf.mxu2  ;;  %v5854_v35 = vpop.f32.mrf.mxu3 }
 0xcbc   : > { %v5810_v0 = vadd.f32 %v5809_v50, %v5735_v11  ;;  %6418 = vmatpush.msra.mxu3 %v6417_v4  ;;  %v6429_v11 = vand.u32 4294901760, %v6428_v5  ;;  %v15064_v8 = vsub.f32 %v6299_v49, %v15049_v39  ;;  %6578 = vmatpush.msrb.mxu1 %v15049_v39 }
 0xcbd   : > { %6365 = vmatpush.msra.mxu2 %v15049_v39 }
 0xcbe   : > { %v5851_v44 = vadd.f32 %v5850_v63, %v5810_v0  ;;  %v6423_v63 = vand.u32 4294901760, %v6422_v14  ;;  %v6439_v0 = vand.u32 4294901760, %v15038_v32  ;;  %v6451_v26 = vand.u32 4294901760, %v15064_v8 }
 0xcc0   : > { %v5896_v12 = vadd.f32 %v5895_v57, %v5851_v44  ;;  %v6433_v57 = vand.u32 4294901760, %v15026_v47  ;;  %6424 = vmatpush.msra.mxu3 %v6423_v63  ;;  %v6440_v60 = vsub.f32 %v15038_v32, %v6439_v0  ;;  %v15066_v44 = vand.u32 4294901760, %v6296_v58 }
 0xcc1   : > { %v14982_v34 = vpop.f32.mrf.mxu0  ;;  %v6452_v14 = vsub.f32 %v15064_v8, %v6451_v26 }
 0xcc2   : > { %v6005_v50 = vadd.f32 %v14950_v48, %v5896_v12  ;;  %v6434_v3 = vsub.f32 %v15026_v47, %v6433_v57  ;;  %6430 = vmatpush.msra.mxu3 %v6429_v11  ;;  %v6441_v17 = vand.u32 4294901760, %v6440_v60  ;;  %v15074_v7 = vsub.f32 %v6296_v58, %v15066_v44  ;;  %6580 = vmatpush.msrb.mxu1 %v15066_v44  ;;  %v6284_v58 = vld [vmem:[#allocation2 + $0x198] sm:$0xff]  ;;  %v6303_v47 = vld [vmem:[#allocation2 + $0x230] sm:$0xff] }
 0xcc3   : > { %v15058_v22 = vpop.f32.mrf.mxu1  ;;  %6367 = vmatpush.msra.mxu2 %v15066_v44  ;;  %v6453_v5 = vand.u32 4294901760, %v6452_v14 }
 0xcc4   : > { %v5813_v52 = vpop.f32.mrf.mxu2 }
 0xcc5   : > { %v5814_v31 = vadd.f32 %v5813_v52, %v5741_v55  ;;  %v6106_v38 = vpop.f32.mrf.mxu3  ;;  %v6435_v52 = vand.u32 4294901760, %v6434_v3  ;;  %v6293_v55 = vld [vmem:[#allocation2 + $0x1e0] sm:$0xff] }
 0xcc7   : > { %v5855_v54 = vadd.f32 %v5854_v35, %v5814_v31  ;;  %v15055_v35 = vsub.f32 %v6302_v24, %v15043_v27  ;;  %v15076_v31 = vand.u32 4294901760, %v6293_v55  ;;  %6436 = vmatpush.msra.mxu3 %v6435_v52  ;;  %v15092_v24 = vand.u32 4294901760, %v6290_v41 }
 0xcc9   : > { %v5904_v36 = vadd.f32 %v14982_v34, %v5855_v54  ;;  %v6445_v34 = vand.u32 4294901760, %v15055_v35  ;;  %6526 = vmatpush.msrb.mxu0 %v15055_v35  ;;  %v6457_v54 = vand.u32 4294901760, %v15074_v7  ;;  %v15090_v4 = vsub.f32 %v6293_v55, %v15076_v31  ;;  %6442 = vmatpush.msra.mxu3 %v6441_v17 }
 0xcca   : > { %v15102_v11 = vsub.f32 %v6290_v41, %v15092_v24  ;;  %6582 = vmatpush.msrb.mxu1 %v15076_v31  ;;  %6369 = vmatpush.msra.mxu2 %v15076_v31 }
 0xccb   : > { %v6181_v18 = vpop.f32.mrf.mxu0  ;;  %v6009_v62 = vadd.f32 %v14996_v46, %v5904_v36  ;;  %v6446_v12 = vsub.f32 %v15055_v35, %v6445_v34  ;;  %6529 = vmatpush.msrb.mxu0 %v15064_v8  ;;  %v6463_v49 = vand.u32 4294901760, %v15090_v4  ;;  %v6226_v41 = vpop.f32.mrf.mxu1 }
 0xccc   : > { %v6062_v37 = vpop.f32.mrf.mxu2  ;;  %v6469_v17 = vand.u32 4294901760, %v15102_v11  ;;  %6584 = vmatpush.msrb.mxu1 %v15092_v24  ;;  %6371 = vmatpush.msra.mxu2 %v15092_v24 }
 0xccd   : > { %v6063_v48 = vadd.f32 %v6062_v37, %v6005_v50  ;;  %6532 = vmatpush.msrb.mxu0 %v15074_v7  ;;  %v6287_v37 = vld [vmem:[#allocation2 + $0x1b0] sm:$0xff]  ;;  %v6112_v63 = vpop.f32.mrf.mxu3  ;;  %v6458_v50 = vsub.f32 %v15074_v7, %v6457_v54  ;;  %v6464_v55 = vsub.f32 %v15090_v4, %v6463_v49 }
 0xcce   : > { %v15107_v36 = vand.u32 4294901760, %v6287_v37  ;;  %v6470_v14 = vsub.f32 %v15102_v11, %v6469_v17 }
 0xccf   : > { %v6107_v28 = vadd.f32 %v6106_v38, %v6063_v48  ;;  %v6447_v38 = vand.u32 4294901760, %v6446_v12  ;;  %6535 = vmatpush.msrb.mxu0 %v15090_v4  ;;  %v6459_v60 = vand.u32 4294901760, %v6458_v50  ;;  %v6281_v12 = vld [vmem:[#allocation2 + $0x180] sm:$0xff] }
 0xcd0   : > { %6586 = vmatpush.msrb.mxu1 %v15107_v36  ;;  %6373 = vmatpush.msra.mxu2 %v15107_v36  ;;  %v6471_v50 = vand.u32 4294901760, %v6470_v14 }
 0xcd1   : > { %v6182_v3 = vadd.f32 %v6181_v18, %v6107_v28  ;;  %6448 = vmatpush.msra.mxu3 %v6447_v38  ;;  %v15118_v28 = vsub.f32 %v6287_v37, %v15107_v36  ;;  %6538 = vmatpush.msrb.mxu0 %v15102_v11  ;;  %v15127_v38 = vand.u32 4294901760, %v6281_v12 }
 0xcd3   : > { %v6185_v52 = vpop.f32.mrf.mxu0  ;;  %6454 = vmatpush.msra.mxu3 %v6453_v5  ;;  %v6223_v37 = vadd.f32 %v15058_v22, %v6182_v3  ;;  %v6475_v5 = vand.u32 4294901760, %v15118_v28  ;;  %6541 = vmatpush.msrb.mxu0 %v15118_v28 }
 0xcd4   : > { %v6067_v2 = vpop.f32.mrf.mxu2 }
 0xcd5   : > { %v6068_v46 = vadd.f32 %v6067_v2, %v6009_v62  ;;  %v15113_v62 = vand.u32 4294901760, %v6284_v58  ;;  %v6465_v2 = vand.u32 4294901760, %v6464_v55  ;;  %6460 = vmatpush.msra.mxu3 %v6459_v60  ;;  %v6476_v22 = vsub.f32 %v15118_v28, %v6475_v5  ;;  %v6327_v55 = vld [vmem:[#allocation2 + $0x2f0] sm:$0xff] }
 0xcd7   : > { %v6113_v48 = vadd.f32 %v6112_v63, %v6068_v46  ;;  %v15125_v46 = vsub.f32 %v6284_v58, %v15113_v62  ;;  %v15136_v58 = vsub.f32 %v6281_v12, %v15127_v38  ;;  %6588 = vmatpush.msrb.mxu1 %v15113_v62  ;;  %6375 = vmatpush.msra.mxu2 %v15113_v62  ;;  %v6477_v12 = vand.u32 4294901760, %v6476_v22 }
 0xcd8   : > { %6466 = vmatpush.msra.mxu3 %v6465_v2 }
 0xcd9   : > { %v6186_v18 = vadd.f32 %v6185_v52, %v6113_v48  ;;  %v6481_v48 = vand.u32 4294901760, %v15125_v46  ;;  %6544 = vmatpush.msrb.mxu0 %v15125_v46  ;;  %v17372_v60 = vand.u32 4294901760, %v15136_v58  ;;  %6590 = vmatpush.msrb.mxu1 %v15127_v38 }
 0xcda   : > { %6377 = vmatpush.msra.mxu2 %v15127_v38  ;;  %6472 = vmatpush.msra.mxu3 %v6471_v50 }
 0xcdb   : > { %v6227_v63 = vadd.f32 %v6226_v41, %v6186_v18  ;;  %v6482_v3 = vsub.f32 %v15125_v46, %v6481_v48  ;;  %6547 = vmatpush.msrb.mxu0 %v15136_v58  ;;  %v15159_v41 = vand.u32 4294901760, %v6327_v55  ;;  %v6488_v14 = vsub.f32 %v15136_v58, %v17372_v60 }
 0xcdc   : > { %6607 = vmatpush.msrb.mxu2 %v6397_v45  ;;  %6478 = vmatpush.msra.mxu3 %v6477_v12 }
 0xcdd   : > { %v15141_v52 = vadd.f32 %v6227_v63, %v14316_v13  ;;  %v15154_v13 = vadd.f32 %v6223_v37, %v14314_v29  ;;  %v6483_v2 = vand.u32 4294901760, %v6482_v3  ;;  %v6324_v63 = vld [vmem:[#allocation2 + $0x2d8] sm:$0xff]  ;;  %6719 = vmatpush.msra.mxu0 %v15159_v41  ;;  %v15169_v37 = vsub.f32 %v6327_v55, %v15159_v41  ;;  %v6321_v3 = vld [vmem:[#allocation2 + $0x2c0] sm:$0xff]  ;;  %v6318_v55 = vld [vmem:[#allocation2 + $0x2a8] sm:$0xff] }
 0xcde   : > { %v15171_v50 = vand.u32 4294901760, %v6324_v63  ;;  %v6489_v22 = vand.u32 4294901760, %v6488_v14  ;;  %6611 = vmatpush.msrb.mxu2 %v6403_v53  ;;  %v15177_v45 = vand.u32 4294901760, %v6321_v3 }
 0xcdf   : > { %v6234_v18 = vmul.f32 %v14038_v61, %v15141_v52  ;;  %6484 = vmatpush.msra.mxu3 %v6483_v2  ;;  %v6769_v25 = vand.u32 4294901760, %v15169_v37  ;;  %v15189_v2 = vand.u32 4294901760, %v6318_v55 }
 0xce0   : > { %6721 = vmatpush.msra.mxu0 %v15171_v50  ;;  %6615 = vmatpush.msrb.mxu2 %v6409_v20  ;;  %v15193_v14 = vsub.f32 %v6321_v3, %v15177_v45  ;;  %v6312_v3 = vld [vmem:[#allocation2 + $0x278] sm:$0xff] }
 0xce1   : > { %v6235_v29 = vadd.f32 %v6234_v18, %v15154_v13  ;;  %v15180_v18 = vsub.f32 %v6324_v63, %v15171_v50  ;;  %6490 = vmatpush.msra.mxu3 %v6489_v22  ;;  %v6770_v21 = vsub.f32 %v15169_v37, %v6769_v25  ;;  %v6315_v63 = vld [vmem:[#allocation2 + $0x290] sm:$0xff]  ;;  %v15206_v22 = vsub.f32 %v6318_v55, %v15189_v2 }
 0xce2   : > { %6723 = vmatpush.msra.mxu0 %v15177_v45  ;;  %6619 = vmatpush.msrb.mxu2 %v6415_v1 }
 0xce3   : > { %v6236_v60 = vrot.slane %v6235_v29, 4  ;;  %v17373_v53 = vand.u32 4294901760, %v15180_v18  ;;  %6678 = vmatpush.msrb.mxu3 %v14952_v42  ;;  %v6771_v20 = vand.u32 4294901760, %v6770_v21  ;;  %v6781_v42 = vand.u32 4294901760, %v15193_v14 }
 0xce4   : > { %6725 = vmatpush.msra.mxu0 %v15189_v2  ;;  %6623 = vmatpush.msrb.mxu2 %v6421_v19  ;;  %v15211_v21 = vand.u32 4294901760, %v6312_v3  ;;  %v6787_v55 = vand.u32 4294901760, %v15206_v22 }
 0xce5   : > { %v6237_v12 = vadd.f32 %v6236_v60, %v6235_v29  ;;  %v6776_v60 = vsub.f32 %v15180_v18, %v17373_v53  ;;  %v15201_v29 = vand.u32 4294901760, %v6315_v63  ;;  %6680 = vmatpush.msrb.mxu3 %v14957_v59  ;;  %6772 = vmatpush.msra.mxu1 %v6771_v20  ;;  %v6782_v59 = vsub.f32 %v15193_v14, %v6781_v42 }
 0xce6   : > { %6627 = vmatpush.msrb.mxu2 %v6427_v23  ;;  %v6788_v20 = vsub.f32 %v15206_v22, %v6787_v55 }
 0xce7   : > { %v6238_v43 = vrot.slane %v6237_v12, 2  ;;  %v6777_v1 = vand.u32 4294901760, %v6776_v60  ;;  %6727 = vmatpush.msra.mxu0 %v15201_v29  ;;  %v15214_v53 = vsub.f32 %v6315_v63, %v15201_v29  ;;  %6682 = vmatpush.msrb.mxu3 %v14966_v30  ;;  %v15225_v63 = vand.u32 4294901760, %v6309_v40 }
 0xce8   : > { %v15228_v30 = vsub.f32 %v6312_v3, %v15211_v21  ;;  %6631 = vmatpush.msrb.mxu2 %v6433_v57 }
 0xce9   : > { %v6239_v6 = vadd.f32 %v6238_v43, %v6237_v12  ;;  %6778 = vmatpush.msra.mxu1 %v6777_v1  ;;  %6729 = vmatpush.msra.mxu0 %v15211_v21  ;;  %v17374_v12 = vand.u32 4294901760, %v15214_v53  ;;  %v6783_v43 = vand.u32 4294901760, %v6782_v59  ;;  %v15241_v1 = vand.u32 4294901760, %v6306_v33 }
 0xcea   : > { %6684 = vmatpush.msrb.mxu3 %v14979_v16  ;;  %v6799_v3 = vand.u32 4294901760, %v15228_v30  ;;  %v6789_v16 = vand.u32 4294901760, %v6788_v20  ;;  %v15245_v59 = vsub.f32 %v6309_v40, %v15225_v63  ;;  %6635 = vmatpush.msrb.mxu2 %v6439_v0 }
 0xceb   : > { %v6240_v19 = vrot.slane %v6239_v6, 1  ;;  %v6794_v60 = vsub.f32 %v15214_v53, %v17374_v12  ;;  %6731 = vmatpush.msra.mxu0 %v15225_v63  ;;  %6784 = vmatpush.msra.mxu1 %v6783_v43  ;;  %v15251_v12 = vand.u32 4294901760, %v6303_v47  ;;  %v15258_v40 = vsub.f32 %v6306_v33, %v15241_v1  ;;  %v6300_v43 = vld [vmem:[#allocation2 + $0x218] sm:$0xff] }
 0xcec   : > { %6686 = vmatpush.msrb.mxu3 %v14989_v15  ;;  %v6805_v15 = vand.u32 4294901760, %v15245_v59  ;;  %v15267_v32 = vand.u32 4294901760, %v6300_v43  ;;  %6639 = vmatpush.msrb.mxu2 %v6445_v34 }
 0xced   : > { %v6241_v23 = vadd.f32 %v6240_v19, %v6239_v6  ;;  %v6795_v6 = vand.u32 4294901760, %v6794_v60  ;;  %v6800_v19 = vsub.f32 %v15228_v30, %v6799_v3  ;;  %6733 = vmatpush.msra.mxu0 %v15241_v1  ;;  %6790 = vmatpush.msra.mxu1 %v6789_v16  ;;  %v17375_v0 = vand.u32 4294901760, %v15258_v40 }
 0xcee   : > { %6688 = vmatpush.msrb.mxu3 %v15004_v10  ;;  %v6806_v10 = vsub.f32 %v15245_v59, %v6805_v15  ;;  %6643 = vmatpush.msrb.mxu2 %v6451_v26 }
 0xcef   : > { %v6242_v57 = vmul.f32 0.11111111, %v6241_v23  ;;  %v6801_v60 = vand.u32 4294901760, %v6800_v19  ;;  %6735 = vmatpush.msra.mxu0 %v15251_v12  ;;  %6796 = vmatpush.msra.mxu1 %v6795_v6  ;;  %v6294_v6 = vld [vmem:[#allocation2 + $0x1e8] sm:$0xff] }
 0xcf0   : > { %6690 = vmatpush.msrb.mxu3 %v15013_v9  ;;  %v15285_v9 = vsub.f32 %v6300_v43, %v15267_v32  ;;  %v6807_v16 = vand.u32 4294901760, %v6806_v10  ;;  %v15299_v26 = vand.u32 4294901760, %v6294_v6  ;;  %6647 = vmatpush.msrb.mxu2 %v6457_v54  ;;  %v6291_v10 = vld [vmem:[#allocation2 + $0x1d0] sm:$0xff] }
 0xcf1   : > { %v15261_v20 = vsub.f32 %v15154_v13, %v6242_v57  ;;  %v15264_v23 = vsub.f32 %v15141_v52, %v6242_v57  ;;  %v15277_v52 = vsub.f32 %v6303_v47, %v15251_v12  ;;  %v6297_v13 = vld [vmem:[#allocation2 + $0x200] sm:$0xff]  ;;  %6737 = vmatpush.msra.mxu0 %v15267_v32  ;;  %6802 = vmatpush.msra.mxu1 %v6801_v60  ;;  %v15315_v7 = vand.u32 4294901760, %v6291_v10 }
 0xcf2   : > { %v15282_v35 = vand.u32 4294901760, %v6297_v13  ;;  %6692 = vmatpush.msrb.mxu3 %v15028_v51  ;;  %v6812_v47 = vsub.f32 %v15258_v40, %v17375_v0  ;;  %v17376_v8 = vand.u32 4294901760, %v15285_v9  ;;  %6651 = vmatpush.msrb.mxu2 %v6463_v49  ;;  %v15321_v54 = vsub.f32 %v6294_v6, %v15299_v26  ;;  %v6285_v49 = vld [vmem:[#allocation2 + $0x1a0] sm:$0xff] }
 0xcf3   : > { %v6246_v33 = vmul.f32 %v15264_v23, %v15264_v23  ;;  %v6245_v34 = vmul.f32 %v15261_v20, %v15261_v20  ;;  %v6817_v57 = vand.u32 4294901760, %v15277_v52  ;;  %6808 = vmatpush.msra.mxu1 %v6807_v16  ;;  %v15334_v4 = vsub.f32 %v6291_v10, %v15315_v7 }
 0xcf4   : > { %6739 = vmatpush.msra.mxu0 %v15282_v35  ;;  %v15302_v43 = vsub.f32 %v6297_v13, %v15282_v35  ;;  %6694 = vmatpush.msrb.mxu3 %v15043_v27  ;;  %v6813_v51 = vand.u32 4294901760, %v6812_v47  ;;  %v6824_v0 = vsub.f32 %v15285_v9, %v17376_v8 }
 0xcf5   : > { %v6248_v19 = vmul.f32 %v14038_v61, %v6246_v33  ;;  %v6818_v60 = vsub.f32 %v15277_v52, %v6817_v57  ;;  %6655 = vmatpush.msrb.mxu2 %v6469_v17  ;;  %v6841_v11 = vand.u32 4294901760, %v15334_v4  ;;  %v6282_v17 = vld [vmem:[#allocation2 + $0x188] sm:$0xff] }
 0xcf6   : > { %6741 = vmatpush.msra.mxu0 %v15299_v26  ;;  %v6829_v13 = vand.u32 4294901760, %v15302_v43  ;;  %6696 = vmatpush.msrb.mxu3 %v15049_v39  ;;  %v6825_v47 = vand.u32 4294901760, %v6824_v0  ;;  %v6835_v39 = vand.u32 4294901760, %v15321_v54 }
 0xcf7   : > { %v6249_v33 = vadd.f32 %v6248_v19, %v6245_v34  ;;  %6814 = vmatpush.msra.mxu1 %v6813_v51  ;;  %v6819_v27 = vand.u32 4294901760, %v6818_v60  ;;  %v6288_v34 = vld [vmem:[#allocation2 + $0x1b8] sm:$0xff]  ;;  %v15337_v51 = vand.u32 4294901760, %v6285_v49  ;;  %6659 = vmatpush.msrb.mxu2 %v6475_v5  ;;  %v6842_v5 = vsub.f32 %v15334_v4, %v6841_v11 }
 0xcf8   : > { %v6830_v19 = vsub.f32 %v15302_v43, %v6829_v13  ;;  %6743 = vmatpush.msra.mxu0 %v15315_v7  ;;  %v15327_v8 = vand.u32 4294901760, %v6288_v34  ;;  %6698 = vmatpush.msrb.mxu3 %v15066_v44  ;;  %v6836_v44 = vsub.f32 %v15321_v54, %v6835_v39 }
 0xcf9   : > { %v6250_v16 = vrot.slane %v6249_v33, 4  ;;  %6820 = vmatpush.msra.mxu1 %v6819_v27  ;;  %v15351_v27 = vand.u32 4294901760, %v6282_v17  ;;  %v15354_v28 = vsub.f32 %v6285_v49, %v15337_v51  ;;  %6663 = vmatpush.msrb.mxu2 %v6481_v48  ;;  %v6843_v48 = vand.u32 4294901760, %v6842_v5 }
 0xcfa   : > { %v6831_v6 = vand.u32 4294901760, %v6830_v19  ;;  %6745 = vmatpush.msra.mxu0 %v15327_v8  ;;  %v15340_v60 = vsub.f32 %v6288_v34, %v15327_v8  ;;  %6700 = vmatpush.msrb.mxu3 %v15076_v31  ;;  %v6837_v31 = vand.u32 4294901760, %v6836_v44 }
 0xcfb   : > { %v6251_v0 = vadd.f32 %v6250_v16, %v6249_v33  ;;  %6826 = vmatpush.msra.mxu1 %v6825_v47  ;;  %v6853_v47 = vand.u32 4294901760, %v15354_v28  ;;  %v15368_v46 = vsub.f32 %v6282_v17, %v15351_v27 }
 0xcfc   : > { %6747 = vmatpush.msra.mxu0 %v15337_v51  ;;  %v6847_v33 = vand.u32 4294901760, %v15340_v60  ;;  %6702 = vmatpush.msrb.mxu3 %v15092_v24  ;;  %v17443_v24 = vand.u32 4294901760, %v15136_v58 }
 0xcfd   : > { %v6252_v10 = vrot.slane %v6251_v0, 2  ;;  %6832 = vmatpush.msra.mxu1 %v6831_v6  ;;  %v6859_v6 = vand.u32 4294901760, %v15368_v46 }
 0xcfe   : > { %v6848_v16 = vsub.f32 %v15340_v60, %v6847_v33  ;;  %6749 = vmatpush.msra.mxu0 %v15351_v27  ;;  %6667 = vmatpush.msrb.mxu2 %v17443_v24 }
 0xcff   : > { %v6253_v34 = vadd.f32 %v6252_v10, %v6251_v0  ;;  %6704 = vmatpush.msrb.mxu3 %v15107_v36  ;;  %6838 = vmatpush.msra.mxu1 %v6837_v31  ;;  %v6854_v0 = vsub.f32 %v15354_v28, %v6853_v47  ;;  %v6860_v58 = vsub.f32 %v15368_v46, %v6859_v6 }
 0xd00   : > { %v6849_v49 = vand.u32 4294901760, %v6848_v16 }
 0xd01   : > { %v6254_v19 = vrot.slane %v6253_v34, 1  ;;  %6706 = vmatpush.msrb.mxu3 %v15113_v62  ;;  %6844 = vmatpush.msra.mxu1 %v6843_v48  ;;  %v6855_v17 = vand.u32 4294901760, %v6854_v0  ;;  %v6861_v10 = vand.u32 4294901760, %v6860_v58 }
 0xd03   : > { %v6255_v44 = vadd.f32 %v6254_v19, %v6253_v34  ;;  %6708 = vmatpush.msrb.mxu3 %v15127_v38  ;;  %6850 = vmatpush.msra.mxu1 %v6849_v49  ;;  %v12109_v38 = vld [vmem:[%s17331_s11] ss:$0 sm:$0xff] }
 0xd05   : > { %v6256_v36 = vmul.f32 0.11111111, %v6255_v44  ;;  %6856 = vmatpush.msra.mxu1 %v6855_v17  ;;  %v12110_v44 = vld [vmem:[%s17444_s26] ss:$0 sm:$0xff]  ;;  %s17474_s26 = sld [smem:[#allocation26_spill]] }
 0xd07   : > { %v6257_v31 = vadd.f32 1e-05, %v6256_v36  ;;  %6862 = vmatpush.msra.mxu1 %v6861_v10 }
 0xd09   : > { %12151 = vrsqrt.f32 %v6257_v31  ;;  %vm6264_vm15 = vweird.f32 %v6257_v31 }
 0xd0b   : > { %s11875_s27 = scalar_lea.hbm %s17474_s26, %s12010_s3 }
 0xd0c   : > { %s11878_s21 = sshll.u32 %s11875_s27, 4  ;;  %s11879_s21 = int_to_ptr.hbm [resolvable:$true] %s11878_s21 }
 0xd0d   : > { %s12323_s24 = sshra.s32 %s11879_s21, 4  ;;  %s12324_s24 = int_to_ptr.hbm [resolvable:$true] %s12323_s24 }
 0xd0e   : > { %s12325_s17 = scalar_lea.hbm %s12324_s24, 16 }
 0xd0f   : > { %v12152_v5 = vpop.eup %12151  ;;  %p12326_p0 = scmp.ne.s32.totalorder %s12324_s24, %s12325_s17 }
 0xd10   : > { %v6259_v16 = vmul.f32 %v12152_v5, %v6257_v31  ;;  %vm6265_vm14 = vweird.f32 %v12152_v5 }
 0xd11   : > { %vm6266_vm0 = vmor %vm6264_vm15, %vm6265_vm14  ;;  %p12327_p1 = pnand %p12326_p0, %p12509_p5 }
 0xd12   : > { %v6260_v24 = vmul.f32 %v12152_v5, %v6259_v16 }
 0xd13   : > { %p12328_p2 = pneg %p12327_p1 }
 0xd14   : > { %v6261_v62 = vmul.f32 0.5, %v6260_v24 }
 0xd16   : > { %v6262_v48 = vsub.f32 1.5, %v6261_v62  ;;  %v17446_v62 = vand.u32 4294901760, %v15180_v18 }
 0xd18   : > { %v6263_v34 = vmul.f32 %v12152_v5, %v6262_v48 }
 0xd1a   : > { %v6267_v19 = vsel %vm6266_vm0, %v12152_v5, %v6263_v34 }
 0xd1b   : > { %v6268_v49 = vmul.f32 %v6267_v19, %v15261_v20  ;;  %v6269_v0 = vmul.f32 %v6267_v19, %v15264_v23 }
 0xd1d   : > { %v6273_v17 = vmul.f32 %v12109_v38, %v6268_v49  ;;  %v6274_v58 = vmul.f32 %v12109_v38, %v6269_v0  ;;  %v6307_v38 = vld [vmem:[#allocation2 + $0x250] sm:$0xff] }
 0xd1e   : > { %v15551_v0 = vand.u32 4294901760, %v6307_v38 }
 0xd1f   : > { %v15390_v36 = vadd.f32 %v12110_v44, %v6273_v17  ;;  %v15392_v10 = vadd.f32 %v12110_v44, %v6274_v58  ;;  %v6304_v44 = vld [vmem:[#allocation2 + $0x238] sm:$0xff]  ;;  %v6301_v17 = vld [vmem:[#allocation2 + $0x220] sm:$0xff] }
 0xd20   : > { %v15565_v58 = vand.u32 4294901760, %v6304_v44 }
 0xd21   : > { %v15395_v31 = vand.u32 4294901760, %v15390_v36  ;;  %v15398_v16 = vand.u32 4294901760, %v15392_v10 }
 0xd23   : > { %6492 = vmatmul.f32.vlgmr.msra.gmra.mxu3 %v15395_v31  ;;  %v15403_v20 = vsub.f32 %v15390_v36, %v15395_v31  ;;  %v15418_v24 = vsub.f32 %v15392_v10, %v15398_v16 }
 0xd24   : > { %6932 = vmatpush.msra.mxu3 %v15159_v41 }
 0xd25   : > { %6550 = vmatmul.f32.vlgmr.msrb.gmra.mxu0 %v15403_v20  ;;  %v15408_v23 = vand.u32 4294901760, %v15403_v20 }
 0xd26   : > { %6934 = vmatpush.msra.mxu3 %v15171_v50  ;;  %6979 = vmatpush.msrb.mxu0 %v6769_v25  ;;  %v15432_v25 = vand.u32 4294901760, %v15418_v24 }
 0xd27   : > { %6594 = vmatmul.f32.vlgmr.msrb.gmra.mxu1 %v15408_v23  ;;  %v6381_v5 = vsub.f32 %v15403_v20, %v15408_v23 }
 0xd28   : > { %6936 = vmatpush.msra.mxu3 %v15177_v45  ;;  %6983 = vmatpush.msrb.mxu0 %v17446_v62  ;;  %v15575_v62 = vsub.f32 %v6307_v38, %v15551_v0 }
 0xd29   : > { %7050 = vmatpush.msrb.mxu1 %v15159_v41  ;;  %v15424_v48 = vand.u32 4294901760, %v6381_v5  ;;  %v6389_v41 = vsub.f32 %v15418_v24, %v15432_v25 }
 0xd2a   : > { %6938 = vmatpush.msra.mxu3 %v15189_v2  ;;  %6987 = vmatpush.msrb.mxu0 %v6781_v42  ;;  %v6322_v42 = vld [vmem:[#allocation2 + $0x2c8] sm:$0xff] }
 0xd2b   : > { %7052 = vmatpush.msrb.mxu1 %v15171_v50  ;;  %6383 = vmatmul.f32.vlgmr.msra.gmra.mxu2 %v15424_v48  ;;  %v17447_v50 = vand.u32 4294901760, %v15214_v53 }
 0xd2c   : > { %6496 = vmatmul.f32.gmra.mxu3 %v15398_v16  ;;  %6874 = vmatpush.msra.mxu2 %v15169_v37  ;;  %v6328_v37 = vld [vmem:[#allocation2 + $0x2f8] sm:$0xff] }
 0xd2d   : > { %6940 = vmatpush.msra.mxu3 %v15201_v29  ;;  %6991 = vmatpush.msrb.mxu0 %v6787_v55  ;;  %v17449_v55 = vand.u32 4294901760, %v15285_v9 }
 0xd2e   : > { %7054 = vmatpush.msrb.mxu1 %v15177_v45  ;;  %6555 = vmatmul.f32.gmra.mxu0 %v15418_v24  ;;  %v15455_v45 = vand.u32 4294901760, %v6389_v41  ;;  %v6298_v41 = vld [vmem:[#allocation2 + $0x208] sm:$0xff] }
 0xd2f   : > { %6877 = vmatpush.msra.mxu2 %v15180_v18  ;;  %6942 = vmatpush.msra.mxu3 %v15211_v21  ;;  %v15462_v18 = vand.u32 4294901760, %v6328_v37 }
 0xd30   : > { %6995 = vmatpush.msrb.mxu0 %v17447_v50  ;;  %7056 = vmatpush.msrb.mxu1 %v15189_v2  ;;  %v6325_v2 = vld [vmem:[#allocation2 + $0x2e0] sm:$0xff]  ;;  %v15578_v50 = vand.u32 4294901760, %v6301_v17 }
 0xd31   : > { %6600 = vmatmul.f32.gmra.mxu1 %v15432_v25  ;;  %6880 = vmatpush.msra.mxu2 %v15193_v14  ;;  %v17448_v14 = vand.u32 4294901760, %v15258_v40 }
 0xd32   : > { %6944 = vmatpush.msra.mxu3 %v15225_v63  ;;  %6999 = vmatpush.msrb.mxu0 %v6799_v3 }
 0xd33   : > { %7058 = vmatpush.msrb.mxu1 %v15201_v29  ;;  %6883 = vmatpush.msra.mxu2 %v15206_v22  ;;  %v15471_v29 = vand.u32 4294901760, %v6325_v2  ;;  %v15476_v22 = vsub.f32 %v6328_v37, %v15462_v18  ;;  %v6295_v37 = vld [vmem:[#allocation2 + $0x1f0] sm:$0xff] }
 0xd34   : > { %6946 = vmatpush.msra.mxu3 %v15241_v1  ;;  %7003 = vmatpush.msrb.mxu0 %v6805_v15 }
 0xd35   : > { %7060 = vmatpush.msrb.mxu1 %v15211_v21  ;;  %6391 = vmatmul.f32.gmra.mxu2 %v15455_v45  ;;  %v15483_v21 = vand.u32 4294901760, %v6322_v42  ;;  %v7141_v3 = vand.u32 4294901760, %v15476_v22 }
 0xd36   : > { %6710 = vmatmul.f32.vlgmr.msrb.gmra.mxu3 %v15395_v31  ;;  %6886 = vmatpush.msra.mxu2 %v15214_v53  ;;  %v6319_v53 = vld [vmem:[#allocation2 + $0x2b0] sm:$0xff] }
 0xd37   : > { %6948 = vmatpush.msra.mxu3 %v15251_v12  ;;  %7007 = vmatpush.msrb.mxu0 %v17448_v14  ;;  %v15588_v14 = vand.u32 4294901760, %v6298_v41 }
 0xd38   : > { %7062 = vmatpush.msrb.mxu1 %v15225_v63  ;;  %6755 = vmatmul.f32.vlgmr.msra.gmra.mxu0 %v15424_v48  ;;  %v15489_v63 = vsub.f32 %v6325_v2, %v15471_v29  ;;  %v15586_v2 = vsub.f32 %v6304_v44, %v15565_v58 }
 0xd39   : > { %6889 = vmatpush.msra.mxu2 %v15228_v30  ;;  %6950 = vmatpush.msra.mxu3 %v15267_v32  ;;  %v6316_v30 = vld [vmem:[#allocation2 + $0x298] sm:$0xff] }
 0xd3a   : > { %7011 = vmatpush.msrb.mxu0 %v6817_v57  ;;  %7064 = vmatpush.msrb.mxu1 %v15241_v1  ;;  %v15494_v1 = vand.u32 4294901760, %v6319_v53  ;;  %v15504_v15 = vand.u32 4294901760, %v6316_v30 }
 0xd3b   : > { %6864 = vmatmul.f32.vlgmr.msra.gmra.mxu1 %v15395_v31  ;;  %6892 = vmatpush.msra.mxu2 %v15245_v59  ;;  %v15502_v59 = vsub.f32 %v6322_v42, %v15483_v21  ;;  %v7183_v42 = vand.u32 4294901760, %v15575_v62 }
 0xd3c   : > { %6952 = vmatpush.msra.mxu3 %v15282_v35  ;;  %7015 = vmatpush.msrb.mxu0 %v17449_v55  ;;  %v15516_v57 = vsub.f32 %v6319_v53, %v15494_v1  ;;  %v6292_v53 = vld [vmem:[#allocation2 + $0x1d8] sm:$0xff]  ;;  %v15600_v55 = vand.u32 4294901760, %v6295_v37 }
 0xd3d   : > { %7066 = vmatpush.msrb.mxu1 %v15251_v12  ;;  %6895 = vmatpush.msra.mxu2 %v15258_v40  ;;  %v7147_v12 = vand.u32 4294901760, %v15489_v63  ;;  %v6313_v40 = vld [vmem:[#allocation2 + $0x280] sm:$0xff]  ;;  %v7184_v38 = vsub.f32 %v15575_v62, %v7183_v42 }
 0xd3e   : > { %6954 = vmatpush.msra.mxu3 %v15299_v26  ;;  %7019 = vmatpush.msrb.mxu0 %v6829_v13  ;;  %v7153_v13 = vand.u32 4294901760, %v15502_v59  ;;  %v15526_v34 = vand.u32 4294901760, %v6313_v40  ;;  %v7159_v19 = vand.u32 4294901760, %v15516_v57  ;;  %v15622_v44 = vsub.f32 %v6295_v37, %v15600_v55 }
 0xd3f   : > { %7068 = vmatpush.msrb.mxu1 %v15267_v32  ;;  %6669 = vmatmul.f32.vlgmr.msrb.gmra.mxu2 %v15395_v31  ;;  %v7142_v32 = vsub.f32 %v15476_v22, %v7141_v3 }
 0xd40   : > { %6714 = vmatmul.f32.gmra.mxu3 %v15398_v16  ;;  %6898 = vmatpush.msra.mxu2 %v15277_v52  ;;  %v6310_v52 = vld [vmem:[#allocation2 + $0x268] sm:$0xff] }
 0xd41   : > { %6956 = vmatpush.msra.mxu3 %v15315_v7  ;;  %7023 = vmatpush.msrb.mxu0 %v6835_v39  ;;  %v15524_v39 = vsub.f32 %v6316_v30, %v15504_v15  ;;  %v15537_v49 = vand.u32 4294901760, %v6310_v52 }
 0xd42   : > { %7070 = vmatpush.msrb.mxu1 %v15282_v35  ;;  %6763 = vmatmul.f32.gmra.mxu0 %v15455_v45  ;;  %v7148_v35 = vsub.f32 %v15489_v63, %v7147_v12 }
 0xd43   : > { %6901 = vmatpush.msra.mxu2 %v15285_v9  ;;  %6958 = vmatpush.msra.mxu3 %v15327_v8  ;;  %v7143_v9 = vand.u32 4294901760, %v7142_v32  ;;  %v7189_v32 = vand.u32 4294901760, %v15586_v2 }
 0xd44   : > { %7027 = vmatpush.msrb.mxu0 %v6841_v11  ;;  %7072 = vmatpush.msrb.mxu1 %v15299_v26  ;;  %v7154_v26 = vsub.f32 %v15502_v59, %v7153_v13  ;;  %v15549_v11 = vsub.f32 %v6313_v40, %v15526_v34  ;;  %v6289_v40 = vld [vmem:[#allocation2 + $0x1c0] sm:$0xff] }
 0xd45   : > { %6868 = vmatmul.f32.gmra.mxu1 %v15398_v16  ;;  %6904 = vmatpush.msra.mxu2 %v15302_v43  ;;  %v7165_v43 = vand.u32 4294901760, %v15524_v39 }
 0xd46   : > { %6960 = vmatpush.msra.mxu3 %v15337_v51  ;;  %7031 = vmatpush.msrb.mxu0 %v6847_v33  ;;  %v15561_v33 = vsub.f32 %v6310_v52, %v15537_v49  ;;  %v7171_v5 = vand.u32 4294901760, %v15549_v11  ;;  %v15612_v52 = vand.u32 4294901760, %v6292_v53 }
 0xd47   : > { %7074 = vmatpush.msrb.mxu1 %v15315_v7  ;;  %6907 = vmatpush.msra.mxu2 %v15321_v54  ;;  %v7149_v7 = vand.u32 4294901760, %v7148_v35  ;;  %v7160_v54 = vsub.f32 %v15516_v57, %v7159_v19 }
 0xd48   : > { %6962 = vmatpush.msra.mxu3 %v15351_v27  ;;  %7035 = vmatpush.msrb.mxu0 %v6853_v47  ;;  %v7166_v47 = vsub.f32 %v15524_v39, %v7165_v43 }
 0xd49   : > { %7076 = vmatpush.msrb.mxu1 %v15327_v8  ;;  %6673 = vmatmul.f32.gmra.mxu2 %v15398_v16  ;;  %v7155_v8 = vand.u32 4294901760, %v7154_v26 }
 0xd4a   : > { %7144 = vmatpush.msrb.mxu3 %v7143_v9  ;;  %6910 = vmatpush.msra.mxu2 %v15334_v4  ;;  %v7161_v4 = vand.u32 4294901760, %v7160_v54  ;;  %v6286_v9 = vld [vmem:[#allocation2 + $0x1a8] sm:$0xff]  ;;  %v6283_v54 = vld [vmem:[#allocation2 + $0x190] sm:$0xff] }
 0xd4b   : > { %6966 = vmatmul.f32.vlgmr.msra.gmra.mxu3 %v15408_v23  ;;  %7039 = vmatpush.msrb.mxu0 %v6859_v6  ;;  %v7177_v6 = vand.u32 4294901760, %v15561_v33 }
 0xd4c   : > { %7078 = vmatpush.msrb.mxu1 %v15337_v51  ;;  %7150 = vmatpush.msrb.mxu3 %v7149_v7  ;;  %v7167_v51 = vand.u32 4294901760, %v7166_v47  ;;  %v15624_v7 = vand.u32 4294901760, %v6289_v40  ;;  %v15635_v47 = vsub.f32 %v6292_v53, %v15612_v52  ;;  %v15649_v53 = vand.u32 4294901760, %v6283_v54 }
 0xd4d   : > { %7246 = vmatpush.msra.mxu0 %v15476_v22  ;;  %6913 = vmatpush.msra.mxu2 %v15340_v60  ;;  %v7172_v60 = vsub.f32 %v15549_v11, %v7171_v5  ;;  %v7178_v30 = vsub.f32 %v15561_v33, %v7177_v6 }
 0xd4e   : > { %7041 = vmatmul.f32.vlgmr.msrb.gmra.mxu0 %v15395_v31  ;;  %7080 = vmatpush.msrb.mxu1 %v15351_v27  ;;  %v15598_v27 = vsub.f32 %v6301_v17, %v15578_v50  ;;  %v7190_v17 = vsub.f32 %v15586_v2, %v7189_v32 }
 0xd4f   : > { %7156 = vmatpush.msrb.mxu3 %v7155_v8  ;;  %7249 = vmatpush.msra.mxu0 %v15489_v63  ;;  %v7173_v35 = vand.u32 4294901760, %v7172_v60  ;;  %v15647_v60 = vsub.f32 %v6289_v40, %v15624_v7 }
 0xd50   : > { %7304 = vmatpush.msra.mxu1 %v15462_v18  ;;  %6916 = vmatpush.msra.mxu2 %v15354_v28  ;;  %v15610_v28 = vsub.f32 %v6298_v41, %v15588_v14  ;;  %v17377_v26 = vand.u32 4294901760, %v15598_v27  ;;  %v15637_v41 = vand.u32 4294901760, %v6286_v9 }
 0xd51   : > { %7082 = vmatmul.f32.vlgmr.msrb.gmra.mxu1 %v15395_v31  ;;  %7162 = vmatpush.msrb.mxu3 %v7161_v4  ;;  %v7185_v4 = vand.u32 4294901760, %v7184_v38  ;;  %v17379_v38 = vand.u32 4294901760, %v15635_v47 }
 0xd52   : > { %7252 = vmatpush.msra.mxu0 %v15502_v59  ;;  %7306 = vmatpush.msra.mxu1 %v15471_v29  ;;  %v17378_v8 = vand.u32 4294901760, %v15610_v28  ;;  %v7196_v37 = vsub.f32 %v15598_v27, %v17377_v26  ;;  %v15659_v26 = vsub.f32 %v6286_v9, %v15637_v41 }
 0xd53   : > { %6919 = vmatpush.msra.mxu2 %v15368_v46  ;;  %7168 = vmatpush.msrb.mxu3 %v7167_v51  ;;  %v7179_v46 = vand.u32 4294901760, %v7178_v30  ;;  %v17380_v51 = vand.u32 4294901760, %v15622_v44  ;;  %v7191_v30 = vand.u32 4294901760, %v7190_v17  ;;  %v7219_v17 = vand.u32 4294901760, %v15647_v60 }
 0xd54   : > { %7255 = vmatpush.msra.mxu0 %v15516_v57  ;;  %7308 = vmatpush.msra.mxu1 %v15483_v21  ;;  %v7197_v40 = vand.u32 4294901760, %v7196_v37  ;;  %v7225_v37 = vand.u32 4294901760, %v15659_v26 }
 0xd55   : > { %7091 = vmatpush.msrb.mxu2 %v15462_v18  ;;  %6972 = vmatmul.f32.gmra.mxu3 %v15432_v25 }
 0xd56   : > { %6922 = vmatmul.f32.vlgmr.msra.gmra.mxu2 %v15403_v20  ;;  %7174 = vmatpush.msrb.mxu3 %v7173_v35  ;;  %v7202_v35 = vsub.f32 %v15610_v28, %v17378_v8  ;;  %v15669_v8 = vsub.f32 %v6283_v54, %v15649_v53 }
 0xd57   : > { %7093 = vmatpush.msrb.mxu2 %v15471_v29  ;;  %7258 = vmatpush.msra.mxu0 %v15524_v39 }
 0xd58   : > { %7310 = vmatpush.msra.mxu1 %v15494_v1  ;;  %7045 = vmatmul.f32.gmra.mxu0 %v15398_v16  ;;  %v7203_v9 = vand.u32 4294901760, %v7202_v35  ;;  %v7231_v35 = vand.u32 4294901760, %v15669_v8 }
 0xd59   : > { %7095 = vmatpush.msrb.mxu2 %v15483_v21  ;;  %7180 = vmatpush.msrb.mxu3 %v7179_v46  ;;  %v7208_v46 = vsub.f32 %v15622_v44, %v17380_v51  ;;  %v7226_v51 = vsub.f32 %v15659_v26, %v7225_v37 }
 0xd5a   : > { %7261 = vmatpush.msra.mxu0 %v15549_v11  ;;  %7312 = vmatpush.msra.mxu1 %v15504_v15 }
 0xd5b   : > { %7086 = vmatmul.f32.gmra.mxu1 %v15398_v16  ;;  %7097 = vmatpush.msrb.mxu2 %v15494_v1  ;;  %v7209_v54 = vand.u32 4294901760, %v7208_v46  ;;  %v7232_v46 = vsub.f32 %v15669_v8, %v7231_v35 }
 0xd5c   : > { %7186 = vmatpush.msrb.mxu3 %v7185_v4  ;;  %7264 = vmatpush.msra.mxu0 %v15561_v33  ;;  %v7214_v4 = vsub.f32 %v15635_v47, %v17379_v38 }
 0xd5d   : > { %7314 = vmatpush.msra.mxu1 %v15526_v34  ;;  %7099 = vmatpush.msrb.mxu2 %v15504_v15 }
 0xd5e   : > { %7192 = vmatpush.msrb.mxu3 %v7191_v30  ;;  %7267 = vmatpush.msra.mxu0 %v15575_v62  ;;  %v7220_v30 = vsub.f32 %v15647_v60, %v7219_v17  ;;  %v7215_v38 = vand.u32 4294901760, %v7214_v4  ;;  %v7233_v4 = vand.u32 4294901760, %v7232_v46 }
 0xd5f   : > { %7316 = vmatpush.msra.mxu1 %v15537_v49  ;;  %6927 = vmatmul.f32.gmra.mxu2 %v15418_v24 }
 0xd60   : > { %7101 = vmatpush.msrb.mxu2 %v15526_v34  ;;  %7198 = vmatpush.msrb.mxu3 %v7197_v40  ;;  %v7221_v40 = vand.u32 4294901760, %v7220_v30 }
 0xd61   : > { %7270 = vmatpush.msra.mxu0 %v15586_v2  ;;  %7318 = vmatpush.msra.mxu1 %v15551_v0 }
 0xd62   : > { %7103 = vmatpush.msrb.mxu2 %v15537_v49  ;;  %7204 = vmatpush.msrb.mxu3 %v7203_v9  ;;  %v7227_v9 = vand.u32 4294901760, %v7226_v51 }
 0xd63   : > { %7273 = vmatpush.msra.mxu0 %v15598_v27  ;;  %7320 = vmatpush.msra.mxu1 %v15565_v58 }
 0xd64   : > { %7105 = vmatpush.msrb.mxu2 %v15551_v0  ;;  %7210 = vmatpush.msrb.mxu3 %v7209_v54 }
 0xd65   : > { %7276 = vmatpush.msra.mxu0 %v15610_v28  ;;  %7322 = vmatpush.msra.mxu1 %v15578_v50 }
 0xd66   : > { %7107 = vmatpush.msrb.mxu2 %v15565_v58  ;;  %7216 = vmatpush.msrb.mxu3 %v7215_v38 }
 0xd67   : > { %7279 = vmatpush.msra.mxu0 %v15622_v44  ;;  %7324 = vmatpush.msra.mxu1 %v15588_v14 }
 0xd68   : > { %7109 = vmatpush.msrb.mxu2 %v15578_v50  ;;  %7222 = vmatpush.msrb.mxu3 %v7221_v40 }
 0xd69   : > { %7282 = vmatpush.msra.mxu0 %v15635_v47  ;;  %7326 = vmatpush.msra.mxu1 %v15600_v55 }
 0xd6a   : > { %7111 = vmatpush.msrb.mxu2 %v15588_v14  ;;  %7228 = vmatpush.msrb.mxu3 %v7227_v9 }
 0xd6b   : > { %7285 = vmatpush.msra.mxu0 %v15647_v60  ;;  %7328 = vmatpush.msra.mxu1 %v15612_v52 }
 0xd6c   : > { %7113 = vmatpush.msrb.mxu2 %v15600_v55  ;;  %7234 = vmatpush.msrb.mxu3 %v7233_v4 }
 0xd6d   : > { %7288 = vmatpush.msra.mxu0 %v15659_v26  ;;  %7330 = vmatpush.msra.mxu1 %v15624_v7 }
 0xd6e   : > { %7236 = vmatmul.f32.vlgmr.msrb.gmra.mxu3 %v15395_v31  ;;  %7115 = vmatpush.msrb.mxu2 %v15612_v52 }
 0xd6f   : > { %7422 = vmatpush.msra.mxu3 %v15462_v18  ;;  %7291 = vmatpush.msra.mxu0 %v15669_v8 }
 0xd70   : > { %7332 = vmatpush.msra.mxu1 %v15637_v41  ;;  %7294 = vmatmul.f32.vlgmr.msra.gmra.mxu0 %v15403_v20  ;;  %v17450_v20 = vand.u32 4294901760, %v15598_v27 }
 0xd71   : > { %7424 = vmatpush.msra.mxu3 %v15471_v29  ;;  %7117 = vmatpush.msrb.mxu2 %v15624_v7 }
 0xd72   : > { %7334 = vmatpush.msra.mxu1 %v15649_v53 }
 0xd73   : > { %7338 = vmatmul.f32.vlgmr.msra.gmra.mxu1 %v15408_v23  ;;  %7426 = vmatpush.msra.mxu3 %v15483_v21  ;;  %v17451_v23 = vand.u32 4294901760, %v15610_v28 }
 0xd74   : > { %7119 = vmatpush.msrb.mxu2 %v15637_v41 }
 0xd75   : > { %7428 = vmatpush.msra.mxu3 %v15494_v1 }
 0xd76   : > { %7121 = vmatpush.msrb.mxu2 %v15649_v53  ;;  %7240 = vmatmul.f32.gmra.mxu3 %v15398_v16 }
 0xd77   : > { %7127 = vmatmul.f32.vlgmr.msrb.gmra.mxu2 %v15424_v48  ;;  %7430 = vmatpush.msra.mxu3 %v15504_v15  ;;  %v17453_v48 = vand.u32 4294901760, %v15635_v47 }
 0xd78   : > { %7351 = vmatpush.msra.mxu2 %v7141_v3  ;;  %7299 = vmatmul.f32.gmra.mxu0 %v15418_v24  ;;  %v17452_v24 = vand.u32 4294901760, %v15622_v44 }
 0xd79   : > { %7432 = vmatpush.msra.mxu3 %v15526_v34 }
 0xd7a   : > { %7355 = vmatpush.msra.mxu2 %v7147_v12 }
 0xd7b   : > { %7344 = vmatmul.f32.gmra.mxu1 %v15432_v25  ;;  %7434 = vmatpush.msra.mxu3 %v15537_v49 }
 0xd7c   : > { %7359 = vmatpush.msra.mxu2 %v7153_v13 }
 0xd7d   : > { %7436 = vmatpush.msra.mxu3 %v15551_v0 }
 0xd7e   : > { %7363 = vmatpush.msra.mxu2 %v7159_v19 }
 0xd7f   : > { %7135 = vmatmul.f32.gmra.mxu2 %v15455_v45  ;;  %7438 = vmatpush.msra.mxu3 %v15565_v58 }
 0xd80   : > { %7367 = vmatpush.msra.mxu2 %v7165_v43 }
 0xd81   : > { %7440 = vmatpush.msra.mxu3 %v15578_v50 }
 0xd82   : > { %7371 = vmatpush.msra.mxu2 %v7171_v5 }
 0xd83   : > { %7442 = vmatpush.msra.mxu3 %v15588_v14 }
 0xd84   : > { %7375 = vmatpush.msra.mxu2 %v7177_v6 }
 0xd85   : > { %7444 = vmatpush.msra.mxu3 %v15600_v55 }
 0xd86   : > { %7379 = vmatpush.msra.mxu2 %v7183_v42 }
 0xd87   : > { %7446 = vmatpush.msra.mxu3 %v15612_v52 }
 0xd88   : > { %7383 = vmatpush.msra.mxu2 %v7189_v32 }
 0xd89   : > { %7448 = vmatpush.msra.mxu3 %v15624_v7 }
 0xd8a   : > { %7387 = vmatpush.msra.mxu2 %v17450_v20 }
 0xd8b   : > { %7450 = vmatpush.msra.mxu3 %v15637_v41 }
 0xd8c   : > { %7391 = vmatpush.msra.mxu2 %v17451_v23 }
 0xd8d   : > { %7452 = vmatpush.msra.mxu3 %v15649_v53 }
 0xd8e   : > { %7395 = vmatpush.msra.mxu2 %v17452_v24  ;;  %7454 = vmatmul.f32.vlgmr.msra.gmra.mxu3 %v15395_v31 }
 0xd90   : > { %7399 = vmatpush.msra.mxu2 %v17453_v48 }
 0xd92   : > { %7403 = vmatpush.msra.mxu2 %v7219_v17 }
 0xd94   : > { %7407 = vmatpush.msra.mxu2 %v7225_v37 }
 0xd96   : > { %7411 = vmatpush.msra.mxu2 %v7231_v35  ;;  %7458 = vmatmul.f32.gmra.mxu3 %v15398_v16 }
 0xd97   : > { %7413 = vmatmul.f32.vlgmr.msra.gmra.mxu2 %v15395_v31 }
 0xd9f   : > { %7417 = vmatmul.f32.gmra.mxu2 %v15398_v16 }
 0xda2   : > { %v6551_v18 = vpop.f32.mrf.mxu0 }
 0xda4   : > { %v6595_v29 = vpop.f32.mrf.mxu1 }
 0xda6   : > { %v6493_v45 = vpop.f32.mrf.mxu3 }
 0xdab   : > { %v6556_v63 = vpop.f32.mrf.mxu0 }
 0xdae   : > { %v6384_v25 = vpop.f32.mrf.mxu2  ;;  %v6601_v3 = vpop.f32.mrf.mxu1 }
 0xdaf   : > { %v6497_v21 = vpop.f32.mrf.mxu3  ;;  %v6494_v57 = vadd.f32 %v6493_v45, %v6384_v25 }
 0xdb1   : > { %v6552_v34 = vadd.f32 %v6551_v18, %v6494_v57 }
 0xdb3   : > { %v6596_v16 = vadd.f32 %v6595_v29, %v6552_v34 }
 0xdb5   : > { %v6756_v15 = vpop.f32.mrf.mxu0 }
 0xdb8   : > { %v6392_v22 = vpop.f32.mrf.mxu2  ;;  %v6865_v12 = vpop.f32.mrf.mxu1 }
 0xdb9   : > { %v6711_v59 = vpop.f32.mrf.mxu3  ;;  %v6498_v49 = vadd.f32 %v6497_v21, %v6392_v22  ;;  %v6866_v43 = vadd.f32 %v6865_v12, %v6756_v15 }
 0xdbb   : > { %v6557_v58 = vadd.f32 %v6556_v63, %v6498_v49 }
 0xdbd   : > { %v6602_v42 = vadd.f32 %v6601_v3, %v6557_v58 }
 0xdbf   : > { %v6764_v19 = vpop.f32.mrf.mxu0 }
 0xdc2   : > { %v6670_v1 = vpop.f32.mrf.mxu2  ;;  %v6869_v31 = vpop.f32.mrf.mxu1 }
 0xdc3   : > { %v6715_v39 = vpop.f32.mrf.mxu3  ;;  %v6671_v11 = vadd.f32 %v6670_v1, %v6596_v16  ;;  %v6870_v32 = vadd.f32 %v6869_v31, %v6764_v19 }
 0xdc5   : > { %v15778_v50 = vadd.f32 %v6711_v59, %v6671_v11 }
 0xdc7   : > { %v7463_v27 = vsel %vm1888_vm1, %v15778_v50, 0 }
 0xdc8   : > { %v7492_v26 = vand.u32 4294901760, %v7463_v27 }
 0xdca   : > { %v7493_v60 = vsub.f32 %v7463_v27, %v7492_v26 }
 0xdcb   : > { %v7042_v6 = vpop.f32.mrf.mxu0 }
 0xdcc   : > { %v6674_v13 = vpop.f32.mrf.mxu2  ;;  %v7494_v35 = vand.u32 4294901760, %v7493_v60 }
 0xdcd   : > { %v6675_v55 = vadd.f32 %v6674_v13, %v6602_v42 }
 0xdce   : > { %v6967_v5 = vpop.f32.mrf.mxu3  ;;  %v7083_v14 = vpop.f32.mrf.mxu1  ;;  %v7495_v20 = vsub.f32 %v7493_v60, %v7494_v35 }
 0xdcf   : > { %v15784_v7 = vadd.f32 %v6715_v39, %v6675_v55 }
 0xdd0   : > { %v7496_v45 = vand.u32 4294901760, %v7495_v20 }
 0xdd1   : > { %v7466_v37 = vsel %vm1888_vm1, %v15784_v7, 0 }
 0xdd2   : > { %v7500_v40 = vand.u32 4294901760, %v7466_v37 }
 0xdd4   : > { %v7501_v23 = vsub.f32 %v7466_v37, %v7500_v40 }
 0xdd5   : > { %v7046_v51 = vpop.f32.mrf.mxu0 }
 0xdd6   : > { %v7502_v18 = vand.u32 4294901760, %v7501_v23 }
 0xdd8   : > { %v6973_v8 = vpop.f32.mrf.mxu3  ;;  %v7087_v38 = vpop.f32.mrf.mxu1  ;;  %v7503_v21 = vsub.f32 %v7501_v23, %v7502_v18 }
 0xdd9   : > { %v6923_v0 = vpop.f32.mrf.mxu2 }
 0xdda   : > { %v6924_v33 = vadd.f32 %v6923_v0, %v6866_v43  ;;  %v7504_v3 = vand.u32 4294901760, %v7503_v21 }
 0xddc   : > { %v6968_v62 = vadd.f32 %v6967_v5, %v6924_v33 }
 0xdde   : > { %v7043_v2 = vadd.f32 %v7042_v6, %v6968_v62 }
 0xde0   : > { %v15782_v28 = vadd.f32 %v7083_v14, %v7043_v2 }
 0xde2   : > { %v6928_v52 = vpop.f32.mrf.mxu2  ;;  %v7469_v41 = vsel %vm1888_vm1, %v15782_v28, 0 }
 0xde3   : > { %v6929_v44 = vadd.f32 %v6928_v52, %v6870_v32  ;;  %v7490_v17 = vand.u32 4294901760, %v7469_v41 }
 0xde5   : > { %v6974_v47 = vadd.f32 %v6973_v8, %v6929_v44  ;;  %v7530_v9 = vsub.f32 %v7469_v41, %v7490_v17 }
 0xde7   : > { %v7047_v53 = vadd.f32 %v7046_v51, %v6974_v47  ;;  %v7531_v48 = vand.u32 4294901760, %v7530_v9 }
 0xde9   : > { %v15790_v54 = vadd.f32 %v7087_v38, %v7047_v53  ;;  %v7532_v22 = vsub.f32 %v7530_v9, %v7531_v48 }
 0xdeb   : > { %7916 = vrot.lane.b32.xlu1 %v15790_v54, %s12395_s14  ;;  %v7472_v30 = vsel %vm1888_vm1, %v15790_v54, 0  ;;  %v7533_v63 = vand.u32 4294901760, %v7532_v22 }
 0xdec   : > { %v7488_v46 = vand.u32 4294901760, %v7472_v30 }
 0xded   : > { %v7295_v15 = vpop.f32.mrf.mxu0 }
 0xdee   : > { %7489 = vmatpush.xpose.msrb.mxu0 %v7488_v46  ;;  %v7524_v4 = vsub.f32 %v7472_v30, %v7488_v46  ;;  %7652 = vmatpush.xpose.msrb.mxu3 %v7488_v46 }
 0xdf0   : > { %v7525_v24 = vand.u32 4294901760, %v7524_v4  ;;  %v7339_v34 = vpop.f32.mrf.mxu1 }
 0xdf1   : > { %v7237_v1 = vpop.f32.mrf.mxu3 }
 0xdf2   : > { %7491 = vmatpush.xpose.msrb.mxu0 %v7490_v17  ;;  %7623 = vmatpush.xpose.msrb.mxu2 %v7525_v24  ;;  %v7526_v25 = vsub.f32 %v7524_v4, %v7525_v24 }
 0xdf3   : > { %7654 = vmatpush.xpose.msrb.mxu3 %v7490_v17  ;;  %7910 = vrot.lane.b32.xlu1 %v15778_v50, %s12395_s14 }
 0xdf4   : > { %v7527_v29 = vand.u32 4294901760, %v7526_v25 }
 0xdf5   : > { %7497 = vmatmul.f32.vlgmr.msrb.gmra.mxu0 %v7496_v45  ;;  %v7300_v11 = vpop.f32.mrf.mxu0 }
 0xdf6   : > { %7560 = vmatpush.xpose.msra.mxu0 %v7524_v4  ;;  %7656 = vmatmul.f32.vlgmr.msrb.gmra.mxu3 %v7492_v26 }
 0xdf7   : > { %7528 = vmatpush.xpose.msrb.mxu1 %v7527_v29  ;;  %7627 = vmatpush.xpose.msrb.mxu2 %v7531_v48 }
 0xdf8   : > { %v7345_v58 = vpop.f32.mrf.mxu1 }
 0xdf9   : > { %v7241_v57 = vpop.f32.mrf.mxu3 }
 0xdfa   : > { %7563 = vmatpush.xpose.msra.mxu0 %v7530_v9  ;;  %7629 = vmatmul.f32.vlgmr.msrb.gmra.mxu2 %v7492_v26  ;;  %v7128_v59 = vpop.f32.mrf.mxu2 }
 0xdfb   : > { %7534 = vmatpush.xpose.msrb.mxu1 %v7533_v63  ;;  %7912 = vrot.lane.b32.xlu1 %v15784_v7, %s12395_s14  ;;  %v7238_v12 = vadd.f32 %v7237_v1, %v7128_v59 }
 0xdfd   : > { %7505 = vmatmul.f32.gmra.mxu0 %v7504_v3  ;;  %v7296_v39 = vadd.f32 %v7295_v15, %v7238_v12 }
 0xdfe   : > { %7536 = vmatmul.f32.vlgmr.msrb.gmra.mxu1 %v7492_v26  ;;  %7660 = vmatmul.f32.gmra.mxu3 %v7500_v40 }
 0xdff   : > { %7590 = vmatpush.xpose.msra.mxu1 %v7488_v46  ;;  %v7340_v31 = vadd.f32 %v7339_v34, %v7296_v39 }
 0xe02   : > { %7633 = vmatmul.f32.gmra.mxu2 %v7500_v40  ;;  %v7136_v13 = vpop.f32.mrf.mxu2 }
 0xe03   : > { %7592 = vmatpush.xpose.msra.mxu1 %v7490_v17  ;;  %v7242_v19 = vadd.f32 %v7241_v57, %v7136_v13 }
 0xe05   : > { %7566 = vmatmul.f32.vlgmr.msra.gmra.mxu0 %v7493_v60  ;;  %v7301_v0 = vadd.f32 %v7300_v11, %v7242_v19 }
 0xe06   : > { %7540 = vmatmul.f32.gmra.mxu1 %v7500_v40 }
 0xe07   : > { %v7346_v5 = vadd.f32 %v7345_v58, %v7301_v0 }
 0xe0d   : > { %7571 = vmatmul.f32.gmra.mxu0 %v7501_v23 }
 0xe0e   : > { %7596 = vmatmul.f32.vlgmr.msra.gmra.mxu1 %v7494_v35 }
 0xe11   : > { %v7455_v49 = vpop.f32.mrf.mxu3 }
 0xe16   : > { %7602 = vmatmul.f32.gmra.mxu1 %v7502_v18 }
 0xe19   : > { %v7459_v14 = vpop.f32.mrf.mxu3 }
 0xe1a   : > { %v7414_v16 = vpop.f32.mrf.mxu2 }
 0xe1b   : > { %v7415_v43 = vadd.f32 %v7414_v16, %v7340_v31 }
 0xe1d   : > { %v15800_v33 = vadd.f32 %v7455_v49, %v7415_v43 }
 0xe1f   : > { %v7736_v62 = vand.u32 4294901760, %v15800_v33 }
 0xe21   : > { %v7776_v27 = vsub.f32 %v15800_v33, %v7736_v62 }
 0xe22   : > { %v7418_v6 = vpop.f32.mrf.mxu2 }
 0xe23   : > { %v7419_v2 = vadd.f32 %v7418_v6, %v7346_v5  ;;  %v7777_v52 = vand.u32 4294901760, %v7776_v27 }
 0xe25   : > { %v15803_v42 = vadd.f32 %v7459_v14, %v7419_v2  ;;  %v7778_v8 = vsub.f32 %v7776_v27, %v7777_v52 }
 0xe27   : > { %v7734_v55 = vand.u32 4294901760, %v15803_v42  ;;  %v7779_v41 = vand.u32 4294901760, %v7778_v8 }
 0xe29   : > { %7735 = vmatpush.msrb.mxu0 %v7734_v55  ;;  %7836 = vmatpush.msra.mxu3 %v7734_v55  ;;  %v7770_v32 = vsub.f32 %v15803_v42, %v7734_v55 }
 0xe2b   : > { %7737 = vmatpush.msrb.mxu0 %v7736_v62  ;;  %7806 = vmatpush.msra.mxu2 %v7770_v32  ;;  %v7771_v26 = vand.u32 4294901760, %v7770_v32 }
 0xe2c   : > { %7838 = vmatpush.msra.mxu3 %v7736_v62 }
 0xe2d   : > { %7809 = vmatpush.msra.mxu2 %v7776_v27  ;;  %7869 = vmatpush.msra.mxu0 %v7771_v26  ;;  %v7772_v44 = vsub.f32 %v7770_v32, %v7771_v26 }
 0xe2f   : > { %7873 = vmatpush.msra.mxu0 %v7777_v52  ;;  %v7773_v47 = vand.u32 4294901760, %v7772_v44 }
 0xe31   : > { %7774 = vmatpush.msrb.mxu1 %v7773_v47 }
 0xe33   : > { %7780 = vmatpush.msrb.mxu1 %v7779_v41 }
 0xe35   : > { %7898 = vmatpush.msra.mxu1 %v7734_v55 }
 0xe37   : > { %7900 = vmatpush.msra.mxu1 %v7736_v62 }
 0xe5d   : > { %v7917_v51 = vpop.permute.xlu1 %7916 }
 0xe5e   : > { %v7924_v60 = vsel %vm1888_vm1, %v7917_v51, 0 }
 0xe5f   : > { %v15809_v53 = vand.u32 4294901760, %v7924_v60 }
 0xe61   : > { %v15812_v38 = vsub.f32 %v7924_v60, %v15809_v53  ;;  %7941 = vmatpush.xpose.msrb.mxu2 %v15809_v53 }
 0xe63   : > { %v7977_v17 = vand.u32 4294901760, %v15812_v38 }
 0xe65   : > { %v7978_v37 = vsub.f32 %v15812_v38, %v7977_v17 }
 0xe67   : > { %v7979_v30 = vand.u32 4294901760, %v7978_v37 }
 0xe69   : > { %7980 = vmatpush.xpose.msrb.mxu3 %v7979_v30  ;;  %v7911_v30 = vpop.permute.xlu1 %7910 }
 0xe72   : > { %v7498_v35 = vpop.f32.mrf.mxu0 }
 0xe79   : > { %v7657_v45 = vpop.f32.mrf.mxu3 }
 0xe7a   : > { %v7506_v40 = vpop.f32.mrf.mxu0 }
 0xe7b   : > { %v7537_v46 = vpop.f32.mrf.mxu1 }
 0xe7c   : > { %v7538_v20 = vadd.f32 %v7537_v46, %v7498_v35 }
 0xe7d   : > { %v7630_v24 = vpop.f32.mrf.mxu2 }
 0xe81   : > { %v7661_v13 = vpop.f32.mrf.mxu3 }
 0xe82   : > { %v7567_v4 = vpop.f32.mrf.mxu0 }
 0xe83   : > { %v7541_v9 = vpop.f32.mrf.mxu1  ;;  %v7568_v23 = vadd.f32 %v7567_v4, %v7538_v20 }
 0xe84   : > { %v7542_v22 = vadd.f32 %v7541_v9, %v7506_v40 }
 0xe85   : > { %v7634_v12 = vpop.f32.mrf.mxu2 }
 0xe8a   : > { %v7572_v29 = vpop.f32.mrf.mxu0 }
 0xe8b   : > { %v7597_v48 = vpop.f32.mrf.mxu1  ;;  %v7573_v63 = vadd.f32 %v7572_v29, %v7542_v22 }
 0xe8c   : > { %v7598_v25 = vadd.f32 %v7597_v48, %v7568_v23  ;;  %v7918_v48 = vsel %vm1888_vm1, %v7911_v30, 0 }
 0xe8e   : > { %v7631_v18 = vadd.f32 %v7630_v24, %v7598_v25 }
 0xe90   : > { %v7658_v21 = vadd.f32 %v7657_v45, %v7631_v18 }
 0xe92   : > { %v7664_v3 = vsel %vm698_vm2, %v7658_v21, -1e+30 }
 0xe93   : > { %v7603_v1 = vpop.f32.mrf.mxu1  ;;  %v7666_v59 = vsel %vm2093_vm3, %v7664_v3, -inf }
 0xe94   : > { %v7604_v15 = vadd.f32 %v7603_v1, %v7573_v63  ;;  %7667 = vmax.xlane.f32.xlu2 %v7666_v59 }
 0xe96   : > { %v7635_v57 = vadd.f32 %v7634_v12, %v7604_v15  ;;  %v7913_v12 = vpop.permute.xlu1 %7912 }
 0xe98   : > { %v7662_v39 = vadd.f32 %v7661_v13, %v7635_v57 }
 0xe9a   : > { %v7665_v34 = vsel %vm698_vm2, %v7662_v39, -1e+30 }
 0xe9b   : > { %v7669_v19 = vsel %vm2093_vm3, %v7665_v34, -inf }
 0xe9c   : > { %7670 = vmax.xlane.f32.xlu2 %v7669_v19 }
 0xf07   : > { %v7668_v31 = vpop.xlane.xlu2 %7667 }
 0xf08   : > { %v7672_v49 = vsub.f32 %v7664_v3, %v7668_v31  ;;  %v7944_v3 = vand.u32 4294901760, %v7918_v48  ;;  %v7920_v31 = vsel %vm1888_vm1, %v7913_v12, 0 }
 0xf0a   : > { %v7674_v16 = vmul.f32 1.442695, %v7672_v49 }
 0xf0c   : > { %12153 = vpow2.f32 %v7674_v16 }
 0xf0f   : > { %v7671_v43 = vpop.xlane.xlu2 %7670 }
 0xf10   : > { %v7673_v11 = vsub.f32 %v7665_v34, %v7671_v43  ;;  %v7945_v34 = vsub.f32 %v7918_v48, %v7944_v3 }
 0xf12   : > { %v12154_v0 = vpop.eup %12153  ;;  %v7676_v58 = vmul.f32 1.442695, %v7673_v11  ;;  %v7946_v11 = vand.u32 4294901760, %v7945_v34 }
 0xf13   : > { %v7678_v5 = vsel %vm2093_vm3, %v12154_v0, 0.0 }
 0xf14   : > { %12155 = vpow2.f32 %v7676_v58  ;;  %7679 = vadd.xlane.f32.xlu2 %v7678_v5  ;;  %v7947_v5 = vsub.f32 %v7945_v34, %v7946_v11 }
 0xf1a   : > { %v12156_v62 = vpop.eup %12155 }
 0xf1b   : > { %v7681_v6 = vsel %vm2093_vm3, %v12156_v62, 0.0 }
 0xf1c   : > { %7682 = vadd.xlane.f32.xlu0 %v7681_v6 }
 0xf2c   : > { %7914 = vrot.lane.b32.xlu2 %v15782_v28, %s12395_s14 }
 0xf87   : > { %v7680_v2 = vpop.xlane.xlu2 %7679 }
 0xf88   : > { %12157 = vrcp.f32 %v7680_v2  ;;  %v7695_v44 = vand.u32 2147483648, %v7680_v2  ;;  %v7693_v41 = vand.u32 2147483647, %v7680_v2  ;;  %vm7689_vm5 = vweird.f32 %v7680_v2 }
 0xf8a   : > { %v7696_v35 = vor.u32 1.1754944e-38, %v7695_v44  ;;  %vm7694_vm7 = vcmp.eq.f32.partialorder %v7693_v41, 8.507059e+37 }
 0xf8e   : > { %v12158_v14 = vpop.eup %12157 }
 0xf8f   : > { %v7685_v27 = vmul.f32 %v12158_v14, %v7680_v2  ;;  %v7683_v55 = vpop.xlane.xlu0 %7682  ;;  %v7915_v32 = vpop.permute.xlu2 %7914  ;;  %vm7690_vm4 = vweird.f32 %v12158_v14  ;;  %v7948_v2 = vand.u32 4294901760, %v7947_v5 }
 0xf90   : > { %12159 = vrcp.f32 %v7683_v55  ;;  %v7922_v26 = vsel %vm1888_vm1, %v7915_v32, 0  ;;  %vm7691_vm6 = vmor %vm7689_vm5, %vm7690_vm4  ;;  %v7710_v25 = vand.u32 2147483648, %v7683_v55  ;;  %v7708_v29 = vand.u32 2147483647, %v7683_v55 }
 0xf91   : > { %v7686_v52 = vsub.f32 1.0, %v7685_v27  ;;  %v7942_v8 = vand.u32 4294901760, %v7922_v26  ;;  %vm7704_vm9 = vweird.f32 %v7683_v55 }
 0xf92   : > { %v7711_v1 = vor.u32 1.1754944e-38, %v7710_v25  ;;  %vm7709_vm11 = vcmp.eq.f32.partialorder %v7708_v29, 8.507059e+37 }
 0xf93   : > { %v7687_v47 = vmul.f32 %v12158_v14, %v7686_v52  ;;  %v15830_v51 = vsub.f32 %v7922_v26, %v7942_v8  ;;  %7943 = vmatpush.xpose.msrb.mxu2 %v7942_v8 }
 0xf95   : > { %v7688_v60 = vadd.f32 %v12158_v14, %v7687_v47  ;;  %v7983_v40 = vand.u32 4294901760, %v15830_v51 }
 0xf96   : > { %v12160_v37 = vpop.eup %12159 }
 0xf97   : > { %v7692_v46 = vsel %vm7691_vm6, %v12158_v14, %v7688_v60  ;;  %v7700_v9 = vmul.f32 %v12160_v37, %v7683_v55  ;;  %v7984_v20 = vsub.f32 %v15830_v51, %v7983_v40  ;;  %vm7705_vm8 = vweird.f32 %v12160_v37 }
 0xf98   : > { %v7697_v4 = vsel %vm7694_vm7, %v7696_v35, %v7692_v46  ;;  %vm7706_vm10 = vmor %vm7704_vm9, %vm7705_vm8 }
 0xf99   : > { %v7698_v23 = vmul.f32 %v12154_v0, %v7697_v4  ;;  %v7701_v24 = vsub.f32 1.0, %v7700_v9  ;;  %v7985_v45 = vand.u32 4294901760, %v7984_v20  ;;  %v7952_v0 = vand.u32 4294901760, %v7920_v31 }
 0xf9b   : > { %v7702_v18 = vmul.f32 %v12160_v37, %v7701_v24  ;;  %v7715_v22 = vsel %vm2093_vm3, %v7698_v23, 0  ;;  %7986 = vmatpush.xpose.msrb.mxu3 %v7985_v45 }
 0xf9c   : > { %v7738_v21 = vand.u32 4294901760, %v7715_v22 }
 0xf9d   : > { %v7703_v63 = vadd.f32 %v12160_v37, %v7702_v18 }
 0xf9e   : > { %7782 = vmatmul.f32.vlgmr.msrb.gmra.mxu1 %v7738_v21  ;;  %v7739_v59 = vsub.f32 %v7715_v22, %v7738_v21 }
 0xf9f   : > { %v7707_v15 = vsel %vm7706_vm10, %v12160_v37, %v7703_v63  ;;  %8042 = vmatpush.xpose.msrb.mxu1 %v15809_v53 }
 0xfa0   : > { %v7712_v57 = vsel %vm7709_vm11, %v7711_v1, %v7707_v15  ;;  %7812 = vmatmul.f32.vlgmr.msra.gmra.mxu2 %v7739_v59  ;;  %v7740_v13 = vand.u32 4294901760, %v7739_v59 }
 0xfa1   : > { %8075 = vmatpush.xpose.msra.mxu2 %v7977_v17  ;;  %v7713_v39 = vmul.f32 %v12156_v62, %v7712_v57  ;;  %v7953_v62 = vsub.f32 %v7920_v31, %v7952_v0 }
 0xfa2   : > { %7842 = vmatmul.f32.vlgmr.msra.gmra.mxu3 %v7740_v13  ;;  %v7741_v19 = vsub.f32 %v7739_v59, %v7740_v13 }
 0xfa3   : > { %8044 = vmatpush.xpose.msrb.mxu1 %v7942_v8  ;;  %8104 = vmatpush.xpose.msra.mxu3 %v15809_v53  ;;  %v7718_v49 = vsel %vm2093_vm3, %v7713_v39, 0  ;;  %v7954_v14 = vand.u32 4294901760, %v7953_v62 }
 0xfa4   : > { %v7742_v16 = vand.u32 4294901760, %v7741_v19  ;;  %v7746_v43 = vand.u32 4294901760, %v7718_v49 }
 0xfa5   : > { %8079 = vmatpush.xpose.msra.mxu2 %v7983_v40  ;;  %v7955_v27 = vsub.f32 %v7953_v62, %v7954_v14 }
 0xfa6   : > { %7743 = vmatmul.f32.vlgmr.msrb.gmra.mxu0 %v7742_v16  ;;  %7786 = vmatmul.f32.gmra.mxu1 %v7746_v43  ;;  %v7747_v58 = vsub.f32 %v7718_v49, %v7746_v43 }
 0xfa7   : > { %8012 = vmatpush.xpose.msrb.mxu0 %v15812_v38  ;;  %8106 = vmatpush.xpose.msra.mxu3 %v7942_v8  ;;  %v7956_v38 = vand.u32 4294901760, %v7955_v27 }
 0xfa8   : > { %7817 = vmatmul.f32.gmra.mxu2 %v7747_v58  ;;  %v7748_v17 = vand.u32 4294901760, %v7747_v58 }
 0xfaa   : > { %7848 = vmatmul.f32.gmra.mxu3 %v7748_v17  ;;  %v7749_v6 = vsub.f32 %v7747_v58, %v7748_v17 }
 0xfab   : > { %8015 = vmatpush.xpose.msrb.mxu0 %v15830_v51 }
 0xfac   : > { %v7750_v53 = vand.u32 4294901760, %v7749_v6 }
 0xfae   : > { %7751 = vmatmul.f32.gmra.mxu0 %v7750_v53  ;;  %7902 = vmatmul.f32.vlgmr.msra.gmra.mxu1 %v7738_v21 }
 0xfb0   : > { %7949 = vmatmul.f32.vlgmr.msrb.gmra.mxu2 %v7948_v2 }
 0xfb2   : > { %7988 = vmatmul.f32.vlgmr.msrb.gmra.mxu3 %v7944_v3 }
 0xfb6   : > { %7875 = vmatmul.f32.vlgmr.msra.gmra.mxu0 %v7738_v21  ;;  %7906 = vmatmul.f32.gmra.mxu1 %v7746_v43 }
 0xfb8   : > { %7957 = vmatmul.f32.gmra.mxu2 %v7956_v38 }
 0xfba   : > { %7992 = vmatmul.f32.gmra.mxu3 %v7952_v0 }
 0xfbe   : > { %7879 = vmatmul.f32.gmra.mxu0 %v7746_v43  ;;  %8048 = vmatmul.f32.vlgmr.msrb.gmra.mxu1 %v7946_v11 }
 0xfc0   : > { %8081 = vmatmul.f32.vlgmr.msra.gmra.mxu2 %v7944_v3 }
 0xfc2   : > { %8108 = vmatmul.f32.vlgmr.msra.gmra.mxu3 %v7944_v3 }
 0xfc6   : > { %8018 = vmatmul.f32.vlgmr.msrb.gmra.mxu0 %v7945_v34  ;;  %8054 = vmatmul.f32.gmra.mxu1 %v7954_v14 }
 0xfc8   : > { %8085 = vmatmul.f32.gmra.mxu2 %v7952_v0 }
 0xfca   : > { %8112 = vmatmul.f32.gmra.mxu3 %v7952_v0 }
 0xfce   : > { %8023 = vmatmul.f32.gmra.mxu0 %v7953_v62 }
0x101b   : > { %v15844_v55 = vpop.f32.mrf.mxu1 }
0x1023   : > { %v15846_v32 = vpop.f32.mrf.mxu0  ;;  %v15848_v52 = vpop.f32.mrf.mxu2 }
0x1024   : > { %v15850_v26 = vpop.f32.mrf.mxu1 }
0x1025   : > { %v15852_v44 = vpop.f32.mrf.mxu3 }
0x102b   : > { %v15854_v8 = vpop.f32.mrf.mxu0  ;;  %v15856_v47 = vpop.f32.mrf.mxu2 }
0x102c   : > { %v15860_v51 = vpop.f32.mrf.mxu1 }
0x102d   : > { %v15858_v41 = vpop.f32.mrf.mxu3 }
0x1033   : > { %v15862_v60 = vpop.f32.mrf.mxu0  ;;  %v7950_v37 = vpop.f32.mrf.mxu2 }
0x1034   : > { %v15864_v35 = vpop.f32.mrf.mxu1 }
0x1035   : > { %v7989_v30 = vpop.f32.mrf.mxu3 }
0x1036   : > { %v7990_v4 = vadd.f32 %v7989_v30, %v7950_v37 }
0x103b   : > { %v15866_v40 = vpop.f32.mrf.mxu0  ;;  %v7958_v46 = vpop.f32.mrf.mxu2 }
0x103c   : > { %v8049_v20 = vpop.f32.mrf.mxu1 }
0x103d   : > { %v7993_v9 = vpop.f32.mrf.mxu3 }
0x103e   : > { %v7994_v29 = vadd.f32 %v7993_v9, %v7958_v46 }
0x1043   : > { %v8019_v23 = vpop.f32.mrf.mxu0  ;;  %v8082_v48 = vpop.f32.mrf.mxu2 }
0x1044   : > { %v8020_v24 = vadd.f32 %v8019_v23, %v7990_v4  ;;  %v8055_v1 = vpop.f32.mrf.mxu1 }
0x1045   : > { %v8109_v45 = vpop.f32.mrf.mxu3 }
0x1046   : > { %v8050_v25 = vadd.f32 %v8049_v20, %v8020_v24 }
0x1048   : > { %v8083_v18 = vadd.f32 %v8082_v48, %v8050_v25 }
0x104a   : > { %v8110_v22 = vadd.f32 %v8109_v45, %v8083_v18 }
0x104b   : > { %v8024_v21 = vpop.f32.mrf.mxu0  ;;  %v8086_v12 = vpop.f32.mrf.mxu2 }
0x104c   : > { %v8025_v63 = vadd.f32 %v8024_v21, %v7994_v29  ;;  %v8116_v3 = vsel %vm698_vm2, %v8110_v22, -1e+30 }
0x104d   : > { %v8118_v59 = vsel %vm2093_vm3, %v8116_v3, -inf  ;;  %v8113_v13 = vpop.f32.mrf.mxu3 }
0x104e   : > { %v8056_v15 = vadd.f32 %v8055_v1, %v8025_v63  ;;  %8119 = vmax.xlane.f32.xlu1 %v8118_v59 }
0x1050   : > { %v8087_v57 = vadd.f32 %v8086_v12, %v8056_v15 }
0x1052   : > { %v8114_v39 = vadd.f32 %v8113_v13, %v8087_v57 }
0x1054   : > { %v8117_v34 = vsel %vm698_vm2, %v8114_v39, -1e+30 }
0x1055   : > { %v8121_v19 = vsel %vm2093_vm3, %v8117_v34, -inf }
0x1056   : > { %8122 = vmax.xlane.f32.xlu2 %v8121_v19 }
0x1067   : > { %8168 = vrot.lane.b32.xlu1 %v15800_v33, %s12395_s14 }
0x106e   : > { %8820 = vrot.lane.b32.xlu2 %v15790_v54, %s12396_s18 }
0x10c1   : > { %v8120_v31 = vpop.xlane.xlu1 %8119 }
0x10c2   : > { %v8124_v49 = vsub.f32 %v8116_v3, %v8120_v31 }
0x10c4   : > { %v8126_v16 = vmul.f32 1.442695, %v8124_v49 }
0x10c6   : > { %12161 = vpow2.f32 %v8126_v16 }
0x10c9   : > { %v8123_v43 = vpop.xlane.xlu2 %8122 }
0x10ca   : > { %v8125_v11 = vsub.f32 %v8117_v34, %v8123_v43 }
0x10cc   : > { %v12162_v0 = vpop.eup %12161  ;;  %v8128_v58 = vmul.f32 1.442695, %v8125_v11 }
0x10cd   : > { %v8130_v17 = vsel %vm2093_vm3, %v12162_v0, 0.0 }
0x10ce   : > { %12163 = vpow2.f32 %v8128_v58  ;;  %8131 = vadd.xlane.f32.xlu0 %v8130_v17 }
0x10d4   : > { %v12164_v5 = vpop.eup %12163 }
0x10d5   : > { %v8133_v62 = vsel %vm2093_vm3, %v12164_v5, 0.0 }
0x10d6   : > { %8134 = vadd.xlane.f32.xlu0 %v8133_v62 }
0x10d9   : > { %v8169_v45 = vpop.permute.xlu1 %8168 }
0x10da   : > { %v8196_v3 = vand.u32 4294901760, %v8169_v45 }
0x10dc   : > { %v8236_v39 = vsub.f32 %v8169_v45, %v8196_v3 }
0x10ea   : > { %8170 = vrot.lane.b32.xlu0 %v15803_v42, %s12395_s14  ;;  %s17475_s14 = smov %s17474_s26 }
0x10eb   : > { %s12329_s3 = scalar_lea.hbm %s17475_s14, 32  ;;  %p12330_p3 = scmp.lt.s32.totalorder %s12324_s24, %s17475_s14 }
0x10ec   : > { %p12331_p4 = scmp.lt.s32.totalorder %s12329_s3, %s12325_s17 }
0x10ee   : > { %p12332_p7 = por %p12331_p4, %p12330_p3 }
0x10f0   : > { %p12333_p8 = pnand %p12332_p7, %p12328_p2 }
0x10f2   : > { %8818 = vrot.lane.b32.xlu0 %v15782_v28, %s12396_s18 }
0x10fa   : > { %8814 = vrot.lane.b32.xlu0 %v15778_v50, %s12396_s18 }
0x1102   : > { %8816 = vrot.lane.b32.xlu0 %v15784_v7, %s12396_s18 }
0x1141   : > { %v8132_v6 = vpop.xlane.xlu0 %8131 }
0x1142   : > { %12165 = vrcp.f32 %v8132_v6  ;;  %v8147_v38 = vand.u32 2147483648, %v8132_v6  ;;  %v8145_v30 = vand.u32 2147483647, %v8132_v6  ;;  %vm8141_vm13 = vweird.f32 %v8132_v6 }
0x1144   : > { %v8148_v4 = vor.u32 1.1754944e-38, %v8147_v38  ;;  %vm8146_vm15 = vcmp.eq.f32.partialorder %v8145_v30, 8.507059e+37 }
0x1148   : > { %v12166_v53 = vpop.eup %12165 }
0x1149   : > { %v8137_v2 = vmul.f32 %v12166_v53, %v8132_v6  ;;  %v8135_v14 = vpop.xlane.xlu0 %8134  ;;  %vm8142_vm12 = vweird.f32 %v12166_v53 }
0x114a   : > { %12167 = vrcp.f32 %v8135_v14  ;;  %vm8143_vm14 = vmor %vm8141_vm13, %vm8142_vm12  ;;  %v8162_v18 = vand.u32 2147483648, %v8135_v14  ;;  %v8160_v21 = vand.u32 2147483647, %v8135_v14  ;;  %vm8156_vm4 = vweird.f32 %v8135_v14 }
0x114b   : > { %v8138_v27 = vsub.f32 1.0, %v8137_v2 }
0x114c   : > { %v8163_v15 = vor.u32 1.1754944e-38, %v8162_v18  ;;  %vm8161_vm6 = vcmp.eq.f32.partialorder %v8160_v21, 8.507059e+37 }
0x114d   : > { %v8139_v37 = vmul.f32 %v12166_v53, %v8138_v27 }
0x114f   : > { %v8140_v46 = vadd.f32 %v12166_v53, %v8139_v37  ;;  %v6337_v37 = vld [vmem:[#allocation5 + $0xb8] sm:$0xff] }
0x1150   : > { %v12168_v9 = vpop.eup %12167  ;;  %v8388_v30 = vand.u32 4294901760, %v6337_v37 }
0x1151   : > { %v8144_v20 = vsel %vm8143_vm14, %v12166_v53, %v8140_v46  ;;  %v8152_v23 = vmul.f32 %v12168_v9, %v8135_v14  ;;  %vm8157_vm0 = vweird.f32 %v12168_v9  ;;  %v6336_v46 = vld [vmem:[#allocation5 + $0xb0] sm:$0xff] }
0x1152   : > { %v8149_v24 = vsel %vm8146_vm15, %v8148_v4, %v8144_v20  ;;  %vm8158_vm5 = vmor %vm8156_vm4, %vm8157_vm0  ;;  %v8390_v4 = vand.u32 4294901760, %v6336_v46  ;;  %v6335_v20 = vld [vmem:[#allocation5 + $0xa8] sm:$0xff] }
0x1153   : > { %v8150_v48 = vmul.f32 %v12162_v0, %v8149_v24  ;;  %v8153_v25 = vsub.f32 1.0, %v8152_v23  ;;  %v8237_v0 = vand.u32 4294901760, %v8236_v39 }
0x1154   : > { %v8432_v24 = vsub.f32 %v6336_v46, %v8390_v4 }
0x1155   : > { %v8175_v29 = vsel %vm2093_vm3, %v8150_v48, 0  ;;  %v8154_v22 = vmul.f32 %v12168_v9, %v8153_v25  ;;  %v8392_v48 = vand.u32 4294901760, %v6335_v20  ;;  %v6334_v25 = vld [vmem:[#allocation5 + $0xa0] sm:$0xff] }
0x1156   : > { %v8198_v63 = vand.u32 4294901760, %v8175_v29  ;;  %v8433_v18 = vand.u32 4294901760, %v8432_v24 }
0x1157   : > { %v8155_v1 = vadd.f32 %v12168_v9, %v8154_v22  ;;  %v8394_v22 = vand.u32 4294901760, %v6334_v25 }
0x1158   : > { %v8199_v59 = vsub.f32 %v8175_v29, %v8198_v63  ;;  %v8438_v29 = vsub.f32 %v6335_v20, %v8392_v48 }
0x1159   : > { %v8159_v12 = vsel %vm8158_vm5, %v12168_v9, %v8155_v1  ;;  %v8426_v9 = vsub.f32 %v6337_v37, %v8388_v30  ;;  %v8444_v1 = vsub.f32 %v6334_v25, %v8394_v22 }
0x115a   : > { %v8164_v57 = vsel %vm8161_vm6, %v8163_v15, %v8159_v12  ;;  %v8200_v13 = vand.u32 4294901760, %v8199_v59 }
0x115b   : > { %v8165_v34 = vmul.f32 %v12164_v5, %v8164_v57  ;;  %v8238_v5 = vsub.f32 %v8236_v39, %v8237_v0  ;;  %v8427_v23 = vand.u32 4294901760, %v8426_v9  ;;  %v8445_v12 = vand.u32 4294901760, %v8444_v1 }
0x115c   : > { %v8171_v19 = vpop.permute.xlu0 %8170  ;;  %v8201_v31 = vsub.f32 %v8199_v59, %v8200_v13 }
0x115d   : > { %v8194_v49 = vand.u32 4294901760, %v8171_v19  ;;  %v8178_v16 = vsel %vm2093_vm3, %v8165_v34, 0  ;;  %v8239_v27 = vand.u32 4294901760, %v8238_v5  ;;  %v8428_v45 = vsub.f32 %v8426_v9, %v8427_v23 }
0x115e   : > { %v8206_v43 = vand.u32 4294901760, %v8178_v16  ;;  %v8202_v58 = vand.u32 4294901760, %v8201_v31  ;;  %v6332_v31 = vld [vmem:[#allocation5 + $0x90] sm:$0xff] }
0x115f   : > { %v8230_v11 = vsub.f32 %v8171_v19, %v8194_v49  ;;  %8195 = vmatpush.msra.mxu0 %v8194_v49  ;;  %8296 = vmatpush.msrb.mxu3 %v8194_v49  ;;  %v8429_v21 = vand.u32 4294901760, %v8428_v45 }
0x1160   : > { %v8207_v17 = vsub.f32 %v8178_v16, %v8206_v43 }
0x1161   : > { %v8231_v62 = vand.u32 4294901760, %v8230_v11  ;;  %8197 = vmatpush.msra.mxu0 %v8196_v3  ;;  %8266 = vmatpush.msrb.mxu2 %v8230_v11 }
0x1162   : > { %8298 = vmatpush.msrb.mxu3 %v8196_v3  ;;  %8203 = vmatmul.f32.vlgmr.msra.gmra.mxu0 %v8202_v58  ;;  %v8208_v6 = vand.u32 4294901760, %v8207_v17 }
0x1163   : > { %v8232_v53 = vsub.f32 %v8230_v11, %v8231_v62  ;;  %8302 = vmatmul.f32.vlgmr.msrb.gmra.mxu3 %v8200_v13  ;;  %8269 = vmatpush.msrb.mxu2 %v8236_v39  ;;  %v8446_v13 = vsub.f32 %v8444_v1, %v8445_v12  ;;  %v6333_v39 = vld [vmem:[#allocation5 + $0x98] sm:$0xff]  ;;  %v6331_v11 = vld [vmem:[#allocation5 + $0x88] sm:$0xff] }
0x1164   : > { %8329 = vmatpush.msrb.mxu0 %v8231_v62  ;;  %8272 = vmatmul.f32.vlgmr.msrb.gmra.mxu2 %v8199_v59  ;;  %v8209_v2 = vsub.f32 %v8207_v17, %v8208_v6  ;;  %v15890_v34 = vand.u32 4294901760, %v6333_v39  ;;  %v15900_v58 = vand.u32 4294901760, %v6331_v11  ;;  %v6330_v62 = vld [vmem:[#allocation5 + $0x80] sm:$0xff] }
0x1165   : > { %v8233_v14 = vand.u32 4294901760, %v8232_v53  ;;  %8389 = vmatpush.msra.mxu2 %v8388_v30  ;;  %8430 = vmatpush.msra.mxu3 %v8429_v21  ;;  %v8447_v19 = vand.u32 4294901760, %v8446_v13  ;;  %v15910_v5 = vand.u32 4294901760, %v6330_v62 }
0x1166   : > { %8333 = vmatpush.msrb.mxu0 %v8237_v0  ;;  %v8210_v38 = vand.u32 4294901760, %v8209_v2  ;;  %v15894_v16 = vsub.f32 %v6333_v39, %v15890_v34  ;;  %v15913_v2 = vsub.f32 %v6331_v11, %v15900_v58  ;;  %v8819_v11 = vpop.permute.xlu0 %8818 }
0x1167   : > { %8234 = vmatpush.msra.mxu1 %v8233_v14  ;;  %8391 = vmatpush.msra.mxu2 %v8390_v4  ;;  %v15921_v37 = vsub.f32 %v6330_v62, %v15910_v5 }
0x1168   : > { %8472 = vmatpush.msra.mxu0 %v8426_v9  ;;  %v8649_v0 = vand.u32 4294901760, %v15894_v16 }
0x1169   : > { %8240 = vmatpush.msra.mxu1 %v8239_v27  ;;  %8393 = vmatpush.msra.mxu2 %v8392_v48  ;;  %v8667_v20 = vand.u32 4294901760, %v15921_v37 }
0x116a   : > { %8211 = vmatmul.f32.gmra.mxu0 %v8210_v38  ;;  %8242 = vmatmul.f32.vlgmr.msra.gmra.mxu1 %v8198_v63  ;;  %v8661_v38 = vand.u32 4294901760, %v15913_v2 }
0x116b   : > { %8308 = vmatmul.f32.gmra.mxu3 %v8208_v6  ;;  %8358 = vmatpush.msrb.mxu1 %v8194_v49  ;;  %v8650_v6 = vsub.f32 %v15894_v16, %v8649_v0 }
0x116c   : > { %8277 = vmatmul.f32.gmra.mxu2 %v8207_v17  ;;  %8475 = vmatpush.msra.mxu0 %v8432_v24 }
0x116d   : > { %8360 = vmatpush.msrb.mxu1 %v8196_v3  ;;  %v8439_v3 = vand.u32 4294901760, %v8438_v29  ;;  %8395 = vmatpush.msra.mxu2 %v8394_v22  ;;  %v8651_v14 = vand.u32 4294901760, %v8650_v6 }
0x116e   : > { %8478 = vmatpush.msra.mxu0 %v8438_v29 }
0x116f   : > { %8506 = vmatpush.msra.mxu1 %v8388_v30  ;;  %v8440_v15 = vsub.f32 %v8438_v29, %v8439_v3  ;;  %8541 = vmatpush.msrb.mxu2 %v8427_v23  ;;  %v7784_v23 = vadd.f32 %v15844_v55, %v15846_v32 }
0x1170   : > { %8481 = vmatpush.msra.mxu0 %v8444_v1 }
0x1171   : > { %8508 = vmatpush.msra.mxu1 %v8390_v4  ;;  %v8441_v57 = vand.u32 4294901760, %v8440_v15  ;;  %8545 = vmatpush.msrb.mxu2 %v8433_v18  ;;  %v7814_v45 = vadd.f32 %v15848_v52, %v7784_v23 }
0x1172   : > { %8246 = vmatmul.f32.gmra.mxu1 %v8206_v43  ;;  %8335 = vmatmul.f32.vlgmr.msrb.gmra.mxu0 %v8198_v63 }
0x1173   : > { %8510 = vmatpush.msra.mxu1 %v8392_v48  ;;  %8611 = vmatpush.msrb.mxu0 %v15890_v34  ;;  %v7844_v21 = vadd.f32 %v15852_v44, %v7814_v45 }
0x1174   : > { %8549 = vmatpush.msrb.mxu2 %v8439_v3 }
0x1175   : > { %8512 = vmatpush.msra.mxu1 %v8394_v22  ;;  %v7877_v1 = vadd.f32 %v15862_v60, %v7844_v21 }
0x1176   : > { %8553 = vmatpush.msrb.mxu2 %v8445_v12 }
0x1177   : > { %v7904_v52 = vadd.f32 %v15860_v51, %v7877_v1 }
0x117a   : > { %8339 = vmatmul.f32.gmra.mxu0 %v8206_v43  ;;  %8362 = vmatmul.f32.vlgmr.msrb.gmra.mxu1 %v8198_v63  ;;  %v8434_v63 = vsub.f32 %v8432_v24, %v8433_v18 }
0x117b   : > { %8652 = vmatpush.msrb.mxu1 %v8651_v14 }
0x117c   : > { %v8435_v59 = vand.u32 4294901760, %v8434_v63  ;;  %v7788_v63 = vadd.f32 %v15850_v26, %v15854_v8  ;;  %v8593_v8 = vsel %vm1888_vm1, %v7904_v52, 0 }
0x117e   : > { %8436 = vmatpush.msra.mxu3 %v8435_v59  ;;  %v7819_v59 = vadd.f32 %v15856_v47, %v7788_v63 }
0x1180   : > { %8442 = vmatpush.msra.mxu3 %v8441_v57  ;;  %v8821_v57 = vpop.permute.xlu2 %8820  ;;  %v7850_v44 = vadd.f32 %v15858_v41, %v7819_v59  ;;  %v8826_v41 = vsel %vm1888_vm1, %v8819_v11, 0 }
0x1181   : > { %v8828_v26 = vsel %vm1888_vm1, %v8821_v57, 0 }
0x1182   : > { %8366 = vmatmul.f32.gmra.mxu1 %v8206_v43  ;;  %v15896_v43 = vand.u32 4294901760, %v6332_v31  ;;  %8448 = vmatpush.msra.mxu3 %v8447_v19  ;;  %v7881_v60 = vadd.f32 %v15866_v40, %v7850_v44  ;;  %v15946_v14 = vand.u32 4294901760, %v8828_v26 }
0x1184   : > { %8576 = vmatpush.msrb.mxu3 %v8388_v30  ;;  %8613 = vmatpush.msrb.mxu0 %v15896_v43  ;;  %v15903_v17 = vsub.f32 %v6332_v31, %v15896_v43  ;;  %v7908_v40 = vadd.f32 %v15864_v35, %v7881_v60 }
0x1186   : > { %8578 = vmatpush.msrb.mxu3 %v8390_v4  ;;  %8615 = vmatpush.msrb.mxu0 %v15900_v58  ;;  %v8655_v53 = vand.u32 4294901760, %v15903_v17  ;;  %v8662_v4 = vsub.f32 %v15913_v2, %v8661_v38 }
0x1188   : > { %8580 = vmatpush.msrb.mxu3 %v8392_v48  ;;  %v8656_v27 = vsub.f32 %v15903_v17, %v8655_v53  ;;  %8617 = vmatpush.msrb.mxu0 %v15910_v5  ;;  %v8663_v24 = vand.u32 4294901760, %v8662_v4  ;;  %v8668_v48 = vsub.f32 %v15921_v37, %v8667_v20 }
0x118a   : > { %8582 = vmatpush.msrb.mxu3 %v8394_v22  ;;  %v8657_v9 = vand.u32 4294901760, %v8656_v27  ;;  %v8669_v25 = vand.u32 4294901760, %v8668_v48  ;;  %v15958_v48 = vand.u32 4294901760, %v8826_v41 }
0x118c   : > { %8658 = vmatpush.msrb.mxu1 %v8657_v9  ;;  %v15974_v63 = vsub.f32 %v8826_v41, %v15958_v48 }
0x118e   : > { %8664 = vmatpush.msrb.mxu1 %v8663_v24  ;;  %v15956_v24 = vsub.f32 %v8828_v26, %v15946_v14  ;;  %v8887_v1 = vand.u32 4294901760, %v15974_v63 }
0x1190   : > { %8670 = vmatpush.msrb.mxu1 %v8669_v25 }
0x11df   : > { %v8204_v49 = vpop.f32.mrf.mxu0 }
0x11e6   : > { %v8303_v32 = vpop.f32.mrf.mxu3 }
0x11e7   : > { %v8212_v30 = vpop.f32.mrf.mxu0  ;;  %v8243_v46 = vpop.f32.mrf.mxu1 }
0x11e8   : > { %v8244_v18 = vadd.f32 %v8243_v46, %v8204_v49  ;;  %v8273_v29 = vpop.f32.mrf.mxu2 }
0x11ea   : > { %v8274_v55 = vadd.f32 %v8273_v29, %v8244_v18  ;;  %v8596_v18 = vsel %vm1888_vm1, %v7908_v40, 0 }
0x11ec   : > { %v8304_v12 = vadd.f32 %v8303_v32, %v8274_v55  ;;  %v8626_v32 = vand.u32 4294901760, %v8596_v18 }
0x11ee   : > { %v8309_v62 = vpop.f32.mrf.mxu3  ;;  %v8627_v59 = vsub.f32 %v8596_v18, %v8626_v32 }
0x11ef   : > { %v8247_v22 = vpop.f32.mrf.mxu1  ;;  %v8336_v3 = vpop.f32.mrf.mxu0 }
0x11f0   : > { %v8248_v15 = vadd.f32 %v8247_v22, %v8212_v30  ;;  %v8337_v13 = vadd.f32 %v8336_v3, %v8304_v12  ;;  %v8278_v39 = vpop.f32.mrf.mxu2  ;;  %v15948_v30 = vand.u32 4294901760, %v8593_v8  ;;  %v8888_v12 = vsub.f32 %v15974_v63, %v8887_v1 }
0x11f2   : > { %v8279_v31 = vadd.f32 %v8278_v39, %v8248_v15  ;;  %v15964_v45 = vsub.f32 %v8593_v8, %v15948_v30 }
0x11f4   : > { %v8310_v27 = vadd.f32 %v8309_v62, %v8279_v31  ;;  %v8620_v55 = vand.u32 4294901760, %v15964_v45 }
0x11f7   : > { %v8363_v19 = vpop.f32.mrf.mxu1  ;;  %v8340_v6 = vpop.f32.mrf.mxu0 }
0x11f8   : > { %v8364_v49 = vadd.f32 %v8363_v19, %v8337_v13  ;;  %v8341_v9 = vadd.f32 %v8340_v6, %v8310_v27 }
0x11fa   : > { %v8371_v47 = vsel %vm1888_vm1, %v8364_v49, 0 }
0x11fb   : > { %v15944_v51 = vand.u32 4294901760, %v8371_v47 }
0x11fd   : > { %v8397_v46 = vsub.f32 %v8371_v47, %v15944_v51  ;;  %8450 = vmatmul.f32.vlgmr.msra.gmra.mxu3 %v15944_v51 }
0x11fe   : > { %8728 = vmatpush.msra.mxu3 %v15890_v34 }
0x11ff   : > { %v8398_v4 = vand.u32 4294901760, %v8397_v46  ;;  %v8367_v23 = vpop.f32.mrf.mxu1  ;;  %8484 = vmatmul.f32.vlgmr.msra.gmra.mxu0 %v8397_v46 }
0x1200   : > { %v8368_v25 = vadd.f32 %v8367_v23, %v8341_v9  ;;  %8730 = vmatpush.msra.mxu3 %v15896_v43  ;;  %8763 = vmatpush.msra.mxu0 %v8649_v0  ;;  %v8881_v0 = vand.u32 4294901760, %v15956_v24 }
0x1201   : > { %v8399_v35 = vsub.f32 %v8397_v46, %v8398_v4  ;;  %8516 = vmatmul.f32.vlgmr.msra.gmra.mxu1 %v8398_v4 }
0x1202   : > { %v8374_v29 = vsel %vm1888_vm1, %v8368_v25, 0  ;;  %8732 = vmatpush.msra.mxu3 %v15900_v58  ;;  %8767 = vmatpush.msra.mxu0 %v8655_v53  ;;  %v8882_v3 = vsub.f32 %v15956_v24, %v8881_v0 }
0x1203   : > { %v8400_v22 = vand.u32 4294901760, %v8399_v35  ;;  %v8404_v21 = vand.u32 4294901760, %v8374_v29  ;;  %8798 = vmatpush.msra.mxu1 %v15890_v34 }
0x1204   : > { %8734 = vmatpush.msra.mxu3 %v15910_v5  ;;  %8771 = vmatpush.msra.mxu0 %v8661_v38  ;;  %v8621_v38 = vsub.f32 %v15964_v45, %v8620_v55 }
0x1205   : > { %8401 = vmatmul.f32.vlgmr.msra.gmra.mxu2 %v8400_v22  ;;  %8454 = vmatmul.f32.gmra.mxu3 %v8404_v21  ;;  %v8405_v53 = vsub.f32 %v8374_v29, %v8404_v21 }
0x1206   : > { %8800 = vmatpush.msra.mxu1 %v15896_v43  ;;  %8694 = vmatpush.msra.mxu2 %v15894_v16  ;;  %v8883_v43 = vand.u32 4294901760, %v8882_v3  ;;  %v8622_v52 = vand.u32 4294901760, %v8621_v38 }
0x1207   : > { %8489 = vmatmul.f32.gmra.mxu0 %v8405_v53  ;;  %v8406_v34 = vand.u32 4294901760, %v8405_v53 }
0x1208   : > { %8775 = vmatpush.msra.mxu0 %v8667_v20  ;;  %8802 = vmatpush.msra.mxu1 %v15900_v58  ;;  %v8628_v58 = vand.u32 4294901760, %v8627_v59 }
0x1209   : > { %8522 = vmatmul.f32.gmra.mxu1 %v8406_v34  ;;  %v8407_v15 = vsub.f32 %v8405_v53, %v8406_v34  ;;  %8697 = vmatpush.msra.mxu2 %v15903_v17  ;;  %v8889_v17 = vand.u32 4294901760, %v8888_v12 }
0x120a   : > { %8804 = vmatpush.msra.mxu1 %v15910_v5  ;;  %v8629_v5 = vsub.f32 %v8627_v59, %v8628_v58 }
0x120b   : > { %v8408_v16 = vand.u32 4294901760, %v8407_v15  ;;  %8700 = vmatpush.msra.mxu2 %v15913_v2 }
0x120c   : > { %v8630_v2 = vand.u32 4294901760, %v8629_v5 }
0x120d   : > { %8409 = vmatmul.f32.gmra.mxu2 %v8408_v16  ;;  %8584 = vmatmul.f32.vlgmr.msrb.gmra.mxu3 %v15944_v51 }
0x120e   : > { %8884 = vmatpush.xpose.msrb.mxu3 %v8883_v43  ;;  %8703 = vmatpush.msra.mxu2 %v15921_v37  ;;  %v8815_v37 = vpop.permute.xlu0 %8814 }
0x120f   : > { %8623 = vmatmul.f32.vlgmr.msrb.gmra.mxu0 %v8622_v52  ;;  %v8822_v20 = vsel %vm1888_vm1, %v8815_v37, 0 }
0x1210   : > { %8916 = vmatpush.xpose.msrb.mxu0 %v15956_v24  ;;  %v8848_v57 = vand.u32 4294901760, %v8822_v20 }
0x1211   : > { %8672 = vmatmul.f32.vlgmr.msrb.gmra.mxu1 %v15948_v30 }
0x1212   : > { %8890 = vmatpush.xpose.msrb.mxu3 %v8889_v17  ;;  %8946 = vmatpush.xpose.msrb.mxu1 %v15946_v14  ;;  %v8849_v39 = vsub.f32 %v8822_v20, %v8848_v57 }
0x1214   : > { %8919 = vmatpush.xpose.msrb.mxu0 %v15974_v63  ;;  %v8850_v44 = vand.u32 4294901760, %v8849_v39 }
0x1215   : > { %8555 = vmatmul.f32.vlgmr.msrb.gmra.mxu2 %v15944_v51  ;;  %8588 = vmatmul.f32.gmra.mxu3 %v8404_v21 }
0x1216   : > { %8845 = vmatpush.xpose.msrb.mxu2 %v15946_v14  ;;  %8948 = vmatpush.xpose.msrb.mxu1 %v15958_v48  ;;  %v8817_v13 = vpop.permute.xlu0 %8816  ;;  %v8851_v49 = vsub.f32 %v8849_v39, %v8850_v44 }
0x1217   : > { %8631 = vmatmul.f32.gmra.mxu0 %v8630_v2  ;;  %v8824_v19 = vsel %vm1888_vm1, %v8817_v13, 0 }
0x1218   : > { %v8856_v31 = vand.u32 4294901760, %v8824_v19  ;;  %v8852_v8 = vand.u32 4294901760, %v8851_v49 }
0x1219   : > { %8676 = vmatmul.f32.gmra.mxu1 %v8626_v32 }
0x121a   : > { %8847 = vmatpush.xpose.msrb.mxu2 %v15958_v48  ;;  %v8857_v26 = vsub.f32 %v8824_v19, %v8856_v31 }
0x121c   : > { %v8858_v60 = vand.u32 4294901760, %v8857_v26 }
0x121d   : > { %8559 = vmatmul.f32.gmra.mxu2 %v8404_v21  ;;  %8738 = vmatmul.f32.vlgmr.msra.gmra.mxu3 %v8620_v55 }
0x121e   : > { %9008 = vmatpush.xpose.msra.mxu3 %v15946_v14  ;;  %v8859_v11 = vsub.f32 %v8857_v26, %v8858_v60 }
0x121f   : > { %8777 = vmatmul.f32.vlgmr.msra.gmra.mxu0 %v15948_v30 }
0x1220   : > { %v8860_v47 = vand.u32 4294901760, %v8859_v11 }
0x1221   : > { %8806 = vmatmul.f32.vlgmr.msra.gmra.mxu1 %v15948_v30 }
0x1222   : > { %9010 = vmatpush.xpose.msra.mxu3 %v15958_v48 }
0x1225   : > { %8706 = vmatmul.f32.vlgmr.msra.gmra.mxu2 %v15964_v45  ;;  %8744 = vmatmul.f32.gmra.mxu3 %v8628_v58 }
0x1226   : > { %8979 = vmatpush.xpose.msra.mxu2 %v8881_v0 }
0x1227   : > { %8781 = vmatmul.f32.gmra.mxu0 %v8626_v32 }
0x1229   : > { %8810 = vmatmul.f32.gmra.mxu1 %v8626_v32 }
0x122a   : > { %8983 = vmatpush.xpose.msra.mxu2 %v8887_v1 }
0x122d   : > { %8711 = vmatmul.f32.gmra.mxu2 %v8627_v59  ;;  %8892 = vmatmul.f32.vlgmr.msrb.gmra.mxu3 %v8848_v57 }
0x122f   : > { %8922 = vmatmul.f32.vlgmr.msrb.gmra.mxu0 %v8849_v39 }
0x1231   : > { %8952 = vmatmul.f32.vlgmr.msrb.gmra.mxu1 %v8850_v44 }
0x1235   : > { %8853 = vmatmul.f32.vlgmr.msrb.gmra.mxu2 %v8852_v8  ;;  %8896 = vmatmul.f32.gmra.mxu3 %v8856_v31 }
0x1237   : > { %8927 = vmatmul.f32.gmra.mxu0 %v8857_v26 }
0x1239   : > { %8958 = vmatmul.f32.gmra.mxu1 %v8858_v60 }
0x123d   : > { %8861 = vmatmul.f32.gmra.mxu2 %v8860_v47  ;;  %9012 = vmatmul.f32.vlgmr.msra.gmra.mxu3 %v8848_v57 }
0x1245   : > { %8985 = vmatmul.f32.vlgmr.msra.gmra.mxu2 %v8848_v57  ;;  %9016 = vmatmul.f32.gmra.mxu3 %v8856_v31 }
0x124d   : > { %8989 = vmatmul.f32.gmra.mxu2 %v8856_v31 }
0x127c   : > { %v16011_v6 = vpop.f32.mrf.mxu0 }
0x127e   : > { %v16013_v51 = vpop.f32.mrf.mxu1 }
0x1280   : > { %v16009_v62 = vpop.f32.mrf.mxu3 }
0x1284   : > { %v16019_v30 = vpop.f32.mrf.mxu0 }
0x1286   : > { %v16025_v40 = vpop.f32.mrf.mxu1 }
0x1288   : > { %v16015_v14 = vpop.f32.mrf.mxu2  ;;  %v16017_v27 = vpop.f32.mrf.mxu3 }
0x128c   : > { %v16027_v9 = vpop.f32.mrf.mxu0 }
0x128e   : > { %v16033_v24 = vpop.f32.mrf.mxu1 }
0x1290   : > { %v16021_v41 = vpop.f32.mrf.mxu2  ;;  %v16023_v46 = vpop.f32.mrf.mxu3 }
0x1294   : > { %v16039_v45 = vpop.f32.mrf.mxu0 }
0x1296   : > { %v16041_v35 = vpop.f32.mrf.mxu1 }
0x1298   : > { %v16029_v4 = vpop.f32.mrf.mxu2  ;;  %v16031_v23 = vpop.f32.mrf.mxu3 }
0x129c   : > { %v16047_v22 = vpop.f32.mrf.mxu0 }
0x129e   : > { %v16049_v21 = vpop.f32.mrf.mxu1 }
0x12a0   : > { %v16035_v48 = vpop.f32.mrf.mxu2  ;;  %v16037_v25 = vpop.f32.mrf.mxu3 }
0x12a4   : > { %v16053_v55 = vpop.f32.mrf.mxu0 }
0x12a6   : > { %v16055_v53 = vpop.f32.mrf.mxu1 }
0x12a8   : > { %v16043_v18 = vpop.f32.mrf.mxu2  ;;  %v16045_v29 = vpop.f32.mrf.mxu3 }
0x12ac   : > { %v8923_v1 = vpop.f32.mrf.mxu0 }
0x12ae   : > { %v8953_v15 = vpop.f32.mrf.mxu1 }
0x12b0   : > { %v16051_v0 = vpop.f32.mrf.mxu2  ;;  %v8893_v63 = vpop.f32.mrf.mxu3 }
0x12b4   : > { %v8928_v17 = vpop.f32.mrf.mxu0 }
0x12b6   : > { %v8959_v20 = vpop.f32.mrf.mxu1 }
0x12b8   : > { %v8854_v32 = vpop.f32.mrf.mxu2  ;;  %v8897_v34 = vpop.f32.mrf.mxu3 }
0x12b9   : > { %v8894_v3 = vadd.f32 %v8893_v63, %v8854_v32 }
0x12bb   : > { %v8924_v59 = vadd.f32 %v8923_v1, %v8894_v3 }
0x12bd   : > { %v8954_v43 = vadd.f32 %v8953_v15, %v8924_v59 }
0x12c0   : > { %v8862_v38 = vpop.f32.mrf.mxu2  ;;  %v9013_v12 = vpop.f32.mrf.mxu3 }
0x12c1   : > { %v8898_v16 = vadd.f32 %v8897_v34, %v8862_v38 }
0x12c3   : > { %v8929_v5 = vadd.f32 %v8928_v17, %v8898_v16 }
0x12c5   : > { %v8960_v13 = vadd.f32 %v8959_v20, %v8929_v5 }
0x12c8   : > { %v8986_v52 = vpop.f32.mrf.mxu2  ;;  %v9017_v44 = vpop.f32.mrf.mxu3 }
0x12c9   : > { %v8987_v58 = vadd.f32 %v8986_v52, %v8954_v43 }
0x12cb   : > { %v9014_v2 = vadd.f32 %v9013_v12, %v8987_v58 }
0x12cd   : > { %v9020_v37 = vsel %vm698_vm2, %v9014_v2, -1e+30 }
0x12ce   : > { %v9022_v57 = vsel %vm2093_vm3, %v9020_v37, -inf }
0x12cf   : > { %9023 = vmax.xlane.f32.xlu2 %v9022_v57 }
0x12d0   : > { %v8990_v39 = vpop.f32.mrf.mxu2 }
0x12d1   : > { %v8991_v19 = vadd.f32 %v8990_v39, %v8960_v13 }
0x12d3   : > { %v9018_v31 = vadd.f32 %v9017_v44, %v8991_v19  ;;  %v6341_v44 = vld [vmem:[#allocation5 + $0xd8] sm:$0xff] }
0x12d5   : > { %v9021_v49 = vsel %vm698_vm2, %v9018_v31, -1e+30 }
0x12d6   : > { %v9025_v26 = vsel %vm2093_vm3, %v9021_v49, -inf }
0x12d7   : > { %9026 = vmax.xlane.f32.xlu1 %v9025_v26 }
0x12f0   : > { %9072 = vrot.lane.b32.xlu1 %v15803_v42, %s12396_s18 }
0x12f8   : > { %9500 = vrot.lane.b32.xlu1 %v15782_v28, %s12397_s19 }
0x1342   : > { %v9024_v8 = vpop.xlane.xlu2 %9023 }
0x1343   : > { %v9028_v60 = vsub.f32 %v9020_v37, %v9024_v8 }
0x1345   : > { %v9030_v11 = vmul.f32 1.442695, %v9028_v60 }
0x1347   : > { %12169 = vpow2.f32 %v9030_v11  ;;  %v16085_v11 = vand.u32 4294901760, %v6341_v44 }
0x134a   : > { %v9027_v47 = vpop.xlane.xlu1 %9026 }
0x134b   : > { %v9029_v63 = vsub.f32 %v9021_v49, %v9027_v47  ;;  %v6340_v47 = vld [vmem:[#allocation5 + $0xd0] sm:$0xff] }
0x134d   : > { %v12170_v32 = vpop.eup %12169  ;;  %v9032_v34 = vmul.f32 1.442695, %v9029_v63 }
0x134e   : > { %v9034_v3 = vsel %vm2093_vm3, %v12170_v32, 0.0 }
0x134f   : > { %12171 = vpow2.f32 %v9032_v34  ;;  %9035 = vadd.xlane.f32.xlu0 %v9034_v3 }
0x1355   : > { %v16068_v1 = vpop.eup %12171 }
0x1356   : > { %v9037_v38 = vsel %vm2093_vm3, %v16068_v1, 0.0 }
0x1357   : > { %9038 = vadd.xlane.f32.xlu2 %v9037_v38 }
0x1362   : > { %v9073_v59 = vpop.permute.xlu1 %9072 }
0x1363   : > { %v16072_v28 = vand.u32 4294901760, %v9073_v59  ;;  %9502 = vrot.lane.b32.xlu0 %v15790_v54, %s12397_s19 }
0x1365   : > { %v9132_v15 = vsub.f32 %v9073_v59, %v16072_v28  ;;  %9097 = vmatpush.msra.mxu0 %v16072_v28  ;;  %9198 = vmatpush.msrb.mxu3 %v16072_v28 }
0x1367   : > { %v9133_v16 = vand.u32 4294901760, %v9132_v15  ;;  %9168 = vmatpush.msrb.mxu2 %v9132_v15 }
0x1369   : > { %v9134_v43 = vsub.f32 %v9132_v15, %v9133_v16 }
0x136b   : > { %v9135_v12 = vand.u32 4294901760, %v9134_v43  ;;  %9496 = vrot.lane.b32.xlu0 %v15778_v50, %s12397_s19 }
0x136d   : > { %9136 = vmatpush.msra.mxu1 %v9135_v12 }
0x136f   : > { %9070 = vrot.lane.b32.xlu2 %v15800_v33, %s12396_s18 }
0x1377   : > { %9498 = vrot.lane.b32.xlu2 %v15784_v7, %s12397_s19 }
0x13c2   : > { %v9036_v54 = vpop.xlane.xlu0 %9035 }
0x13c3   : > { %12173 = vrcp.f32 %v9036_v54  ;;  %v9051_v2 = vand.u32 2147483648, %v9036_v54  ;;  %v9049_v20 = vand.u32 2147483647, %v9036_v54  ;;  %vm9045_vm8 = vweird.f32 %v9036_v54 }
0x13c5   : > { %v9052_v13 = vor.u32 1.1754944e-38, %v9051_v2  ;;  %vm9050_vm10 = vcmp.eq.f32.partialorder %v9049_v20, 8.507059e+37 }
0x13c9   : > { %v12174_v52 = vpop.eup %12173 }
0x13ca   : > { %v9041_v58 = vmul.f32 %v12174_v52, %v9036_v54  ;;  %v9039_v17 = vpop.xlane.xlu2 %9038  ;;  %vm9046_vm7 = vweird.f32 %v12174_v52  ;;  %v16090_v54 = vand.u32 4294901760, %v6340_v47 }
0x13cb   : > { %12175 = vrcp.f32 %v9039_v17  ;;  %vm9047_vm9 = vmor %vm9045_vm8, %vm9046_vm7  ;;  %v9066_v34 = vand.u32 2147483648, %v9039_v17  ;;  %v9064_v38 = vand.u32 2147483647, %v9039_v17  ;;  %vm9060_vm12 = vweird.f32 %v9039_v17 }
0x13cc   : > { %v9042_v5 = vsub.f32 1.0, %v9041_v58 }
0x13cd   : > { %v9067_v2 = vor.u32 1.1754944e-38, %v9066_v34  ;;  %vm9065_vm14 = vcmp.eq.f32.partialorder %v9064_v38, 8.507059e+37 }
0x13ce   : > { %v9043_v37 = vmul.f32 %v12174_v52, %v9042_v5  ;;  %v6338_v5 = vld [vmem:[#allocation5 + $0xc0] sm:$0xff] }
0x13d0   : > { %v9044_v57 = vadd.f32 %v12174_v52, %v9043_v37 }
0x13d1   : > { %v12176_v50 = vpop.eup %12175 }
0x13d2   : > { %v9048_v39 = vsel %vm9047_vm9, %v12174_v52, %v9044_v57  ;;  %v9056_v19 = vmul.f32 %v12176_v50, %v9039_v17  ;;  %v9071_v7 = vpop.permute.xlu2 %9070  ;;  %vm9061_vm11 = vweird.f32 %v12176_v50  ;;  %v9501_v57 = vpop.permute.xlu1 %9500 }
0x13d3   : > { %v9053_v31 = vsel %vm9050_vm10, %v9052_v13, %v9048_v39  ;;  %v9098_v49 = vand.u32 4294901760, %v9071_v7  ;;  %vm16093_vm13 = vmor %vm9060_vm12, %vm9061_vm11 }
0x13d4   : > { %v9054_v26 = vmul.f32 %v12170_v32, %v9053_v31  ;;  %v9057_v8 = vsub.f32 1.0, %v9056_v19  ;;  %v6339_v32 = vld [vmem:[#allocation5 + $0xc8] sm:$0xff] }
0x13d5   : > { %v9138_v60 = vsub.f32 %v9071_v7, %v9098_v49  ;;  %9099 = vmatpush.msra.mxu0 %v9098_v49  ;;  %9200 = vmatpush.msrb.mxu3 %v9098_v49  ;;  %v9503_v59 = vpop.permute.xlu0 %9502  ;;  %v16101_v17 = vand.u32 4294901760, %v6339_v32  ;;  %v16104_v7 = vand.u32 4294901760, %v6338_v5 }
0x13d6   : > { %v9058_v63 = vmul.f32 %v12176_v50, %v9057_v8  ;;  %v9077_v3 = vsel %vm2093_vm3, %v9054_v26, 0  ;;  %v9510_v37 = vsel %vm1888_vm1, %v9503_v59, 0  ;;  %v9508_v8 = vsel %vm1888_vm1, %v9501_v57, 0 }
0x13d7   : > { %9231 = vmatpush.msrb.mxu0 %v9133_v16  ;;  %9171 = vmatpush.msrb.mxu2 %v9138_v60  ;;  %v9139_v15 = vand.u32 4294901760, %v9138_v60  ;;  %v16088_v43 = vand.u32 4294901760, %v9077_v3  ;;  %v16107_v31 = vand.u32 4294901760, %v9510_v37  ;;  %v16116_v38 = vand.u32 4294901760, %v9508_v8 }
0x13d8   : > { %v9059_v12 = vadd.f32 %v12176_v50, %v9058_v63 }
0x13d9   : > { %9291 = vmatpush.msra.mxu2 %v16085_v11  ;;  %9235 = vmatpush.msrb.mxu0 %v9139_v15  ;;  %v9101_v16 = vsub.f32 %v9077_v3, %v16088_v43  ;;  %v9140_v58 = vsub.f32 %v9138_v60, %v9139_v15  ;;  %v9328_v60 = vsub.f32 %v6341_v44, %v16085_v11 }
0x13da   : > { %v9063_v20 = vsel %vm16093_vm13, %v12176_v50, %v9059_v12  ;;  %v16119_v59 = vsub.f32 %v9510_v37, %v16107_v31  ;;  %v9340_v44 = vsub.f32 %v6339_v32, %v16101_v17  ;;  %v16126_v12 = vsub.f32 %v9508_v8, %v16116_v38 }
0x13db   : > { %9293 = vmatpush.msra.mxu2 %v16090_v54  ;;  %v9141_v13 = vand.u32 4294901760, %v9140_v58  ;;  %v9102_v39 = vand.u32 4294901760, %v9101_v16  ;;  %v9068_v19 = vsel %vm9065_vm14, %v9067_v2, %v9063_v20  ;;  %v9329_v20 = vand.u32 4294901760, %v9328_v60 }
0x13dc   : > { %9174 = vmatmul.f32.vlgmr.msrb.gmra.mxu2 %v9101_v16  ;;  %v9069_v50 = vmul.f32 %v16068_v1, %v9068_v19  ;;  %v9334_v1 = vsub.f32 %v6340_v47, %v16090_v54  ;;  %v9563_v52 = vand.u32 4294901760, %v16119_v59  ;;  %v9569_v32 = vand.u32 4294901760, %v16126_v12 }
0x13dd   : > { %9295 = vmatpush.msra.mxu2 %v16101_v17  ;;  %9142 = vmatpush.msra.mxu1 %v9141_v13  ;;  %v9103_v26 = vsub.f32 %v9101_v16, %v9102_v39  ;;  %v9330_v57 = vsub.f32 %v9328_v60, %v9329_v20 }
0x13de   : > { %9204 = vmatmul.f32.vlgmr.msrb.gmra.mxu3 %v9102_v39  ;;  %9144 = vmatmul.f32.vlgmr.msra.gmra.mxu1 %v16088_v43  ;;  %v9080_v34 = vsel %vm2093_vm3, %v9069_v50, 0  ;;  %v9564_v58 = vsub.f32 %v16119_v59, %v9563_v52  ;;  %v9335_v13 = vand.u32 4294901760, %v9334_v1 }
0x13df   : > { %9297 = vmatpush.msra.mxu2 %v16104_v7  ;;  %9260 = vmatpush.msrb.mxu1 %v16072_v28  ;;  %v9104_v63 = vand.u32 4294901760, %v9103_v26  ;;  %v9108_v3 = vand.u32 4294901760, %v9080_v34  ;;  %v9331_v39 = vand.u32 4294901760, %v9330_v57  ;;  %v9341_v26 = vand.u32 4294901760, %v9340_v44 }
0x13e0   : > { %v9565_v2 = vand.u32 4294901760, %v9564_v58  ;;  %v9336_v19 = vsub.f32 %v9334_v1, %v9335_v13 }
0x13e1   : > { %9262 = vmatpush.msrb.mxu1 %v9098_v49  ;;  %9105 = vmatmul.f32.vlgmr.msra.gmra.mxu0 %v9104_v63  ;;  %v9109_v15 = vsub.f32 %v9080_v34, %v9108_v3  ;;  %v9346_v49 = vsub.f32 %v6338_v5, %v16104_v7  ;;  %v9570_v5 = vsub.f32 %v16126_v12, %v9569_v32 }
0x13e2   : > { %9374 = vmatpush.msra.mxu0 %v9328_v60  ;;  %9443 = vmatpush.msrb.mxu2 %v9329_v20  ;;  %v9337_v50 = vand.u32 4294901760, %v9336_v19  ;;  %v9342_v8 = vsub.f32 %v9340_v44, %v9341_v26 }
0x13e3   : > { %9408 = vmatpush.msra.mxu1 %v16085_v11  ;;  %v9110_v28 = vand.u32 4294901760, %v9109_v15  ;;  %v9571_v37 = vand.u32 4294901760, %v9570_v5  ;;  %9332 = vmatpush.msra.mxu3 %v9331_v39  ;;  %v9347_v63 = vand.u32 4294901760, %v9346_v49 }
0x13e4   : > { %9179 = vmatmul.f32.gmra.mxu2 %v9109_v15  ;;  %9377 = vmatpush.msra.mxu0 %v9334_v1 }
0x13e5   : > { %9410 = vmatpush.msra.mxu1 %v16090_v54  ;;  %v9111_v47 = vsub.f32 %v9109_v15, %v9110_v28  ;;  %9447 = vmatpush.msrb.mxu2 %v9335_v13  ;;  %v9348_v34 = vsub.f32 %v9346_v49, %v9347_v63 }
0x13e6   : > { %9210 = vmatmul.f32.gmra.mxu3 %v9110_v28  ;;  %9148 = vmatmul.f32.gmra.mxu1 %v9108_v3 }
0x13e7   : > { %9412 = vmatpush.msra.mxu1 %v16101_v17  ;;  %9380 = vmatpush.msra.mxu0 %v9340_v44  ;;  %v9112_v16 = vand.u32 4294901760, %v9111_v47  ;;  %v9349_v15 = vand.u32 4294901760, %v9348_v34  ;;  %v9499_v34 = vpop.permute.xlu2 %9498 }
0x13e8   : > { %9451 = vmatpush.msrb.mxu2 %v9341_v26  ;;  %9338 = vmatpush.msra.mxu3 %v9337_v50 }
0x13e9   : > { %9414 = vmatpush.msra.mxu1 %v16104_v7  ;;  %9383 = vmatpush.msra.mxu0 %v9346_v49 }
0x13ea   : > { %9113 = vmatmul.f32.gmra.mxu0 %v9112_v16  ;;  %9455 = vmatpush.msrb.mxu2 %v9347_v63 }
0x13ee   : > { %9264 = vmatmul.f32.vlgmr.msrb.gmra.mxu1 %v16088_v43 }
0x13ef   : > { %9566 = vmatpush.xpose.msrb.mxu1 %v9565_v2 }
0x13f2   : > { %9237 = vmatmul.f32.vlgmr.msrb.gmra.mxu0 %v16088_v43  ;;  %v9343_v43 = vand.u32 4294901760, %v9342_v8 }
0x13f3   : > { %9527 = vmatpush.xpose.msrb.mxu0 %v16107_v31  ;;  %9572 = vmatpush.xpose.msrb.mxu1 %v9571_v37 }
0x13f4   : > { %9344 = vmatpush.msra.mxu3 %v9343_v43 }
0x13f6   : > { %9268 = vmatmul.f32.gmra.mxu1 %v9108_v3  ;;  %9350 = vmatpush.msra.mxu3 %v9349_v15 }
0x13f7   : > { %9529 = vmatpush.xpose.msrb.mxu0 %v16116_v38 }
0x13f8   : > { %9478 = vmatpush.msrb.mxu3 %v16085_v11  ;;  %v9497_v11 = vpop.permute.xlu0 %9496 }
0x13fa   : > { %9241 = vmatmul.f32.gmra.mxu0 %v9108_v3  ;;  %9480 = vmatpush.msrb.mxu3 %v16090_v54 }
0x13fc   : > { %9482 = vmatpush.msrb.mxu3 %v16101_v17  ;;  %v9504_v17 = vsel %vm1888_vm1, %v9497_v11, 0 }
0x13fd   : > { %v9530_v50 = vand.u32 4294901760, %v9504_v17 }
0x13fe   : > { %9484 = vmatpush.msrb.mxu3 %v16104_v7 }
0x145b   : > { %v9145_v60 = vpop.f32.mrf.mxu1 }
0x145e   : > { %v9106_v3 = vpop.f32.mrf.mxu0 }
0x145f   : > { %v9146_v44 = vadd.f32 %v9145_v60, %v9106_v3  ;;  %v9175_v28 = vpop.f32.mrf.mxu2 }
0x1461   : > { %v9176_v16 = vadd.f32 %v9175_v28, %v9146_v44  ;;  %v9205_v49 = vpop.f32.mrf.mxu3  ;;  %v9506_v28 = vsel %vm1888_vm1, %v9499_v34, 0 }
0x1463   : > { %v9149_v1 = vpop.f32.mrf.mxu1  ;;  %v9206_v58 = vadd.f32 %v9205_v49, %v9176_v16 }
0x1467   : > { %v9114_v47 = vpop.f32.mrf.mxu0  ;;  %v9180_v57 = vpop.f32.mrf.mxu2 }
0x1468   : > { %v9150_v2 = vadd.f32 %v9149_v1, %v9114_v47  ;;  %v9531_v1 = vsub.f32 %v9504_v17, %v9530_v50 }
0x1469   : > { %v9211_v39 = vpop.f32.mrf.mxu3 }
0x146a   : > { %v9181_v54 = vadd.f32 %v9180_v57, %v9150_v2  ;;  %v9532_v2 = vand.u32 4294901760, %v9531_v1 }
0x146b   : > { %v9265_v5 = vpop.f32.mrf.mxu1 }
0x146c   : > { %v9212_v26 = vadd.f32 %v9211_v39, %v9181_v54 }
0x146f   : > { %v9238_v37 = vpop.f32.mrf.mxu0 }
0x1470   : > { %v9239_v20 = vadd.f32 %v9238_v37, %v9206_v58  ;;  %v9538_v58 = vand.u32 4294901760, %v9506_v28 }
0x1472   : > { %v9266_v13 = vadd.f32 %v9265_v5, %v9239_v20  ;;  %v9539_v37 = vsub.f32 %v9506_v28, %v9538_v58  ;;  %v9533_v20 = vsub.f32 %v9531_v1, %v9532_v2 }
0x1473   : > { %v9269_v60 = vpop.f32.mrf.mxu1 }
0x1474   : > { %v9273_v7 = vsel %vm1888_vm1, %v9266_v13, 0  ;;  %v9540_v57 = vand.u32 4294901760, %v9539_v37 }
0x1475   : > { %v9298_v19 = vand.u32 4294901760, %v9273_v7 }
0x1476   : > { %v9541_v54 = vsub.f32 %v9539_v37, %v9540_v57 }
0x1477   : > { %v9299_v8 = vsub.f32 %v9273_v7, %v9298_v19  ;;  %v9242_v63 = vpop.f32.mrf.mxu0  ;;  %9352 = vmatmul.f32.vlgmr.msra.gmra.mxu3 %v9298_v19 }
0x1478   : > { %v9243_v43 = vadd.f32 %v9242_v63, %v9212_v26  ;;  %9628 = vmatpush.xpose.msra.mxu3 %v16107_v31 }
0x1479   : > { %v9300_v15 = vand.u32 4294901760, %v9299_v8  ;;  %9386 = vmatmul.f32.vlgmr.msra.gmra.mxu0 %v9299_v8 }
0x147a   : > { %v9270_v3 = vadd.f32 %v9269_v60, %v9243_v43  ;;  %9661 = vmatpush.xpose.msra.mxu0 %v9563_v52 }
0x147b   : > { %v9301_v44 = vsub.f32 %v9299_v8, %v9300_v15  ;;  %9418 = vmatmul.f32.vlgmr.msra.gmra.mxu1 %v9300_v15 }
0x147c   : > { %v9276_v47 = vsel %vm1888_vm1, %v9270_v3, 0  ;;  %9630 = vmatpush.xpose.msra.mxu3 %v16116_v38  ;;  %9690 = vmatpush.xpose.msra.mxu1 %v16107_v31 }
0x147d   : > { %v9302_v16 = vand.u32 4294901760, %v9301_v44  ;;  %v9306_v49 = vand.u32 4294901760, %v9276_v47 }
0x147e   : > { %9665 = vmatpush.xpose.msra.mxu0 %v9569_v32  ;;  %v9534_v32 = vand.u32 4294901760, %v9533_v20 }
0x147f   : > { %9303 = vmatmul.f32.vlgmr.msra.gmra.mxu2 %v9302_v16  ;;  %9356 = vmatmul.f32.gmra.mxu3 %v9306_v49  ;;  %v9307_v52 = vsub.f32 %v9276_v47, %v9306_v49 }
0x1480   : > { %9598 = vmatpush.xpose.msra.mxu2 %v16119_v59  ;;  %9692 = vmatpush.xpose.msra.mxu1 %v16116_v38  ;;  %v9542_v59 = vand.u32 4294901760, %v9541_v54 }
0x1481   : > { %9391 = vmatmul.f32.gmra.mxu0 %v9307_v52  ;;  %v9308_v5 = vand.u32 4294901760, %v9307_v52 }
0x1483   : > { %9424 = vmatmul.f32.gmra.mxu1 %v9308_v5  ;;  %v9309_v31 = vsub.f32 %v9307_v52, %v9308_v5 }
0x1484   : > { %9601 = vmatpush.xpose.msra.mxu2 %v16126_v12 }
0x1485   : > { %v9310_v11 = vand.u32 4294901760, %v9309_v31 }
0x1487   : > { %9311 = vmatmul.f32.gmra.mxu2 %v9310_v11  ;;  %9486 = vmatmul.f32.vlgmr.msrb.gmra.mxu3 %v9298_v19 }
0x1489   : > { %9535 = vmatmul.f32.vlgmr.msrb.gmra.mxu0 %v9534_v32 }
0x148b   : > { %9574 = vmatmul.f32.vlgmr.msrb.gmra.mxu1 %v9530_v50 }
0x148f   : > { %9457 = vmatmul.f32.vlgmr.msrb.gmra.mxu2 %v9298_v19  ;;  %9490 = vmatmul.f32.gmra.mxu3 %v9306_v49 }
0x1491   : > { %9543 = vmatmul.f32.gmra.mxu0 %v9542_v59 }
0x1493   : > { %9578 = vmatmul.f32.gmra.mxu1 %v9538_v58 }
0x1497   : > { %9461 = vmatmul.f32.gmra.mxu2 %v9306_v49  ;;  %9634 = vmatmul.f32.vlgmr.msra.gmra.mxu3 %v9532_v2 }
0x1499   : > { %9667 = vmatmul.f32.vlgmr.msra.gmra.mxu0 %v9530_v50 }
0x149b   : > { %9694 = vmatmul.f32.vlgmr.msra.gmra.mxu1 %v9530_v50 }
0x149f   : > { %9604 = vmatmul.f32.vlgmr.msra.gmra.mxu2 %v9531_v1  ;;  %9640 = vmatmul.f32.gmra.mxu3 %v9540_v57 }
0x14a1   : > { %9671 = vmatmul.f32.gmra.mxu0 %v9538_v58 }
0x14a3   : > { %9698 = vmatmul.f32.gmra.mxu1 %v9538_v58 }
0x14a7   : > { %9609 = vmatmul.f32.gmra.mxu2 %v9539_v37 }
0x14f6   : > { %v9387_v12 = vpop.f32.mrf.mxu0 }
0x14f8   : > { %v9419_v13 = vpop.f32.mrf.mxu1 }
0x14fa   : > { %v9353_v38 = vpop.f32.mrf.mxu3 }
0x14fe   : > { %v9392_v26 = vpop.f32.mrf.mxu0 }
0x1500   : > { %v9425_v63 = vpop.f32.mrf.mxu1 }
0x1502   : > { %v9304_v17 = vpop.f32.mrf.mxu2  ;;  %v9357_v39 = vpop.f32.mrf.mxu3 }
0x1503   : > { %v9354_v7 = vadd.f32 %v9353_v38, %v9304_v17 }
0x1505   : > { %v9388_v19 = vadd.f32 %v9387_v12, %v9354_v7 }
0x1506   : > { %v9536_v3 = vpop.f32.mrf.mxu0 }
0x1507   : > { %v9420_v8 = vadd.f32 %v9419_v13, %v9388_v19 }
0x1508   : > { %v9575_v1 = vpop.f32.mrf.mxu1 }
0x1509   : > { %v9576_v37 = vadd.f32 %v9575_v1, %v9536_v3 }
0x150a   : > { %v9312_v43 = vpop.f32.mrf.mxu2  ;;  %v9487_v60 = vpop.f32.mrf.mxu3 }
0x150b   : > { %v9358_v34 = vadd.f32 %v9357_v39, %v9312_v43 }
0x150d   : > { %v9393_v15 = vadd.f32 %v9392_v26, %v9358_v34 }
0x150e   : > { %v9544_v49 = vpop.f32.mrf.mxu0 }
0x150f   : > { %v9426_v50 = vadd.f32 %v9425_v63, %v9393_v15 }
0x1510   : > { %v9579_v52 = vpop.f32.mrf.mxu1 }
0x1511   : > { %v9580_v38 = vadd.f32 %v9579_v52, %v9544_v49 }
0x1512   : > { %v9458_v44 = vpop.f32.mrf.mxu2  ;;  %v9491_v16 = vpop.f32.mrf.mxu3 }
0x1513   : > { %v9459_v28 = vadd.f32 %v9458_v44, %v9420_v8 }
0x1515   : > { %v16161_v47 = vadd.f32 %v9487_v60, %v9459_v28 }
0x1516   : > { %v9668_v57 = vpop.f32.mrf.mxu0 }
0x1518   : > { %v9695_v54 = vpop.f32.mrf.mxu1 }
0x151a   : > { %v9462_v58 = vpop.f32.mrf.mxu2  ;;  %v9635_v20 = vpop.f32.mrf.mxu3 }
0x151b   : > { %v9463_v2 = vadd.f32 %v9462_v58, %v9426_v50 }
0x151d   : > { %v16163_v5 = vadd.f32 %v9491_v16, %v9463_v2 }
0x151e   : > { %v9672_v8 = vpop.f32.mrf.mxu0 }
0x1520   : > { %v9699_v43 = vpop.f32.mrf.mxu1 }
0x1522   : > { %v9605_v31 = vpop.f32.mrf.mxu2  ;;  %v9641_v39 = vpop.f32.mrf.mxu3 }
0x1523   : > { %v9606_v11 = vadd.f32 %v9605_v31, %v9576_v37 }
0x1525   : > { %v9636_v32 = vadd.f32 %v9635_v20, %v9606_v11 }
0x1527   : > { %v9669_v59 = vadd.f32 %v9668_v57, %v9636_v32 }
0x1529   : > { %v9696_v12 = vadd.f32 %v9695_v54, %v9669_v59 }
0x152a   : > { %v9610_v13 = vpop.f32.mrf.mxu2 }
0x152b   : > { %v9611_v17 = vadd.f32 %v9610_v13, %v9580_v38  ;;  %v9702_v7 = vsel %vm698_vm2, %v9696_v12, -1e+30 }
0x152c   : > { %v9704_v19 = vsel %vm2093_vm3, %v9702_v7, -inf }
0x152d   : > { %v9642_v26 = vadd.f32 %v9641_v39, %v9611_v17  ;;  %9705 = vmax.xlane.f32.xlu1 %v9704_v19 }
0x152f   : > { %v9673_v63 = vadd.f32 %v9672_v8, %v9642_v26 }
0x1531   : > { %v9700_v34 = vadd.f32 %v9699_v43, %v9673_v63 }
0x1533   : > { %v9703_v15 = vsel %vm698_vm2, %v9700_v34, -1e+30 }
0x1534   : > { %v9707_v60 = vsel %vm2093_vm3, %v9703_v15, -inf }
0x1535   : > { %9708 = vmax.xlane.f32.xlu0 %v9707_v60 }
0x1549   : > { %9754 = vrot.lane.b32.xlu0 %v15803_v42, %s12397_s19 }
0x15a0   : > { %v9706_v50 = vpop.xlane.xlu1 %9705 }
0x15a1   : > { %v9710_v3 = vsub.f32 %v9702_v7, %v9706_v50 }
0x15a3   : > { %v9712_v1 = vmul.f32 1.442695, %v9710_v3 }
0x15a5   : > { %12177 = vpow2.f32 %v9712_v1 }
0x15a8   : > { %v9709_v44 = vpop.xlane.xlu0 %9708 }
0x15a9   : > { %v9711_v28 = vsub.f32 %v9703_v15, %v9709_v44 }
0x15ab   : > { %v12178_v16 = vpop.eup %12177  ;;  %v9714_v49 = vmul.f32 1.442695, %v9711_v28 }
0x15ac   : > { %v9716_v58 = vsel %vm2093_vm3, %v12178_v16, 0.0 }
0x15ad   : > { %12179 = vpow2.f32 %v9714_v49  ;;  %9717 = vadd.xlane.f32.xlu2 %v9716_v58 }
0x15b3   : > { %v16174_v56 = vpop.eup %12179 }
0x15b4   : > { %v9719_v2 = vsel %vm2093_vm3, %v16174_v56, 0.0 }
0x15b5   : > { %9720 = vadd.xlane.f32.xlu1 %v9719_v2 }
0x15bb   : > { %v9755_v52 = vpop.permute.xlu0 %9754 }
0x15bc   : > { %v9778_v42 = vand.u32 4294901760, %v9755_v52 }
0x15be   : > { %v9814_v37 = vsub.f32 %v9755_v52, %v9778_v42  ;;  %9779 = vmatpush.msrb.mxu2 %v9778_v42  ;;  %9880 = vmatpush.msrb.mxu1 %v9778_v42 }
0x15c0   : > { %v9815_v20 = vand.u32 4294901760, %v9814_v37  ;;  %9850 = vmatpush.msrb.mxu0 %v9814_v37 }
0x15c2   : > { %v9816_v31 = vsub.f32 %v9814_v37, %v9815_v20 }
0x15c4   : > { %v9817_v11 = vand.u32 4294901760, %v9816_v31 }
0x15c5   : > { %9752 = vrot.lane.b32.xlu2 %v15800_v33, %s12397_s19  ;;  %s501_s19 = scalar_lea.vmem [#allocation10], %s11994_s30 }
0x15c6   : > { %9818 = vmatpush.msrb.mxu3 %v9817_v11  ;;  %s11876_s15 = sshll.u32 %s501_s19, 4  ;;  %s11877_s15 = int_to_ptr.vmem [resolvable:$true] %s11876_s15 }
0x1620   : > { %v9718_v57 = vpop.xlane.xlu2 %9717 }
0x1621   : > { %12181 = vrcp.f32 %v9718_v57  ;;  %v9733_v17 = vand.u32 2147483648, %v9718_v57  ;;  %v9731_v19 = vand.u32 2147483647, %v9718_v57  ;;  %vm9727_vm15 = vweird.f32 %v9718_v57 }
0x1623   : > { %v9734_v63 = vor.u32 1.1754944e-38, %v9733_v17  ;;  %vm9732_vm4 = vcmp.eq.f32.partialorder %v9731_v19, 8.507059e+37 }
0x1627   : > { %v12182_v32 = vpop.eup %12181 }
0x1628   : > { %v9723_v54 = vmul.f32 %v12182_v32, %v9718_v57  ;;  %v9753_v59 = vpop.permute.xlu2 %9752  ;;  %v9721_v38 = vpop.xlane.xlu1 %9720  ;;  %vm9728_vm2 = vweird.f32 %v12182_v32 }
0x1629   : > { %v9780_v12 = vand.u32 4294901760, %v9753_v59  ;;  %12183 = vrcp.f32 %v9721_v38  ;;  %vm9729_vm0 = vmor %vm9727_vm15, %vm9728_vm2  ;;  %v9748_v44 = vand.u32 2147483648, %v9721_v38  ;;  %v9746_v49 = vand.u32 2147483647, %v9721_v38 }
0x162a   : > { %v9724_v13 = vsub.f32 1.0, %v9723_v54  ;;  %vm9742_vm6 = vweird.f32 %v9721_v38 }
0x162b   : > { %v9820_v7 = vsub.f32 %v9753_v59, %v9780_v12  ;;  %9781 = vmatpush.msrb.mxu2 %v9780_v12  ;;  %9882 = vmatpush.msrb.mxu1 %v9780_v12  ;;  %v9749_v37 = vor.u32 1.1754944e-38, %v9748_v44  ;;  %vm9747_vm8 = vcmp.eq.f32.partialorder %v9746_v49, 8.507059e+37 }
0x162c   : > { %v9725_v39 = vmul.f32 %v12182_v32, %v9724_v13 }
0x162d   : > { %9913 = vmatpush.msra.mxu2 %v9815_v20  ;;  %9853 = vmatpush.msrb.mxu0 %v9820_v7  ;;  %v9821_v33 = vand.u32 4294901760, %v9820_v7 }
0x162e   : > { %v9726_v26 = vadd.f32 %v12182_v32, %v9725_v39  ;;  %v6344_v39 = vld [vmem:[#allocation5 + $0xf0] sm:$0xff] }
0x162f   : > { %v12184_v8 = vpop.eup %12183  ;;  %9917 = vmatpush.msra.mxu2 %v9821_v33  ;;  %v9822_v43 = vsub.f32 %v9820_v7, %v9821_v33  ;;  %v9974_v33 = vand.u32 4294901760, %v6344_v39 }
0x1630   : > { %v9730_v34 = vsel %vm9729_vm0, %v12182_v32, %v9726_v26  ;;  %v9738_v15 = vmul.f32 %v12184_v8, %v9721_v38  ;;  %vm9743_vm5 = vweird.f32 %v12184_v8  ;;  %v6343_v26 = vld [vmem:[#allocation5 + $0xe8] sm:$0xff] }
0x1631   : > { %v9735_v60 = vsel %vm9732_vm4, %v9734_v63, %v9730_v34  ;;  %v9823_v50 = vand.u32 4294901760, %v9822_v43  ;;  %vm9744_vm7 = vmor %vm9742_vm6, %vm9743_vm5  ;;  %v10016_v63 = vsub.f32 %v6344_v39, %v9974_v33  ;;  %v9976_v43 = vand.u32 4294901760, %v6343_v26  ;;  %v6342_v34 = vld [vmem:[#allocation5 + $0xe0] sm:$0xff] }
0x1632   : > { %v9736_v3 = vmul.f32 %v12178_v16, %v9735_v60  ;;  %v9739_v1 = vsub.f32 1.0, %v9738_v15 }
0x1633   : > { %9824 = vmatpush.msrb.mxu3 %v9823_v50  ;;  %v10017_v60 = vand.u32 4294901760, %v10016_v63  ;;  %v10022_v50 = vsub.f32 %v6343_v26, %v9976_v43 }
0x1634   : > { %v9740_v28 = vmul.f32 %v12184_v8, %v9739_v1  ;;  %v9759_v58 = vsel %vm2093_vm3, %v9736_v3, 0  ;;  %v9978_v3 = vand.u32 4294901760, %v6342_v34 }
0x1635   : > { %9942 = vmatpush.msra.mxu3 %v9778_v42  ;;  %v9782_v2 = vand.u32 4294901760, %v9759_v58  ;;  %v10018_v44 = vsub.f32 %v10016_v63, %v10017_v60 }
0x1636   : > { %v9741_v52 = vadd.f32 %v12184_v8, %v9740_v28  ;;  %v10023_v28 = vand.u32 4294901760, %v10022_v50  ;;  %v10028_v49 = vsub.f32 %v6342_v34, %v9978_v3 }
0x1637   : > { %9944 = vmatpush.msra.mxu3 %v9780_v12  ;;  %v9783_v20 = vsub.f32 %v9759_v58, %v9782_v2  ;;  %v10019_v58 = vand.u32 4294901760, %v10018_v44 }
0x1638   : > { %9826 = vmatmul.f32.vlgmr.msrb.gmra.mxu3 %v9782_v2  ;;  %v9745_v31 = vsel %vm9744_vm7, %v12184_v8, %v9741_v52  ;;  %v10029_v52 = vand.u32 4294901760, %v10028_v49 }
0x1639   : > { %v9750_v16 = vsel %vm9747_vm8, %v9749_v37, %v9745_v31  ;;  %9856 = vmatmul.f32.vlgmr.msrb.gmra.mxu0 %v9783_v20  ;;  %v9784_v11 = vand.u32 4294901760, %v9783_v20 }
0x163a   : > { %v9751_v57 = vmul.f32 %v16174_v56, %v9750_v16  ;;  %v6345_v56 = vld [vmem:[#allocation5 + $0xf8] sm:$0xff] }
0x163b   : > { %9886 = vmatmul.f32.vlgmr.msrb.gmra.mxu1 %v9784_v11  ;;  %v9785_v32 = vsub.f32 %v9783_v20, %v9784_v11  ;;  %v9972_v7 = vand.u32 4294901760, %v6345_v56  ;;  %v10030_v20 = vsub.f32 %v10028_v49, %v10029_v52 }
0x163c   : > { %v9762_v42 = vsel %vm2093_vm3, %v9751_v57, 0 }
0x163d   : > { %v9786_v54 = vand.u32 4294901760, %v9785_v32  ;;  %v9790_v59 = vand.u32 4294901760, %v9762_v42  ;;  %v10010_v19 = vsub.f32 %v6345_v56, %v9972_v7  ;;  %10090 = vmatpush.msrb.mxu3 %v9972_v7  ;;  %9973 = vmatpush.msra.mxu0 %v9972_v7  ;;  %v10031_v31 = vand.u32 4294901760, %v10030_v20 }
0x163f   : > { %9787 = vmatmul.f32.vlgmr.msrb.gmra.mxu2 %v9786_v54  ;;  %v9791_v38 = vsub.f32 %v9762_v42, %v9790_v59  ;;  %v10011_v8 = vand.u32 4294901760, %v10010_v19  ;;  %10092 = vmatpush.msrb.mxu3 %v9974_v33 }
0x1640   : > { %9830 = vmatmul.f32.gmra.mxu3 %v9790_v59  ;;  %10056 = vmatpush.msrb.mxu2 %v10010_v19 }
0x1641   : > { %9861 = vmatmul.f32.gmra.mxu0 %v9791_v38  ;;  %v9792_v12 = vand.u32 4294901760, %v9791_v38  ;;  %v10012_v15 = vsub.f32 %v10010_v19, %v10011_v8  ;;  %10094 = vmatpush.msrb.mxu3 %v9976_v43 }
0x1642   : > { %9975 = vmatpush.msra.mxu0 %v9974_v33  ;;  %10059 = vmatpush.msrb.mxu2 %v10016_v63 }
0x1643   : > { %9892 = vmatmul.f32.gmra.mxu1 %v9792_v12  ;;  %v9793_v13 = vsub.f32 %v9791_v38, %v9792_v12  ;;  %v10013_v1 = vand.u32 4294901760, %v10012_v15  ;;  %10096 = vmatpush.msrb.mxu3 %v9978_v3 }
0x1644   : > { %9977 = vmatpush.msra.mxu0 %v9976_v43  ;;  %10062 = vmatpush.msrb.mxu2 %v10022_v50 }
0x1645   : > { %v9794_v17 = vand.u32 4294901760, %v9793_v13  ;;  %10014 = vmatpush.msra.mxu1 %v10013_v1 }
0x1646   : > { %9979 = vmatpush.msra.mxu0 %v9978_v3  ;;  %10065 = vmatpush.msrb.mxu2 %v10028_v49 }
0x1647   : > { %9795 = vmatmul.f32.gmra.mxu2 %v9794_v17  ;;  %10020 = vmatpush.msra.mxu1 %v10019_v58 }
0x1648   : > { %9946 = vmatmul.f32.vlgmr.msra.gmra.mxu3 %v9782_v2  ;;  %10125 = vmatpush.msrb.mxu0 %v10011_v8 }
0x164a   : > { %10129 = vmatpush.msrb.mxu0 %v10017_v60 }
0x164c   : > { %10133 = vmatpush.msrb.mxu0 %v10023_v28 }
0x164e   : > { %10137 = vmatpush.msrb.mxu0 %v10029_v52 }
0x164f   : > { %9919 = vmatmul.f32.vlgmr.msra.gmra.mxu2 %v9782_v2  ;;  %v10024_v2 = vsub.f32 %v10022_v50, %v10023_v28 }
0x1650   : > { %9950 = vmatmul.f32.gmra.mxu3 %v9790_v59 }
0x1651   : > { %v10025_v37 = vand.u32 4294901760, %v10024_v2 }
0x1653   : > { %10026 = vmatpush.msra.mxu1 %v10025_v37 }
0x1655   : > { %10032 = vmatpush.msra.mxu1 %v10031_v31  ;;  %v8452_v31 = vadd.f32 %v16009_v62, %v16015_v14  ;;  %v10269_v62 = vld [vmem:[#allocation7 + $0x1f0] sm:$0xff] }
0x1657   : > { %9923 = vmatmul.f32.gmra.mxu2 %v9790_v59  ;;  %10160 = vmatpush.msrb.mxu1 %v9972_v7 }
0x1659   : > { %10162 = vmatpush.msrb.mxu1 %v9974_v33 }
0x165b   : > { %10164 = vmatpush.msrb.mxu1 %v9976_v43 }
0x165d   : > { %10166 = vmatpush.msrb.mxu1 %v9978_v3 }
0x16b6   : > { %v9857_v42 = vpop.f32.mrf.mxu0 }
0x16b8   : > { %v9887_v38 = vpop.f32.mrf.mxu1 }
0x16bb   : > { %v9827_v16 = vpop.f32.mrf.mxu3 }
0x16be   : > { %v9862_v19 = vpop.f32.mrf.mxu0 }
0x16c0   : > { %v9893_v33 = vpop.f32.mrf.mxu1 }
0x16c2   : > { %v9788_v11 = vpop.f32.mrf.mxu2 }
0x16c3   : > { %v9831_v57 = vpop.f32.mrf.mxu3  ;;  %v9828_v32 = vadd.f32 %v9827_v16, %v9788_v11  ;;  %v8456_v16 = vadd.f32 %v16017_v27, %v16021_v41  ;;  %v8486_v11 = vadd.f32 %v16011_v6, %v8452_v31  ;;  %v16197_v27 = vand.u32 4294901760, %v10269_v62 }
0x16c5   : > { %v9858_v59 = vadd.f32 %v9857_v42, %v9828_v32  ;;  %v8518_v32 = vadd.f32 %v16013_v51, %v8486_v11  ;;  %v16201_v51 = vsub.f32 %v10269_v62, %v16197_v27  ;;  %10279 = vmatpush.msra.mxu2 %v16197_v27 }
0x16c7   : > { %v9888_v13 = vadd.f32 %v9887_v38, %v9858_v59  ;;  %v8557_v42 = vadd.f32 %v16029_v4, %v8518_v32 }
0x16ca   : > { %v9796_v54 = vpop.f32.mrf.mxu2 }
0x16cb   : > { %v9832_v12 = vadd.f32 %v9831_v57, %v9796_v54  ;;  %v9947_v17 = vpop.f32.mrf.mxu3  ;;  %v8491_v57 = vadd.f32 %v16019_v30, %v8456_v16  ;;  %v10267_v30 = vld [vmem:[#allocation7 + $0x1e0] sm:$0xff] }
0x16cc   : > { %v16203_v41 = vand.u32 4294901760, %v10267_v30 }
0x16cd   : > { %v9863_v26 = vadd.f32 %v9862_v19, %v9832_v12  ;;  %v8524_v59 = vadd.f32 %v16025_v40, %v8491_v57  ;;  %v8586_v12 = vadd.f32 %v16023_v46, %v8557_v42  ;;  %v10265_v46 = vld [vmem:[#allocation7 + $0x1d0] sm:$0xff] }
0x16ce   : > { %10281 = vmatpush.msra.mxu2 %v16203_v41 }
0x16cf   : > { %v9894_v43 = vadd.f32 %v9893_v33, %v9863_v26  ;;  %v8561_v38 = vadd.f32 %v16035_v48, %v8524_v59  ;;  %v8625_v6 = vadd.f32 %v16027_v9, %v8586_v12  ;;  %v16210_v48 = vsub.f32 %v10267_v30, %v16203_v41  ;;  %v10263_v26 = vld [vmem:[#allocation7 + $0x1c0] sm:$0xff] }
0x16d0   : > { %v16213_v9 = vand.u32 4294901760, %v10265_v46  ;;  %v16228_v33 = vand.u32 4294901760, %v10263_v26  ;;  %v10255_v59 = vld [vmem:[#allocation7 + $0x180] sm:$0xff] }
0x16d1   : > { %v8590_v14 = vadd.f32 %v16031_v23, %v8561_v38  ;;  %v10329_v23 = vand.u32 4294901760, %v16201_v51  ;;  %v16274_v62 = vand.u32 4294901760, %v10255_v59 }
0x16d2   : > { %v9920_v56 = vpop.f32.mrf.mxu2  ;;  %10283 = vmatpush.msra.mxu2 %v16213_v9 }
0x16d3   : > { %v9921_v39 = vadd.f32 %v9920_v56, %v9888_v13  ;;  %v9951_v3 = vpop.f32.mrf.mxu3  ;;  %v8633_v4 = vadd.f32 %v16039_v45, %v8590_v14  ;;  %v10330_v45 = vsub.f32 %v16201_v51, %v10329_v23 }
0x16d4   : > { %10285 = vmatpush.msra.mxu2 %v16228_v33 }
0x16d5   : > { %v9948_v7 = vadd.f32 %v9947_v17, %v9921_v39  ;;  %v8674_v17 = vadd.f32 %v16033_v24, %v8625_v6 }
0x16d7   : > { %v9955_v8 = vsel %vm1888_vm1, %v9948_v7, 0  ;;  %v10335_v7 = vand.u32 4294901760, %v16210_v48  ;;  %v8708_v24 = vadd.f32 %v16043_v18, %v8674_v17  ;;  %v16238_v18 = vsub.f32 %v10263_v26, %v16228_v33  ;;  %v10251_v26 = vld [vmem:[#allocation7 + $0x160] sm:$0xff] }
0x16d8   : > { %v9980_v63 = vand.u32 4294901760, %v9955_v8 }
0x16da   : > { %v9981_v34 = vsub.f32 %v9955_v8, %v9980_v63  ;;  %v9924_v15 = vpop.f32.mrf.mxu2  ;;  %10034 = vmatmul.f32.vlgmr.msra.gmra.mxu1 %v9980_v63  ;;  %v16223_v8 = vsub.f32 %v10265_v46, %v16213_v9 }
0x16db   : > { %v9925_v60 = vadd.f32 %v9924_v15, %v9894_v43  ;;  %10492 = vmatpush.msra.mxu1 %v16197_v27  ;;  %v8678_v43 = vadd.f32 %v16041_v35, %v8633_v4  ;;  %v10336_v15 = vsub.f32 %v16210_v48, %v10335_v7 }
0x16dc   : > { %v9982_v50 = vand.u32 4294901760, %v9981_v34  ;;  %10068 = vmatmul.f32.vlgmr.msrb.gmra.mxu2 %v9981_v34 }
0x16dd   : > { %v9952_v1 = vadd.f32 %v9951_v3, %v9925_v60  ;;  %10494 = vmatpush.msra.mxu1 %v16203_v41  ;;  %v10341_v60 = vand.u32 4294901760, %v16223_v8  ;;  %v8713_v35 = vadd.f32 %v16051_v0, %v8678_v43 }
0x16de   : > { %v9983_v44 = vsub.f32 %v9981_v34, %v9982_v50  ;;  %10100 = vmatmul.f32.vlgmr.msrb.gmra.mxu3 %v9982_v50  ;;  %v10331_v34 = vand.u32 4294901760, %v10330_v45 }
0x16df   : > { %v9958_v28 = vsel %vm1888_vm1, %v9952_v1, 0  ;;  %10496 = vmatpush.msra.mxu1 %v16213_v9  ;;  %v8746_v38 = vadd.f32 %v16045_v29, %v8713_v35  ;;  %v10253_v29 = vld [vmem:[#allocation7 + $0x170] sm:$0xff] }
0x16e0   : > { %v9984_v49 = vand.u32 4294901760, %v9983_v44  ;;  %v9988_v58 = vand.u32 4294901760, %v9958_v28  ;;  %v10259_v44 = vld [vmem:[#allocation7 + $0x1a0] sm:$0xff]  ;;  %10332 = vmatpush.msra.mxu3 %v10331_v34 }
0x16e1   : > { %10498 = vmatpush.msra.mxu1 %v16228_v33  ;;  %v8783_v45 = vadd.f32 %v16053_v55, %v8746_v38  ;;  %v16306_v55 = vand.u32 4294901760, %v10251_v26  ;;  %v12111_v38 = vld [vmem:[%s17324_s4 + $0x1] ss:$0 sm:$0xff] }
0x16e2   : > { %9985 = vmatmul.f32.vlgmr.msra.gmra.mxu0 %v9984_v49  ;;  %10038 = vmatmul.f32.gmra.mxu1 %v9988_v58  ;;  %v9989_v2 = vsub.f32 %v9958_v28, %v9988_v58  ;;  %v10337_v28 = vand.u32 4294901760, %v10336_v15  ;;  %v10342_v49 = vsub.f32 %v16223_v8, %v10341_v60 }
0x16e3   : > { %10434 = vmatpush.msra.mxu0 %v16201_v51 }
0x16e4   : > { %10073 = vmatmul.f32.gmra.mxu2 %v9989_v2  ;;  %v9990_v52 = vand.u32 4294901760, %v9989_v2  ;;  %10338 = vmatpush.msra.mxu3 %v10337_v28  ;;  %v10343_v31 = vand.u32 4294901760, %v10342_v49 }
0x16e5   : > { %10437 = vmatpush.msra.mxu0 %v16210_v48 }
0x16e6   : > { %10106 = vmatmul.f32.gmra.mxu3 %v9990_v52  ;;  %v9991_v37 = vsub.f32 %v9989_v2, %v9990_v52  ;;  %v8740_v2 = vadd.f32 %v16037_v25, %v8708_v24  ;;  %v10347_v52 = vand.u32 4294901760, %v16238_v18 }
0x16e7   : > { %10440 = vmatpush.msra.mxu0 %v16223_v8  ;;  %10344 = vmatpush.msra.mxu3 %v10343_v31  ;;  %v16318_v31 = vsub.f32 %v10251_v26, %v16306_v55 }
0x16e8   : > { %v9992_v20 = vand.u32 4294901760, %v9991_v37  ;;  %v10348_v42 = vsub.f32 %v16238_v18, %v10347_v52  ;;  %v8779_v14 = vadd.f32 %v16047_v22, %v8740_v2  ;;  %v16288_v22 = vsub.f32 %v10255_v59, %v16274_v62 }
0x16e9   : > { %10443 = vmatpush.msra.mxu0 %v16238_v18 }
0x16ea   : > { %9993 = vmatmul.f32.gmra.mxu0 %v9992_v20  ;;  %10168 = vmatmul.f32.vlgmr.msrb.gmra.mxu1 %v9980_v63  ;;  %v10257_v20 = vld [vmem:[#allocation7 + $0x190] sm:$0xff]  ;;  %v10371_v43 = vand.u32 4294901760, %v16288_v22  ;;  %v8808_v34 = vadd.f32 %v16049_v21, %v8779_v14 }
0x16eb   : > { %v16260_v11 = vand.u32 4294901760, %v10257_v20 }
0x16ec   : > { %v10372_v49 = vsub.f32 %v16288_v22, %v10371_v43  ;;  %v9494_v21 = vadd.f32 %v16161_v47, %v8808_v34 }
0x16f2   : > { %10139 = vmatmul.f32.vlgmr.msrb.gmra.mxu0 %v9980_v63  ;;  %10172 = vmatmul.f32.gmra.mxu1 %v9988_v58  ;;  %v10261_v63 = vld [vmem:[#allocation7 + $0x1b0] sm:$0xff] }
0x16f3   : > { %v16240_v1 = vand.u32 4294901760, %v10261_v63 }
0x16f5   : > { %v16253_v37 = vsub.f32 %v10261_v63, %v16240_v1  ;;  %10500 = vmatpush.msra.mxu1 %v16240_v1  ;;  %10287 = vmatpush.msra.mxu2 %v16240_v1 }
0x16f7   : > { %10446 = vmatpush.msra.mxu0 %v16253_v37 }
0x16fa   : > { %10143 = vmatmul.f32.gmra.mxu0 %v9988_v58  ;;  %v16248_v58 = vand.u32 4294901760, %v10259_v44 }
0x16fc   : > { %v16258_v16 = vsub.f32 %v10259_v44, %v16248_v58  ;;  %10502 = vmatpush.msra.mxu1 %v16248_v58  ;;  %10289 = vmatpush.msra.mxu2 %v16248_v58  ;;  %v10249_v44 = vld [vmem:[#allocation7 + $0x150] sm:$0xff] }
0x16fd   : > { %v16311_v2 = vand.u32 4294901760, %v10249_v44 }
0x16fe   : > { %v10359_v12 = vand.u32 4294901760, %v16258_v16  ;;  %10449 = vmatpush.msra.mxu0 %v16258_v16  ;;  %10504 = vmatpush.msra.mxu1 %v16260_v11 }
0x16ff   : > { %10291 = vmatpush.msra.mxu2 %v16260_v11  ;;  %v16323_v59 = vsub.f32 %v10249_v44, %v16311_v2 }
0x1700   : > { %v10360_v17 = vsub.f32 %v16258_v16, %v10359_v12  ;;  %10506 = vmatpush.msra.mxu1 %v16274_v62  ;;  %v10256_v16 = vld [vmem:[#allocation7 + $0x188] sm:$0xff] }
0x1701   : > { %10293 = vmatpush.msra.mxu2 %v16274_v62 }
0x1702   : > { %v10361_v24 = vand.u32 4294901760, %v10360_v17 }
0x1757   : > { %v10035_v54 = vpop.f32.mrf.mxu1 }
0x175f   : > { %v9986_v13 = vpop.f32.mrf.mxu0  ;;  %v10039_v40 = vpop.f32.mrf.mxu1 }
0x1760   : > { %v10036_v56 = vadd.f32 %v10035_v54, %v9986_v13  ;;  %v10069_v39 = vpop.f32.mrf.mxu2  ;;  %v10353_v54 = vand.u32 4294901760, %v16253_v37  ;;  %v16272_v13 = vsub.f32 %v10257_v20, %v16260_v11 }
0x1761   : > { %v10101_v3 = vpop.f32.mrf.mxu3 }
0x1762   : > { %v10070_v50 = vadd.f32 %v10069_v39, %v10036_v56  ;;  %v10354_v46 = vsub.f32 %v16253_v37, %v10353_v54  ;;  %v10365_v56 = vand.u32 4294901760, %v16272_v13  ;;  %10452 = vmatpush.msra.mxu0 %v16272_v13  ;;  %v10258_v37 = vld [vmem:[#allocation7 + $0x198] sm:$0xff] }
0x1764   : > { %v10102_v25 = vadd.f32 %v10101_v3, %v10070_v50  ;;  %v10355_v39 = vand.u32 4294901760, %v10354_v46  ;;  %v10366_v63 = vsub.f32 %v16272_v13, %v10365_v56  ;;  %10455 = vmatpush.msra.mxu0 %v16288_v22  ;;  %v10252_v22 = vld [vmem:[#allocation7 + $0x168] sm:$0xff] }
0x1766   : > { %v10367_v28 = vand.u32 4294901760, %v10366_v63 }
0x1767   : > { %v9994_v19 = vpop.f32.mrf.mxu0  ;;  %v10169_v57 = vpop.f32.mrf.mxu1 }
0x1768   : > { %v10040_v0 = vadd.f32 %v10039_v40, %v9994_v19  ;;  %v10074_v6 = vpop.f32.mrf.mxu2  ;;  %v10349_v40 = vand.u32 4294901760, %v10348_v42  ;;  %v16292_v19 = vand.u32 4294901760, %v10253_v29  ;;  %v10373_v42 = vand.u32 4294901760, %v10372_v49 }
0x1769   : > { %v10107_v15 = vpop.f32.mrf.mxu3 }
0x176a   : > { %v10075_v4 = vadd.f32 %v10074_v6, %v10040_v0  ;;  %10350 = vmatpush.msra.mxu3 %v10349_v40  ;;  %v16303_v3 = vsub.f32 %v10253_v29, %v16292_v19  ;;  %10508 = vmatpush.msra.mxu1 %v16292_v19  ;;  %v10383_v6 = vand.u32 4294901760, %v16318_v31  ;;  %v10245_v40 = vld [vmem:[#allocation7 + $0x130] sm:$0xff] }
0x176b   : > { %10295 = vmatpush.msra.mxu2 %v16292_v19  ;;  %v16339_v17 = vand.u32 4294901760, %v10245_v40 }
0x176c   : > { %10356 = vmatpush.msra.mxu3 %v10355_v39  ;;  %v10108_v35 = vadd.f32 %v10107_v15, %v10075_v4  ;;  %v10377_v0 = vand.u32 4294901760, %v16303_v3  ;;  %10458 = vmatpush.msra.mxu0 %v16303_v3  ;;  %v10389_v4 = vand.u32 4294901760, %v16323_v59  ;;  %v10384_v26 = vsub.f32 %v16318_v31, %v10383_v6 }
0x176d   : > { %10510 = vmatpush.msra.mxu1 %v16306_v55  ;;  %10297 = vmatpush.msra.mxu2 %v16306_v55  ;;  %v16354_v34 = vsub.f32 %v10245_v40, %v16339_v17 }
0x176e   : > { %10362 = vmatpush.msra.mxu3 %v10361_v24  ;;  %10461 = vmatpush.msra.mxu0 %v16318_v31  ;;  %v10390_v63 = vsub.f32 %v16323_v59, %v10389_v4  ;;  %v10385_v44 = vand.u32 4294901760, %v10384_v26 }
0x176f   : > { %v10140_v32 = vpop.f32.mrf.mxu0  ;;  %v10173_v14 = vpop.f32.mrf.mxu1  ;;  %10512 = vmatpush.msra.mxu1 %v16311_v2  ;;  %10299 = vmatpush.msra.mxu2 %v16311_v2 }
0x1770   : > { %v10141_v30 = vadd.f32 %v10140_v32, %v10102_v25  ;;  %v10247_v25 = vld [vmem:[#allocation7 + $0x140] sm:$0xff]  ;;  %10368 = vmatpush.msra.mxu3 %v10367_v28  ;;  %10464 = vmatpush.msra.mxu0 %v16323_v59  ;;  %v10241_v28 = vld [vmem:[#allocation7 + $0x110] sm:$0xff] }
0x1772   : > { %v10170_v50 = vadd.f32 %v10169_v57, %v10141_v30  ;;  %v8812_v57 = vadd.f32 %v16055_v53, %v8783_v45  ;;  %v10378_v53 = vsub.f32 %v16303_v3, %v10377_v0  ;;  %v16335_v30 = vand.u32 4294901760, %v10247_v25  ;;  %10374 = vmatpush.msra.mxu3 %v10373_v42  ;;  %v10239_v42 = vld [vmem:[#allocation7 + $0x100] sm:$0xff] }
0x1774   : > { %v10176_v47 = vadd.f32 %v10170_v50, %v9494_v21  ;;  %v9495_v46 = vadd.f32 %v16163_v5, %v8812_v57  ;;  %v10379_v39 = vand.u32 4294901760, %v10378_v53  ;;  %v16347_v45 = vsub.f32 %v10247_v25, %v16335_v30  ;;  %v10243_v5 = vld [vmem:[#allocation7 + $0x120] sm:$0xff]  ;;  %10514 = vmatpush.msra.mxu1 %v16335_v30  ;;  %10301 = vmatpush.msra.mxu2 %v16335_v30 }
0x1775   : > { %v16356_v15 = vand.u32 4294901760, %v10243_v5  ;;  %v10391_v21 = vand.u32 4294901760, %v10390_v63  ;;  %v16381_v53 = vand.u32 4294901760, %v10239_v42 }
0x1776   : > { %v10183_v50 = vadd.f32 %v12111_v38, %v10176_v47  ;;  %10380 = vmatpush.msra.mxu3 %v10379_v39  ;;  %10467 = vmatpush.msra.mxu0 %v16347_v45 }
0x1777   : > { %v10144_v20 = vpop.f32.mrf.mxu0  ;;  %v16364_v25 = vsub.f32 %v10243_v5, %v16356_v15  ;;  %10516 = vmatpush.msra.mxu1 %v16339_v17  ;;  %10303 = vmatpush.msra.mxu2 %v16339_v17  ;;  %v16398_v5 = vsub.f32 %v10239_v42, %v16381_v53  ;;  %v10268_v42 = vld [vmem:[#allocation7 + $0x1e8] sm:$0xff] }
0x1778   : > { %v10145_v32 = vadd.f32 %v10144_v20, %v10108_v35  ;;  %v10395_v35 = vand.u32 4294901760, %v16347_v45  ;;  %v10401_v20 = vand.u32 4294901760, %v16354_v34  ;;  %10386 = vmatpush.msra.mxu3 %v10385_v44  ;;  %10470 = vmatpush.msra.mxu0 %v16354_v34  ;;  %v16386_v40 = vadd.f32 %v10183_v50, %v15390_v36  ;;  %v10270_v44 = vld [vmem:[#allocation7 + $0x1f8] sm:$0xff] }
0x1779   : > { %10518 = vmatpush.msra.mxu1 %v16356_v15  ;;  %10305 = vmatpush.msra.mxu2 %v16356_v15  ;;  %v10419_v50 = vand.u32 4294901760, %v16398_v5 }
0x177a   : > { %v10174_v29 = vadd.f32 %v10173_v14, %v10145_v32  ;;  %v10396_v57 = vsub.f32 %v16347_v45, %v10395_v35  ;;  %v16372_v32 = vand.u32 4294901760, %v10241_v28  ;;  %v10407_v14 = vand.u32 4294901760, %v16364_v25  ;;  %10392 = vmatpush.msra.mxu3 %v10391_v21  ;;  %10473 = vmatpush.msra.mxu0 %v16364_v25 }
0x177c   : > { %v10177_v24 = vadd.f32 %v10174_v29, %v9495_v46  ;;  %v10397_v46 = vand.u32 4294901760, %v10396_v57  ;;  %v10408_v26 = vsub.f32 %v16364_v25, %v10407_v14  ;;  %10520 = vmatpush.msra.mxu1 %v16372_v32  ;;  %10307 = vmatpush.msra.mxu2 %v16372_v32  ;;  %v10420_v57 = vsub.f32 %v16398_v5, %v10419_v50 }
0x177e   : > { %v10184_v49 = vadd.f32 %v12111_v38, %v10177_v24  ;;  %v10402_v38 = vsub.f32 %v16354_v34, %v10401_v20  ;;  %10398 = vmatpush.msra.mxu3 %v10397_v46  ;;  %v10409_v63 = vand.u32 4294901760, %v10408_v26  ;;  %10522 = vmatpush.msra.mxu1 %v16381_v53  ;;  %v10421_v26 = vand.u32 4294901760, %v10420_v57 }
0x177f   : > { %10309 = vmatpush.msra.mxu2 %v16381_v53 }
0x1780   : > { %v16375_v47 = vadd.f32 %v10184_v49, %v15392_v10  ;;  %v16389_v10 = vsub.f32 %v10241_v28, %v16372_v32  ;;  %v10403_v39 = vand.u32 4294901760, %v10402_v38  ;;  %v16412_v49 = vand.u32 4294901760, %v10270_v44 }
0x1781   : > { %10539 = vmatpush.msrb.mxu2 %v10329_v23 }
0x1782   : > { %v10192_v29 = vmul.f32 %v14038_v61, %v16375_v47  ;;  %v17381_v36 = vand.u32 4294901760, %v16389_v10  ;;  %10476 = vmatpush.msra.mxu0 %v16389_v10  ;;  %10404 = vmatpush.msra.mxu3 %v10403_v39  ;;  %v16421_v46 = vsub.f32 %v10270_v44, %v16412_v49 }
0x1783   : > { %10543 = vmatpush.msrb.mxu2 %v10335_v7 }
0x1784   : > { %v10193_v24 = vadd.f32 %v10192_v29, %v16386_v40  ;;  %v10414_v28 = vsub.f32 %v16389_v10, %v17381_v36  ;;  %10479 = vmatpush.msra.mxu0 %v16398_v5  ;;  %10410 = vmatpush.msra.mxu3 %v10409_v63  ;;  %v16423_v29 = vand.u32 4294901760, %v10268_v42  ;;  %v10266_v36 = vld [vmem:[#allocation7 + $0x1d8] sm:$0xff]  ;;  %v10701_v51 = vand.u32 4294901760, %v16421_v46 }
0x1785   : > { %v16429_v23 = vand.u32 4294901760, %v10266_v36  ;;  %10547 = vmatpush.msrb.mxu2 %v10341_v60 }
0x1786   : > { %v10194_v21 = vrot.slane %v10193_v24, 4  ;;  %v10415_v38 = vand.u32 4294901760, %v10414_v28  ;;  %10651 = vmatpush.msrb.mxu0 %v16412_v49  ;;  %v16432_v63 = vsub.f32 %v10268_v42, %v16423_v29  ;;  %v10264_v28 = vld [vmem:[#allocation7 + $0x1c8] sm:$0xff]  ;;  %v10702_v48 = vsub.f32 %v16421_v46, %v10701_v51  ;;  %v10262_v42 = vld [vmem:[#allocation7 + $0x1b8] sm:$0xff] }
0x1787   : > { %10551 = vmatpush.msrb.mxu2 %v10347_v52 }
0x1788   : > { %v10195_v39 = vadd.f32 %v10194_v21, %v10193_v24  ;;  %10416 = vmatpush.msra.mxu3 %v10415_v38  ;;  %10653 = vmatpush.msrb.mxu0 %v16423_v29  ;;  %v10707_v7 = vand.u32 4294901760, %v16432_v63  ;;  %v16441_v24 = vand.u32 4294901760, %v10264_v28  ;;  %v16444_v21 = vsub.f32 %v10266_v36, %v16429_v23 }
0x1789   : > { %v10703_v8 = vand.u32 4294901760, %v10702_v48  ;;  %10555 = vmatpush.msrb.mxu2 %v10353_v54 }
0x178a   : > { %v10196_v44 = vrot.slane %v10195_v39, 2  ;;  %10422 = vmatpush.msra.mxu3 %v10421_v26  ;;  %10655 = vmatpush.msrb.mxu0 %v16429_v23  ;;  %v10708_v60 = vsub.f32 %v16432_v63, %v10707_v7  ;;  %v10713_v38 = vand.u32 4294901760, %v16444_v21  ;;  %v16454_v26 = vand.u32 4294901760, %v10262_v42 }
0x178b   : > { %10704 = vmatpush.msrb.mxu1 %v10703_v8  ;;  %10559 = vmatpush.msrb.mxu2 %v10359_v12 }
0x178c   : > { %v10197_v57 = vadd.f32 %v10196_v44, %v10195_v39  ;;  %10610 = vmatpush.msrb.mxu3 %v16197_v27  ;;  %10657 = vmatpush.msrb.mxu0 %v16441_v24  ;;  %v16458_v27 = vsub.f32 %v10264_v28, %v16441_v24  ;;  %v10260_v39 = vld [vmem:[#allocation7 + $0x1a8] sm:$0xff]  ;;  %v10709_v18 = vand.u32 4294901760, %v10708_v60  ;;  %v10714_v52 = vsub.f32 %v16444_v21, %v10713_v38 }
0x178d   : > { %v16466_v44 = vand.u32 4294901760, %v10260_v39  ;;  %v16469_v48 = vsub.f32 %v10262_v42, %v16454_v26  ;;  %v16477_v60 = vand.u32 4294901760, %v10258_v37  ;;  %10563 = vmatpush.msrb.mxu2 %v10365_v56 }
0x178e   : > { %v10198_v36 = vrot.slane %v10197_v57, 1  ;;  %10612 = vmatpush.msrb.mxu3 %v16203_v41  ;;  %10659 = vmatpush.msrb.mxu0 %v16454_v26  ;;  %v10719_v28 = vand.u32 4294901760, %v16458_v27  ;;  %v10715_v54 = vand.u32 4294901760, %v10714_v52  ;;  %v10254_v52 = vld [vmem:[#allocation7 + $0x178] sm:$0xff] }
0x178f   : > { %10710 = vmatpush.msrb.mxu1 %v10709_v18  ;;  %v10725_v8 = vand.u32 4294901760, %v16469_v48  ;;  %v16480_v42 = vsub.f32 %v10260_v39, %v16466_v44  ;;  %v16493_v39 = vand.u32 4294901760, %v10256_v16  ;;  %10567 = vmatpush.msrb.mxu2 %v10371_v43 }
0x1790   : > { %v10199_v41 = vadd.f32 %v10198_v36, %v10197_v57  ;;  %10614 = vmatpush.msrb.mxu3 %v16213_v9  ;;  %10661 = vmatpush.msrb.mxu0 %v16466_v44  ;;  %v10720_v9 = vsub.f32 %v16458_v27, %v10719_v28 }
0x1791   : > { %10716 = vmatpush.msrb.mxu1 %v10715_v54  ;;  %v10726_v12 = vsub.f32 %v16469_v48, %v10725_v8  ;;  %v17383_v36 = vand.u32 4294901760, %v16480_v42  ;;  %10571 = vmatpush.msrb.mxu2 %v10377_v0 }
0x1792   : > { %v10200_v57 = vmul.f32 0.11111111, %v10199_v41  ;;  %10616 = vmatpush.msrb.mxu3 %v16228_v33  ;;  %10663 = vmatpush.msrb.mxu0 %v16477_v60  ;;  %v16496_v33 = vsub.f32 %v10258_v37, %v16477_v60  ;;  %v10721_v56 = vand.u32 4294901760, %v10720_v9  ;;  %v16512_v37 = vand.u32 4294901760, %v10254_v52 }
0x1793   : > { %v10727_v41 = vand.u32 4294901760, %v10726_v12  ;;  %v10732_v54 = vsub.f32 %v16480_v42, %v17383_v36  ;;  %v16524_v9 = vand.u32 4294901760, %v10252_v22  ;;  %10575 = vmatpush.msrb.mxu2 %v10383_v6 }
0x1794   : > { %v16499_v18 = vsub.f32 %v16386_v40, %v10200_v57  ;;  %v16502_v13 = vsub.f32 %v16375_v47, %v10200_v57  ;;  %10618 = vmatpush.msrb.mxu3 %v16240_v1  ;;  %10665 = vmatpush.msrb.mxu0 %v16493_v39  ;;  %v17382_v40 = vand.u32 4294901760, %v16496_v33  ;;  %v16518_v1 = vsub.f32 %v10256_v16, %v16493_v39 }
0x1795   : > { %10722 = vmatpush.msrb.mxu1 %v10721_v56  ;;  %v10733_v43 = vand.u32 4294901760, %v10732_v54  ;;  %v16527_v12 = vsub.f32 %v10254_v52, %v16512_v37  ;;  %v10250_v54 = vld [vmem:[#allocation7 + $0x158] sm:$0xff]  ;;  %v16541_v3 = vsub.f32 %v10252_v22, %v16524_v9  ;;  %10579 = vmatpush.msrb.mxu2 %v10389_v4  ;;  %v10244_v4 = vld [vmem:[#allocation7 + $0x128] sm:$0xff] }
0x1796   : > { %v10204_v47 = vmul.f32 %v16502_v13, %v16502_v13  ;;  %10620 = vmatpush.msrb.mxu3 %v16248_v58  ;;  %v10738_v57 = vsub.f32 %v16496_v33, %v17382_v40  ;;  %10667 = vmatpush.msrb.mxu0 %v16512_v37  ;;  %v10203_v58 = vmul.f32 %v16499_v18, %v16499_v18  ;;  %v10743_v56 = vand.u32 4294901760, %v16518_v1 }
0x1797   : > { %10728 = vmatpush.msrb.mxu1 %v10727_v41  ;;  %v17384_v52 = vand.u32 4294901760, %v16527_v12  ;;  %v16538_v36 = vand.u32 4294901760, %v10250_v54  ;;  %v10248_v41 = vld [vmem:[#allocation7 + $0x148] sm:$0xff]  ;;  %v10755_v22 = vand.u32 4294901760, %v16541_v3  ;;  %10583 = vmatpush.msrb.mxu2 %v10395_v35 }
0x1798   : > { %v10206_v16 = vmul.f32 %v14038_v61, %v10204_v47  ;;  %10622 = vmatpush.msrb.mxu3 %v16260_v11  ;;  %v10739_v40 = vand.u32 4294901760, %v10738_v57  ;;  %10669 = vmatpush.msrb.mxu0 %v16524_v9  ;;  %v10744_v11 = vsub.f32 %v16518_v1, %v10743_v56  ;;  %v16554_v57 = vand.u32 4294901760, %v10248_v41 }
0x1799   : > { %10734 = vmatpush.msrb.mxu1 %v10733_v43  ;;  %v10750_v47 = vsub.f32 %v16527_v12, %v17384_v52  ;;  %v16557_v31 = vsub.f32 %v10250_v54, %v16538_v36  ;;  %v10246_v43 = vld [vmem:[#allocation7 + $0x138] sm:$0xff]  ;;  %10587 = vmatpush.msrb.mxu2 %v10401_v20  ;;  %v10240_v20 = vld [vmem:[#allocation7 + $0x108] sm:$0xff] }
0x179a   : > { %v10207_v0 = vadd.f32 %v10206_v16, %v10203_v58  ;;  %10624 = vmatpush.msrb.mxu3 %v16274_v62  ;;  %10671 = vmatpush.msrb.mxu0 %v16538_v36  ;;  %v10745_v6 = vand.u32 4294901760, %v10744_v11  ;;  %v10756_v16 = vsub.f32 %v16541_v3, %v10755_v22  ;;  %v16567_v54 = vand.u32 4294901760, %v10246_v43 }
0x179b   : > { %10740 = vmatpush.msrb.mxu1 %v10739_v40  ;;  %v10751_v58 = vand.u32 4294901760, %v10750_v47  ;;  %v10761_v52 = vand.u32 4294901760, %v16557_v31  ;;  %v16579_v47 = vand.u32 4294901760, %v10244_v4  ;;  %10591 = vmatpush.msrb.mxu2 %v10407_v14 }
0x179c   : > { %v10208_v62 = vrot.slane %v10207_v0, 4  ;;  %10626 = vmatpush.msrb.mxu3 %v16292_v19  ;;  %10673 = vmatpush.msrb.mxu0 %v16554_v57  ;;  %v16573_v19 = vsub.f32 %v10248_v41, %v16554_v57  ;;  %v10757_v40 = vand.u32 4294901760, %v10756_v16  ;;  %v16582_v45 = vsub.f32 %v10246_v43, %v16567_v54 }
0x179d   : > { %10746 = vmatpush.msrb.mxu1 %v10745_v6  ;;  %v10762_v11 = vsub.f32 %v16557_v31, %v10761_v52  ;;  %v16593_v43 = vsub.f32 %v10244_v4, %v16579_v47  ;;  %v16606_v4 = vand.u32 4294901760, %v10240_v20 }
0x179e   : > { %v10209_v59 = vadd.f32 %v10208_v62, %v10207_v0  ;;  %10628 = vmatpush.msrb.mxu3 %v16306_v55  ;;  %10675 = vmatpush.msrb.mxu0 %v16567_v54  ;;  %v10767_v35 = vand.u32 4294901760, %v16573_v19  ;;  %v10242_v0 = vld [vmem:[#allocation7 + $0x118] sm:$0xff]  ;;  %v10773_v62 = vand.u32 4294901760, %v16582_v45 }
0x179f   : > { %10752 = vmatpush.msrb.mxu1 %v10751_v58  ;;  %v10763_v41 = vand.u32 4294901760, %v10762_v11  ;;  %v16590_v6 = vand.u32 4294901760, %v10242_v0  ;;  %v10779_v16 = vand.u32 4294901760, %v16593_v43 }
0x17a0   : > { %v10210_v55 = vrot.slane %v10209_v59, 2  ;;  %10630 = vmatpush.msrb.mxu3 %v16311_v2  ;;  %10677 = vmatpush.msrb.mxu0 %v16579_v47  ;;  %v10768_v2 = vsub.f32 %v16573_v19, %v10767_v35  ;;  %v10774_v58 = vsub.f32 %v16582_v45, %v10773_v62 }
0x17a1   : > { %10758 = vmatpush.msrb.mxu1 %v10757_v40  ;;  %v16609_v25 = vsub.f32 %v10242_v0, %v16590_v6  ;;  %v10780_v11 = vsub.f32 %v16593_v43, %v10779_v16  ;;  %v16620_v0 = vsub.f32 %v10240_v20, %v16606_v4 }
0x17a2   : > { %v10211_v34 = vadd.f32 %v10210_v55, %v10209_v59  ;;  %10632 = vmatpush.msrb.mxu3 %v16335_v30  ;;  %10679 = vmatpush.msrb.mxu0 %v16590_v6  ;;  %v17456_v30 = vand.u32 4294901760, %v16389_v10  ;;  %v10769_v59 = vand.u32 4294901760, %v10768_v2  ;;  %v10775_v40 = vand.u32 4294901760, %v10774_v58 }
0x17a3   : > { %10764 = vmatpush.msrb.mxu1 %v10763_v41  ;;  %v10785_v55 = vand.u32 4294901760, %v16609_v25  ;;  %v10791_v2 = vand.u32 4294901760, %v16620_v0 }
0x17a4   : > { %10595 = vmatpush.msrb.mxu2 %v17456_v30  ;;  %v10212_v14 = vrot.slane %v10211_v34, 1  ;;  %10634 = vmatpush.msrb.mxu3 %v16339_v17  ;;  %v10781_v17 = vand.u32 4294901760, %v10780_v11 }
0x17a5   : > { %10681 = vmatpush.msrb.mxu0 %v16606_v4  ;;  %10770 = vmatpush.msrb.mxu1 %v10769_v59  ;;  %v10786_v41 = vsub.f32 %v16609_v25, %v10785_v55  ;;  %v10792_v5 = vsub.f32 %v16620_v0, %v10791_v2 }
0x17a6   : > { %10599 = vmatpush.msrb.mxu2 %v10419_v50  ;;  %v10213_v10 = vadd.f32 %v10212_v14, %v10211_v34  ;;  %10636 = vmatpush.msrb.mxu3 %v16356_v15 }
0x17a7   : > { %10776 = vmatpush.msrb.mxu1 %v10775_v40  ;;  %v10787_v20 = vand.u32 4294901760, %v10786_v41  ;;  %v10793_v15 = vand.u32 4294901760, %v10792_v5  ;;  %v12112_v40 = vld [vmem:[%s17325_s5 + $0x1] ss:$0 sm:$0xff] }
0x17a8   : > { %v10214_v58 = vmul.f32 0.11111111, %v10213_v10  ;;  %10638 = vmatpush.msrb.mxu3 %v16372_v32  ;;  %v12113_v41 = vld [vmem:[%s17326_s6 + $0x1] ss:$0 sm:$0xff] }
0x17a9   : > { %10782 = vmatpush.msrb.mxu1 %v10781_v17 }
0x17aa   : > { %v10215_v50 = vadd.f32 1e-05, %v10214_v58  ;;  %10640 = vmatpush.msrb.mxu3 %v16381_v53 }
0x17ab   : > { %10788 = vmatpush.msrb.mxu1 %v10787_v20 }
0x17ac   : > { %12185 = vrsqrt.f32 %v10215_v50  ;;  %vm10222_vm3 = vweird.f32 %v10215_v50 }
0x17ad   : > { %10794 = vmatpush.msrb.mxu1 %v10793_v15 }
0x17b2   : > { %v12186_v34 = vpop.eup %12185 }
0x17b3   : > { %v10217_v30 = vmul.f32 %v12186_v34, %v10215_v50  ;;  %vm10223_vm1 = vweird.f32 %v12186_v34 }
0x17b4   : > { %vm10224_vm9 = vmor %vm10222_vm3, %vm10223_vm1 }
0x17b5   : > { %v10218_v14 = vmul.f32 %v12186_v34, %v10217_v30 }
0x17b7   : > { %v10219_v59 = vmul.f32 0.5, %v10218_v14 }
0x17b9   : > { %v10220_v11 = vsub.f32 1.5, %v10219_v59 }
0x17bb   : > { %v10221_v32 = vmul.f32 %v12186_v34, %v10220_v11 }
0x17bd   : > { %v10225_v10 = vsel %vm10224_vm9, %v12186_v34, %v10221_v32 }
0x17be   : > { %v10226_v53 = vmul.f32 %v10225_v10, %v16499_v18  ;;  %v10227_v17 = vmul.f32 %v10225_v10, %v16502_v13 }
0x17c0   : > { %v10231_v58 = vmul.f32 %v12112_v40, %v10226_v53  ;;  %v10232_v20 = vmul.f32 %v12112_v40, %v10227_v17  ;;  %v11033_v40 = vld [vmem:[#allocation8 + $0x130] sm:$0xff]  ;;  %v11032_v17 = vld [vmem:[#allocation8 + $0x128] sm:$0xff] }
0x17c2   : > { %v16642_v5 = vadd.f32 %v12113_v41, %v10231_v58  ;;  %v16644_v15 = vadd.f32 %v12113_v41, %v10232_v20  ;;  %v16819_v20 = vand.u32 4294901760, %v11033_v40 }
0x17c4   : > { %v16647_v50 = vand.u32 4294901760, %v16642_v5  ;;  %v16650_v30 = vand.u32 4294901760, %v16644_v15 }
0x17c6   : > { %10424 = vmatmul.f32.vlgmr.msra.gmra.mxu3 %v16647_v50  ;;  %v16655_v18 = vsub.f32 %v16642_v5, %v16647_v50  ;;  %v16670_v14 = vsub.f32 %v16644_v15, %v16650_v30 }
0x17c7   : > { %10864 = vmatpush.msra.mxu3 %v16412_v49 }
0x17c8   : > { %10482 = vmatmul.f32.vlgmr.msra.gmra.mxu0 %v16655_v18  ;;  %v16660_v13 = vand.u32 4294901760, %v16655_v18 }
0x17c9   : > { %10866 = vmatpush.msra.mxu3 %v16423_v29  ;;  %10911 = vmatpush.msra.mxu0 %v10701_v51  ;;  %v16681_v51 = vand.u32 4294901760, %v16670_v14 }
0x17ca   : > { %10526 = vmatmul.f32.vlgmr.msra.gmra.mxu1 %v16660_v13  ;;  %v10313_v34 = vsub.f32 %v16655_v18, %v16660_v13 }
0x17cb   : > { %10868 = vmatpush.msra.mxu3 %v16429_v23  ;;  %10915 = vmatpush.msra.mxu0 %v10707_v7  ;;  %v11041_v7 = vld [vmem:[#allocation8 + $0x170] sm:$0xff] }
0x17cc   : > { %10982 = vmatpush.msra.mxu1 %v16412_v49  ;;  %v10314_v59 = vand.u32 4294901760, %v10313_v34  ;;  %v10321_v49 = vsub.f32 %v16670_v14, %v16681_v51 }
0x17cd   : > { %10870 = vmatpush.msra.mxu3 %v16441_v24  ;;  %10919 = vmatpush.msra.mxu0 %v10713_v38  ;;  %v11040_v38 = vld [vmem:[#allocation8 + $0x168] sm:$0xff] }
0x17ce   : > { %10984 = vmatpush.msra.mxu1 %v16423_v29  ;;  %10315 = vmatmul.f32.vlgmr.msra.gmra.mxu2 %v10314_v59  ;;  %v10322_v29 = vand.u32 4294901760, %v10321_v49 }
0x17cf   : > { %10428 = vmatmul.f32.gmra.mxu3 %v16650_v30  ;;  %10806 = vmatpush.msra.mxu2 %v16421_v46  ;;  %v17457_v46 = vand.u32 4294901760, %v16480_v42 }
0x17d0   : > { %10872 = vmatpush.msra.mxu3 %v16454_v26  ;;  %10923 = vmatpush.msra.mxu0 %v10719_v28  ;;  %v11038_v28 = vld [vmem:[#allocation8 + $0x158] sm:$0xff] }
0x17d1   : > { %10986 = vmatpush.msra.mxu1 %v16429_v23  ;;  %10487 = vmatmul.f32.gmra.mxu0 %v16670_v14  ;;  %v17458_v23 = vand.u32 4294901760, %v16496_v33 }
0x17d2   : > { %10809 = vmatpush.msra.mxu2 %v16432_v63  ;;  %10874 = vmatpush.msra.mxu3 %v16466_v44  ;;  %v11042_v63 = vld [vmem:[#allocation8 + $0x178] sm:$0xff] }
0x17d3   : > { %10927 = vmatpush.msra.mxu0 %v10725_v8  ;;  %10988 = vmatpush.msra.mxu1 %v16441_v24  ;;  %v17459_v24 = vand.u32 4294901760, %v16527_v12 }
0x17d4   : > { %10532 = vmatmul.f32.gmra.mxu1 %v16681_v51  ;;  %10812 = vmatpush.msra.mxu2 %v16444_v21  ;;  %v16719_v21 = vand.u32 4294901760, %v11042_v63 }
0x17d5   : > { %10876 = vmatpush.msra.mxu3 %v16477_v60  ;;  %10931 = vmatpush.msra.mxu0 %v17457_v46  ;;  %v16841_v46 = vsub.f32 %v11033_v40, %v16819_v20  ;;  %v11030_v40 = vld [vmem:[#allocation8 + $0x118] sm:$0xff] }
0x17d6   : > { %10990 = vmatpush.msra.mxu1 %v16454_v26  ;;  %10815 = vmatpush.msra.mxu2 %v16458_v27  ;;  %v16723_v26 = vand.u32 4294901760, %v11041_v7  ;;  %v11039_v27 = vld [vmem:[#allocation8 + $0x160] sm:$0xff] }
0x17d7   : > { %10878 = vmatpush.msra.mxu3 %v16493_v39  ;;  %10935 = vmatpush.msra.mxu0 %v17458_v23 }
0x17d8   : > { %10992 = vmatpush.msra.mxu1 %v16466_v44  ;;  %10323 = vmatmul.f32.gmra.mxu2 %v10322_v29  ;;  %v16731_v44 = vsub.f32 %v11042_v63, %v16719_v21  ;;  %v16741_v8 = vsub.f32 %v11041_v7, %v16723_v26  ;;  %v11169_v7 = vand.u32 4294901760, %v16841_v46 }
0x17d9   : > { %10642 = vmatmul.f32.vlgmr.msrb.gmra.mxu3 %v16647_v50  ;;  %10818 = vmatpush.msra.mxu2 %v16469_v48  ;;  %v16733_v48 = vand.u32 4294901760, %v11040_v38 }
0x17da   : > { %10880 = vmatpush.msra.mxu3 %v16512_v37  ;;  %10939 = vmatpush.msra.mxu0 %v10743_v56 }
0x17db   : > { %10994 = vmatpush.msra.mxu1 %v16477_v60  ;;  %10687 = vmatmul.f32.vlgmr.msrb.gmra.mxu0 %v10314_v59  ;;  %v16743_v60 = vand.u32 4294901760, %v11039_v27  ;;  %v16831_v59 = vand.u32 4294901760, %v11032_v17 }
0x17dc   : > { %10821 = vmatpush.msra.mxu2 %v16480_v42  ;;  %10882 = vmatpush.msra.mxu3 %v16524_v9  ;;  %v11037_v42 = vld [vmem:[#allocation8 + $0x150] sm:$0xff] }
0x17dd   : > { %10943 = vmatpush.msra.mxu0 %v17459_v24  ;;  %10996 = vmatpush.msra.mxu1 %v16493_v39  ;;  %v11115_v39 = vand.u32 4294901760, %v16731_v44  ;;  %v16763_v56 = vsub.f32 %v11039_v27, %v16743_v60  ;;  %v16853_v63 = vsub.f32 %v11032_v17, %v16831_v59 }
0x17de   : > { %10796 = vmatmul.f32.vlgmr.msrb.gmra.mxu1 %v16647_v50  ;;  %10824 = vmatpush.msra.mxu2 %v16496_v33  ;;  %v16752_v33 = vsub.f32 %v11040_v38, %v16733_v48 }
0x17df   : > { %10884 = vmatpush.msra.mxu3 %v16538_v36  ;;  %10947 = vmatpush.msra.mxu0 %v10755_v22  ;;  %v11133_v11 = vand.u32 4294901760, %v16763_v56  ;;  %v11175_v27 = vand.u32 4294901760, %v16853_v63 }
0x17e0   : > { %10998 = vmatpush.msra.mxu1 %v16512_v37  ;;  %10827 = vmatpush.msra.mxu2 %v16518_v1  ;;  %v16754_v37 = vand.u32 4294901760, %v11038_v28  ;;  %v11036_v1 = vld [vmem:[#allocation8 + $0x148] sm:$0xff]  ;;  %v11127_v22 = vand.u32 4294901760, %v16752_v33 }
0x17e1   : > { %10886 = vmatpush.msra.mxu3 %v16554_v57  ;;  %10951 = vmatpush.msra.mxu0 %v10761_v52  ;;  %v16768_v52 = vand.u32 4294901760, %v11036_v1  ;;  %v11134_v41 = vsub.f32 %v16763_v56, %v11133_v11 }
0x17e2   : > { %11000 = vmatpush.msra.mxu1 %v16524_v9  ;;  %10601 = vmatmul.f32.vlgmr.msrb.gmra.mxu2 %v16647_v50  ;;  %v16757_v9 = vand.u32 4294901760, %v11037_v42 }
0x17e3   : > { %10646 = vmatmul.f32.gmra.mxu3 %v16650_v30  ;;  %10830 = vmatpush.msra.mxu2 %v16527_v12  ;;  %v11121_v12 = vand.u32 4294901760, %v16741_v8 }
0x17e4   : > { %10888 = vmatpush.msra.mxu3 %v16567_v54  ;;  %10955 = vmatpush.msra.mxu0 %v10767_v35  ;;  %v16777_v35 = vsub.f32 %v11038_v28, %v16754_v37 }
0x17e5   : > { %11002 = vmatpush.msra.mxu1 %v16538_v36  ;;  %10695 = vmatmul.f32.gmra.mxu0 %v10322_v29  ;;  %v11035_v36 = vld [vmem:[#allocation8 + $0x140] sm:$0xff] }
0x17e6   : > { %10833 = vmatpush.msra.mxu2 %v16541_v3  ;;  %10890 = vmatpush.msra.mxu3 %v16579_v47  ;;  %v11116_v3 = vsub.f32 %v16731_v44, %v11115_v39  ;;  %v16791_v32 = vand.u32 4294901760, %v11035_v36  ;;  %v11139_v10 = vand.u32 4294901760, %v16777_v35 }
0x17e7   : > { %10959 = vmatpush.msra.mxu0 %v10773_v62  ;;  %11004 = vmatpush.msra.mxu1 %v16554_v57  ;;  %v16783_v57 = vsub.f32 %v11037_v42, %v16757_v9  ;;  %v11034_v62 = vld [vmem:[#allocation8 + $0x138] sm:$0xff]  ;;  %v11170_v42 = vsub.f32 %v16841_v46, %v11169_v7 }
0x17e8   : > { %10800 = vmatmul.f32.gmra.mxu1 %v16650_v30  ;;  %10836 = vmatpush.msra.mxu2 %v16557_v31  ;;  %v11122_v31 = vsub.f32 %v16741_v8, %v11121_v12  ;;  %v16805_v53 = vand.u32 4294901760, %v11034_v62  ;;  %v16817_v58 = vsub.f32 %v11035_v36, %v16791_v32  ;;  %v11176_v36 = vsub.f32 %v16853_v63, %v11175_v27 }
0x17e9   : > { %10892 = vmatpush.msra.mxu3 %v16590_v6  ;;  %10963 = vmatpush.msra.mxu0 %v10779_v16  ;;  %v16797_v16 = vsub.f32 %v11036_v1, %v16768_v52 }
0x17ea   : > { %11006 = vmatpush.msra.mxu1 %v16567_v54  ;;  %10839 = vmatpush.msra.mxu2 %v16573_v19  ;;  %v11117_v54 = vand.u32 4294901760, %v11116_v3  ;;  %v11128_v19 = vsub.f32 %v16752_v33, %v11127_v22  ;;  %v16829_v34 = vsub.f32 %v11034_v62, %v16805_v53  ;;  %v11157_v49 = vand.u32 4294901760, %v16817_v58 }
0x17eb   : > { %10894 = vmatpush.msra.mxu3 %v16606_v4  ;;  %10967 = vmatpush.msra.mxu0 %v10785_v55  ;;  %v11145_v55 = vand.u32 4294901760, %v16783_v57  ;;  %v11171_v3 = vand.u32 4294901760, %v11170_v42 }
0x17ec   : > { %11008 = vmatpush.msra.mxu1 %v16579_v47  ;;  %10605 = vmatmul.f32.gmra.mxu2 %v16650_v30  ;;  %v11123_v47 = vand.u32 4294901760, %v11122_v31  ;;  %v11163_v23 = vand.u32 4294901760, %v16829_v34 }
0x17ed   : > { %10898 = vmatmul.f32.vlgmr.msra.gmra.mxu3 %v16660_v13  ;;  %10842 = vmatpush.msra.mxu2 %v16582_v45  ;;  %v11151_v45 = vand.u32 4294901760, %v16797_v16  ;;  %v11031_v13 = vld [vmem:[#allocation8 + $0x120] sm:$0xff] }
0x17ee   : > { %10971 = vmatpush.msra.mxu0 %v10791_v2  ;;  %11010 = vmatpush.msra.mxu1 %v16590_v6  ;;  %v11129_v6 = vand.u32 4294901760, %v11128_v19  ;;  %v11140_v2 = vsub.f32 %v16777_v35, %v11139_v10  ;;  %v16843_v29 = vand.u32 4294901760, %v11031_v13  ;;  %v11164_v38 = vsub.f32 %v16829_v34, %v11163_v23  ;;  %v11029_v19 = vld [vmem:[#allocation8 + $0x110] sm:$0xff] }
0x17ef   : > { %10973 = vmatmul.f32.vlgmr.msra.gmra.mxu0 %v16647_v50  ;;  %10845 = vmatpush.msra.mxu2 %v16593_v43  ;;  %v11146_v43 = vsub.f32 %v16783_v57, %v11145_v55 }
0x17f0   : > { %11012 = vmatpush.msra.mxu1 %v16606_v4  ;;  %11118 = vmatpush.msrb.mxu3 %v11117_v54  ;;  %v11135_v4 = vand.u32 4294901760, %v11134_v41  ;;  %v16863_v24 = vsub.f32 %v11031_v13, %v16843_v29  ;;  %v16914_v54 = vand.u32 4294901760, %v11030_v40  ;;  %v11028_v41 = vld [vmem:[#allocation8 + $0x108] sm:$0xff] }
0x17f1   : > { %11014 = vmatmul.f32.vlgmr.msra.gmra.mxu1 %v16647_v50  ;;  %10848 = vmatpush.msra.mxu2 %v16609_v25  ;;  %v11141_v25 = vand.u32 4294901760, %v11140_v2  ;;  %v11152_v50 = vsub.f32 %v16797_v16, %v11151_v45  ;;  %v16927_v2 = vand.u32 4294901760, %v11028_v41 }
0x17f2   : > { %11124 = vmatpush.msrb.mxu3 %v11123_v47  ;;  %11278 = vmatpush.msrb.mxu1 %v16719_v21  ;;  %v11181_v1 = vand.u32 4294901760, %v16863_v24  ;;  %v16917_v17 = vsub.f32 %v11030_v40, %v16914_v54  ;;  %v16919_v47 = vand.u32 4294901760, %v11029_v19 }
0x17f3   : > { %10851 = vmatpush.msra.mxu2 %v16620_v0  ;;  %11220 = vmatpush.msrb.mxu0 %v16731_v44  ;;  %v11147_v0 = vand.u32 4294901760, %v11146_v43  ;;  %v11027_v43 = vld [vmem:[#allocation8 + $0x100] sm:$0xff] }
0x17f4   : > { %10854 = vmatmul.f32.vlgmr.msra.gmra.mxu2 %v16655_v18  ;;  %11130 = vmatpush.msrb.mxu3 %v11129_v6  ;;  %v11158_v18 = vsub.f32 %v16817_v58, %v11157_v49  ;;  %v11182_v62 = vsub.f32 %v16863_v24, %v11181_v1  ;;  %v11187_v13 = vand.u32 4294901760, %v16917_v17  ;;  %v16925_v6 = vsub.f32 %v11029_v19, %v16919_v47 }
0x17f5   : > { %10904 = vmatmul.f32.gmra.mxu3 %v16681_v51  ;;  %11280 = vmatpush.msrb.mxu1 %v16723_v26  ;;  %v11153_v51 = vand.u32 4294901760, %v11152_v50  ;;  %v16937_v50 = vsub.f32 %v11028_v41, %v16927_v2 }
0x17f6   : > { %11136 = vmatpush.msrb.mxu3 %v11135_v4  ;;  %11065 = vmatpush.msrb.mxu2 %v16719_v21  ;;  %v11159_v28 = vand.u32 4294901760, %v11158_v18  ;;  %v11183_v31 = vand.u32 4294901760, %v11182_v62  ;;  %v11188_v4 = vsub.f32 %v16917_v17, %v11187_v13 }
0x17f7   : > { %10977 = vmatmul.f32.gmra.mxu0 %v16650_v30  ;;  %11282 = vmatpush.msrb.mxu1 %v16733_v48 }
0x17f8   : > { %11142 = vmatpush.msrb.mxu3 %v11141_v25  ;;  %11067 = vmatpush.msrb.mxu2 %v16723_v26  ;;  %v11193_v25 = vand.u32 4294901760, %v16925_v6  ;;  %v11189_v18 = vand.u32 4294901760, %v11188_v4 }
0x17f9   : > { %11018 = vmatmul.f32.gmra.mxu1 %v16650_v30  ;;  %11223 = vmatpush.msrb.mxu0 %v16741_v8  ;;  %v11165_v30 = vand.u32 4294901760, %v11164_v38  ;;  %v11199_v38 = vand.u32 4294901760, %v16937_v50 }
0x17fa   : > { %11148 = vmatpush.msrb.mxu3 %v11147_v0  ;;  %11284 = vmatpush.msrb.mxu1 %v16743_v60  ;;  %v16939_v0 = vand.u32 4294901760, %v11027_v43 }
0x17fb   : > { %11069 = vmatpush.msrb.mxu2 %v16733_v48  ;;  %11226 = vmatpush.msrb.mxu0 %v16752_v33  ;;  %v11055_v33 = vld [vmem:[#allocation8 + $0x1e0] sm:$0xff] }
0x17fc   : > { %10859 = vmatmul.f32.gmra.mxu2 %v16670_v14  ;;  %11154 = vmatpush.msrb.mxu3 %v11153_v51  ;;  %v11177_v14 = vand.u32 4294901760, %v11176_v36  ;;  %v11194_v51 = vsub.f32 %v16925_v6, %v11193_v25 }
0x17fd   : > { %11286 = vmatpush.msrb.mxu1 %v16754_v37  ;;  %11071 = vmatpush.msrb.mxu2 %v16743_v60 }
0x17fe   : > { %11160 = vmatpush.msrb.mxu3 %v11159_v28  ;;  %11229 = vmatpush.msrb.mxu0 %v16763_v56  ;;  %v16949_v28 = vsub.f32 %v11027_v43, %v16939_v0  ;;  %v11195_v42 = vand.u32 4294901760, %v11194_v51  ;;  %v16993_v51 = vand.u32 4294901760, %v11055_v33  ;;  %v11054_v56 = vld [vmem:[#allocation8 + $0x1d8] sm:$0xff] }
0x17ff   : > { %11288 = vmatpush.msrb.mxu1 %v16757_v9  ;;  %11073 = vmatpush.msrb.mxu2 %v16754_v37 }
0x1800   : > { %11166 = vmatpush.msrb.mxu3 %v11165_v30  ;;  %11232 = vmatpush.msrb.mxu0 %v16777_v35  ;;  %v11200_v30 = vsub.f32 %v16937_v50, %v11199_v38  ;;  %v11205_v36 = vand.u32 4294901760, %v16949_v28  ;;  %v17008_v35 = vand.u32 4294901760, %v11054_v56 }
0x1801   : > { %11290 = vmatpush.msrb.mxu1 %v16768_v52  ;;  %11075 = vmatpush.msrb.mxu2 %v16757_v9 }
0x1802   : > { %11172 = vmatpush.msrb.mxu3 %v11171_v3  ;;  %11235 = vmatpush.msrb.mxu0 %v16783_v57  ;;  %v11058_v3 = vld [vmem:[#allocation8 + $0x1f8] sm:$0xff]  ;;  %v11201_v44 = vand.u32 4294901760, %v11200_v30  ;;  %v17004_v30 = vsub.f32 %v11055_v33, %v16993_v51  ;;  %v17019_v57 = vsub.f32 %v11054_v56, %v17008_v35 }
0x1803   : > { %11292 = vmatpush.msrb.mxu1 %v16791_v32  ;;  %11077 = vmatpush.msrb.mxu2 %v16768_v52  ;;  %v16960_v62 = vand.u32 4294901760, %v11058_v3 }
0x1804   : > { %11178 = vmatpush.msrb.mxu3 %v11177_v14  ;;  %11238 = vmatpush.msrb.mxu0 %v16797_v16  ;;  %v11057_v14 = vld [vmem:[#allocation8 + $0x1f0] sm:$0xff]  ;;  %v17396_v33 = vand.u32 4294901760, %v17019_v57 }
0x1805   : > { %11294 = vmatpush.msrb.mxu1 %v16805_v53  ;;  %11079 = vmatpush.msrb.mxu2 %v16791_v32  ;;  %v16971_v40 = vand.u32 4294901760, %v11057_v14 }
0x1806   : > { %11184 = vmatpush.msrb.mxu3 %v11183_v31  ;;  %11241 = vmatpush.msrb.mxu0 %v16817_v58  ;;  %v16969_v31 = vsub.f32 %v11058_v3, %v16960_v62 }
0x1807   : > { %11296 = vmatpush.msrb.mxu1 %v16819_v20  ;;  %11081 = vmatpush.msrb.mxu2 %v16805_v53  ;;  %v16978_v41 = vsub.f32 %v11057_v14, %v16971_v40 }
0x1808   : > { %11244 = vmatpush.msrb.mxu0 %v16829_v34  ;;  %11190 = vmatpush.msrb.mxu3 %v11189_v18  ;;  %v11487_v19 = vand.u32 4294901760, %v16969_v31 }
0x1809   : > { %11298 = vmatpush.msrb.mxu1 %v16831_v59  ;;  %11083 = vmatpush.msrb.mxu2 %v16819_v20  ;;  %v11493_v4 = vand.u32 4294901760, %v16978_v41 }
0x180a   : > { %11247 = vmatpush.msrb.mxu0 %v16841_v46  ;;  %11196 = vmatpush.msrb.mxu3 %v11195_v42 }
0x180b   : > { %11300 = vmatpush.msrb.mxu1 %v16843_v29  ;;  %11085 = vmatpush.msrb.mxu2 %v16831_v59 }
0x180c   : > { %11250 = vmatpush.msrb.mxu0 %v16853_v63  ;;  %11202 = vmatpush.msrb.mxu3 %v11201_v44  ;;  %v17397_v44 = vand.u32 4294901760, %v17004_v30 }
0x180d   : > { %11087 = vmatpush.msrb.mxu2 %v16843_v29  ;;  %11302 = vmatpush.msrb.mxu1 %v16914_v54 }
0x180e   : > { %11253 = vmatpush.msrb.mxu0 %v16863_v24  ;;  %v11506_v14 = vsub.f32 %v17004_v30, %v17397_v44 }
0x180f   : > { %11089 = vmatpush.msrb.mxu2 %v16914_v54  ;;  %11304 = vmatpush.msrb.mxu1 %v16919_v47 }
0x1810   : > { %11256 = vmatpush.msrb.mxu0 %v16917_v17 }
0x1811   : > { %11091 = vmatpush.msrb.mxu2 %v16919_v47  ;;  %11306 = vmatpush.msrb.mxu1 %v16927_v2 }
0x1812   : > { %11259 = vmatpush.msrb.mxu0 %v16925_v6 }
0x1813   : > { %11093 = vmatpush.msrb.mxu2 %v16927_v2  ;;  %11308 = vmatpush.msrb.mxu1 %v16939_v0 }
0x1814   : > { %11262 = vmatpush.msrb.mxu0 %v16937_v50 }
0x1815   : > { %11095 = vmatpush.msrb.mxu2 %v16939_v0 }
0x1816   : > { %11265 = vmatpush.msrb.mxu0 %v16949_v28 }
0x1817   : > { %11325 = vmatpush.msra.mxu2 %v11115_v39  ;;  %v11206_v39 = vsub.f32 %v16949_v28, %v11205_v36 }
0x1818   : > { %11437 = vmatpush.msra.mxu0 %v16960_v62 }
0x1819   : > { %11329 = vmatpush.msra.mxu2 %v11121_v12  ;;  %v11207_v8 = vand.u32 4294901760, %v11206_v39  ;;  %v11056_v12 = vld [vmem:[#allocation8 + $0x1e8] sm:$0xff] }
0x181a   : > { %v16980_v43 = vand.u32 4294901760, %v11056_v12  ;;  %11439 = vmatpush.msra.mxu0 %v16971_v40 }
0x181b   : > { %11333 = vmatpush.msra.mxu2 %v11127_v22  ;;  %11208 = vmatpush.msrb.mxu3 %v11207_v8  ;;  %v11488_v22 = vsub.f32 %v16969_v31, %v11487_v19 }
0x181c   : > { %v16991_v18 = vsub.f32 %v11056_v12, %v16980_v43  ;;  %11441 = vmatpush.msra.mxu0 %v16980_v43 }
0x181d   : > { %11337 = vmatpush.msra.mxu2 %v11133_v11  ;;  %11396 = vmatpush.msra.mxu3 %v16719_v21  ;;  %v11489_v21 = vand.u32 4294901760, %v11488_v22  ;;  %v11494_v11 = vsub.f32 %v16978_v41, %v11493_v4  ;;  %v11051_v22 = vld [vmem:[#allocation8 + $0x1c0] sm:$0xff] }
0x181e   : > { %v11499_v42 = vand.u32 4294901760, %v16991_v18  ;;  %11443 = vmatpush.msra.mxu0 %v16993_v51  ;;  %v17042_v56 = vand.u32 4294901760, %v11051_v22 }
0x181f   : > { %11341 = vmatpush.msra.mxu2 %v11139_v10  ;;  %11398 = vmatpush.msra.mxu3 %v16723_v26  ;;  %v11053_v10 = vld [vmem:[#allocation8 + $0x1d0] sm:$0xff]  ;;  %v11495_v26 = vand.u32 4294901760, %v11494_v11  ;;  %v11050_v11 = vld [vmem:[#allocation8 + $0x1b8] sm:$0xff] }
0x1820   : > { %11490 = vmatpush.msra.mxu1 %v11489_v21  ;;  %v11500_v3 = vsub.f32 %v16991_v18, %v11499_v42  ;;  %v17016_v39 = vand.u32 4294901760, %v11053_v10  ;;  %11445 = vmatpush.msra.mxu0 %v17008_v35  ;;  %v11512_v21 = vsub.f32 %v17019_v57, %v17396_v33 }
0x1821   : > { %11345 = vmatpush.msra.mxu2 %v11145_v55  ;;  %11400 = vmatpush.msra.mxu3 %v16733_v48  ;;  %v11052_v55 = vld [vmem:[#allocation8 + $0x1c8] sm:$0xff] }
0x1822   : > { %11496 = vmatpush.msra.mxu1 %v11495_v26  ;;  %v11501_v48 = vand.u32 4294901760, %v11500_v3  ;;  %v17029_v8 = vsub.f32 %v11053_v10, %v17016_v39  ;;  %v17031_v12 = vand.u32 4294901760, %v11052_v55  ;;  %11447 = vmatpush.msra.mxu0 %v17016_v39  ;;  %v17058_v10 = vand.u32 4294901760, %v11050_v11  ;;  %v11049_v3 = vld [vmem:[#allocation8 + $0x1b0] sm:$0xff] }
0x1823   : > { %11349 = vmatpush.msra.mxu2 %v11151_v45  ;;  %11402 = vmatpush.msra.mxu3 %v16743_v60  ;;  %v11507_v60 = vand.u32 4294901760, %v11506_v14  ;;  %v11513_v26 = vand.u32 4294901760, %v11512_v21  ;;  %v11048_v14 = vld [vmem:[#allocation8 + $0x1a8] sm:$0xff]  ;;  %v11047_v21 = vld [vmem:[#allocation8 + $0x1a0] sm:$0xff] }
0x1824   : > { %11502 = vmatpush.msra.mxu1 %v11501_v48  ;;  %v17395_v16 = vand.u32 4294901760, %v17029_v8  ;;  %v17040_v45 = vsub.f32 %v11052_v55, %v17031_v12  ;;  %11449 = vmatpush.msra.mxu0 %v17031_v12  ;;  %v17069_v55 = vsub.f32 %v11050_v11, %v17058_v10  ;;  %v17071_v48 = vand.u32 4294901760, %v11049_v3 }
0x1825   : > { %11353 = vmatpush.msra.mxu2 %v11157_v49  ;;  %11404 = vmatpush.msra.mxu3 %v16754_v37  ;;  %v17056_v49 = vsub.f32 %v11051_v22, %v17042_v56  ;;  %v17080_v22 = vand.u32 4294901760, %v11048_v14  ;;  %v17095_v11 = vand.u32 4294901760, %v11047_v21 }
0x1826   : > { %11508 = vmatpush.msra.mxu1 %v11507_v60  ;;  %v11518_v37 = vsub.f32 %v17029_v8, %v17395_v16  ;;  %v17393_v58 = vand.u32 4294901760, %v17040_v45  ;;  %11451 = vmatpush.msra.mxu0 %v17042_v56  ;;  %v17084_v60 = vsub.f32 %v11049_v3, %v17071_v48 }
0x1827   : > { %11357 = vmatpush.msra.mxu2 %v11163_v23  ;;  %11406 = vmatpush.msra.mxu3 %v16757_v9  ;;  %v17392_v23 = vand.u32 4294901760, %v17056_v49 }
0x1828   : > { %v11519_v9 = vand.u32 4294901760, %v11518_v37  ;;  %v11524_v34 = vsub.f32 %v17040_v45, %v17393_v58  ;;  %11514 = vmatpush.msra.mxu1 %v11513_v26  ;;  %11453 = vmatpush.msra.mxu0 %v17058_v10  ;;  %v17390_v37 = vand.u32 4294901760, %v17084_v60  ;;  %v11046_v26 = vld [vmem:[#allocation8 + $0x198] sm:$0xff] }
0x1829   : > { %11361 = vmatpush.msra.mxu2 %v11169_v7  ;;  %11408 = vmatpush.msra.mxu3 %v16768_v52  ;;  %v11530_v46 = vsub.f32 %v17056_v49, %v17392_v23  ;;  %v17391_v7 = vand.u32 4294901760, %v17069_v55  ;;  %v17106_v3 = vand.u32 4294901760, %v11046_v26 }
0x182a   : > { %v11525_v52 = vand.u32 4294901760, %v11524_v34  ;;  %11520 = vmatpush.msra.mxu1 %v11519_v9  ;;  %11455 = vmatpush.msra.mxu0 %v17071_v48  ;;  %v11542_v9 = vsub.f32 %v17084_v60, %v17390_v37  ;;  %v11045_v34 = vld [vmem:[#allocation8 + $0x190] sm:$0xff] }
0x182b   : > { %11365 = vmatpush.msra.mxu2 %v11175_v27  ;;  %11410 = vmatpush.msra.mxu3 %v16791_v32  ;;  %v11531_v32 = vand.u32 4294901760, %v11530_v46  ;;  %v11536_v63 = vsub.f32 %v17069_v55, %v17391_v7  ;;  %v17093_v27 = vsub.f32 %v11048_v14, %v17080_v22  ;;  %v17122_v14 = vand.u32 4294901760, %v11045_v34  ;;  %v11044_v46 = vld [vmem:[#allocation8 + $0x188] sm:$0xff] }
0x182c   : > { %11526 = vmatpush.msra.mxu1 %v11525_v52  ;;  %11457 = vmatpush.msra.mxu0 %v17080_v22  ;;  %v11543_v52 = vand.u32 4294901760, %v11542_v9 }
0x182d   : > { %11369 = vmatpush.msra.mxu2 %v11181_v1  ;;  %11412 = vmatpush.msra.mxu3 %v16805_v53  ;;  %v11537_v53 = vand.u32 4294901760, %v11536_v63  ;;  %v17389_v24 = vand.u32 4294901760, %v17093_v27  ;;  %v17104_v1 = vsub.f32 %v11047_v21, %v17095_v11  ;;  %v17133_v21 = vsub.f32 %v11045_v34, %v17122_v14  ;;  %v11043_v63 = vld [vmem:[#allocation8 + $0x180] sm:$0xff] }
0x182e   : > { %11532 = vmatpush.msra.mxu1 %v11531_v32  ;;  %11459 = vmatpush.msra.mxu0 %v17095_v11  ;;  %v17136_v32 = vand.u32 4294901760, %v11044_v46 }
0x182f   : > { %11373 = vmatpush.msra.mxu2 %v11187_v13  ;;  %11414 = vmatpush.msra.mxu3 %v16819_v20  ;;  %v11548_v20 = vsub.f32 %v17093_v27, %v17389_v24  ;;  %v17388_v17 = vand.u32 4294901760, %v17104_v1  ;;  %v17120_v13 = vsub.f32 %v11046_v26, %v17106_v3  ;;  %v17145_v26 = vand.u32 4294901760, %v11043_v63 }
0x1830   : > { %11538 = vmatpush.msra.mxu1 %v11537_v53  ;;  %11461 = vmatpush.msra.mxu0 %v17106_v3  ;;  %v17149_v53 = vsub.f32 %v11044_v46, %v17136_v32 }
0x1831   : > { %11377 = vmatpush.msra.mxu2 %v11193_v25  ;;  %11416 = vmatpush.msra.mxu3 %v16831_v59  ;;  %v11549_v59 = vand.u32 4294901760, %v11548_v20  ;;  %v11554_v6 = vsub.f32 %v17104_v1, %v17388_v17  ;;  %v17387_v25 = vand.u32 4294901760, %v17120_v13 }
0x1832   : > { %11544 = vmatpush.msra.mxu1 %v11543_v52  ;;  %11463 = vmatpush.msra.mxu0 %v17122_v14  ;;  %v17385_v9 = vand.u32 4294901760, %v17149_v53 }
0x1833   : > { %11381 = vmatpush.msra.mxu2 %v11199_v38  ;;  %11418 = vmatpush.msra.mxu3 %v16843_v29  ;;  %v11555_v29 = vand.u32 4294901760, %v11554_v6  ;;  %v11560_v50 = vsub.f32 %v17120_v13, %v17387_v25  ;;  %v17386_v38 = vand.u32 4294901760, %v17133_v21 }
0x1834   : > { %11550 = vmatpush.msra.mxu1 %v11549_v59  ;;  %11465 = vmatpush.msra.mxu0 %v17136_v32  ;;  %v17169_v59 = vld [vmem:[%s17328_s8 + $0x2] sm:$0x3] }
0x1835   : > { %11385 = vmatpush.msra.mxu2 %v11205_v36  ;;  %11420 = vmatpush.msra.mxu3 %v16914_v54  ;;  %v11561_v28 = vand.u32 4294901760, %v11560_v50  ;;  %v11566_v54 = vsub.f32 %v17133_v21, %v17386_v38  ;;  %v17156_v36 = vsub.f32 %v11043_v63, %v17145_v26 }
0x1836   : > { %11556 = vmatpush.msra.mxu1 %v11555_v29  ;;  %11467 = vmatpush.msra.mxu0 %v17145_v26 }
0x1837   : > { %11422 = vmatpush.msra.mxu3 %v16919_v47  ;;  %v11567_v20 = vand.u32 4294901760, %v11566_v54  ;;  %v17394_v52 = vand.u32 4294901760, %v17156_v36  ;;  %v11572_v47 = vsub.f32 %v17149_v53, %v17385_v9 }
0x1838   : > { %11562 = vmatpush.msra.mxu1 %v11561_v28  ;;  %v10274_v28 = vperm.slane %v17169_v59, 0 }
0x1839   : > { %11424 = vmatpush.msra.mxu3 %v16927_v2  ;;  %v11578_v2 = vsub.f32 %v17156_v36, %v17394_v52  ;;  %v11573_v63 = vand.u32 4294901760, %v11572_v47 }
0x183a   : > { %11568 = vmatpush.msra.mxu1 %v11567_v20 }
0x183b   : > { %11426 = vmatpush.msra.mxu3 %v16939_v0  ;;  %v11579_v50 = vand.u32 4294901760, %v11578_v2 }
0x183c   : > { %11574 = vmatpush.msra.mxu1 %v11573_v63 }
0x183e   : > { %11580 = vmatpush.msra.mxu1 %v11579_v50  ;;  %v10275_v50 = vperm.slane %v17169_v59, 1 }
0x1845   : > { %v10483_v46 = vpop.f32.mrf.mxu0 }
0x1847   : > { %v10527_v29 = vpop.f32.mrf.mxu1 }
0x1849   : > { %v10425_v34 = vpop.f32.mrf.mxu3 }
0x184e   : > { %v10488_v38 = vpop.f32.mrf.mxu0 }
0x1851   : > { %v10316_v6 = vpop.f32.mrf.mxu2  ;;  %v10533_v24 = vpop.f32.mrf.mxu1 }
0x1852   : > { %v10317_v54 = vadd.f32 %v10316_v6, %v10274_v28  ;;  %v10429_v9 = vpop.f32.mrf.mxu3 }
0x1854   : > { %v10426_v17 = vadd.f32 %v10425_v34, %v10317_v54 }
0x1856   : > { %v10484_v37 = vadd.f32 %v10483_v46, %v10426_v17 }
0x1858   : > { %v10528_v23 = vadd.f32 %v10527_v29, %v10484_v37  ;;  %v10688_v58 = vpop.f32.mrf.mxu0 }
0x185b   : > { %v10324_v25 = vpop.f32.mrf.mxu2  ;;  %v10797_v16 = vpop.f32.mrf.mxu1 }
0x185c   : > { %v10325_v0 = vadd.f32 %v10324_v25, %v10274_v28  ;;  %v10643_v7 = vpop.f32.mrf.mxu3  ;;  %v17460_v28 = vand.u32 4294901760, %v17004_v30 }
0x185e   : > { %v10430_v20 = vadd.f32 %v10429_v9, %v10325_v0 }
0x1860   : > { %v10489_v44 = vadd.f32 %v10488_v38, %v10430_v20  ;;  %v10689_v38 = vadd.f32 %v10688_v58, %v10275_v50  ;;  %v17461_v20 = vand.u32 4294901760, %v17019_v57 }
0x1862   : > { %v10534_v54 = vadd.f32 %v10533_v24, %v10489_v44  ;;  %v10696_v17 = vpop.f32.mrf.mxu0  ;;  %v10798_v24 = vadd.f32 %v10797_v16, %v10689_v38 }
0x1863   : > { %v10697_v16 = vadd.f32 %v10696_v17, %v10275_v50  ;;  %v17462_v50 = vand.u32 4294901760, %v17029_v8  ;;  %v17463_v17 = vand.u32 4294901760, %v17040_v45 }
0x1865   : > { %v10602_v52 = vpop.f32.mrf.mxu2 }
0x1866   : > { %v10603_v47 = vadd.f32 %v10602_v52, %v10528_v23  ;;  %v10647_v6 = vpop.f32.mrf.mxu3 }
0x1868   : > { %v10644_v2 = vadd.f32 %v10643_v7, %v10603_v47  ;;  %v10801_v7 = vpop.f32.mrf.mxu1 }
0x186a   : > { %v11022_v33 = vmax.f32 %v10644_v2, 0.0 }
0x186c   : > { %v17176_v63 = vand.u32 4294901760, %v11022_v33 }
0x186e   : > { %v11097_v34 = vsub.f32 %v11022_v33, %v17176_v63  ;;  %11210 = vmatmul.f32.vlgmr.msrb.gmra.mxu3 %v17176_v63 }
0x186f   : > { %v10606_v37 = vpop.f32.mrf.mxu2  ;;  %11650 = vmatpush.msrb.mxu3 %v16960_v62 }
0x1870   : > { %v11098_v25 = vand.u32 4294901760, %v11097_v34  ;;  %v10607_v23 = vadd.f32 %v10606_v37, %v10534_v54  ;;  %11268 = vmatmul.f32.vlgmr.msrb.gmra.mxu0 %v11097_v34  ;;  %v11015_v59 = vpop.f32.mrf.mxu1 }
0x1871   : > { %11652 = vmatpush.msrb.mxu3 %v16971_v40  ;;  %11697 = vmatpush.msrb.mxu0 %v11487_v19  ;;  %v10899_v19 = vpop.f32.mrf.mxu3 }
0x1872   : > { %v11099_v9 = vsub.f32 %v11097_v34, %v11098_v25  ;;  %v10648_v52 = vadd.f32 %v10647_v6, %v10607_v23  ;;  %11312 = vmatmul.f32.vlgmr.msrb.gmra.mxu1 %v11098_v25  ;;  %v17467_v23 = vand.u32 4294901760, %v17093_v27 }
0x1873   : > { %11654 = vmatpush.msrb.mxu3 %v16980_v43  ;;  %11768 = vmatpush.msrb.mxu1 %v16960_v62 }
0x1874   : > { %v11100_v44 = vand.u32 4294901760, %v11099_v9  ;;  %v11024_v33 = vmax.f32 %v10648_v52, 0.0  ;;  %11701 = vmatpush.msrb.mxu0 %v11493_v4  ;;  %v10974_v4 = vpop.f32.mrf.mxu0 }
0x1875   : > { %11656 = vmatpush.msrb.mxu3 %v16993_v51  ;;  %11770 = vmatpush.msrb.mxu1 %v16971_v40 }
0x1876   : > { %v17191_v46 = vand.u32 4294901760, %v11024_v33  ;;  %11101 = vmatmul.f32.vlgmr.msrb.gmra.mxu2 %v11100_v44  ;;  %11705 = vmatpush.msrb.mxu0 %v11499_v42 }
0x1877   : > { %v10855_v58 = vpop.f32.mrf.mxu2  ;;  %11592 = vmatpush.msrb.mxu2 %v16969_v31  ;;  %11658 = vmatpush.msrb.mxu3 %v17008_v35 }
0x1878   : > { %v10856_v62 = vadd.f32 %v10855_v58, %v10798_v24  ;;  %11214 = vmatmul.f32.gmra.mxu3 %v17191_v46  ;;  %11772 = vmatpush.msrb.mxu1 %v16980_v43  ;;  %v11105_v40 = vsub.f32 %v11024_v33, %v17191_v46 }
0x1879   : > { %11595 = vmatpush.msrb.mxu2 %v16978_v41  ;;  %11660 = vmatpush.msrb.mxu3 %v17016_v39  ;;  %v10802_v41 = vadd.f32 %v10801_v7, %v10697_v16 }
0x187a   : > { %v10900_v42 = vadd.f32 %v10899_v19, %v10856_v62  ;;  %11273 = vmatmul.f32.gmra.mxu0 %v11105_v40  ;;  %11774 = vmatpush.msrb.mxu1 %v16993_v51  ;;  %v11106_v31 = vand.u32 4294901760, %v11105_v40 }
0x187b   : > { %11598 = vmatpush.msrb.mxu2 %v16991_v18  ;;  %11662 = vmatpush.msrb.mxu3 %v17031_v12 }
0x187c   : > { %v10975_v29 = vadd.f32 %v10974_v4, %v10900_v42  ;;  %11318 = vmatmul.f32.gmra.mxu1 %v11106_v31  ;;  %v11107_v43 = vsub.f32 %v11105_v40, %v11106_v31  ;;  %11709 = vmatpush.msrb.mxu0 %v17460_v28 }
0x187d   : > { %11776 = vmatpush.msrb.mxu1 %v17008_v35  ;;  %11601 = vmatpush.msrb.mxu2 %v17004_v30  ;;  %v10905_v35 = vpop.f32.mrf.mxu3 }
0x187e   : > { %v11016_v0 = vadd.f32 %v11015_v59, %v10975_v29  ;;  %11664 = vmatpush.msrb.mxu3 %v17042_v56  ;;  %v11108_v51 = vand.u32 4294901760, %v11107_v43  ;;  %11713 = vmatpush.msrb.mxu0 %v17461_v20 }
0x187f   : > { %v10860_v18 = vpop.f32.mrf.mxu2  ;;  %11778 = vmatpush.msrb.mxu1 %v17016_v39  ;;  %11604 = vmatpush.msrb.mxu2 %v17019_v57  ;;  %v10978_v39 = vpop.f32.mrf.mxu0 }
0x1880   : > { %v11023_v47 = vmax.f32 %v11016_v0, 0.0  ;;  %v10861_v2 = vadd.f32 %v10860_v18, %v10802_v41  ;;  %11109 = vmatmul.f32.gmra.mxu2 %v11108_v51  ;;  %11428 = vmatmul.f32.vlgmr.msra.gmra.mxu3 %v17176_v63 }
0x1881   : > { %11666 = vmatpush.msrb.mxu3 %v17058_v10  ;;  %11780 = vmatpush.msrb.mxu1 %v17031_v12  ;;  %v11019_v12 = vpop.f32.mrf.mxu1 }
0x1882   : > { %v17217_v30 = vand.u32 4294901760, %v11023_v47  ;;  %v10906_v6 = vadd.f32 %v10905_v35, %v10861_v2  ;;  %11607 = vmatpush.msrb.mxu2 %v17029_v8  ;;  %11717 = vmatpush.msrb.mxu0 %v17462_v50 }
0x1883   : > { %11668 = vmatpush.msrb.mxu3 %v17071_v48  ;;  %11782 = vmatpush.msrb.mxu1 %v17042_v56 }
0x1884   : > { %v11469_v57 = vsub.f32 %v11023_v47, %v17217_v30  ;;  %v10979_v34 = vadd.f32 %v10978_v39, %v10906_v6  ;;  %11582 = vmatmul.f32.vlgmr.msra.gmra.mxu1 %v17217_v30  ;;  %11610 = vmatpush.msrb.mxu2 %v17040_v45 }
0x1885   : > { %11670 = vmatpush.msrb.mxu3 %v17080_v22  ;;  %11784 = vmatpush.msrb.mxu1 %v17058_v10  ;;  %v17464_v10 = vand.u32 4294901760, %v17056_v49 }
0x1886   : > { %v11470_v54 = vand.u32 4294901760, %v11469_v57  ;;  %v11020_v8 = vadd.f32 %v11019_v12, %v10979_v34  ;;  %11613 = vmatpush.msrb.mxu2 %v17056_v49  ;;  %11721 = vmatpush.msrb.mxu0 %v17463_v17 }
0x1887   : > { %11672 = vmatpush.msrb.mxu3 %v17095_v11  ;;  %11786 = vmatpush.msrb.mxu1 %v17071_v48 }
0x1888   : > { %v11025_v56 = vmax.f32 %v11020_v8, 0.0  ;;  %11387 = vmatmul.f32.vlgmr.msra.gmra.mxu2 %v17176_v63  ;;  %11432 = vmatmul.f32.gmra.mxu3 %v17191_v46  ;;  %v11471_v37 = vsub.f32 %v11469_v57, %v11470_v54  ;;  %v17466_v63 = vand.u32 4294901760, %v17084_v60 }
0x1889   : > { %11616 = vmatpush.msrb.mxu2 %v17069_v55  ;;  %11674 = vmatpush.msrb.mxu3 %v17106_v3 }
0x188a   : > { %11788 = vmatpush.msrb.mxu1 %v17080_v22  ;;  %11725 = vmatpush.msrb.mxu0 %v17464_v10  ;;  %v11472_v45 = vand.u32 4294901760, %v11471_v37  ;;  %v11476_v25 = vand.u32 4294901760, %v11025_v56  ;;  %v17465_v22 = vand.u32 4294901760, %v17069_v55 }
0x188b   : > { %11619 = vmatpush.msrb.mxu2 %v17084_v60  ;;  %11676 = vmatpush.msrb.mxu3 %v17122_v14  ;;  %v17468_v60 = vand.u32 4294901760, %v17104_v1 }
0x188c   : > { %11790 = vmatpush.msrb.mxu1 %v17095_v11  ;;  %11473 = vmatmul.f32.vlgmr.msra.gmra.mxu0 %v11472_v45  ;;  %v11477_v48 = vsub.f32 %v11025_v56, %v11476_v25 }
0x188d   : > { %11586 = vmatmul.f32.gmra.mxu1 %v11476_v25  ;;  %11622 = vmatpush.msrb.mxu2 %v17093_v27  ;;  %v17470_v27 = vand.u32 4294901760, %v17133_v21 }
0x188e   : > { %11678 = vmatpush.msrb.mxu3 %v17136_v32  ;;  %11729 = vmatpush.msrb.mxu0 %v17465_v22  ;;  %v11478_v49 = vand.u32 4294901760, %v11477_v48 }
0x188f   : > { %11792 = vmatpush.msrb.mxu1 %v17106_v3  ;;  %11625 = vmatpush.msrb.mxu2 %v17104_v1  ;;  %v17469_v3 = vand.u32 4294901760, %v17120_v13  ;;  %v17472_v1 = vand.u32 4294901760, %v17156_v36 }
0x1890   : > { %11680 = vmatpush.msrb.mxu3 %v17145_v26  ;;  %11733 = vmatpush.msrb.mxu0 %v17466_v63  ;;  %v11479_v11 = vsub.f32 %v11477_v48, %v11478_v49 }
0x1891   : > { %11794 = vmatpush.msrb.mxu1 %v17122_v14  ;;  %11391 = vmatmul.f32.gmra.mxu2 %v17191_v46  ;;  %v17471_v14 = vand.u32 4294901760, %v17149_v53 }
0x1892   : > { %11684 = vmatmul.f32.vlgmr.msrb.gmra.mxu3 %v11470_v54  ;;  %11628 = vmatpush.msrb.mxu2 %v17120_v13  ;;  %v11480_v55 = vand.u32 4294901760, %v11479_v11 }
0x1893   : > { %11737 = vmatpush.msrb.mxu0 %v17467_v23  ;;  %11796 = vmatpush.msrb.mxu1 %v17136_v32 }
0x1894   : > { %11631 = vmatpush.msrb.mxu2 %v17133_v21  ;;  %11481 = vmatmul.f32.gmra.mxu0 %v11480_v55  ;;  %v12114_v21 = vld [vmem:[%s17330_s10 + $0x1] ss:$0 sm:$0xff] }
0x1895   : > { %11741 = vmatpush.msrb.mxu0 %v17468_v60  ;;  %11798 = vmatpush.msrb.mxu1 %v17145_v26 }
0x1896   : > { %11800 = vmatmul.f32.vlgmr.msrb.gmra.mxu1 %v17217_v30  ;;  %11634 = vmatpush.msrb.mxu2 %v17149_v53 }
0x1897   : > { %11745 = vmatpush.msrb.mxu0 %v17469_v3 }
0x1898   : > { %11637 = vmatpush.msrb.mxu2 %v17156_v36 }
0x1899   : > { %11749 = vmatpush.msrb.mxu0 %v17470_v27  ;;  %11640 = vmatmul.f32.vlgmr.msrb.gmra.mxu2 %v11469_v57 }
0x189a   : > { %11690 = vmatmul.f32.gmra.mxu3 %v11478_v49 }
0x189b   : > { %11753 = vmatpush.msrb.mxu0 %v17471_v14 }
0x189d   : > { %11757 = vmatpush.msrb.mxu0 %v17472_v1 }
0x189e   : > { %11759 = vmatmul.f32.vlgmr.msrb.gmra.mxu0 %v17217_v30  ;;  %11804 = vmatmul.f32.gmra.mxu1 %v11476_v25 }
0x18a1   : > { %11645 = vmatmul.f32.gmra.mxu2 %v11477_v48 }
0x18a6   : > { %11763 = vmatmul.f32.gmra.mxu0 %v11476_v25 }
0x18ed   : > { %v11269_v32 = vpop.f32.mrf.mxu0 }
0x18ef   : > { %v11313_v26 = vpop.f32.mrf.mxu1 }
0x18f1   : > { %v11211_v13 = vpop.f32.mrf.mxu3 }
0x18f7   : > { %v11274_v9 = vpop.f32.mrf.mxu0 }
0x18f9   : > { %v11102_v7 = vpop.f32.mrf.mxu2  ;;  %v11319_v53 = vpop.f32.mrf.mxu1 }
0x18fa   : > { %v11103_v52 = vadd.f32 %v12114_v21, %v11102_v7 }
0x18fb   : > { %v11215_v38 = vpop.f32.mrf.mxu3 }
0x18fc   : > { %v11212_v36 = vadd.f32 %v11211_v13, %v11103_v52 }
0x18fe   : > { %v11270_v19 = vadd.f32 %v11269_v32, %v11212_v36 }
0x1900   : > { %v11314_v4 = vadd.f32 %v11313_v26, %v11270_v19 }
0x1901   : > { %v11583_v62 = vpop.f32.mrf.mxu1 }
0x1903   : > { %v11110_v44 = vpop.f32.mrf.mxu2  ;;  %v11429_v33 = vpop.f32.mrf.mxu3 }
0x1904   : > { %v11111_v24 = vadd.f32 %v12114_v21, %v11110_v44 }
0x1906   : > { %v11216_v40 = vadd.f32 %v11215_v38, %v11111_v24 }
0x1908   : > { %v11275_v42 = vadd.f32 %v11274_v9, %v11216_v40 }
0x1909   : > { %v11474_v46 = vpop.f32.mrf.mxu0 }
0x190a   : > { %v11320_v28 = vadd.f32 %v11319_v53, %v11275_v42  ;;  %v11587_v41 = vpop.f32.mrf.mxu1  ;;  %v12116_v42 = vld [vmem:[%s17445_s20 + $0x1] ss:$0 sm:$0xff] }
0x190b   : > { %v11388_v58 = vpop.f32.mrf.mxu2  ;;  %v11433_v31 = vpop.f32.mrf.mxu3 }
0x190c   : > { %v11389_v16 = vadd.f32 %v11388_v58, %v11314_v4 }
0x190e   : > { %v11430_v43 = vadd.f32 %v11429_v33, %v11389_v16 }
0x1910   : > { %v11475_v51 = vadd.f32 %v11474_v46, %v11430_v43 }
0x1911   : > { %v11482_v59 = vpop.f32.mrf.mxu0 }
0x1912   : > { %v11584_v2 = vadd.f32 %v11583_v62, %v11475_v51  ;;  %v12115_v62 = vld [vmem:[%s17331_s11 + $0x1] ss:$0 sm:$0xff] }
0x1913   : > { %v11801_v50 = vpop.f32.mrf.mxu1 }
0x1914   : > { %v11392_v29 = vpop.f32.mrf.mxu2 }
0x1915   : > { %v11393_v0 = vadd.f32 %v11392_v29, %v11320_v28  ;;  %v11685_v18 = vpop.f32.mrf.mxu3 }
0x1917   : > { %v11434_v20 = vadd.f32 %v11433_v31, %v11393_v0 }
0x1919   : > { %v11483_v6 = vadd.f32 %v11482_v59, %v11434_v20 }
0x191b   : > { %v11760_v35 = vpop.f32.mrf.mxu0  ;;  %v11588_v57 = vadd.f32 %v11587_v41, %v11483_v6  ;;  %v11805_v10 = vpop.f32.mrf.mxu1 }
0x191c   : > { %v11641_v47 = vpop.f32.mrf.mxu2 }
0x191d   : > { %v11642_v30 = vadd.f32 %v11641_v47, %v11584_v2  ;;  %v11691_v54 = vpop.f32.mrf.mxu3 }
0x191f   : > { %v11686_v39 = vadd.f32 %v11685_v18, %v11642_v30 }
0x1921   : > { %v11761_v8 = vadd.f32 %v11760_v35, %v11686_v39 }
0x1923   : > { %v11764_v56 = vpop.f32.mrf.mxu0  ;;  %v11802_v45 = vadd.f32 %v11801_v50, %v11761_v8 }
0x1924   : > { %v11646_v34 = vpop.f32.mrf.mxu2 }
0x1925   : > { %v11647_v12 = vadd.f32 %v11646_v34, %v11588_v57  ;;  %v11808_v22 = vadd.f32 %v11802_v45, %v16642_v5 }
0x1927   : > { %v11692_v17 = vadd.f32 %v11691_v54, %v11647_v12 }
0x1929   : > { %v11765_v37 = vadd.f32 %v11764_v56, %v11692_v17 }
0x192b   : > { %v11806_v25 = vadd.f32 %v11805_v10, %v11765_v37 }
0x192d   : > { %v11809_v48 = vadd.f32 %v11806_v25, %v16644_v15 }
0x192f   : > { %v11815_v49 = vmul.f32 %v14038_v61, %v11809_v48 }
0x1931   : > { %v11816_v63 = vadd.f32 %v11815_v49, %v11808_v22 }
0x1933   : > { %v11817_v11 = vrot.slane %v11816_v63, 4 }
0x1935   : > { %v11818_v55 = vadd.f32 %v11817_v11, %v11816_v63 }
0x1937   : > { %v11819_v23 = vrot.slane %v11818_v55, 2 }
0x1939   : > { %v11820_v60 = vadd.f32 %v11819_v23, %v11818_v55 }
0x193b   : > { %v11821_v3 = vrot.slane %v11820_v60, 1 }
0x193d   : > { %v11822_v27 = vadd.f32 %v11821_v3, %v11820_v60 }
0x193f   : > { %v11823_v14 = vmul.f32 0.11111111, %v11822_v27 }
0x1941   : > { %v11824_v1 = vsub.f32 %v11808_v22, %v11823_v14  ;;  %v11825_v13 = vsub.f32 %v11809_v48, %v11823_v14 }
0x1943   : > { %v11827_v32 = vmul.f32 %v11825_v13, %v11825_v13  ;;  %v11826_v26 = vmul.f32 %v11824_v1, %v11824_v1 }
0x1945   : > { %v11829_v7 = vmul.f32 %v14038_v61, %v11827_v32 }
0x1947   : > { %v11830_v15 = vadd.f32 %v11829_v7, %v11826_v26 }
0x1949   : > { %v11831_v38 = vrot.slane %v11830_v15, 4 }
0x194b   : > { %v11832_v5 = vadd.f32 %v11831_v38, %v11830_v15 }
0x194d   : > { %v11833_v21 = vrot.slane %v11832_v5, 2 }
0x194f   : > { %v11834_v9 = vadd.f32 %v11833_v21, %v11832_v5 }
0x1951   : > { %v11835_v53 = vrot.slane %v11834_v9, 1 }
0x1953   : > { %v11836_v52 = vadd.f32 %v11835_v53, %v11834_v9 }
0x1955   : > { %v11837_v44 = vmul.f32 0.11111111, %v11836_v52 }
0x1957   : > { %v11838_v36 = vadd.f32 1e-05, %v11837_v44 }
0x1959   : > { %12187 = vrsqrt.f32 %v11838_v36  ;;  %vm11845_vm11 = vweird.f32 %v11838_v36 }
0x195f   : > { %v12188_v33 = vpop.eup %12187 }
0x1960   : > { %v11840_v24 = vmul.f32 %v12188_v33, %v11838_v36  ;;  %vm11846_vm10 = vweird.f32 %v12188_v33 }
0x1961   : > { %vm11847_vm12 = vmor %vm11845_vm11, %vm11846_vm10 }
0x1962   : > { %v11841_v46 = vmul.f32 %v12188_v33, %v11840_v24 }
0x1964   : > { %v11842_v19 = vmul.f32 0.5, %v11841_v46 }
0x1966   : > { %v11843_v58 = vsub.f32 1.5, %v11842_v19 }
0x1968   : > { %v11844_v61 = vmul.f32 %v12188_v33, %v11843_v58 }
0x196a   : > { %v11848_v40 = vsel %vm11847_vm12, %v12188_v33, %v11844_v61 }
0x196b   : > { %v11849_v4 = vmul.f32 %v11848_v40, %v11824_v1  ;;  %v11850_v16 = vmul.f32 %v11848_v40, %v11825_v13 }
0x196d   : > { %v11854_v31 = vmul.f32 %v12115_v62, %v11849_v4  ;;  %v11855_v59 = vmul.f32 %v12115_v62, %v11850_v16 }
0x196f   : > { %v11859_v29 = vadd.f32 %v12116_v42, %v11854_v31  ;;  %v11860_v43 = vadd.f32 %v12116_v42, %v11855_v59 }
0x1971   : > { %11861 = vst [vmem:[%s501_s19] sm:$0xff] %v11859_v29 }
0x1972   : > { %11862 = vst [vmem:[%s501_s19 + $0x8] sm:$0xff] %v11860_v43 }
0x1973   : > { %12336 = shalt.err (!%p12333_p8)
}
0x1974   : > { %s12399_s23 = smov 128   ;;  %s12400_s13 = smov 8  }
0x1975   : > { %12029 = dma.vmem_to_hbm [thread:$0]  (%p12509_p5), %s11877_s15, 256, %s11879_s21, %s11864_s22, %s12399_s23, %s12399_s23, %s12400_s13  }
0x1976 PF: > { %s17477_s25 = sld [smem:[#allocation18_spill]] }
0x1977   : > { %s17478_s26 = sld [smem:[#allocation15_spill]] }
0x197c   : > { %p12056_p9 = scmp.ge.s32.totalorder %s17477_s25, 2 }
0x197d   : > { %s11893_s28 = sand.u32 1, %s17478_s26  }
0x197e   : > { %p12045_p10 = pnand %p12056_p9, %p12513_p6  ;;  %s11894_s18 = scalar_lea.sflag [#allocation4], %s11893_s28 }
0x1980   : > { %p12046_p11 = pneg %p12045_p10 }
0x1982   : > { %12366 = dma.done.wait (%p12046_p11), %s11894_s18, 256  }
0x1983   : > { %12368 = vsyncadd (%p12046_p11), %s11894_s18, 4294967040  ;;  %s17480_s28 = sld [smem:[#allocation19_spill]] }
0x1984   : > { %s17481_s25 = sld [smem:[#allocation16_spill]] }
0x1985   : > { %s17482_s26 = sld [smem:[#allocation17_spill]] }
0x1986   : > { %s17483_s27 = sld [smem:[#allocation20_spill]] }
0x1989   : > { %p26_p12 = scmp.ge.s32.totalorder %s17480_s28, 4  }
0x198b   :  { %28 = sbr.rel (!%p26_p12) target bundleno = 11 (0xb), region = 135 }
0x1990   :  { %11900 = vsyncpa [#allocation3], 1 }
0x1991   :  { %11902 = vsyncpa [#allocation3 + $0x1], 1 }
0x1992   :  { %11903 = vsyncpa [#allocation6], 1 }
0x1993   :  { %11904 = vsyncpa [#allocation9], 1 }
0x1994   :  { %11905 = vsyncpa [#allocation4], 1 }
0x1995   :  { %11907 = vsyncpa [#allocation4 + $0x1], 1 }

</bundles_post_ra>
